<compile_context>
chip_gen: v7x
topology: tpu7x:2x2x1
jax: 0.10.0
libtpu: 0.0.40
codegen_flags: <defaults>
</compile_context>

<pallas_src>
import math
from functools import partial

import jax
import jax.numpy as jnp
from jax.experimental import pallas as pl
from jax.experimental.pallas import tpu as pltpu


_VMEM_LIMIT = 48 * 1024 * 1024  # <= v7x 64 MiB/TC physical VMEM


def _cp(sems):
    return pltpu.CompilerParams(dimension_semantics=sems,
                                vmem_limit_bytes=_VMEM_LIMIT)


def _round_up(x, m):
    return ((x + m - 1) // m) * m


# ---------------- Pallas kernels ----------------

def _conv3x3_relu_kernel(x_ref, w_ref, b_ref, o_ref):
    # x_ref: (1, H+2, W+2, Cin)  zero-padded NHWC input tile (one image), bf16
    # w_ref: (9*Cin, TCout)      im2col-folded weights, bf16
    # b_ref: (1, TCout)          bias, f32
    # o_ref: (1, H*W, TCout)     output tile, bf16
    _, Hp, Wp, Cin = x_ref.shape
    H, W = Hp - 2, Wp - 2
    x = x_ref[0]                                           # (H+2, W+2, Cin)
    # Build the 9 im2col taps from the VMEM-resident padded block and fold them
    # into K so the conv is ONE MXU matmul with K = 9*Cin.
    taps = [x[kh:kh + H, kw:kw + W, :].reshape(H * W, Cin)
            for kh in range(3) for kw in range(3)]
    xk = jnp.concatenate(taps, axis=-1)                    # (H*W, 9*Cin), VMEM only
    acc = jnp.dot(xk, w_ref[...], preferred_element_type=jnp.float32)
    y = jnp.maximum(acc + b_ref[...], 0.0)                 # bias + ReLU in f32
    o_ref[0] = y.astype(o_ref.dtype)


def _maxpool2x2_kernel(x_ref, o_ref):
    # Single-pass 2x2 max pool on one image: (1, H, W, C) -> (1, H/2, W/2, C).
    _, H, W, C = x_ref.shape
    Ho, Wo = H // 2, W // 2
    x = x_ref[0].reshape(Ho, 2, Wo, 2, C)
    m = jnp.maximum(x[:, 0], x[:, 1])                      # (Ho, Wo, 2, C)
    o_ref[0] = jnp.maximum(m[:, :, 0], m[:, :, 1])         # (Ho, Wo, C)


def _linear_kernel(x_ref, w_ref, b_ref, o_ref, acc_ref, *, apply_relu):
    # K-tiled GEMM with f32 accumulator; bias + optional ReLU on the last K step.
    k = pl.program_id(1)

    @pl.when(k == 0)
    def _():
        acc_ref[...] = jnp.zeros_like(acc_ref)

    acc_ref[...] += jnp.dot(x_ref[...], w_ref[...],
                            preferred_element_type=jnp.float32)

    @pl.when(k == pl.num_programs(1) - 1)
    def _():
        y = acc_ref[...] + b_ref[...]
        if apply_relu:
            y = jnp.maximum(y, 0.0)
        o_ref[...] = y.astype(o_ref.dtype)


# ---------------- wrappers ----------------

def conv3x3_relu(x_nhwc, w_folded, b):
    # x_nhwc: (N, H, W, Cin) bf16; w_folded: (9*Cin, Cout) bf16; b: (Cout,) f32
    N, H, W, Cin = x_nhwc.shape
    Cout = w_folded.shape[-1]
    if Cout % 256 == 0:
        tc = 256
    elif Cout % 128 == 0:
        tc = 128
    else:
        tc = Cout
    nj = Cout // tc
    xp = jnp.pad(x_nhwc, ((0, 0), (1, 1), (1, 1), (0, 0)))
    b2 = b.reshape(1, Cout).astype(jnp.float32)
    out = pl.pallas_call(
        _conv3x3_relu_kernel,
        out_shape=jax.ShapeDtypeStruct((N, H * W, Cout), jnp.bfloat16),
        grid=(N, nj),
        in_specs=[
            pl.BlockSpec((1, H + 2, W + 2, Cin), lambda n, j: (n, 0, 0, 0)),
            pl.BlockSpec((9 * Cin, tc), lambda n, j: (0, j)),
            pl.BlockSpec((1, tc), lambda n, j: (0, j)),
        ],
        out_specs=pl.BlockSpec((1, H * W, tc), lambda n, j: (n, 0, j)),
        compiler_params=_cp(("parallel", "parallel")),
    )(xp, w_folded, b2)
    # TODO(synk): for very large spatial dims, tile H with a 1-row halo instead of
    # whole-image blocks; at these shapes whole-image blocks fit VMEM comfortably.
    return out.reshape(N, H, W, Cout)


def maxpool2x2(x_nhwc):
    N, H, W, C = x_nhwc.shape
    Ho, Wo = H // 2, W // 2
    return pl.pallas_call(
        _maxpool2x2_kernel,
        out_shape=jax.ShapeDtypeStruct((N, Ho, Wo, C), x_nhwc.dtype),
        grid=(N,),
        in_specs=[pl.BlockSpec((1, H, W, C), lambda n: (n, 0, 0, 0))],
        out_specs=pl.BlockSpec((1, Ho, Wo, C), lambda n: (n, 0, 0, 0)),
        compiler_params=_cp(("parallel",)),
    )(x_nhwc)


def linear(x, w, b, *, apply_relu, out_dtype):
    # x: (M, K) bf16 (M multiple of 8); w: (K, Nout) bf16; b: (Nout,) f32
    M, K = x.shape
    Kw, Nout = w.shape
    assert K == Kw
    tk = 256 if K % 256 == 0 else K
    tn = 512 if Nout % 512 == 0 else Nout
    nk, nj = K // tk, Nout // tn
    b2 = b.reshape(1, Nout).astype(jnp.float32)
    return pl.pallas_call(
        partial(_linear_kernel, apply_relu=apply_relu),
        out_shape=jax.ShapeDtypeStruct((M, Nout), out_dtype),
        grid=(nj, nk),
        in_specs=[
            pl.BlockSpec((M, tk), lambda j, k: (0, k)),
            pl.BlockSpec((tk, tn), lambda j, k: (k, j)),
            pl.BlockSpec((1, tn), lambda j, k: (0, j)),
        ],
        out_specs=pl.BlockSpec((M, tn), lambda j, k: (0, j)),
        scratch_shapes=[pltpu.VMEM((M, tn), jnp.float32)],
        compiler_params=_cp(("parallel", "arbitrary")),
    )(x, w, b2)


# ---------------- parameter init (mirrors VGG._initialize_weights) ----------------

def init_params(key, cfg, in_ch, num_classes):
    params = {"convs": [], "linears": []}
    c_real = in_ch
    c_pad = in_ch if in_ch >= 32 else 32      # lane-pad the first conv's Cin
    for v in cfg:
        if v == "M":
            continue
        key, k1 = jax.random.split(key)
        std = math.sqrt(2.0 / (3 * 3 * v))    # n = kh*kw*out_channels
        w = jax.random.normal(k1, (v, c_real, 3, 3), jnp.float32) * std  # (Cout,Cin,kh,kw)
        w = jnp.transpose(w, (2, 3, 1, 0))    # (kh, kw, Cin, Cout)
        if c_pad != c_real:
            w = jnp.pad(w, ((0, 0), (0, 0), (0, c_pad - c_real), (0, 0)))
        w_folded = w.reshape(9 * c_pad, v).astype(jnp.bfloat16)
        params["convs"].append((w_folded, jnp.zeros((v,), jnp.float32)))
        c_real = c_pad = v
    ncls_pad = _round_up(num_classes, 128)    # lane-pad logits, sliced back later
    dims_in = [512 * 2 * 2, 1024, 1024]
    dims_out = [1024, 1024, num_classes]
    dims_out_pad = [1024, 1024, ncls_pad]
    for i in range(3):
        key, k1 = jax.random.split(key)
        w = jax.random.normal(k1, (dims_out[i], dims_in[i]), jnp.float32) * 0.01  # (out,in)
        w_io = w.T                                                                 # (in,out)
        if dims_out_pad[i] != dims_out[i]:
            w_io = jnp.pad(w_io, ((0, 0), (0, dims_out_pad[i] - dims_out[i])))
        params["linears"].append((w_io.astype(jnp.bfloat16),
                                  jnp.zeros((dims_out_pad[i],), jnp.float32)))
    return params


# ---------------- forward ----------------

def vgg_forward(params, x_nchw, *, cfg, num_classes):
    N = x_nchw.shape[0]
    x = jnp.transpose(x_nchw, (0, 2, 3, 1))                  # NCHW -> NHWC
    cin_pad = params["convs"][0][0].shape[0] // 9            # static
    if x.shape[-1] < cin_pad:
        x = jnp.pad(x, ((0, 0), (0, 0), (0, 0), (0, cin_pad - x.shape[-1])))
    x = x.astype(jnp.bfloat16)
    ci = 0
    for v in cfg:
        if v == "M":
            x = maxpool2x2(x)
        else:
            w_folded, b = params["convs"][ci]
            x = conv3x3_relu(x, w_folded, b)
            ci += 1
    # flatten in PyTorch NCHW order to match x.view(x.size(0), -1)
    x = jnp.transpose(x, (0, 3, 1, 2)).reshape(N, -1)
    m_pad = max(_round_up(N, 8), 8)                          # MXU-friendly M
    if m_pad != N:
        x = jnp.pad(x, ((0, m_pad - N), (0, 0)))
    x = x.astype(jnp.bfloat16)
    (w1, b1), (w2, b2), (w3, b3) = params["linears"]
    x = linear(x, w1, b1, apply_relu=True, out_dtype=jnp.bfloat16)
    # TODO(synk): nn.Dropout is treated as identity (inference-mode semantics).
    x = linear(x, w2, b2, apply_relu=True, out_dtype=jnp.bfloat16)
    x = linear(x, w3, b3, apply_relu=False, out_dtype=jnp.float32)
    return x[:N, :num_classes]


if __name__ == "__main__":
    # Small `features` stack (Conv3x3+ReLU, MaxPool2x2) ending at 512 x 2 x 2 so the
    # fixed classifier Linear(512*2*2, 1024) of the reference module applies.
    cfg = (64, "M", 128, "M", 512, "M")
    num_classes = 10
    key = jax.random.PRNGKey(0)
    key, kx = jax.random.split(key)
    x = jax.random.normal(kx, (2, 3, 16, 16), jnp.float32)   # NCHW input like PyTorch
    params = init_params(key, cfg, in_ch=3, num_classes=num_classes)
    fwd = jax.jit(partial(vgg_forward, cfg=cfg, num_classes=num_classes))
    y = fwd(params, x)
    y = jax.block_until_ready(y)
    assert y.shape == (2, num_classes)
    assert bool(jnp.all(jnp.isfinite(y)))
    print("KERNEL_OK")
</pallas_src>

<mosaic_0001>
module attributes {stable_mosaic.version = 11 : i64} {
  func.func @_maxpool2x2_kernel(%arg0: i32, %arg1: memref<1x16x16x64xbf16, #tpu.memory_space<vmem>>, %arg2: memref<1x8x8x64xbf16, #tpu.memory_space<vmem>>) attributes {dimension_semantics = [#tpu.dimension_semantics<parallel>], iteration_bounds = array<i64: 2>, scalar_prefetch = 0 : i64, scratch_operands = 0 : i64, tpu.core_type = #tpu.core_type<tc>, window_params = [{transform_indices = @transform_0, window_bounds = array<i64: 1, 16, 16, 64>}, {transform_indices = @transform_1, window_bounds = array<i64: 1, 8, 8, 64>}]} {
    %c0 = arith.constant 0 : index
    %c0_0 = arith.constant 0 : index
    %c0_1 = arith.constant 0 : index
    %c0_2 = arith.constant 0 : index
    %0 = vector.load %arg1[%c0, %c0_0, %c0_1, %c0_2] : memref<1x16x16x64xbf16, #tpu.memory_space<vmem>>, vector<1x16x16x64xbf16>
    %1 = vector.shape_cast %0 : vector<1x16x16x64xbf16> to vector<16x16x64xbf16>
    %2 = vector.shape_cast %1 : vector<16x16x64xbf16> to vector<8x2x8x2x64xbf16>
    %3 = vector.extract_strided_slice %2 {offsets = [0, 0, 0, 0, 0], sizes = [8, 1, 8, 2, 64], strides = [1, 1, 1, 1, 1]} : vector<8x2x8x2x64xbf16> to vector<8x1x8x2x64xbf16>
    %4 = vector.shape_cast %3 : vector<8x1x8x2x64xbf16> to vector<8x8x2x64xbf16>
    %5 = vector.extract_strided_slice %2 {offsets = [0, 1, 0, 0, 0], sizes = [8, 1, 8, 2, 64], strides = [1, 1, 1, 1, 1]} : vector<8x2x8x2x64xbf16> to vector<8x1x8x2x64xbf16>
    %6 = vector.shape_cast %5 : vector<8x1x8x2x64xbf16> to vector<8x8x2x64xbf16>
    %7 = arith.maximumf %4, %6 : vector<8x8x2x64xbf16>
    %8 = vector.extract_strided_slice %7 {offsets = [0, 0, 0, 0], sizes = [8, 8, 1, 64], strides = [1, 1, 1, 1]} : vector<8x8x2x64xbf16> to vector<8x8x1x64xbf16>
    %9 = vector.shape_cast %8 : vector<8x8x1x64xbf16> to vector<8x8x64xbf16>
    %10 = vector.extract_strided_slice %7 {offsets = [0, 0, 1, 0], sizes = [8, 8, 1, 64], strides = [1, 1, 1, 1]} : vector<8x8x2x64xbf16> to vector<8x8x1x64xbf16>
    %11 = vector.shape_cast %10 : vector<8x8x1x64xbf16> to vector<8x8x64xbf16>
    %12 = arith.maximumf %9, %11 : vector<8x8x64xbf16>
    %c0_3 = arith.constant 0 : index
    %c0_4 = arith.constant 0 : index
    %c0_5 = arith.constant 0 : index
    %c0_6 = arith.constant 0 : index
    %13 = vector.load %arg2[%c0_3, %c0_4, %c0_5, %c0_6] : memref<1x8x8x64xbf16, #tpu.memory_space<vmem>>, vector<1x8x8x64xbf16>
    %14 = vector.shape_cast %13 : vector<1x8x8x64xbf16> to vector<8x8x64xbf16>
    %15 = vector.shape_cast %12 : vector<8x8x64xbf16> to vector<1x8x8x64xbf16>
    tpu.vector_store %arg2[%c0_3, %c0_4, %c0_5, %c0_6], %15 {strides = array<i32>} : memref<1x8x8x64xbf16, #tpu.memory_space<vmem>>, vector<1x8x8x64xbf16>,
    return
  }
  func.func @transform_0(%arg0: i32) -> (i32, i32, i32, i32) {
    %c0_i32 = arith.constant 0 : i32
    %c0_i32_0 = arith.constant 0 : i32
    %c0_i32_1 = arith.constant 0 : i32
    %c0_i32_2 = arith.constant 0 : i32
    return %arg0, %c0_i32, %c0_i32_0, %c0_i32_1 : i32, i32, i32, i32
  }
  func.func @transform_1(%arg0: i32) -> (i32, i32, i32, i32) {
    %c0_i32 = arith.constant 0 : i32
    %c0_i32_0 = arith.constant 0 : i32
    %c0_i32_1 = arith.constant 0 : i32
    %c0_i32_2 = arith.constant 0 : i32
    return %arg0, %c0_i32, %c0_i32_0, %c0_i32_1 : i32, i32, i32, i32
  }
}

module attributes {stable_mosaic.version = 11 : i64} {
  func.func @_conv3x3_relu_kernel(%arg0: i32, %arg1: i32, %arg2: memref<1x18x18x32xbf16, #tpu.memory_space<vmem>>, %arg3: memref<288x64xbf16, #tpu.memory_space<vmem>>, %arg4: memref<1x64xf32, #tpu.memory_space<vmem>>, %arg5: memref<1x256x64xbf16, #tpu.memory_space<vmem>>) attributes {dimension_semantics = [#tpu.dimension_semantics<parallel>, #tpu.dimension_semantics<parallel>], iteration_bounds = array<i64: 2, 1>, scalar_prefetch = 0 : i64, scratch_operands = 0 : i64, tpu.core_type = #tpu.core_type<tc>, window_params = [{transform_indices = @transform_0, window_bounds = array<i64: 1, 18, 18, 32>}, {transform_indices = @transform_1, window_bounds = array<i64: 288, 64>}, {transform_indices = @transform_2, window_bounds = array<i64: 1, 64>}, {transform_indices = @transform_3, window_bounds = array<i64: 1, 256, 64>}]} {
    %c0 = arith.constant 0 : index
    %c0_0 = arith.constant 0 : index
    %c0_1 = arith.constant 0 : index
    %c0_2 = arith.constant 0 : index
    %0 = vector.load %arg2[%c0, %c0_0, %c0_1, %c0_2] : memref<1x18x18x32xbf16, #tpu.memory_space<vmem>>, vector<1x18x18x32xbf16>
    %1 = vector.shape_cast %0 : vector<1x18x18x32xbf16> to vector<18x18x32xbf16>
    %2 = vector.extract_strided_slice %1 {offsets = [0, 0, 0], sizes = [16, 16, 32], strides = [1, 1, 1]} : vector<18x18x32xbf16> to vector<16x16x32xbf16>
    %3 = vector.shape_cast %2 : vector<16x16x32xbf16> to vector<256x32xbf16>
    %4 = vector.extract_strided_slice %1 {offsets = [0, 1, 0], sizes = [16, 16, 32], strides = [1, 1, 1]} : vector<18x18x32xbf16> to vector<16x16x32xbf16>
    %5 = vector.shape_cast %4 : vector<16x16x32xbf16> to vector<256x32xbf16>
    %6 = vector.extract_strided_slice %1 {offsets = [0, 2, 0], sizes = [16, 16, 32], strides = [1, 1, 1]} : vector<18x18x32xbf16> to vector<16x16x32xbf16>
    %7 = vector.shape_cast %6 : vector<16x16x32xbf16> to vector<256x32xbf16>
    %8 = vector.extract_strided_slice %1 {offsets = [1, 0, 0], sizes = [16, 16, 32], strides = [1, 1, 1]} : vector<18x18x32xbf16> to vector<16x16x32xbf16>
    %9 = vector.shape_cast %8 : vector<16x16x32xbf16> to vector<256x32xbf16>
    %10 = vector.extract_strided_slice %1 {offsets = [1, 1, 0], sizes = [16, 16, 32], strides = [1, 1, 1]} : vector<18x18x32xbf16> to vector<16x16x32xbf16>
    %11 = vector.shape_cast %10 : vector<16x16x32xbf16> to vector<256x32xbf16>
    %12 = vector.extract_strided_slice %1 {offsets = [1, 2, 0], sizes = [16, 16, 32], strides = [1, 1, 1]} : vector<18x18x32xbf16> to vector<16x16x32xbf16>
    %13 = vector.shape_cast %12 : vector<16x16x32xbf16> to vector<256x32xbf16>
    %14 = vector.extract_strided_slice %1 {offsets = [2, 0, 0], sizes = [16, 16, 32], strides = [1, 1, 1]} : vector<18x18x32xbf16> to vector<16x16x32xbf16>
    %15 = vector.shape_cast %14 : vector<16x16x32xbf16> to vector<256x32xbf16>
    %16 = vector.extract_strided_slice %1 {offsets = [2, 1, 0], sizes = [16, 16, 32], strides = [1, 1, 1]} : vector<18x18x32xbf16> to vector<16x16x32xbf16>
    %17 = vector.shape_cast %16 : vector<16x16x32xbf16> to vector<256x32xbf16>
    %18 = vector.extract_strided_slice %1 {offsets = [2, 2, 0], sizes = [16, 16, 32], strides = [1, 1, 1]} : vector<18x18x32xbf16> to vector<16x16x32xbf16>
    %19 = vector.shape_cast %18 : vector<16x16x32xbf16> to vector<256x32xbf16>
    %20 = tpu.concatenate %3, %5, %7, %9, %11, %13, %15, %17, %19 in 1 : vector<256x32xbf16>, vector<256x32xbf16>, vector<256x32xbf16>, vector<256x32xbf16>, vector<256x32xbf16>, vector<256x32xbf16>, vector<256x32xbf16>, vector<256x32xbf16>, vector<256x32xbf16> -> vector<256x288xbf16>
    %c0_3 = arith.constant 0 : index
    %c0_4 = arith.constant 0 : index
    %21 = vector.load %arg3[%c0_3, %c0_4] : memref<288x64xbf16, #tpu.memory_space<vmem>>, vector<288x64xbf16>
    %cst = arith.constant dense<0.000000e+00> : vector<256x64xf32>
    %22 = tpu.matmul %20, %21, %cst {dimension_numbers = #tpu.dot_dimension_numbers<[1], [0], [0], [1], [0, 0, 1, 1], [], []>} : vector<256x288xbf16>, vector<288x64xbf16>, vector<256x64xf32> -> vector<256x64xf32>
    %c0_5 = arith.constant 0 : index
    %c0_6 = arith.constant 0 : index
    %23 = vector.load %arg4[%c0_5, %c0_6] : memref<1x64xf32, #tpu.memory_space<vmem>>, vector<1x64xf32>
    %24 = vector.broadcast %23 : vector<1x64xf32> to vector<256x64xf32>
    %25 = arith.addf %22, %24 : vector<256x64xf32>
    %cst_7 = arith.constant 0.000000e+00 : f32
    %26 = vector.broadcast %cst_7 : f32 to vector<256x64xf32>
    %27 = arith.maximumf %25, %26 : vector<256x64xf32>
    %28 = arith.truncf %27 : vector<256x64xf32> to vector<256x64xbf16>
    %c0_8 = arith.constant 0 : index
    %c0_9 = arith.constant 0 : index
    %c0_10 = arith.constant 0 : index
    %29 = vector.load %arg5[%c0_8, %c0_9, %c0_10] : memref<1x256x64xbf16, #tpu.memory_space<vmem>>, vector<1x256x64xbf16>
    %30 = vector.shape_cast %29 : vector<1x256x64xbf16> to vector<256x64xbf16>
    %31 = vector.shape_cast %28 : vector<256x64xbf16> to vector<1x256x64xbf16>
    tpu.vector_store %arg5[%c0_8, %c0_9, %c0_10], %31 {strides = array<i32>} : memref<1x256x64xbf16, #tpu.memory_space<vmem>>, vector<1x256x64xbf16>,
    return
  }
  func.func @transform_0(%arg0: i32, %arg1: i32) -> (i32, i32, i32, i32) {
    %c0_i32 = arith.constant 0 : i32
    %c0_i32_0 = arith.constant 0 : i32
    %c0_i32_1 = arith.constant 0 : i32
    %c0_i32_2 = arith.constant 0 : i32
    return %arg0, %c0_i32, %c0_i32_0, %c0_i32_1 : i32, i32, i32, i32
  }
  func.func @transform_1(%arg0: i32, %arg1: i32) -> (i32, i32) {
    %c0_i32 = arith.constant 0 : i32
    %c0_i32_0 = arith.constant 0 : i32
    return %c0_i32, %arg1 : i32, i32
  }
  func.func @transform_2(%arg0: i32, %arg1: i32) -> (i32, i32) {
    %c0_i32 = arith.constant 0 : i32
    %c0_i32_0 = arith.constant 0 : i32
    return %c0_i32, %arg1 : i32, i32
  }
  func.func @transform_3(%arg0: i32, %arg1: i32) -> (i32, i32, i32) {
    %c0_i32 = arith.constant 0 : i32
    %c0_i32_0 = arith.constant 0 : i32
    return %arg0, %c0_i32, %arg1 : i32, i32, i32
  }
}

module attributes {stable_mosaic.version = 11 : i64} {
  func.func @_conv3x3_relu_kernel(%arg0: i32, %arg1: i32, %arg2: memref<1x10x10x64xbf16, #tpu.memory_space<vmem>>, %arg3: memref<576x128xbf16, #tpu.memory_space<vmem>>, %arg4: memref<1x128xf32, #tpu.memory_space<vmem>>, %arg5: memref<1x64x128xbf16, #tpu.memory_space<vmem>>) attributes {dimension_semantics = [#tpu.dimension_semantics<parallel>, #tpu.dimension_semantics<parallel>], iteration_bounds = array<i64: 2, 1>, scalar_prefetch = 0 : i64, scratch_operands = 0 : i64, tpu.core_type = #tpu.core_type<tc>, window_params = [{transform_indices = @transform_0, window_bounds = array<i64: 1, 10, 10, 64>}, {transform_indices = @transform_1, window_bounds = array<i64: 576, 128>}, {transform_indices = @transform_2, window_bounds = array<i64: 1, 128>}, {transform_indices = @transform_3, window_bounds = array<i64: 1, 64, 128>}]} {
    %c0 = arith.constant 0 : index
    %c0_0 = arith.constant 0 : index
    %c0_1 = arith.constant 0 : index
    %c0_2 = arith.constant 0 : index
    %0 = vector.load %arg2[%c0, %c0_0, %c0_1, %c0_2] : memref<1x10x10x64xbf16, #tpu.memory_space<vmem>>, vector<1x10x10x64xbf16>
    %1 = vector.shape_cast %0 : vector<1x10x10x64xbf16> to vector<10x10x64xbf16>
    %2 = vector.extract_strided_slice %1 {offsets = [0, 0, 0], sizes = [8, 8, 64], strides = [1, 1, 1]} : vector<10x10x64xbf16> to vector<8x8x64xbf16>
    %3 = vector.shape_cast %2 : vector<8x8x64xbf16> to vector<64x64xbf16>
    %4 = vector.extract_strided_slice %1 {offsets = [0, 1, 0], sizes = [8, 8, 64], strides = [1, 1, 1]} : vector<10x10x64xbf16> to vector<8x8x64xbf16>
    %5 = vector.shape_cast %4 : vector<8x8x64xbf16> to vector<64x64xbf16>
    %6 = vector.extract_strided_slice %1 {offsets = [0, 2, 0], sizes = [8, 8, 64], strides = [1, 1, 1]} : vector<10x10x64xbf16> to vector<8x8x64xbf16>
    %7 = vector.shape_cast %6 : vector<8x8x64xbf16> to vector<64x64xbf16>
    %8 = vector.extract_strided_slice %1 {offsets = [1, 0, 0], sizes = [8, 8, 64], strides = [1, 1, 1]} : vector<10x10x64xbf16> to vector<8x8x64xbf16>
    %9 = vector.shape_cast %8 : vector<8x8x64xbf16> to vector<64x64xbf16>
    %10 = vector.extract_strided_slice %1 {offsets = [1, 1, 0], sizes = [8, 8, 64], strides = [1, 1, 1]} : vector<10x10x64xbf16> to vector<8x8x64xbf16>
    %11 = vector.shape_cast %10 : vector<8x8x64xbf16> to vector<64x64xbf16>
    %12 = vector.extract_strided_slice %1 {offsets = [1, 2, 0], sizes = [8, 8, 64], strides = [1, 1, 1]} : vector<10x10x64xbf16> to vector<8x8x64xbf16>
    %13 = vector.shape_cast %12 : vector<8x8x64xbf16> to vector<64x64xbf16>
    %14 = vector.extract_strided_slice %1 {offsets = [2, 0, 0], sizes = [8, 8, 64], strides = [1, 1, 1]} : vector<10x10x64xbf16> to vector<8x8x64xbf16>
    %15 = vector.shape_cast %14 : vector<8x8x64xbf16> to vector<64x64xbf16>
    %16 = vector.extract_strided_slice %1 {offsets = [2, 1, 0], sizes = [8, 8, 64], strides = [1, 1, 1]} : vector<10x10x64xbf16> to vector<8x8x64xbf16>
    %17 = vector.shape_cast %16 : vector<8x8x64xbf16> to vector<64x64xbf16>
    %18 = vector.extract_strided_slice %1 {offsets = [2, 2, 0], sizes = [8, 8, 64], strides = [1, 1, 1]} : vector<10x10x64xbf16> to vector<8x8x64xbf16>
    %19 = vector.shape_cast %18 : vector<8x8x64xbf16> to vector<64x64xbf16>
    %20 = tpu.concatenate %3, %5, %7, %9, %11, %13, %15, %17, %19 in 1 : vector<64x64xbf16>, vector<64x64xbf16>, vector<64x64xbf16>, vector<64x64xbf16>, vector<64x64xbf16>, vector<64x64xbf16>, vector<64x64xbf16>, vector<64x64xbf16>, vector<64x64xbf16> -> vector<64x576xbf16>
    %c0_3 = arith.constant 0 : index
    %c0_4 = arith.constant 0 : index
    %21 = vector.load %arg3[%c0_3, %c0_4] : memref<576x128xbf16, #tpu.memory_space<vmem>>, vector<576x128xbf16>
    %cst = arith.constant dense<0.000000e+00> : vector<64x128xf32>
    %22 = tpu.matmul %20, %21, %cst {dimension_numbers = #tpu.dot_dimension_numbers<[1], [0], [0], [1], [0, 0, 1, 1], [], []>} : vector<64x576xbf16>, vector<576x128xbf16>, vector<64x128xf32> -> vector<64x128xf32>
    %c0_5 = arith.constant 0 : index
    %c0_6 = arith.constant 0 : index
    %23 = vector.load %arg4[%c0_5, %c0_6] : memref<1x128xf32, #tpu.memory_space<vmem>>, vector<1x128xf32>
    %24 = vector.broadcast %23 : vector<1x128xf32> to vector<64x128xf32>
    %25 = arith.addf %22, %24 : vector<64x128xf32>
    %cst_7 = arith.constant 0.000000e+00 : f32
    %26 = vector.broadcast %cst_7 : f32 to vector<64x128xf32>
    %27 = arith.maximumf %25, %26 : vector<64x128xf32>
    %28 = arith.truncf %27 : vector<64x128xf32> to vector<64x128xbf16>
    %c0_8 = arith.constant 0 : index
    %c0_9 = arith.constant 0 : index
    %c0_10 = arith.constant 0 : index
    %29 = vector.load %arg5[%c0_8, %c0_9, %c0_10] : memref<1x64x128xbf16, #tpu.memory_space<vmem>>, vector<1x64x128xbf16>
    %30 = vector.shape_cast %29 : vector<1x64x128xbf16> to vector<64x128xbf16>
    %31 = vector.shape_cast %28 : vector<64x128xbf16> to vector<1x64x128xbf16>
    tpu.vector_store %arg5[%c0_8, %c0_9, %c0_10], %31 {strides = array<i32>} : memref<1x64x128xbf16, #tpu.memory_space<vmem>>, vector<1x64x128xbf16>,
    return
  }
  func.func @transform_0(%arg0: i32, %arg1: i32) -> (i32, i32, i32, i32) {
    %c0_i32 = arith.constant 0 : i32
    %c0_i32_0 = arith.constant 0 : i32
    %c0_i32_1 = arith.constant 0 : i32
    %c0_i32_2 = arith.constant 0 : i32
    return %arg0, %c0_i32, %c0_i32_0, %c0_i32_1 : i32, i32, i32, i32
  }
  func.func @transform_1(%arg0: i32, %arg1: i32) -> (i32, i32) {
    %c0_i32 = arith.constant 0 : i32
    %c0_i32_0 = arith.constant 0 : i32
    return %c0_i32, %arg1 : i32, i32
  }
  func.func @transform_2(%arg0: i32, %arg1: i32) -> (i32, i32) {
    %c0_i32 = arith.constant 0 : i32
    %c0_i32_0 = arith.constant 0 : i32
    return %c0_i32, %arg1 : i32, i32
  }
  func.func @transform_3(%arg0: i32, %arg1: i32) -> (i32, i32, i32) {
    %c0_i32 = arith.constant 0 : i32
    %c0_i32_0 = arith.constant 0 : i32
    return %arg0, %c0_i32, %arg1 : i32, i32, i32
  }
}

module attributes {stable_mosaic.version = 11 : i64} {
  func.func @_maxpool2x2_kernel(%arg0: i32, %arg1: memref<1x8x8x128xbf16, #tpu.memory_space<vmem>>, %arg2: memref<1x4x4x128xbf16, #tpu.memory_space<vmem>>) attributes {dimension_semantics = [#tpu.dimension_semantics<parallel>], iteration_bounds = array<i64: 2>, scalar_prefetch = 0 : i64, scratch_operands = 0 : i64, tpu.core_type = #tpu.core_type<tc>, window_params = [{transform_indices = @transform_0, window_bounds = array<i64: 1, 8, 8, 128>}, {transform_indices = @transform_1, window_bounds = array<i64: 1, 4, 4, 128>}]} {
    %c0 = arith.constant 0 : index
    %c0_0 = arith.constant 0 : index
    %c0_1 = arith.constant 0 : index
    %c0_2 = arith.constant 0 : index
    %0 = vector.load %arg1[%c0, %c0_0, %c0_1, %c0_2] : memref<1x8x8x128xbf16, #tpu.memory_space<vmem>>, vector<1x8x8x128xbf16>
    %1 = vector.shape_cast %0 : vector<1x8x8x128xbf16> to vector<8x8x128xbf16>
    %2 = vector.shape_cast %1 : vector<8x8x128xbf16> to vector<4x2x4x2x128xbf16>
    %3 = vector.extract_strided_slice %2 {offsets = [0, 0, 0, 0, 0], sizes = [4, 1, 4, 2, 128], strides = [1, 1, 1, 1, 1]} : vector<4x2x4x2x128xbf16> to vector<4x1x4x2x128xbf16>
    %4 = vector.shape_cast %3 : vector<4x1x4x2x128xbf16> to vector<4x4x2x128xbf16>
    %5 = vector.extract_strided_slice %2 {offsets = [0, 1, 0, 0, 0], sizes = [4, 1, 4, 2, 128], strides = [1, 1, 1, 1, 1]} : vector<4x2x4x2x128xbf16> to vector<4x1x4x2x128xbf16>
    %6 = vector.shape_cast %5 : vector<4x1x4x2x128xbf16> to vector<4x4x2x128xbf16>
    %7 = arith.maximumf %4, %6 : vector<4x4x2x128xbf16>
    %8 = vector.extract_strided_slice %7 {offsets = [0, 0, 0, 0], sizes = [4, 4, 1, 128], strides = [1, 1, 1, 1]} : vector<4x4x2x128xbf16> to vector<4x4x1x128xbf16>
    %9 = vector.shape_cast %8 : vector<4x4x1x128xbf16> to vector<4x4x128xbf16>
    %10 = vector.extract_strided_slice %7 {offsets = [0, 0, 1, 0], sizes = [4, 4, 1, 128], strides = [1, 1, 1, 1]} : vector<4x4x2x128xbf16> to vector<4x4x1x128xbf16>
    %11 = vector.shape_cast %10 : vector<4x4x1x128xbf16> to vector<4x4x128xbf16>
    %12 = arith.maximumf %9, %11 : vector<4x4x128xbf16>
    %c0_3 = arith.constant 0 : index
    %c0_4 = arith.constant 0 : index
    %c0_5 = arith.constant 0 : index
    %c0_6 = arith.constant 0 : index
    %13 = vector.load %arg2[%c0_3, %c0_4, %c0_5, %c0_6] : memref<1x4x4x128xbf16, #tpu.memory_space<vmem>>, vector<1x4x4x128xbf16>
    %14 = vector.shape_cast %13 : vector<1x4x4x128xbf16> to vector<4x4x128xbf16>
    %15 = vector.shape_cast %12 : vector<4x4x128xbf16> to vector<1x4x4x128xbf16>
    tpu.vector_store %arg2[%c0_3, %c0_4, %c0_5, %c0_6], %15 {strides = array<i32>} : memref<1x4x4x128xbf16, #tpu.memory_space<vmem>>, vector<1x4x4x128xbf16>,
    return
  }
  func.func @transform_0(%arg0: i32) -> (i32, i32, i32, i32) {
    %c0_i32 = arith.constant 0 : i32
    %c0_i32_0 = arith.constant 0 : i32
    %c0_i32_1 = arith.constant 0 : i32
    %c0_i32_2 = arith.constant 0 : i32
    return %arg0, %c0_i32, %c0_i32_0, %c0_i32_1 : i32, i32, i32, i32
  }
  func.func @transform_1(%arg0: i32) -> (i32, i32, i32, i32) {
    %c0_i32 = arith.constant 0 : i32
    %c0_i32_0 = arith.constant 0 : i32
    %c0_i32_1 = arith.constant 0 : i32
    %c0_i32_2 = arith.constant 0 : i32
    return %arg0, %c0_i32, %c0_i32_0, %c0_i32_1 : i32, i32, i32, i32
  }
}

module attributes {stable_mosaic.version = 11 : i64} {
  func.func @_conv3x3_relu_kernel(%arg0: i32, %arg1: i32, %arg2: memref<1x6x6x128xbf16, #tpu.memory_space<vmem>>, %arg3: memref<1152x256xbf16, #tpu.memory_space<vmem>>, %arg4: memref<1x256xf32, #tpu.memory_space<vmem>>, %arg5: memref<1x16x256xbf16, #tpu.memory_space<vmem>>) attributes {dimension_semantics = [#tpu.dimension_semantics<parallel>, #tpu.dimension_semantics<parallel>], iteration_bounds = array<i64: 2, 2>, scalar_prefetch = 0 : i64, scratch_operands = 0 : i64, tpu.core_type = #tpu.core_type<tc>, window_params = [{transform_indices = @transform_0, window_bounds = array<i64: 1, 6, 6, 128>}, {transform_indices = @transform_1, window_bounds = array<i64: 1152, 256>}, {transform_indices = @transform_2, window_bounds = array<i64: 1, 256>}, {transform_indices = @transform_3, window_bounds = array<i64: 1, 16, 256>}]} {
    %c0 = arith.constant 0 : index
    %c0_0 = arith.constant 0 : index
    %c0_1 = arith.constant 0 : index
    %c0_2 = arith.constant 0 : index
    %0 = vector.load %arg2[%c0, %c0_0, %c0_1, %c0_2] : memref<1x6x6x128xbf16, #tpu.memory_space<vmem>>, vector<1x6x6x128xbf16>
    %1 = vector.shape_cast %0 : vector<1x6x6x128xbf16> to vector<6x6x128xbf16>
    %2 = vector.extract_strided_slice %1 {offsets = [0, 0, 0], sizes = [4, 4, 128], strides = [1, 1, 1]} : vector<6x6x128xbf16> to vector<4x4x128xbf16>
    %3 = vector.shape_cast %2 : vector<4x4x128xbf16> to vector<16x128xbf16>
    %4 = vector.extract_strided_slice %1 {offsets = [0, 1, 0], sizes = [4, 4, 128], strides = [1, 1, 1]} : vector<6x6x128xbf16> to vector<4x4x128xbf16>
    %5 = vector.shape_cast %4 : vector<4x4x128xbf16> to vector<16x128xbf16>
    %6 = vector.extract_strided_slice %1 {offsets = [0, 2, 0], sizes = [4, 4, 128], strides = [1, 1, 1]} : vector<6x6x128xbf16> to vector<4x4x128xbf16>
    %7 = vector.shape_cast %6 : vector<4x4x128xbf16> to vector<16x128xbf16>
    %8 = vector.extract_strided_slice %1 {offsets = [1, 0, 0], sizes = [4, 4, 128], strides = [1, 1, 1]} : vector<6x6x128xbf16> to vector<4x4x128xbf16>
    %9 = vector.shape_cast %8 : vector<4x4x128xbf16> to vector<16x128xbf16>
    %10 = vector.extract_strided_slice %1 {offsets = [1, 1, 0], sizes = [4, 4, 128], strides = [1, 1, 1]} : vector<6x6x128xbf16> to vector<4x4x128xbf16>
    %11 = vector.shape_cast %10 : vector<4x4x128xbf16> to vector<16x128xbf16>
    %12 = vector.extract_strided_slice %1 {offsets = [1, 2, 0], sizes = [4, 4, 128], strides = [1, 1, 1]} : vector<6x6x128xbf16> to vector<4x4x128xbf16>
    %13 = vector.shape_cast %12 : vector<4x4x128xbf16> to vector<16x128xbf16>
    %14 = vector.extract_strided_slice %1 {offsets = [2, 0, 0], sizes = [4, 4, 128], strides = [1, 1, 1]} : vector<6x6x128xbf16> to vector<4x4x128xbf16>
    %15 = vector.shape_cast %14 : vector<4x4x128xbf16> to vector<16x128xbf16>
    %16 = vector.extract_strided_slice %1 {offsets = [2, 1, 0], sizes = [4, 4, 128], strides = [1, 1, 1]} : vector<6x6x128xbf16> to vector<4x4x128xbf16>
    %17 = vector.shape_cast %16 : vector<4x4x128xbf16> to vector<16x128xbf16>
    %18 = vector.extract_strided_slice %1 {offsets = [2, 2, 0], sizes = [4, 4, 128], strides = [1, 1, 1]} : vector<6x6x128xbf16> to vector<4x4x128xbf16>
    %19 = vector.shape_cast %18 : vector<4x4x128xbf16> to vector<16x128xbf16>
    %20 = tpu.concatenate %3, %5, %7, %9, %11, %13, %15, %17, %19 in 1 : vector<16x128xbf16>, vector<16x128xbf16>, vector<16x128xbf16>, vector<16x128xbf16>, vector<16x128xbf16>, vector<16x128xbf16>, vector<16x128xbf16>, vector<16x128xbf16>, vector<16x128xbf16> -> vector<16x1152xbf16>
    %c0_3 = arith.constant 0 : index
    %c0_4 = arith.constant 0 : index
    %21 = vector.load %arg3[%c0_3, %c0_4] : memref<1152x256xbf16, #tpu.memory_space<vmem>>, vector<1152x256xbf16>
    %cst = arith.constant dense<0.000000e+00> : vector<16x256xf32>
    %22 = tpu.matmul %20, %21, %cst {dimension_numbers = #tpu.dot_dimension_numbers<[1], [0], [0], [1], [0, 0, 1, 1], [], []>} : vector<16x1152xbf16>, vector<1152x256xbf16>, vector<16x256xf32> -> vector<16x256xf32>
    %c0_5 = arith.constant 0 : index
    %c0_6 = arith.constant 0 : index
    %23 = vector.load %arg4[%c0_5, %c0_6] : memref<1x256xf32, #tpu.memory_space<vmem>>, vector<1x256xf32>
    %24 = vector.broadcast %23 : vector<1x256xf32> to vector<16x256xf32>
    %25 = arith.addf %22, %24 : vector<16x256xf32>
    %cst_7 = arith.constant 0.000000e+00 : f32
    %26 = vector.broadcast %cst_7 : f32 to vector<16x256xf32>
    %27 = arith.maximumf %25, %26 : vector<16x256xf32>
    %28 = arith.truncf %27 : vector<16x256xf32> to vector<16x256xbf16>
    %c0_8 = arith.constant 0 : index
    %c0_9 = arith.constant 0 : index
    %c0_10 = arith.constant 0 : index
    %29 = vector.load %arg5[%c0_8, %c0_9, %c0_10] : memref<1x16x256xbf16, #tpu.memory_space<vmem>>, vector<1x16x256xbf16>
    %30 = vector.shape_cast %29 : vector<1x16x256xbf16> to vector<16x256xbf16>
    %31 = vector.shape_cast %28 : vector<16x256xbf16> to vector<1x16x256xbf16>
    tpu.vector_store %arg5[%c0_8, %c0_9, %c0_10], %31 {strides = array<i32>} : memref<1x16x256xbf16, #tpu.memory_space<vmem>>, vector<1x16x256xbf16>,
    return
  }
  func.func @transform_0(%arg0: i32, %arg1: i32) -> (i32, i32, i32, i32) {
    %c0_i32 = arith.constant 0 : i32
    %c0_i32_0 = arith.constant 0 : i32
    %c0_i32_1 = arith.constant 0 : i32
    %c0_i32_2 = arith.constant 0 : i32
    return %arg0, %c0_i32, %c0_i32_0, %c0_i32_1 : i32, i32, i32, i32
  }
  func.func @transform_1(%arg0: i32, %arg1: i32) -> (i32, i32) {
    %c0_i32 = arith.constant 0 : i32
    %c0_i32_0 = arith.constant 0 : i32
    return %c0_i32, %arg1 : i32, i32
  }
  func.func @transform_2(%arg0: i32, %arg1: i32) -> (i32, i32) {
    %c0_i32 = arith.constant 0 : i32
    %c0_i32_0 = arith.constant 0 : i32
    return %c0_i32, %arg1 : i32, i32
  }
  func.func @transform_3(%arg0: i32, %arg1: i32) -> (i32, i32, i32) {
    %c0_i32 = arith.constant 0 : i32
    %c0_i32_0 = arith.constant 0 : i32
    return %arg0, %c0_i32, %arg1 : i32, i32, i32
  }
}

module attributes {stable_mosaic.version = 11 : i64} {
  func.func @_maxpool2x2_kernel(%arg0: i32, %arg1: memref<1x4x4x512xbf16, #tpu.memory_space<vmem>>, %arg2: memref<1x2x2x512xbf16, #tpu.memory_space<vmem>>) attributes {dimension_semantics = [#tpu.dimension_semantics<parallel>], iteration_bounds = array<i64: 2>, scalar_prefetch = 0 : i64, scratch_operands = 0 : i64, tpu.core_type = #tpu.core_type<tc>, window_params = [{transform_indices = @transform_0, window_bounds = array<i64: 1, 4, 4, 512>}, {transform_indices = @transform_1, window_bounds = array<i64: 1, 2, 2, 512>}]} {
    %c0 = arith.constant 0 : index
    %c0_0 = arith.constant 0 : index
    %c0_1 = arith.constant 0 : index
    %c0_2 = arith.constant 0 : index
    %0 = vector.load %arg1[%c0, %c0_0, %c0_1, %c0_2] : memref<1x4x4x512xbf16, #tpu.memory_space<vmem>>, vector<1x4x4x512xbf16>
    %1 = vector.shape_cast %0 : vector<1x4x4x512xbf16> to vector<4x4x512xbf16>
    %2 = vector.shape_cast %1 : vector<4x4x512xbf16> to vector<2x2x2x2x512xbf16>
    %3 = vector.extract_strided_slice %2 {offsets = [0, 0, 0, 0, 0], sizes = [2, 1, 2, 2, 512], strides = [1, 1, 1, 1, 1]} : vector<2x2x2x2x512xbf16> to vector<2x1x2x2x512xbf16>
    %4 = vector.shape_cast %3 : vector<2x1x2x2x512xbf16> to vector<2x2x2x512xbf16>
    %5 = vector.extract_strided_slice %2 {offsets = [0, 1, 0, 0, 0], sizes = [2, 1, 2, 2, 512], strides = [1, 1, 1, 1, 1]} : vector<2x2x2x2x512xbf16> to vector<2x1x2x2x512xbf16>
    %6 = vector.shape_cast %5 : vector<2x1x2x2x512xbf16> to vector<2x2x2x512xbf16>
    %7 = arith.maximumf %4, %6 : vector<2x2x2x512xbf16>
    %8 = vector.extract_strided_slice %7 {offsets = [0, 0, 0, 0], sizes = [2, 2, 1, 512], strides = [1, 1, 1, 1]} : vector<2x2x2x512xbf16> to vector<2x2x1x512xbf16>
    %9 = vector.shape_cast %8 : vector<2x2x1x512xbf16> to vector<2x2x512xbf16>
    %10 = vector.extract_strided_slice %7 {offsets = [0, 0, 1, 0], sizes = [2, 2, 1, 512], strides = [1, 1, 1, 1]} : vector<2x2x2x512xbf16> to vector<2x2x1x512xbf16>
    %11 = vector.shape_cast %10 : vector<2x2x1x512xbf16> to vector<2x2x512xbf16>
    %12 = arith.maximumf %9, %11 : vector<2x2x512xbf16>
    %c0_3 = arith.constant 0 : index
    %c0_4 = arith.constant 0 : index
    %c0_5 = arith.constant 0 : index
    %c0_6 = arith.constant 0 : index
    %13 = vector.load %arg2[%c0_3, %c0_4, %c0_5, %c0_6] : memref<1x2x2x512xbf16, #tpu.memory_space<vmem>>, vector<1x2x2x512xbf16>
    %14 = vector.shape_cast %13 : vector<1x2x2x512xbf16> to vector<2x2x512xbf16>
    %15 = vector.shape_cast %12 : vector<2x2x512xbf16> to vector<1x2x2x512xbf16>
    tpu.vector_store %arg2[%c0_3, %c0_4, %c0_5, %c0_6], %15 {strides = array<i32>} : memref<1x2x2x512xbf16, #tpu.memory_space<vmem>>, vector<1x2x2x512xbf16>,
    return
  }
  func.func @transform_0(%arg0: i32) -> (i32, i32, i32, i32) {
    %c0_i32 = arith.constant 0 : i32
    %c0_i32_0 = arith.constant 0 : i32
    %c0_i32_1 = arith.constant 0 : i32
    %c0_i32_2 = arith.constant 0 : i32
    return %arg0, %c0_i32, %c0_i32_0, %c0_i32_1 : i32, i32, i32, i32
  }
  func.func @transform_1(%arg0: i32) -> (i32, i32, i32, i32) {
    %c0_i32 = arith.constant 0 : i32
    %c0_i32_0 = arith.constant 0 : i32
    %c0_i32_1 = arith.constant 0 : i32
    %c0_i32_2 = arith.constant 0 : i32
    return %arg0, %c0_i32, %c0_i32_0, %c0_i32_1 : i32, i32, i32, i32
  }
}

module attributes {stable_mosaic.version = 11 : i64} {
  func.func @_linear_kernel(%arg0: i32, %arg1: i32, %arg2: memref<8x256xbf16, #tpu.memory_space<vmem>>, %arg3: memref<256x512xbf16, #tpu.memory_space<vmem>>, %arg4: memref<1x512xf32, #tpu.memory_space<vmem>>, %arg5: memref<8x512xbf16, #tpu.memory_space<vmem>>, %arg6: memref<8x512xf32, #tpu.memory_space<vmem>>) attributes {dimension_semantics = [#tpu.dimension_semantics<parallel>, #tpu.dimension_semantics<arbitrary>], iteration_bounds = array<i64: 2, 4>, scalar_prefetch = 0 : i64, scratch_operands = 1 : i64, tpu.core_type = #tpu.core_type<tc>, window_params = [{transform_indices = @transform_0, window_bounds = array<i64: 8, 256>}, {transform_indices = @transform_1, window_bounds = array<i64: 256, 512>}, {transform_indices = @transform_2, window_bounds = array<i64: 1, 512>}, {transform_indices = @transform_3, window_bounds = array<i64: 8, 512>}]} {
    %c0_i32 = arith.constant 0 : i32
    %0 = arith.cmpi eq, %arg1, %c0_i32 : i32
    %1 = arith.extui %0 : i1 to i32
    %c0_i32_0 = arith.constant 0 : i32
    %2 = arith.cmpi ne, %1, %c0_i32_0 : i32
    scf.if %2 {
      %cst_9 = arith.constant 0.000000e+00 : f32
      %12 = vector.broadcast %cst_9 : f32 to vector<8x512xf32>
      %c0_10 = arith.constant 0 : index
      %c0_11 = arith.constant 0 : index
      %13 = vector.load %arg6[%c0_10, %c0_11] : memref<8x512xf32, #tpu.memory_space<vmem>>, vector<8x512xf32>
      tpu.vector_store %arg6[%c0_10, %c0_11], %12 {strides = array<i32>} : memref<8x512xf32, #tpu.memory_space<vmem>>, vector<8x512xf32>,
    } else {
    }
    %c0 = arith.constant 0 : index
    %c0_1 = arith.constant 0 : index
    %3 = vector.load %arg6[%c0, %c0_1] : memref<8x512xf32, #tpu.memory_space<vmem>>, vector<8x512xf32>
    %c0_2 = arith.constant 0 : index
    %c0_3 = arith.constant 0 : index
    %4 = vector.load %arg2[%c0_2, %c0_3] : memref<8x256xbf16, #tpu.memory_space<vmem>>, vector<8x256xbf16>
    %c0_4 = arith.constant 0 : index
    %c0_5 = arith.constant 0 : index
    %5 = vector.load %arg3[%c0_4, %c0_5] : memref<256x512xbf16, #tpu.memory_space<vmem>>, vector<256x512xbf16>
    %cst = arith.constant dense<0.000000e+00> : vector<8x512xf32>
    %6 = tpu.matmul %4, %5, %cst {dimension_numbers = #tpu.dot_dimension_numbers<[1], [0], [0], [1], [0, 0, 1, 1], [], []>} : vector<8x256xbf16>, vector<256x512xbf16>, vector<8x512xf32> -> vector<8x512xf32>
    %7 = arith.addf %3, %6 : vector<8x512xf32>
    %c0_6 = arith.constant 0 : index
    %c0_7 = arith.constant 0 : index
    %8 = vector.load %arg6[%c0_6, %c0_7] : memref<8x512xf32, #tpu.memory_space<vmem>>, vector<8x512xf32>
    tpu.vector_store %arg6[%c0_6, %c0_7], %7 {strides = array<i32>} : memref<8x512xf32, #tpu.memory_space<vmem>>, vector<8x512xf32>,
    %c3_i32 = arith.constant 3 : i32
    %9 = arith.cmpi eq, %arg1, %c3_i32 : i32
    %10 = arith.extui %9 : i1 to i32
    %c0_i32_8 = arith.constant 0 : i32
    %11 = arith.cmpi ne, %10, %c0_i32_8 : i32
    scf.if %11 {
      %c0_9 = arith.constant 0 : index
      %c0_10 = arith.constant 0 : index
      %12 = vector.load %arg6[%c0_9, %c0_10] : memref<8x512xf32, #tpu.memory_space<vmem>>, vector<8x512xf32>
      %c0_11 = arith.constant 0 : index
      %c0_12 = arith.constant 0 : index
      %13 = vector.load %arg4[%c0_11, %c0_12] : memref<1x512xf32, #tpu.memory_space<vmem>>, vector<1x512xf32>
      %14 = vector.broadcast %13 : vector<1x512xf32> to vector<8x512xf32>
      %15 = arith.addf %12, %14 : vector<8x512xf32>
      %cst_13 = arith.constant 0.000000e+00 : f32
      %16 = vector.broadcast %cst_13 : f32 to vector<8x512xf32>
      %17 = arith.maximumf %15, %16 : vector<8x512xf32>
      %18 = arith.truncf %17 : vector<8x512xf32> to vector<8x512xbf16>
      %c0_14 = arith.constant 0 : index
      %c0_15 = arith.constant 0 : index
      %19 = vector.load %arg5[%c0_14, %c0_15] : memref<8x512xbf16, #tpu.memory_space<vmem>>, vector<8x512xbf16>
      tpu.vector_store %arg5[%c0_14, %c0_15], %18 {strides = array<i32>} : memref<8x512xbf16, #tpu.memory_space<vmem>>, vector<8x512xbf16>,
    } else {
    }
    return
  }
  func.func @transform_0(%arg0: i32, %arg1: i32) -> (i32, i32) {
    %c0_i32 = arith.constant 0 : i32
    %c0_i32_0 = arith.constant 0 : i32
    return %c0_i32, %arg1 : i32, i32
  }
  func.func @transform_1(%arg0: i32, %arg1: i32) -> (i32, i32) {
    %c0_i32 = arith.constant 0 : i32
    return %arg1, %arg0 : i32, i32
  }
  func.func @transform_2(%arg0: i32, %arg1: i32) -> (i32, i32) {
    %c0_i32 = arith.constant 0 : i32
    %c0_i32_0 = arith.constant 0 : i32
    return %c0_i32, %arg0 : i32, i32
  }
  func.func @transform_3(%arg0: i32, %arg1: i32) -> (i32, i32) {
    %c0_i32 = arith.constant 0 : i32
    %c0_i32_0 = arith.constant 0 : i32
    return %c0_i32, %arg0 : i32, i32
  }
}

module attributes {stable_mosaic.version = 11 : i64} {
  func.func @_linear_kernel(%arg0: i32, %arg1: i32, %arg2: memref<8x256xbf16, #tpu.memory_space<vmem>>, %arg3: memref<256x512xbf16, #tpu.memory_space<vmem>>, %arg4: memref<1x512xf32, #tpu.memory_space<vmem>>, %arg5: memref<8x512xbf16, #tpu.memory_space<vmem>>, %arg6: memref<8x512xf32, #tpu.memory_space<vmem>>) attributes {dimension_semantics = [#tpu.dimension_semantics<parallel>, #tpu.dimension_semantics<arbitrary>], iteration_bounds = array<i64: 2, 8>, scalar_prefetch = 0 : i64, scratch_operands = 1 : i64, tpu.core_type = #tpu.core_type<tc>, window_params = [{transform_indices = @transform_0, window_bounds = array<i64: 8, 256>}, {transform_indices = @transform_1, window_bounds = array<i64: 256, 512>}, {transform_indices = @transform_2, window_bounds = array<i64: 1, 512>}, {transform_indices = @transform_3, window_bounds = array<i64: 8, 512>}]} {
    %c0_i32 = arith.constant 0 : i32
    %0 = arith.cmpi eq, %arg1, %c0_i32 : i32
    %1 = arith.extui %0 : i1 to i32
    %c0_i32_0 = arith.constant 0 : i32
    %2 = arith.cmpi ne, %1, %c0_i32_0 : i32
    scf.if %2 {
      %cst_9 = arith.constant 0.000000e+00 : f32
      %12 = vector.broadcast %cst_9 : f32 to vector<8x512xf32>
      %c0_10 = arith.constant 0 : index
      %c0_11 = arith.constant 0 : index
      %13 = vector.load %arg6[%c0_10, %c0_11] : memref<8x512xf32, #tpu.memory_space<vmem>>, vector<8x512xf32>
      tpu.vector_store %arg6[%c0_10, %c0_11], %12 {strides = array<i32>} : memref<8x512xf32, #tpu.memory_space<vmem>>, vector<8x512xf32>,
    } else {
    }
    %c0 = arith.constant 0 : index
    %c0_1 = arith.constant 0 : index
    %3 = vector.load %arg6[%c0, %c0_1] : memref<8x512xf32, #tpu.memory_space<vmem>>, vector<8x512xf32>
    %c0_2 = arith.constant 0 : index
    %c0_3 = arith.constant 0 : index
    %4 = vector.load %arg2[%c0_2, %c0_3] : memref<8x256xbf16, #tpu.memory_space<vmem>>, vector<8x256xbf16>
    %c0_4 = arith.constant 0 : index
    %c0_5 = arith.constant 0 : index
    %5 = vector.load %arg3[%c0_4, %c0_5] : memref<256x512xbf16, #tpu.memory_space<vmem>>, vector<256x512xbf16>
    %cst = arith.constant dense<0.000000e+00> : vector<8x512xf32>
    %6 = tpu.matmul %4, %5, %cst {dimension_numbers = #tpu.dot_dimension_numbers<[1], [0], [0], [1], [0, 0, 1, 1], [], []>} : vector<8x256xbf16>, vector<256x512xbf16>, vector<8x512xf32> -> vector<8x512xf32>
    %7 = arith.addf %3, %6 : vector<8x512xf32>
    %c0_6 = arith.constant 0 : index
    %c0_7 = arith.constant 0 : index
    %8 = vector.load %arg6[%c0_6, %c0_7] : memref<8x512xf32, #tpu.memory_space<vmem>>, vector<8x512xf32>
    tpu.vector_store %arg6[%c0_6, %c0_7], %7 {strides = array<i32>} : memref<8x512xf32, #tpu.memory_space<vmem>>, vector<8x512xf32>,
    %c7_i32 = arith.constant 7 : i32
    %9 = arith.cmpi eq, %arg1, %c7_i32 : i32
    %10 = arith.extui %9 : i1 to i32
    %c0_i32_8 = arith.constant 0 : i32
    %11 = arith.cmpi ne, %10, %c0_i32_8 : i32
    scf.if %11 {
      %c0_9 = arith.constant 0 : index
      %c0_10 = arith.constant 0 : index
      %12 = vector.load %arg6[%c0_9, %c0_10] : memref<8x512xf32, #tpu.memory_space<vmem>>, vector<8x512xf32>
      %c0_11 = arith.constant 0 : index
      %c0_12 = arith.constant 0 : index
      %13 = vector.load %arg4[%c0_11, %c0_12] : memref<1x512xf32, #tpu.memory_space<vmem>>, vector<1x512xf32>
      %14 = vector.broadcast %13 : vector<1x512xf32> to vector<8x512xf32>
      %15 = arith.addf %12, %14 : vector<8x512xf32>
      %cst_13 = arith.constant 0.000000e+00 : f32
      %16 = vector.broadcast %cst_13 : f32 to vector<8x512xf32>
      %17 = arith.maximumf %15, %16 : vector<8x512xf32>
      %18 = arith.truncf %17 : vector<8x512xf32> to vector<8x512xbf16>
      %c0_14 = arith.constant 0 : index
      %c0_15 = arith.constant 0 : index
      %19 = vector.load %arg5[%c0_14, %c0_15] : memref<8x512xbf16, #tpu.memory_space<vmem>>, vector<8x512xbf16>
      tpu.vector_store %arg5[%c0_14, %c0_15], %18 {strides = array<i32>} : memref<8x512xbf16, #tpu.memory_space<vmem>>, vector<8x512xbf16>,
    } else {
    }
    return
  }
  func.func @transform_0(%arg0: i32, %arg1: i32) -> (i32, i32) {
    %c0_i32 = arith.constant 0 : i32
    %c0_i32_0 = arith.constant 0 : i32
    return %c0_i32, %arg1 : i32, i32
  }
  func.func @transform_1(%arg0: i32, %arg1: i32) -> (i32, i32) {
    %c0_i32 = arith.constant 0 : i32
    return %arg1, %arg0 : i32, i32
  }
  func.func @transform_2(%arg0: i32, %arg1: i32) -> (i32, i32) {
    %c0_i32 = arith.constant 0 : i32
    %c0_i32_0 = arith.constant 0 : i32
    return %c0_i32, %arg0 : i32, i32
  }
  func.func @transform_3(%arg0: i32, %arg1: i32) -> (i32, i32) {
    %c0_i32 = arith.constant 0 : i32
    %c0_i32_0 = arith.constant 0 : i32
    return %c0_i32, %arg0 : i32, i32
  }
}

module attributes {stable_mosaic.version = 11 : i64} {
  func.func @_linear_kernel(%arg0: i32, %arg1: i32, %arg2: memref<8x256xbf16, #tpu.memory_space<vmem>>, %arg3: memref<256x128xbf16, #tpu.memory_space<vmem>>, %arg4: memref<1x128xf32, #tpu.memory_space<vmem>>, %arg5: memref<8x128xf32, #tpu.memory_space<vmem>>, %arg6: memref<8x128xf32, #tpu.memory_space<vmem>>) attributes {dimension_semantics = [#tpu.dimension_semantics<parallel>, #tpu.dimension_semantics<arbitrary>], iteration_bounds = array<i64: 1, 4>, scalar_prefetch = 0 : i64, scratch_operands = 1 : i64, tpu.core_type = #tpu.core_type<tc>, window_params = [{transform_indices = @transform_0, window_bounds = array<i64: 8, 256>}, {transform_indices = @transform_1, window_bounds = array<i64: 256, 128>}, {transform_indices = @transform_2, window_bounds = array<i64: 1, 128>}, {transform_indices = @transform_3, window_bounds = array<i64: 8, 128>}]} {
    %c0_i32 = arith.constant 0 : i32
    %0 = arith.cmpi eq, %arg1, %c0_i32 : i32
    %1 = arith.extui %0 : i1 to i32
    %c0_i32_0 = arith.constant 0 : i32
    %2 = arith.cmpi ne, %1, %c0_i32_0 : i32
    scf.if %2 {
      %cst_9 = arith.constant 0.000000e+00 : f32
      %12 = vector.broadcast %cst_9 : f32 to vector<8x128xf32>
      %c0_10 = arith.constant 0 : index
      %c0_11 = arith.constant 0 : index
      %13 = vector.load %arg6[%c0_10, %c0_11] : memref<8x128xf32, #tpu.memory_space<vmem>>, vector<8x128xf32>
      tpu.vector_store %arg6[%c0_10, %c0_11], %12 {strides = array<i32>} : memref<8x128xf32, #tpu.memory_space<vmem>>, vector<8x128xf32>,
    } else {
    }
    %c0 = arith.constant 0 : index
    %c0_1 = arith.constant 0 : index
    %3 = vector.load %arg6[%c0, %c0_1] : memref<8x128xf32, #tpu.memory_space<vmem>>, vector<8x128xf32>
    %c0_2 = arith.constant 0 : index
    %c0_3 = arith.constant 0 : index
    %4 = vector.load %arg2[%c0_2, %c0_3] : memref<8x256xbf16, #tpu.memory_space<vmem>>, vector<8x256xbf16>
    %c0_4 = arith.constant 0 : index
    %c0_5 = arith.constant 0 : index
    %5 = vector.load %arg3[%c0_4, %c0_5] : memref<256x128xbf16, #tpu.memory_space<vmem>>, vector<256x128xbf16>
    %cst = arith.constant dense<0.000000e+00> : vector<8x128xf32>
    %6 = tpu.matmul %4, %5, %cst {dimension_numbers = #tpu.dot_dimension_numbers<[1], [0], [0], [1], [0, 0, 1, 1], [], []>} : vector<8x256xbf16>, vector<256x128xbf16>, vector<8x128xf32> -> vector<8x128xf32>
    %7 = arith.addf %3, %6 : vector<8x128xf32>
    %c0_6 = arith.constant 0 : index
    %c0_7 = arith.constant 0 : index
    %8 = vector.load %arg6[%c0_6, %c0_7] : memref<8x128xf32, #tpu.memory_space<vmem>>, vector<8x128xf32>
    tpu.vector_store %arg6[%c0_6, %c0_7], %7 {strides = array<i32>} : memref<8x128xf32, #tpu.memory_space<vmem>>, vector<8x128xf32>,
    %c3_i32 = arith.constant 3 : i32
    %9 = arith.cmpi eq, %arg1, %c3_i32 : i32
    %10 = arith.extui %9 : i1 to i32
    %c0_i32_8 = arith.constant 0 : i32
    %11 = arith.cmpi ne, %10, %c0_i32_8 : i32
    scf.if %11 {
      %c0_9 = arith.constant 0 : index
      %c0_10 = arith.constant 0 : index
      %12 = vector.load %arg6[%c0_9, %c0_10] : memref<8x128xf32, #tpu.memory_space<vmem>>, vector<8x128xf32>
      %c0_11 = arith.constant 0 : index
      %c0_12 = arith.constant 0 : index
      %13 = vector.load %arg4[%c0_11, %c0_12] : memref<1x128xf32, #tpu.memory_space<vmem>>, vector<1x128xf32>
      %14 = vector.broadcast %13 : vector<1x128xf32> to vector<8x128xf32>
      %15 = arith.addf %12, %14 : vector<8x128xf32>
      %c0_13 = arith.constant 0 : index
      %c0_14 = arith.constant 0 : index
      %16 = vector.load %arg5[%c0_13, %c0_14] : memref<8x128xf32, #tpu.memory_space<vmem>>, vector<8x128xf32>
      tpu.vector_store %arg5[%c0_13, %c0_14], %15 {strides = array<i32>} : memref<8x128xf32, #tpu.memory_space<vmem>>, vector<8x128xf32>,
    } else {
    }
    return
  }
  func.func @transform_0(%arg0: i32, %arg1: i32) -> (i32, i32) {
    %c0_i32 = arith.constant 0 : i32
    %c0_i32_0 = arith.constant 0 : i32
    return %c0_i32, %arg1 : i32, i32
  }
  func.func @transform_1(%arg0: i32, %arg1: i32) -> (i32, i32) {
    %c0_i32 = arith.constant 0 : i32
    return %arg1, %arg0 : i32, i32
  }
  func.func @transform_2(%arg0: i32, %arg1: i32) -> (i32, i32) {
    %c0_i32 = arith.constant 0 : i32
    %c0_i32_0 = arith.constant 0 : i32
    return %c0_i32, %arg0 : i32, i32
  }
  func.func @transform_3(%arg0: i32, %arg1: i32) -> (i32, i32) {
    %c0_i32 = arith.constant 0 : i32
    %c0_i32_0 = arith.constant 0 : i32
    return %c0_i32, %arg0 : i32, i32
  }
}

</mosaic_0001>

<bundles_post_ra>
// kernel: vgg_forward.12
= control target key start
LH: loop header
LB: loop body
LE: loop exit
PB: predicated region body
PF: predicated region fallthrough
CT: control target
= control target key end

     0   :  { %s936_s6 = smov 0   ;;  %s1039_s0 = inlined_call_operand.vmem [shape: bf16[2,8,8,128], index: 0, kind: input, shape index: {}]   ;;  %s1040_s1 = inlined_call_operand.vmem [shape: bf16[2,4,4,128], index: 1, kind: output, shape index: {}]  }
   0x1 LB: > { %s863_s7 = sadd.s32 4294967295, %s921_s6   ;;  %p867_p0 = scmp.ge.s32.totalorder %s921_s6, 1  ;;  %s921_s6 = sphi %s936_s6, %s11_s6  }
   0x2   : > { %p87_p1 = scmp.lt.s32.totalorder %s921_s6, 3 }
   0x4   : > { %p88_p2 = pnand %p867_p0, %p87_p1 }
   0x5   : > { %p107_p3 = scmp.lt.s32.totalorder (!%p88_p2), %s863_s7, 1  ;;  %v144_v0 = vlaneseq (!%p88_p2)  ;;  %v923_v1 = vmov (!%p88_p2), 1966171168   ;;  %v924_v3 = vmov (!%p88_p2), 1935823168   ;;  %vm742_vm0 = vcmask (!%p88_p2), 1041409  }
   0x6   : > { %91 = sbr.rel (%p88_p2) target bundleno = 67 (0x43), region = 24  ;;  %v142_v2 = vunpack.c.l.s4 (!%p88_p2), %v923_v1  ;;  %v502_v4 = vunpack.c.l.s4 (!%p88_p2), %v924_v3  ;;  %v925_v6 = vmov (!%p88_p2), 1983009808   ;;  %vm745_vm1 = vcmask (!%p88_p2), 1042434  }
   0x7   : > { %v145_v5 = vshrl.u32 (!%p88_p2), %v144_v0, 7  ;;  %v614_v7 = vunpack.c.l.s4 (!%p88_p2), %v925_v6  ;;  %vm748_vm2 = vcmask (!%p88_p2), 1043459  }
   0x8   : > { %v143_v8 = vunpack.c.0.s8 (!%p88_p2), %v142_v2  ;;  %v503_v9 = vunpack.c.0.s8 (!%p88_p2), %v502_v4 }
   0x9   : > { %v615_v10 = vunpack.c.0.s8 (!%p88_p2), %v614_v7 }
   0xa   : > { %v952_v11 = vsub.s32 (!%p88_p2), %v143_v8, %v145_v5  ;;  %v958_v18 = vsub.s32 (!%p88_p2), %v503_v9, %v145_v5 }
   0xb   : > { %v960_v19 = vsub.s32 (!%p88_p2), %v615_v10, %v145_v5 }
   0xd   : > { %s1042_s7 = smov (!%p107_p3, %s863_s7), 1 }
   0xe   : > { %s902_s8 = sshll.u32 %s1042_s7, 5  ;;  %s903_s12 = sshll.u32 %s1042_s7, 3 }
   0xf   : > { %s950_s11 = scalar_lea.vmem %s1039_s0, %s902_s8  ;;  %s997_s15 = scalar_lea.vmem %s1040_s1, %s903_s12 }
  0x10   : > { %v872_v12 = vld.sshfl [vmem:[%s950_s11] sm:$0x33 pattern:$0x75316420] }
  0x11   : > { %v873_v13 = vld.sshfl [vmem:[%s950_s11 + $0x4] sm:$0x33 pattern:$0x75316420]  ;;  %v140_v14 = vcombine.high %v872_v12, %v872_v12  ;;  %v147_v15 = vrot.slane %v872_v12, %v952_v11 }
  0x12   : > { %v164_v16 = vcombine.high %v873_v13, %v873_v13  ;;  %v171_v17 = vrot.slane %v873_v13, %v952_v11  ;;  %v874_v20 = vld.sshfl [vmem:[%s950_s11 + $0x8] sm:$0x33 pattern:$0x75316420] }
  0x13   : > { %v154_v21 = vrot.slane %v140_v14, %v952_v11  ;;  %v155_v22 = vcombine.high %v147_v15, %v147_v15  ;;  %v875_v23 = vld.sshfl [vmem:[%s950_s11 + $0xc] sm:$0x33 pattern:$0x75316420]  ;;  %v188_v24 = vcombine.high %v874_v20, %v874_v20  ;;  %v195_v25 = vrot.slane %v874_v20, %v952_v11 }
  0x14   : > { %v178_v26 = vrot.slane %v164_v16, %v952_v11  ;;  %v179_v27 = vcombine.high %v171_v17, %v171_v17  ;;  %v357_v28 = vmax.bf16 %v171_v17, %v147_v15  ;;  %v212_v29 = vcombine.high %v875_v23, %v875_v23  ;;  %v876_v2 = vld.sshfl [vmem:[%s950_s11 + $0x10] sm:$0x33 pattern:$0x75316420] }
  0x15   : > { %v156_v30 = vcombine.high %v154_v21, %v154_v21  ;;  %v202_v31 = vrot.slane %v188_v24, %v952_v11  ;;  %v203_v32 = vcombine.high %v195_v25, %v195_v25  ;;  %v219_v33 = vrot.slane %v875_v23, %v952_v11 }
  0x16   : > { %v180_v34 = vcombine.high %v178_v26, %v178_v26  ;;  %v358_v35 = vmax.bf16 %v178_v26, %v154_v21  ;;  %v359_v36 = vmax.bf16 %v179_v27, %v155_v22  ;;  %v374_v37 = vshrl.u32 %v357_v28, 16  ;;  %v877_v22 = vld.sshfl [vmem:[%s950_s11 + $0x14] sm:$0x33 pattern:$0x75316420] }
  0x17   : > { %v204_v38 = vcombine.high %v202_v31, %v202_v31  ;;  %v226_v39 = vrot.slane %v212_v29, %v952_v11  ;;  %v227_v40 = vcombine.high %v219_v33, %v219_v33  ;;  %v361_v41 = vmax.bf16 %v219_v33, %v195_v25 }
  0x18   : > { %v360_v42 = vmax.bf16 %v180_v34, %v156_v30  ;;  %v379_v43 = vshrl.u32 %v358_v35, 16  ;;  %v384_v44 = vshrl.u32 %v359_v36, 16  ;;  %v469_v45 = vmax.bf16 %v374_v37, %v357_v28 }
  0x19   : > { %v228_v46 = vcombine.high %v226_v39, %v226_v39  ;;  %v362_v47 = vmax.bf16 %v226_v39, %v202_v31  ;;  %v363_v48 = vmax.bf16 %v227_v40, %v203_v32  ;;  %v394_v49 = vshrl.u32 %v361_v41, 16 }
  0x1a   : > { %v389_v50 = vshrl.u32 %v360_v42, 16  ;;  %v470_v51 = vmax.bf16 %v379_v43, %v358_v35  ;;  %v471_v52 = vmax.bf16 %v384_v44, %v359_v36  ;;  %v507_v53 = vrot.slane %v469_v45, %v958_v18  ;;  %v878_v35 = vld.sshfl [vmem:[%s950_s11 + $0x18] sm:$0x33 pattern:$0x75316420] }
  0x1b   : > { %v364_v54 = vmax.bf16 %v228_v46, %v204_v38  ;;  %v399_v55 = vshrl.u32 %v362_v47, 16  ;;  %v404_v56 = vshrl.u32 %v363_v48, 16  ;;  %v473_v57 = vmax.bf16 %v394_v49, %v361_v41 }
  0x1c   : > { %v472_v58 = vmax.bf16 %v389_v50, %v360_v42  ;;  %v514_v59 = vrot.slane %v470_v51, %v958_v18  ;;  %v521_v60 = vrot.slane %v471_v52, %v958_v18  ;;  %v619_v61 = vrot.slane %v507_v53, %v960_v19  ;;  %v879_v52 = vld.sshfl [vmem:[%s950_s11 + $0x1c] sm:$0x33 pattern:$0x75316420] }
  0x1d   : > { %v409_v62 = vshrl.u32 %v364_v54, 16  ;;  %v474_v63 = vmax.bf16 %v399_v55, %v362_v47  ;;  %v475_v0 = vmax.bf16 %v404_v56, %v363_v48  ;;  %v535_v1 = vrot.slane %v473_v57, %v958_v18 }
  0x1e   : > { %v528_v3 = vrot.slane %v472_v58, %v958_v18  ;;  %v626_v4 = vrot.slane %v514_v59, %v960_v19  ;;  %v633_v5 = vrot.slane %v521_v60, %v960_v19  ;;  %v725_v6 = vunpack.c.l.b16 %v619_v61 }
  0x1f   : > { %v476_v7 = vmax.bf16 %v409_v62, %v364_v54  ;;  %v542_v8 = vrot.slane %v474_v63, %v958_v18  ;;  %v549_v9 = vrot.slane %v475_v0, %v958_v18  ;;  %v647_v10 = vrot.slane %v535_v1, %v960_v19 }
  0x20   : > { %v640_v12 = vrot.slane %v528_v3, %v960_v19  ;;  %v726_v13 = vunpack.c.l.b16 %v626_v4  ;;  %v727_v14 = vunpack.c.l.b16 %v633_v5  ;;  %v236_v15 = vcombine.high %v876_v2, %v876_v2 }
  0x21   : > { %v556_v16 = vrot.slane %v476_v7, %v958_v18  ;;  %v654_v17 = vrot.slane %v542_v8, %v960_v19  ;;  %v661_v20 = vrot.slane %v549_v9, %v960_v19  ;;  %v729_v21 = vunpack.c.l.b16 %v647_v10 }
  0x22   : > { %v728_v23 = vunpack.c.l.b16 %v640_v12  ;;  %v741_v24 = vrot.slane %v726_v13, 7  ;;  %v744_v25 = vrot.slane %v727_v14, 6  ;;  %v243_v26 = vrot.slane %v876_v2, %v952_v11 }
  0x23   : > { %v668_v27 = vrot.slane %v556_v16, %v960_v19  ;;  %v730_v28 = vunpack.c.l.b16 %v654_v17  ;;  %v731_v29 = vunpack.c.l.b16 %v661_v20  ;;  %v250_v30 = vrot.slane %v236_v15, %v952_v11 }
  0x24   : > { %v743_v31 = vsel %vm742_vm0, %v741_v24, %v725_v6  ;;  %v747_v32 = vrot.slane %v728_v23, 5  ;;  %v251_v33 = vcombine.high %v243_v26, %v243_v26  ;;  %v260_v34 = vcombine.high %v877_v22, %v877_v22 }
  0x25   : > { %v746_v36 = vsel %vm745_vm1, %v744_v25, %v743_v31  ;;  %v732_v37 = vunpack.c.l.b16 %v668_v27  ;;  %v750_v38 = vrot.slane %v730_v28, 7  ;;  %v752_v39 = vrot.slane %v731_v29, 6 }
  0x26   : > { %v749_v40 = vsel %vm748_vm2, %v747_v32, %v746_v36  ;;  %v252_v41 = vcombine.high %v250_v30, %v250_v30  ;;  %v267_v42 = vrot.slane %v877_v22, %v952_v11  ;;  %v274_v43 = vrot.slane %v260_v34, %v952_v11 }
  0x27   : > { %v768_v44 = vpack.c.b16 %v749_v40, %v749_v40  ;;  %v751_v45 = vsel %vm742_vm0, %v750_v38, %v729_v21  ;;  %v754_v46 = vrot.slane %v732_v37, 5  ;;  %v284_v47 = vcombine.high %v878_v35, %v878_v35 }
  0x28   : > { %v753_v48 = vsel %vm745_vm1, %v752_v39, %v751_v45  ;;  %v275_v49 = vcombine.high %v267_v42, %v267_v42  ;;  %v276_v50 = vcombine.high %v274_v43, %v274_v43  ;;  %v365_v51 = vmax.bf16 %v267_v42, %v243_v26 }
  0x29   : > { %896 = vst.sshfl [vmem:[%s997_s15] sm:$0x3 pattern:$0x76325410] %v768_v44  ;;  %v755_v53 = vsel %vm748_vm2, %v754_v46, %v753_v48  ;;  %v366_v54 = vmax.bf16 %v274_v43, %v250_v30  ;;  %v291_v55 = vrot.slane %v878_v35, %v952_v11  ;;  %v298_v56 = vrot.slane %v284_v47, %v952_v11 }
  0x2a   : > { %v769_v57 = vpack.c.b16 %v755_v53, %v755_v53  ;;  %v367_v58 = vmax.bf16 %v275_v49, %v251_v33  ;;  %v368_v59 = vmax.bf16 %v276_v50, %v252_v41  ;;  %v414_v60 = vshrl.u32 %v365_v51, 16 }
  0x2b   : > { %v419_v61 = vshrl.u32 %v366_v54, 16  ;;  %v299_v62 = vcombine.high %v291_v55, %v291_v55  ;;  %v308_v63 = vcombine.high %v879_v52, %v879_v52  ;;  %v315_v3 = vrot.slane %v879_v52, %v952_v11 }
  0x2c   : > { %897 = vst.sshfl [vmem:[%s997_s15 + $0x2] sm:$0x3 pattern:$0x76325410] %v769_v57  ;;  %v424_v0 = vshrl.u32 %v367_v58, 16  ;;  %v429_v1 = vshrl.u32 %v368_v59, 16  ;;  %v477_v2 = vmax.bf16 %v414_v60, %v365_v51  ;;  %v300_v5 = vcombine.high %v298_v56, %v298_v56 }
  0x2d   : > { %v478_v4 = vmax.bf16 %v419_v61, %v366_v54  ;;  %v322_v6 = vrot.slane %v308_v63, %v952_v11  ;;  %v323_v10 = vcombine.high %v315_v3, %v315_v3  ;;  %v369_v14 = vmax.bf16 %v315_v3, %v291_v55 }
  0x2e   : > { %v479_v7 = vmax.bf16 %v424_v0, %v367_v58  ;;  %v480_v8 = vmax.bf16 %v429_v1, %v368_v59  ;;  %v563_v9 = vrot.slane %v477_v2, %v958_v18 }
  0x2f   : > { %v570_v12 = vrot.slane %v478_v4, %v958_v18  ;;  %v324_v13 = vcombine.high %v322_v6, %v322_v6  ;;  %v370_v15 = vmax.bf16 %v322_v6, %v298_v56  ;;  %v371_v21 = vmax.bf16 %v323_v10, %v299_v62 }
  0x30   : > { %v577_v16 = vrot.slane %v479_v7, %v958_v18  ;;  %v584_v17 = vrot.slane %v480_v8, %v958_v18  ;;  %v675_v20 = vrot.slane %v563_v9, %v960_v19  ;;  %v434_v23 = vshrl.u32 %v369_v14, 16 }
  0x31   : > { %v682_v22 = vrot.slane %v570_v12, %v960_v19  ;;  %v372_v11 = vmax.bf16 %v324_v13, %v300_v5  ;;  %v439_v24 = vshrl.u32 %v370_v15, 16  ;;  %v444_v28 = vshrl.u32 %v371_v21, 16 }
  0x32   : > { %v689_v25 = vrot.slane %v577_v16, %v960_v19  ;;  %v696_v26 = vrot.slane %v584_v17, %v960_v19  ;;  %v733_v27 = vunpack.c.l.b16 %v675_v20  ;;  %v481_v31 = vmax.bf16 %v434_v23, %v369_v14 }
  0x33   : > { %v734_v29 = vunpack.c.l.b16 %v682_v22  ;;  %v449_v30 = vshrl.u32 %v372_v11, 16  ;;  %v482_v32 = vmax.bf16 %v439_v24, %v370_v15  ;;  %v483_v35 = vmax.bf16 %v444_v28, %v371_v21 }
  0x34   : > { %v735_v33 = vunpack.c.l.b16 %v689_v25  ;;  %v736_v34 = vunpack.c.l.b16 %v696_v26  ;;  %v591_v38 = vrot.slane %v481_v31, %v958_v18 }
  0x35   : > { %v756_v36 = vrot.slane %v734_v29, 7  ;;  %v484_v37 = vmax.bf16 %v449_v30, %v372_v11  ;;  %v598_v39 = vrot.slane %v482_v32, %v958_v18  ;;  %v605_v42 = vrot.slane %v483_v35, %v958_v18 }
  0x36   : > { %v758_v40 = vrot.slane %v735_v33, 6  ;;  %v760_v41 = vrot.slane %v736_v34, 5  ;;  %v703_v45 = vrot.slane %v591_v38, %v960_v19 }
  0x37   : > { %v757_v43 = vsel %vm742_vm0, %v756_v36, %v733_v27  ;;  %v612_v44 = vrot.slane %v484_v37, %v958_v18  ;;  %v710_v46 = vrot.slane %v598_v39, %v960_v19  ;;  %v717_v48 = vrot.slane %v605_v42, %v960_v19 }
  0x38   : > { %v759_v47 = vsel %vm745_vm1, %v758_v40, %v757_v43  ;;  %v737_v51 = vunpack.c.l.b16 %v703_v45 }
  0x39   : > { %v761_v49 = vsel %vm748_vm2, %v760_v41, %v759_v47  ;;  %v724_v50 = vrot.slane %v612_v44, %v960_v19  ;;  %v738_v52 = vunpack.c.l.b16 %v710_v46  ;;  %v739_v54 = vunpack.c.l.b16 %v717_v48 }
  0x3a   : > { %v770_v53 = vpack.c.b16 %v761_v49, %v761_v49 }
  0x3b   : > { %v740_v55 = vunpack.c.l.b16 %v724_v50  ;;  %v762_v56 = vrot.slane %v738_v52, 7  ;;  %v764_v18 = vrot.slane %v739_v54, 6 }
  0x3c   : > { %898 = vst.sshfl [vmem:[%s997_s15 + $0x4] sm:$0x3 pattern:$0x76325410] %v770_v53 }
  0x3d   : > { %v763_v57 = vsel %vm742_vm0, %v762_v56, %v737_v51  ;;  %v766_v58 = vrot.slane %v740_v55, 5 }
  0x3e   : > { %v765_v59 = vsel %vm745_vm1, %v764_v18, %v763_v57 }
  0x3f   : > { %v767_v60 = vsel %vm748_vm2, %v766_v58, %v765_v59 }
  0x40   : > { %v771_v61 = vpack.c.b16 %v767_v60, %v767_v60 }
  0x42   : > { %899 = vst.sshfl [vmem:[%s997_s15 + $0x6] sm:$0x3 pattern:$0x76325410] %v771_v61 }
  0x43 PF: > { %s11_s6 = sadd.s32 1, %s921_s6  }
  0x44   : > { %p8_p4 = scmp.ge.s32.totalorder %s11_s6, 4  }
  0x46   :  { %10 = sbr.rel (!%p8_p4) target bundleno = 1 (0x1), region = 54 }

// kernel: vgg_forward.10
= control target key start
LH: loop header
LB: loop body
LE: loop exit
PB: predicated region body
PF: predicated region fallthrough
CT: control target
= control target key end

     0   :  { %s2951_s6 = smov 0   ;;  %s4664_s0 = inlined_call_operand.vmem [shape: bf16[2,16,16,64], index: 0, kind: input, shape index: {}]   ;;  %s4665_s1 = inlined_call_operand.vmem [shape: bf16[2,8,8,64], index: 1, kind: output, shape index: {}]  }
   0x1 LB: > { %s2812_s7 = sadd.s32 4294967295, %s2937_s6   ;;  %p2816_p0 = scmp.ge.s32.totalorder %s2937_s6, 1  ;;  %s2937_s6 = sphi %s2951_s6, %s11_s6  }
   0x2   : > { %p87_p1 = scmp.lt.s32.totalorder %s2937_s6, 3 }
   0x4   : > { %p88_p2 = pnand %p2816_p0, %p87_p1 }
   0x6   : > { %91 = sbr.rel (%p88_p2) target bundleno = 204 (0xcc), region = 24 }
   0xd   : > { %p107_p3 = scmp.lt.s32.totalorder %s2812_s7, 1  ;;  %v192_v0 = vlaneseq  ;;  %v2939_v1 = vmov 1966171168   ;;  %v2940_v3 = vmov 1935823168   ;;  %vm2614_vm0 = vcmask 1041409  }
   0xe   : > { %v190_v2 = vunpack.c.l.s4 %v2939_v1  ;;  %v1654_v4 = vunpack.c.l.s4 %v2940_v3  ;;  %vm2617_vm1 = vcmask 1042434   ;;  %vm2620_vm2 = vcmask 1043459  }
   0xf   : > { %s5054_s7 = smov (!%p107_p3, %s2812_s7), 1  ;;  %v193_v5 = vshrl.u32 %v192_v0, 7  ;;  %vm2623_vm3 = vcmask 1044484   ;;  %vm2626_vm4 = vcmask 1045509   ;;  %vm2629_vm5 = vcmask 1046534  }
  0x10   : > { %v191_v6 = vunpack.c.0.s8 %v190_v2  ;;  %s2919_s8 = sshll.u32 %s5054_s7, 7  ;;  %v1655_v7 = vunpack.c.0.s8 %v1654_v4  ;;  %vm2632_vm6 = vcmask 1047559   ;;  %s2920_s12 = sshll.u32 %s5054_s7, 5  ;;  %vm2748_vm7 = vcmask 519168  }
  0x11   : > { %s2965_s11 = scalar_lea.vmem %s4664_s0, %s2919_s8  ;;  %s116_s15 = scalar_lea.vmem %s4665_s1, %s2920_s12 }
  0x12   : > { %v2967_v8 = vsub.s32 %v191_v6, %v193_v5  ;;  %v2821_v9 = vld.sshfl [vmem:[%s2965_s11] sm:$0x33 pattern:$0x75316420]  ;;  %v2978_v16 = vsub.s32 %v1655_v7, %v193_v5 }
  0x13   : > { %v2822_v10 = vld.sshfl [vmem:[%s2965_s11 + $0x4] sm:$0x33 pattern:$0x75316420]  ;;  %v188_v11 = vcombine.high %v2821_v9, %v2821_v9 }
  0x14   : > { %v2972_v12 = vrot.slane %v2821_v9, %v2967_v8  ;;  %v2823_v13 = vld.sshfl [vmem:[%s2965_s11 + $0x8] sm:$0x33 pattern:$0x75316420]  ;;  %v212_v14 = vcombine.high %v2822_v10, %v2822_v10  ;;  %v2976_v15 = vrot.slane %v2822_v10, %v2967_v8  ;;  %4735 = vst [vmem:[#allocation2_spill] sm:$0xff] %v2978_v16 }
  0x15   : > { %v2824_v17 = vld.sshfl [vmem:[%s2965_s11 + $0xc] sm:$0x33 pattern:$0x75316420]  ;;  %v2982_v18 = vrot.slane %v188_v11, %v2967_v8  ;;  %v236_v20 = vcombine.high %v2823_v13, %v2823_v13  ;;  %v2987_v21 = vrot.slane %v2823_v13, %v2967_v8 }
  0x16   : > { %v2825_v22 = vld.sshfl [vmem:[%s2965_s11 + $0x10] sm:$0x33 pattern:$0x75316420]  ;;  %v2991_v23 = vrot.slane %v212_v14, %v2967_v8  ;;  %v260_v25 = vcombine.high %v2824_v17, %v2824_v17  ;;  %v2996_v26 = vrot.slane %v2824_v17, %v2967_v8 }
  0x17   : > { %v2826_v27 = vld.sshfl [vmem:[%s2965_s11 + $0x14] sm:$0x33 pattern:$0x75316420]  ;;  %v3002_v29 = vrot.slane %v236_v20, %v2967_v8  ;;  %v284_v31 = vcombine.high %v2825_v22, %v2825_v22  ;;  %v3015_v36 = vrot.slane %v2825_v22, %v2967_v8 }
  0x18   : > { %v2827_v32 = vld.sshfl [vmem:[%s2965_s11 + $0x18] sm:$0x33 pattern:$0x75316420]  ;;  %v3010_v34 = vrot.slane %v260_v25, %v2967_v8  ;;  %v308_v40 = vcombine.high %v2826_v27, %v2826_v27  ;;  %v3024_v41 = vrot.slane %v2826_v27, %v2967_v8 }
  0x19   : > { %v2828_v37 = vld.sshfl [vmem:[%s2965_s11 + $0x1c] sm:$0x33 pattern:$0x75316420]  ;;  %v3021_v39 = vrot.slane %v284_v31, %v2967_v8  ;;  %v332_v45 = vcombine.high %v2827_v32, %v2827_v32  ;;  %v3032_v46 = vrot.slane %v2827_v32, %v2967_v8 }
  0x1a   : > { %v2829_v42 = vld.sshfl [vmem:[%s2965_s11 + $0x20] sm:$0x33 pattern:$0x75316420]  ;;  %v3038_v49 = vrot.slane %v308_v40, %v2967_v8  ;;  %v356_v51 = vcombine.high %v2828_v37, %v2828_v37  ;;  %v3049_v55 = vrot.slane %v2828_v37, %v2967_v8 }
  0x1b   : > { %v2830_v47 = vld.sshfl [vmem:[%s2965_s11 + $0x24] sm:$0x33 pattern:$0x75316420]  ;;  %v3044_v53 = vrot.slane %v332_v45, %v2967_v8  ;;  %v380_v56 = vcombine.high %v2829_v42, %v2829_v42  ;;  %v3058_v60 = vrot.slane %v2829_v42, %v2967_v8 }
  0x1c   : > { %v2831_v52 = vld.sshfl [vmem:[%s2965_s11 + $0x28] sm:$0x33 pattern:$0x75316420]  ;;  %v3055_v59 = vrot.slane %v356_v51, %v2967_v8  ;;  %v404_v61 = vcombine.high %v2830_v47, %v2830_v47  ;;  %v3069_v2 = vrot.slane %v2830_v47, %v2967_v8 }
  0x1d   : > { %v2832_v57 = vld.sshfl [vmem:[%s2965_s11 + $0x2c] sm:$0x33 pattern:$0x75316420]  ;;  %v3066_v1 = vrot.slane %v380_v56, %v2967_v8  ;;  %v428_v7 = vcombine.high %v2831_v52, %v2831_v52  ;;  %v3084_v11 = vrot.slane %v2831_v52, %v2967_v8 }
  0x1e   : > { %v2833_v62 = vld.sshfl [vmem:[%s2965_s11 + $0x30] sm:$0x33 pattern:$0x75316420]  ;;  %v3077_v6 = vrot.slane %v404_v61, %v2967_v8  ;;  %v452_v13 = vcombine.high %v2832_v57, %v2832_v57  ;;  %v3093_v22 = vrot.slane %v2832_v57, %v2967_v8 }
  0x1f   : > { %v2834_v3 = vld.sshfl [vmem:[%s2965_s11 + $0x34] sm:$0x33 pattern:$0x75316420]  ;;  %v3090_v20 = vrot.slane %v428_v7, %v2967_v8  ;;  %v476_v25 = vcombine.high %v2833_v62, %v2833_v62  ;;  %v3102_v37 = vrot.slane %v2833_v62, %v2967_v8 }
  0x20   : > { %v2835_v14 = vld.sshfl [vmem:[%s2965_s11 + $0x38] sm:$0x33 pattern:$0x75316420]  ;;  %v3099_v32 = vrot.slane %v452_v13, %v2967_v8  ;;  %v500_v40 = vcombine.high %v2834_v3, %v2834_v3  ;;  %v3113_v52 = vrot.slane %v2834_v3, %v2967_v8 }
  0x21   : > { %v2836_v27 = vld.sshfl [vmem:[%s2965_s11 + $0x3c] sm:$0x33 pattern:$0x75316420]  ;;  %v3110_v51 = vrot.slane %v476_v25, %v2967_v8  ;;  %v524_v7 = vcombine.high %v2835_v14, %v2835_v14  ;;  %v3128_v3 = vrot.slane %v2835_v14, %v2967_v8 }
  0x22   : > { %v2837_v42 = vld.sshfl [vmem:[%s2965_s11 + $0x40] sm:$0x33 pattern:$0x75316420]  ;;  %v3121_v62 = vrot.slane %v500_v40, %v2967_v8  ;;  %v548_v17 = vcombine.high %v2836_v27, %v2836_v27  ;;  %v3137_v47 = vrot.slane %v2836_v27, %v2967_v8 }
  0x23   : > { %v2838_v56 = vld.sshfl [vmem:[%s2965_s11 + $0x44] sm:$0x33 pattern:$0x75316420]  ;;  %v3134_v40 = vrot.slane %v524_v7, %v2967_v8  ;;  %v572_v10 = vcombine.high %v2837_v42, %v2837_v42  ;;  %v3146_v45 = vrot.slane %v2837_v42, %v2967_v8 }
  0x24   : > { %v2839_v57 = vld.sshfl [vmem:[%s2965_s11 + $0x48] sm:$0x33 pattern:$0x75316420]  ;;  %v3143_v14 = vrot.slane %v548_v17, %v2967_v8  ;;  %v596_v9 = vcombine.high %v2838_v56, %v2838_v56  ;;  %v3157_v25 = vrot.slane %v2838_v56, %v2967_v8 }
  0x25   : > { %v2840_v13 = vld.sshfl [vmem:[%s2965_s11 + $0x4c] sm:$0x33 pattern:$0x75316420]  ;;  %v3154_v31 = vrot.slane %v572_v10, %v2967_v8  ;;  %v620_v7 = vcombine.high %v2839_v57, %v2839_v57  ;;  %v3172_v56 = vrot.slane %v2839_v57, %v2967_v8 }
  0x26   : > { %v2841_v61 = vld.sshfl [vmem:[%s2965_s11 + $0x50] sm:$0x33 pattern:$0x75316420]  ;;  %v3165_v4 = vrot.slane %v596_v9, %v2967_v8  ;;  %v644_v58 = vcombine.high %v2840_v13, %v2840_v13  ;;  %v3181_v0 = vrot.slane %v2840_v13, %v2967_v8 }
  0x27   : > { %v2842_v17 = vld.sshfl [vmem:[%s2965_s11 + $0x54] sm:$0x33 pattern:$0x75316420]  ;;  %v3178_v9 = vrot.slane %v620_v7, %v2967_v8  ;;  %v668_v50 = vcombine.high %v2841_v61, %v2841_v61  ;;  %v3190_v63 = vrot.slane %v2841_v61, %v2967_v8 }
  0x28   : > { %v2843_v42 = vld.sshfl [vmem:[%s2965_s11 + $0x58] sm:$0x33 pattern:$0x75316420]  ;;  %v3187_v57 = vrot.slane %v644_v58, %v2967_v8  ;;  %v692_v48 = vcombine.high %v2842_v17, %v2842_v17  ;;  %v3201_v27 = vrot.slane %v2842_v17, %v2967_v8 }
  0x29   : > { %v2844_v10 = vld.sshfl [vmem:[%s2965_s11 + $0x5c] sm:$0x33 pattern:$0x75316420]  ;;  %v3198_v54 = vrot.slane %v668_v50, %v2967_v8  ;;  %v716_v7 = vcombine.high %v2843_v42, %v2843_v42  ;;  %v3216_v17 = vrot.slane %v2843_v42, %v2967_v8 }
  0x2a   : > { %v2845_v5 = vld.sshfl [vmem:[%s2965_s11 + $0x60] sm:$0x33 pattern:$0x75316420]  ;;  %v3209_v43 = vrot.slane %v692_v48, %v2967_v8  ;;  %v740_v33 = vcombine.high %v2844_v10, %v2844_v10  ;;  %v3225_v35 = vrot.slane %v2844_v10, %v2967_v8 }
  0x2b   : > { %v2846_v58 = vld.sshfl [vmem:[%s2965_s11 + $0x64] sm:$0x33 pattern:$0x75316420]  ;;  %v3222_v48 = vrot.slane %v716_v7, %v2967_v8  ;;  %v764_v24 = vcombine.high %v2845_v5, %v2845_v5  ;;  %v3234_v38 = vrot.slane %v2845_v5, %v2967_v8  ;;  %v3323_v5 = vmax.bf16 %v3002_v29, %v2982_v18 }
  0x2c   : > { %4736 = vst [vmem:[#allocation3_spill] sm:$0xff] %v3209_v43  ;;  %v2847_v61 = vld.sshfl [vmem:[%s2965_s11 + $0x68] sm:$0x33 pattern:$0x75316420]  ;;  %4737 = vst [vmem:[#allocation4_spill] sm:$0xff] %v3225_v35  ;;  %v3231_v42 = vrot.slane %v740_v33, %v2967_v8  ;;  %v788_v28 = vcombine.high %v2846_v58, %v2846_v58  ;;  %v3245_v13 = vrot.slane %v2846_v58, %v2967_v8 }
  0x2d   : > { %v2848_v50 = vld.sshfl [vmem:[%s2965_s11 + $0x6c] sm:$0x33 pattern:$0x75316420]  ;;  %4739 = vst [vmem:[#allocation6_spill] sm:$0xff] %v3234_v38  ;;  %v3242_v30 = vrot.slane %v764_v24, %v2967_v8  ;;  %v812_v7 = vcombine.high %v2847_v61, %v2847_v61  ;;  %v3260_v58 = vrot.slane %v2847_v61, %v2967_v8  ;;  %4746 = vst [vmem:[#allocation13_spill] sm:$0xff] %v3323_v5 }
  0x2e   : > { %4738 = vst [vmem:[#allocation5_spill] sm:$0xff] %v3231_v42  ;;  %v2849_v44 = vld.sshfl [vmem:[%s2965_s11 + $0x70] sm:$0x33 pattern:$0x75316420]  ;;  %4741 = vst [vmem:[#allocation8_spill] sm:$0xff] %v3245_v13  ;;  %v3253_v16 = vrot.slane %v788_v28, %v2967_v8  ;;  %v836_v43 = vcombine.high %v2848_v50, %v2848_v50  ;;  %v3269_v28 = vrot.slane %v2848_v50, %v2967_v8 }
  0x2f   : > { %4740 = vst [vmem:[#allocation7_spill] sm:$0xff] %v3242_v30  ;;  %v2850_v33 = vld.sshfl [vmem:[%s2965_s11 + $0x74] sm:$0x33 pattern:$0x75316420]  ;;  %v3266_v19 = vrot.slane %v812_v7, %v2967_v8  ;;  %v860_v38 = vcombine.high %v2849_v44, %v2849_v44  ;;  %v3278_v61 = vrot.slane %v2849_v44, %v2967_v8  ;;  %v3314_v44 = vmax.bf16 %v2987_v21, %v2972_v12 }
  0x30   : > { %4742 = vst [vmem:[#allocation9_spill] sm:$0xff] %v3253_v16  ;;  %v2851_v35 = vld.sshfl [vmem:[%s2965_s11 + $0x78] sm:$0x33 pattern:$0x75316420]  ;;  %v3275_v24 = vrot.slane %v836_v43, %v2967_v8  ;;  %v884_v13 = vcombine.high %v2850_v33, %v2850_v33  ;;  %v3288_v16 = vrot.slane %v2850_v33, %v2967_v8 }
  0x31   : > { %v2852_v42 = vld.sshfl [vmem:[%s2965_s11 + $0x7c] sm:$0x33 pattern:$0x75316420]  ;;  %v3285_v50 = vrot.slane %v860_v38, %v2967_v8  ;;  %v908_v30 = vcombine.high %v2851_v35, %v2851_v35  ;;  %v3302_v7 = vrot.slane %v2851_v35, %v2967_v8  ;;  %4745 = vst [vmem:[#allocation12_spill] sm:$0xff] %v3314_v44 }
  0x32   : > { %4743 = vst [vmem:[#allocation10_spill] sm:$0xff] %v3275_v24  ;;  %v3295_v10 = vrot.slane %v884_v13, %v2967_v8  ;;  %v932_v33 = vcombine.high %v2852_v42, %v2852_v42  ;;  %v3310_v13 = vrot.slane %v2852_v42, %v2967_v8  ;;  %v4748_v42 = vcombine.high %v2987_v21, %v2987_v21 }
  0x33   : > { %v3307_v24 = vrot.slane %v908_v30, %v2967_v8  ;;  %v923_v38 = vcombine.high %v3302_v7, %v3302_v7  ;;  %v4747_v30 = vcombine.high %v2972_v12, %v2972_v12  ;;  %v3347_v12 = vmax.bf16 %v2996_v26, %v2976_v15 }
  0x34   : > { %4744 = vst [vmem:[#allocation11_spill] sm:$0xff] %v3295_v10  ;;  %v3319_v35 = vrot.slane %v932_v33, %v2967_v8  ;;  %v947_v10 = vcombine.high %v3310_v13, %v3310_v13  ;;  %v4749_v8 = vcombine.high %v2982_v18, %v2982_v18  ;;  %v4750_v33 = vcombine.high %v3002_v29, %v3002_v29 }
  0x35   : > { %v3331_v43 = vmax.bf16 %v4748_v42, %v4747_v30  ;;  %v924_v44 = vcombine.high %v3307_v24, %v3307_v24  ;;  %4752 = vst [vmem:[#allocation15_spill] sm:$0xff] %v3347_v12  ;;  %v3353_v30 = vmax.bf16 %v3010_v34, %v2991_v23  ;;  %v4753_v42 = vcombine.high %v2976_v15, %v2976_v15 }
  0x36   : > { %v3343_v5 = vmax.bf16 %v4750_v33, %v4749_v8  ;;  %v948_v21 = vcombine.high %v3319_v35, %v3319_v35  ;;  %v4754_v18 = vcombine.high %v2996_v26, %v2996_v26  ;;  %v4755_v8 = vcombine.high %v2991_v23, %v2991_v23 }
  0x37   : > { %v4756_v33 = vcombine.high %v3010_v34, %v3010_v34  ;;  %v3377_v15 = vmax.bf16 %v3044_v53, %v3021_v39  ;;  %v4757_v26 = vcombine.high %v3015_v36, %v3015_v36  ;;  %v4759_v34 = vcombine.high %v3021_v39, %v3021_v39 }
  0x38   : > { %4751 = vst [vmem:[#allocation14_spill] sm:$0xff] %v3343_v5  ;;  %v3361_v29 = vmax.bf16 %v4754_v18, %v4753_v42  ;;  %v3373_v5 = vmax.bf16 %v3032_v46, %v3015_v36  ;;  %v4758_v42 = vcombine.high %v3032_v46, %v3032_v46  ;;  %v4760_v18 = vcombine.high %v3044_v53, %v3044_v53 }
  0x39   : > { %v3369_v12 = vmax.bf16 %v4756_v33, %v4755_v8  ;;  %v3397_v33 = vmax.bf16 %v3049_v55, %v3024_v41  ;;  %v3401_v36 = vmax.bf16 %v3055_v59, %v3038_v49  ;;  %v4761_v46 = vcombine.high %v3024_v41, %v3024_v41 }
  0x3a   : > { %v3385_v23 = vmax.bf16 %v4758_v42, %v4757_v26  ;;  %v3393_v8 = vmax.bf16 %v4760_v18, %v4759_v34  ;;  %v4762_v26 = vcombine.high %v3049_v55, %v3049_v55  ;;  %v4763_v53 = vcombine.high %v3038_v49, %v3038_v49 }
  0x3b   : > { %v4764_v42 = vcombine.high %v3055_v59, %v3055_v59  ;;  %v3421_v18 = vmax.bf16 %v3084_v11, %v3058_v60  ;;  %v3425_v41 = vmax.bf16 %v3090_v20, %v3066_v1  ;;  %v4765_v55 = vcombine.high %v3058_v60, %v3058_v60 }
  0x3c   : > { %v3409_v39 = vmax.bf16 %v4762_v26, %v4761_v46  ;;  %v4766_v46 = vcombine.high %v3084_v11, %v3084_v11  ;;  %v4767_v59 = vcombine.high %v3066_v1, %v3066_v1  ;;  %v4768_v26 = vcombine.high %v3090_v20, %v3090_v20 }
  0x3d   : > { %v3417_v34 = vmax.bf16 %v4764_v42, %v4763_v53  ;;  %v3445_v42 = vmax.bf16 %v3093_v22, %v3069_v2  ;;  %v3449_v60 = vmax.bf16 %v3099_v32, %v3077_v6  ;;  %v4769_v11 = vcombine.high %v3069_v2, %v3069_v2 }
  0x3e   : > { %v3433_v49 = vmax.bf16 %v4766_v46, %v4765_v55  ;;  %v3441_v53 = vmax.bf16 %v4768_v26, %v4767_v59  ;;  %v4770_v55 = vcombine.high %v3093_v22, %v3093_v22  ;;  %v4771_v20 = vcombine.high %v3077_v6, %v3077_v6 }
  0x3f   : > { %v4772_v46 = vcombine.high %v3099_v32, %v3099_v32  ;;  %v3469_v26 = vmax.bf16 %v3128_v3, %v3102_v37  ;;  %v3473_v2 = vmax.bf16 %v3134_v40, %v3110_v51  ;;  %v4773_v22 = vcombine.high %v3102_v37, %v3102_v37 }
  0x40   : > { %v3457_v1 = vmax.bf16 %v4770_v55, %v4769_v11  ;;  %v4774_v11 = vcombine.high %v3128_v3, %v3128_v3  ;;  %v4775_v32 = vcombine.high %v3110_v51, %v3110_v51  ;;  %v4776_v55 = vcombine.high %v3134_v40, %v3134_v40 }
  0x41   : > { %v3465_v59 = vmax.bf16 %v4772_v46, %v4771_v20  ;;  %v3493_v46 = vmax.bf16 %v3137_v47, %v3113_v52  ;;  %v3497_v37 = vmax.bf16 %v3143_v14, %v3121_v62  ;;  %v4777_v3 = vcombine.high %v3113_v52, %v3113_v52 }
  0x42   : > { %v3481_v6 = vmax.bf16 %v4774_v11, %v4773_v22  ;;  %v3489_v20 = vmax.bf16 %v4776_v55, %v4775_v32  ;;  %v4778_v22 = vcombine.high %v3137_v47, %v3137_v47  ;;  %v4780_v40 = vcombine.high %v3121_v62, %v3121_v62 }
  0x43   : > { %v4781_v11 = vcombine.high %v3143_v14, %v3143_v14  ;;  %v3517_v55 = vmax.bf16 %v3172_v56, %v3146_v45  ;;  %v3521_v52 = vmax.bf16 %v3178_v9, %v3154_v31  ;;  %v4783_v47 = vcombine.high %v3146_v45, %v3146_v45 }
  0x44   : > { %v3505_v51 = vmax.bf16 %v4778_v22, %v4777_v3  ;;  %v4784_v3 = vcombine.high %v3172_v56, %v3172_v56  ;;  %v4786_v14 = vcombine.high %v3154_v31, %v3154_v31  ;;  %v4787_v22 = vcombine.high %v3178_v9, %v3178_v9 }
  0x45   : > { %v3513_v32 = vmax.bf16 %v4781_v11, %v4780_v40  ;;  %4782 = vst [vmem:[#allocation17_spill] sm:$0xff] %v3521_v52  ;;  %v3541_v11 = vmax.bf16 %v3181_v0, %v3157_v25  ;;  %v3545_v45 = vmax.bf16 %v3187_v57, %v3165_v4  ;;  %v4790_v56 = vcombine.high %v3157_v25, %v3157_v25 }
  0x46   : > { %4779 = vst [vmem:[#allocation16_spill] sm:$0xff] %v3505_v51  ;;  %v3529_v62 = vmax.bf16 %v4784_v3, %v4783_v47  ;;  %v3537_v40 = vmax.bf16 %v4787_v22, %v4786_v14  ;;  %v4791_v47 = vcombine.high %v3181_v0, %v3181_v0  ;;  %v4793_v9 = vcombine.high %v3165_v4, %v3165_v4 }
  0x47   : > { %4788 = vst [vmem:[#allocation19_spill] sm:$0xff] %v3541_v11  ;;  %4789 = vst [vmem:[#allocation20_spill] sm:$0xff] %v3545_v45  ;;  %v4794_v3 = vcombine.high %v3187_v57, %v3187_v57  ;;  %v3565_v22 = vmax.bf16 %v3216_v17, %v3190_v63  ;;  %v3569_v25 = vmax.bf16 %v3222_v48, %v3198_v54 }
  0x48   : > { %4785 = vst [vmem:[#allocation18_spill] sm:$0xff] %v3529_v62  ;;  %v3553_v31 = vmax.bf16 %v4791_v47, %v4790_v56  ;;  %v4798_v0 = vcombine.high %v3190_v63, %v3190_v63  ;;  %v4799_v56 = vcombine.high %v3216_v17, %v3216_v17  ;;  %v4800_v57 = vcombine.high %v3198_v54, %v3198_v54 }
  0x49   : > { %v3561_v14 = vmax.bf16 %v4794_v3, %v4793_v9  ;;  %4796 = vst [vmem:[#allocation23_spill] sm:$0xff] %v3565_v22  ;;  %4797 = vst [vmem:[#allocation24_spill] sm:$0xff] %v3569_v25  ;;  %v4801_v47 = vcombine.high %v3222_v48, %v3222_v48  ;;  %v4802_v3 = vld [vmem:[#allocation4_spill] sm:$0xff]  ;;  %v4804_v25 = vld [vmem:[#allocation3_spill] sm:$0xff]  ;;  %v4807_v17 = vcombine.high %v3201_v27, %v3201_v27 }
  0x4a   : > { %4792 = vst [vmem:[#allocation21_spill] sm:$0xff] %v3553_v31  ;;  %v3577_v4 = vmax.bf16 %v4799_v56, %v4798_v0  ;;  %v3589_v22 = vmax.bf16 %v4802_v3, %v3201_v27  ;;  %v4808_v0 = vcombine.high %v4802_v3, %v4802_v3  ;;  %v4809_v48 = vcombine.high %v4804_v25, %v4804_v25 }
  0x4b   : > { %4795 = vst [vmem:[#allocation22_spill] sm:$0xff] %v3561_v14  ;;  %v3585_v9 = vmax.bf16 %v4801_v47, %v4800_v57  ;;  %v4805_v14 = vld [vmem:[#allocation5_spill] sm:$0xff]  ;;  %v4812_v47 = vld [vmem:[#allocation6_spill] sm:$0xff] }
  0x4c   : > { %4803 = vst [vmem:[#allocation4_spill] sm:$0xff] %v3589_v22  ;;  %v3593_v63 = vmax.bf16 %v4805_v14, %v4804_v25  ;;  %v3601_v54 = vmax.bf16 %v4808_v0, %v4807_v17  ;;  %v4810_v56 = vcombine.high %v4805_v14, %v4805_v14  ;;  %v3613_v22 = vmax.bf16 %v3260_v58, %v4812_v47 }
  0x4d   : > { %v4816_v3 = vcombine.high %v4812_v47, %v4812_v47  ;;  %v4817_v17 = vcombine.high %v3260_v58, %v3260_v58  ;;  %v4820_v0 = vcombine.high %v3266_v19, %v3266_v19 }
  0x4e   : > { %4806 = vst [vmem:[#allocation3_spill] sm:$0xff] %v3593_v63  ;;  %v3609_v57 = vmax.bf16 %v4810_v56, %v4809_v48  ;;  %4813 = vst [vmem:[#allocation6_spill] sm:$0xff] %v3613_v22  ;;  %v4814_v63 = vld [vmem:[#allocation7_spill] sm:$0xff]  ;;  %v4821_v56 = vld [vmem:[#allocation8_spill] sm:$0xff] }
  0x4f   : > { %v3617_v27 = vmax.bf16 %v3266_v19, %v4814_v63  ;;  %v3625_v25 = vmax.bf16 %v4817_v17, %v4816_v3  ;;  %v4819_v14 = vcombine.high %v4814_v63, %v4814_v63  ;;  %v3637_v22 = vmax.bf16 %v3269_v28, %v4821_v56 }
  0x50   : > { %4811 = vst [vmem:[#allocation5_spill] sm:$0xff] %v3609_v57  ;;  %v4823_v57 = vld [vmem:[#allocation10_spill] sm:$0xff]  ;;  %v4824_v58 = vcombine.high %v4821_v56, %v4821_v56  ;;  %v4825_v3 = vcombine.high %v3269_v28, %v3269_v28  ;;  %v3665_v56 = vmax.bf16 %v3307_v24, %v3285_v50  ;;  %v4828_v28 = vcombine.high %v3278_v61, %v3278_v61  ;;  %v4843_v51 = vld [vmem:[#allocation24_spill] sm:$0xff] }
  0x51   : > { %4815 = vst [vmem:[#allocation7_spill] sm:$0xff] %v3617_v27  ;;  %4818 = vst [vmem:[#allocation25_spill] sm:$0xff] %v3625_v25  ;;  %v3633_v48 = vmax.bf16 %v4820_v0, %v4819_v14  ;;  %v4822_v27 = vld [vmem:[#allocation9_spill] sm:$0xff]  ;;  %v4827_v17 = vcombine.high %v4823_v57, %v4823_v57  ;;  %v3661_v0 = vmax.bf16 %v3302_v7, %v3278_v61  ;;  %v4833_v7 = vld [vmem:[#allocation11_spill] sm:$0xff] }
  0x52   : > { %v3641_v47 = vmax.bf16 %v4823_v57, %v4822_v27  ;;  %v3649_v63 = vmax.bf16 %v4825_v3, %v4824_v58  ;;  %v4826_v19 = vcombine.high %v4822_v27, %v4822_v27  ;;  %v3670_v58 = vmax.bf16 %v923_v38, %v4828_v28  ;;  %v4838_v28 = vld [vmem:[#allocation13_spill] sm:$0xff] }
  0x53   : > { %v4830_v27 = vcombine.high %v3285_v50, %v3285_v50  ;;  %v3679_v57 = vmax.bf16 %v3310_v13, %v3288_v16  ;;  %v4835_v24 = vcombine.high %v3288_v16, %v3288_v16  ;;  %v4836_v61 = vcombine.high %v4833_v7, %v4833_v7  ;;  %v4837_v50 = vld [vmem:[#allocation12_spill] sm:$0xff] }
  0x54   : > { %v3657_v14 = vmax.bf16 %v4827_v17, %v4826_v19  ;;  %4829 = vst [vmem:[#allocation8_spill] sm:$0xff] %v3670_v58  ;;  %v3683_v19 = vmax.bf16 %v3319_v35, %v4833_v7  ;;  %v4840_v35 = vld [vmem:[#allocation15_spill] sm:$0xff]  ;;  %v4844_v52 = vld [vmem:[#allocation4_spill] sm:$0xff]  ;;  %v4849_v11 = vmov %v3670_v58 }
  0x55   : > { %v3675_v3 = vmax.bf16 %v924_v44, %v4830_v27  ;;  %4832 = vst [vmem:[#allocation10_spill] sm:$0xff] %v3679_v57  ;;  %v3688_v17 = vmax.bf16 %v947_v10, %v4835_v24  ;;  %v3693_v38 = vmax.bf16 %v948_v21, %v4836_v61  ;;  %v4839_v57 = vld [vmem:[#allocation14_spill] sm:$0xff]  ;;  %v4842_v44 = vld [vmem:[#allocation23_spill] sm:$0xff]  ;;  %v4854_v10 = vshrl.u32 %v4838_v28, 16 }
  0x56   : > { %4834 = vst [vmem:[#allocation11_spill] sm:$0xff] %v3683_v19  ;;  %v4841_v27 = vld [vmem:[#allocation22_spill] sm:$0xff]  ;;  %v4845_v62 = vld [vmem:[#allocation3_spill] sm:$0xff]  ;;  %v4852_v25 = vmov %v3683_v19  ;;  %v4853_v19 = vshrl.u32 %v4837_v50, 16  ;;  %v4855_v21 = vshrl.u32 %v3331_v43, 16  ;;  %v4856_v13 = vshrl.u32 %v4839_v57, 16 }
  0x57   : > { %4831 = vst [vmem:[#allocation9_spill] sm:$0xff] %v3675_v3  ;;  %v4850_v45 = vmov %v3675_v3  ;;  %v3767_v16 = vmax.bf16 %v4854_v10, %v4838_v28  ;;  %v4857_v3 = vshrl.u32 %v4840_v35, 16  ;;  %v4859_v10 = vshrl.u32 %v3361_v29, 16 }
  0x58   : > { %v3762_v58 = vmax.bf16 %v4853_v19, %v4837_v50  ;;  %v3772_v24 = vmax.bf16 %v4855_v21, %v3331_v43  ;;  %v3777_v61 = vmax.bf16 %v4856_v13, %v4839_v57  ;;  %v4858_v50 = vshrl.u32 %v3353_v30, 16 }
  0x59   : > { %v3782_v19 = vmax.bf16 %v4857_v3, %v4840_v35  ;;  %v3792_v43 = vmax.bf16 %v4859_v10, %v3361_v29  ;;  %v4860_v21 = vshrl.u32 %v3369_v12, 16  ;;  %v4861_v13 = vshrl.u32 %v3373_v5, 16 }
  0x5a   : > { %v3787_v28 = vmax.bf16 %v4858_v50, %v3353_v30  ;;  %v4862_v35 = vshrl.u32 %v3377_v15, 16  ;;  %v4863_v50 = vshrl.u32 %v3385_v23, 16  ;;  %v4864_v10 = vshrl.u32 %v3393_v8, 16 }
  0x5b   : > { %v3797_v57 = vmax.bf16 %v4860_v21, %v3369_v12  ;;  %v3802_v3 = vmax.bf16 %v4861_v13, %v3373_v5  ;;  %v4865_v21 = vshrl.u32 %v3397_v33, 16  ;;  %v4866_v13 = vshrl.u32 %v3401_v36, 16 }
  0x5c   : > { %v4851_v31 = vld [vmem:[#allocation10_spill] sm:$0xff]  ;;  %v3807_v30 = vmax.bf16 %v4862_v35, %v3377_v15  ;;  %v3812_v29 = vmax.bf16 %v4863_v50, %v3385_v23  ;;  %v3817_v12 = vmax.bf16 %v4864_v10, %v3393_v8  ;;  %v4867_v35 = vshrl.u32 %v3409_v39, 16 }
  0x5d   : > { %v3822_v5 = vmax.bf16 %v4865_v21, %v3397_v33  ;;  %v3827_v15 = vmax.bf16 %v4866_v13, %v3401_v36  ;;  %v4868_v50 = vshrl.u32 %v3417_v34, 16  ;;  %v4869_v10 = vshrl.u32 %v3421_v18, 16 }
  0x5e   : > { %v3832_v23 = vmax.bf16 %v4867_v35, %v3409_v39  ;;  %v4870_v21 = vshrl.u32 %v3425_v41, 16  ;;  %v4871_v13 = vshrl.u32 %v3433_v49, 16  ;;  %v4872_v35 = vshrl.u32 %v3441_v53, 16 }
  0x5f   : > { %v3837_v8 = vmax.bf16 %v4868_v50, %v3417_v34  ;;  %v3842_v33 = vmax.bf16 %v4869_v10, %v3421_v18  ;;  %v4873_v50 = vshrl.u32 %v3445_v42, 16  ;;  %v4874_v10 = vshrl.u32 %v3449_v60, 16 }
  0x60   : > { %v3847_v36 = vmax.bf16 %v4870_v21, %v3425_v41  ;;  %v3852_v39 = vmax.bf16 %v4871_v13, %v3433_v49  ;;  %v3857_v34 = vmax.bf16 %v4872_v35, %v3441_v53  ;;  %v4875_v21 = vshrl.u32 %v3457_v1, 16 }
  0x61   : > { %v3862_v18 = vmax.bf16 %v4873_v50, %v3445_v42  ;;  %v3867_v41 = vmax.bf16 %v4874_v10, %v3449_v60  ;;  %v4876_v13 = vshrl.u32 %v3465_v59, 16  ;;  %v4877_v35 = vshrl.u32 %v3469_v26, 16 }
  0x62   : > { %v3872_v49 = vmax.bf16 %v4875_v21, %v3457_v1  ;;  %v4878_v50 = vshrl.u32 %v3473_v2, 16  ;;  %v4879_v10 = vshrl.u32 %v3481_v6, 16  ;;  %v4880_v21 = vshrl.u32 %v3489_v20, 16 }
  0x63   : > { %v3877_v53 = vmax.bf16 %v4876_v13, %v3465_v59  ;;  %v3882_v42 = vmax.bf16 %v4877_v35, %v3469_v26  ;;  %v4881_v13 = vshrl.u32 %v3493_v46, 16  ;;  %v4883_v35 = vshrl.u32 %v3497_v37, 16 }
  0x64   : > { %v3887_v60 = vmax.bf16 %v4878_v50, %v3473_v2  ;;  %v3892_v1 = vmax.bf16 %v4879_v10, %v3481_v6  ;;  %v3897_v59 = vmax.bf16 %v4880_v21, %v3489_v20  ;;  %v4885_v50 = vld [vmem:[#allocation16_spill] sm:$0xff]  ;;  %v4887_v10 = vshrl.u32 %v3513_v32, 16 }
  0x65   : > { %v3902_v26 = vmax.bf16 %v4881_v13, %v3493_v46  ;;  %v3907_v2 = vmax.bf16 %v4883_v35, %v3497_v37  ;;  %v4886_v7 = vshrl.u32 %v4885_v50, 16  ;;  %v4889_v21 = vshrl.u32 %v3517_v55, 16  ;;  %v4891_v13 = vld [vmem:[#allocation17_spill] sm:$0xff]  ;;  %v4894_v35 = vld [vmem:[#allocation18_spill] sm:$0xff] }
  0x66   : > { %v3917_v20 = vmax.bf16 %v4887_v10, %v3513_v32  ;;  %v4897_v10 = vld [vmem:[#allocation19_spill] sm:$0xff] }
  0x67   : > { %4882 = vst [vmem:[#allocation12_spill] sm:$0xff] %v3902_v26  ;;  %4884 = vst [vmem:[#allocation13_spill] sm:$0xff] %v3907_v2  ;;  %v3912_v6 = vmax.bf16 %v4886_v7, %v4885_v50  ;;  %v3922_v46 = vmax.bf16 %v4889_v21, %v3517_v55  ;;  %v4892_v26 = vshrl.u32 %v4891_v13, 16  ;;  %v4895_v2 = vshrl.u32 %v4894_v35, 16  ;;  %v4899_v21 = vld [vmem:[#allocation20_spill] sm:$0xff] }
  0x68   : > { %4888 = vst [vmem:[#allocation14_spill] sm:$0xff] %v3917_v20  ;;  %v4896_v50 = vshrl.u32 %v3537_v40, 16  ;;  %v4898_v20 = vshrl.u32 %v4897_v10, 16 }
  0x69   : > { %4890 = vst [vmem:[#allocation15_spill] sm:$0xff] %v3922_v46  ;;  %v3927_v37 = vmax.bf16 %v4892_v26, %v4891_v13  ;;  %v3932_v7 = vmax.bf16 %v4895_v2, %v4894_v35  ;;  %v4900_v46 = vshrl.u32 %v4899_v21, 16  ;;  %v4901_v13 = vld [vmem:[#allocation21_spill] sm:$0xff]  ;;  %v4903_v35 = vshrl.u32 %v4841_v27, 16 }
  0x6a   : > { %v3937_v32 = vmax.bf16 %v4896_v50, %v3537_v40  ;;  %v3942_v55 = vmax.bf16 %v4898_v20, %v4897_v10  ;;  %v4904_v50 = vshrl.u32 %v4842_v44, 16  ;;  %v4905_v10 = vshrl.u32 %v4843_v51, 16 }
  0x6b   : > { %4893 = vst [vmem:[#allocation22_spill] sm:$0xff] %v3927_v37  ;;  %v3947_v26 = vmax.bf16 %v4900_v46, %v4899_v21  ;;  %v4902_v37 = vshrl.u32 %v4901_v13, 16  ;;  %v3957_v40 = vmax.bf16 %v4903_v35, %v4841_v27  ;;  %v4906_v21 = vshrl.u32 %v3577_v4, 16 }
  0x6c   : > { %v3962_v20 = vmax.bf16 %v4904_v50, %v4842_v44  ;;  %v3967_v46 = vmax.bf16 %v4905_v10, %v4843_v51  ;;  %v4910_v35 = vshrl.u32 %v4844_v52, 16  ;;  %v4912_v50 = vshrl.u32 %v4845_v62, 16 }
  0x6d   : > { %v3952_v2 = vmax.bf16 %v4902_v37, %v4901_v13  ;;  %v3972_v37 = vmax.bf16 %v4906_v21, %v3577_v4  ;;  %v4908_v13 = vshrl.u32 %v3585_v9, 16  ;;  %v4914_v10 = vshrl.u32 %v3601_v54, 16  ;;  %v4915_v21 = vld [vmem:[#allocation5_spill] sm:$0xff] }
  0x6e   : > { %v3982_v44 = vmax.bf16 %v4910_v35, %v4844_v52  ;;  %v3987_v51 = vmax.bf16 %v4912_v50, %v4845_v62  ;;  %v4919_v35 = vld [vmem:[#allocation7_spill] sm:$0xff]  ;;  %v4921_v50 = vld [vmem:[#allocation25_spill] sm:$0xff] }
  0x6f   : > { %4907 = vst [vmem:[#allocation23_spill] sm:$0xff] %v3972_v37  ;;  %v3977_v27 = vmax.bf16 %v4908_v13, %v3585_v9  ;;  %v3992_v4 = vmax.bf16 %v4914_v10, %v3601_v54  ;;  %v4916_v37 = vshrl.u32 %v4915_v21, 16  ;;  %v4917_v13 = vld [vmem:[#allocation6_spill] sm:$0xff]  ;;  %v4923_v10 = vshrl.u32 %v3633_v48, 16 }
  0x70   : > { %4911 = vst [vmem:[#allocation4_spill] sm:$0xff] %v3982_v44  ;;  %4913 = vst [vmem:[#allocation3_spill] sm:$0xff] %v3987_v51  ;;  %v4920_v44 = vshrl.u32 %v4919_v35, 16  ;;  %v4922_v51 = vshrl.u32 %v4921_v50, 16 }
  0x71   : > { %4909 = vst [vmem:[#allocation24_spill] sm:$0xff] %v3977_v27  ;;  %v3997_v9 = vmax.bf16 %v4916_v37, %v4915_v21  ;;  %v4918_v27 = vshrl.u32 %v4917_v13, 16  ;;  %v4017_v37 = vmax.bf16 %v4923_v10, %v3633_v48  ;;  %v4924_v21 = vshrl.u32 %v3637_v22, 16 }
  0x72   : > { %v4007_v62 = vmax.bf16 %v4920_v44, %v4919_v35  ;;  %v4012_v54 = vmax.bf16 %v4922_v51, %v4921_v50  ;;  %v4926_v35 = vshrl.u32 %v3649_v63, 16  ;;  %v4927_v50 = vshrl.u32 %v3657_v14, 16 }
  0x73   : > { %v4002_v52 = vmax.bf16 %v4918_v27, %v4917_v13  ;;  %v4022_v27 = vmax.bf16 %v4924_v21, %v3637_v22  ;;  %v4925_v13 = vshrl.u32 %v3641_v47, 16  ;;  %v4928_v10 = vshrl.u32 %v3661_v0, 16 }
  0x74   : > { %v4032_v51 = vmax.bf16 %v4926_v35, %v3649_v63  ;;  %v4037_v48 = vmax.bf16 %v4927_v50, %v3657_v14  ;;  %v4929_v21 = vshrl.u32 %v3665_v56, 16  ;;  %v4931_v35 = vshrl.u32 %v4850_v45, 16 }
  0x75   : > { %v4027_v44 = vmax.bf16 %v4925_v13, %v3641_v47  ;;  %v4042_v22 = vmax.bf16 %v4928_v10, %v3661_v0  ;;  %v4930_v13 = vshrl.u32 %v4849_v11, 16  ;;  %v4933_v50 = vshrl.u32 %v4851_v31, 16 }
  0x76   : > { %v4047_v47 = vmax.bf16 %v4929_v21, %v3665_v56  ;;  %v4057_v14 = vmax.bf16 %v4931_v35, %v4850_v45  ;;  %v4934_v10 = vshrl.u32 %v4852_v25, 16  ;;  %v4935_v21 = vshrl.u32 %v3688_v17, 16  ;;  %v4937_v35 = vld [vmem:[#allocation2_spill] sm:$0xff] }
  0x77   : > { %v4052_v63 = vmax.bf16 %v4930_v13, %v4849_v11  ;;  %v4062_v0 = vmax.bf16 %v4933_v50, %v4851_v31  ;;  %v4936_v13 = vshrl.u32 %v3693_v38, 16  ;;  %v1673_v31 = vrot.slane %v3767_v16, %v4937_v35 }
  0x78   : > { %4932 = vst [vmem:[#allocation8_spill] sm:$0xff] %v4057_v14  ;;  %v4067_v56 = vmax.bf16 %v4934_v10, %v4852_v25  ;;  %v4072_v11 = vmax.bf16 %v4935_v21, %v3688_v17  ;;  %v1659_v14 = vrot.slane %v3762_v58, %v4937_v35  ;;  %v1687_v25 = vrot.slane %v3772_v24, %v4937_v35 }
  0x79   : > { %v4077_v45 = vmax.bf16 %v4936_v13, %v3693_v38  ;;  %v1701_v50 = vrot.slane %v3777_v61, %v4937_v35  ;;  %v1715_v17 = vrot.slane %v3782_v19, %v4937_v35  ;;  %v1729_v10 = vrot.slane %v3787_v28, %v4937_v35 }
  0x7a   : > { %v1743_v38 = vrot.slane %v3792_v43, %v4937_v35  ;;  %v1757_v58 = vrot.slane %v3797_v57, %v4937_v35  ;;  %v4096_v16 = vrot.slane %v1659_v14, %v4937_v35  ;;  %v4099_v24 = vrot.slane %v1673_v31, %v4937_v35 }
  0x7b   : > { %v4102_v61 = vrot.slane %v1687_v25, %v4937_v35  ;;  %v4105_v19 = vrot.slane %v1701_v50, %v4937_v35  ;;  %v4108_v28 = vrot.slane %v1715_v17, %v4937_v35  ;;  %v4111_v43 = vrot.slane %v1729_v10, %v4937_v35 }
  0x7c   : > { %v4114_v57 = vrot.slane %v1743_v38, %v4937_v35  ;;  %v4117_v14 = vrot.slane %v1757_v58, %v4937_v35  ;;  %v1771_v21 = vrot.slane %v3802_v3, %v4937_v35  ;;  %v1785_v13 = vrot.slane %v3807_v30, %v4937_v35 }
  0x7d   : > { %v1799_v31 = vrot.slane %v3812_v29, %v4937_v35  ;;  %v1813_v25 = vrot.slane %v3817_v12, %v4937_v35  ;;  %v1827_v50 = vrot.slane %v3822_v5, %v4937_v35  ;;  %v1841_v17 = vrot.slane %v3827_v15, %v4937_v35 }
  0x7e   : > { %v1855_v10 = vrot.slane %v3832_v23, %v4937_v35  ;;  %v1869_v3 = vrot.slane %v3837_v8, %v4937_v35  ;;  %v4136_v30 = vrot.slane %v1771_v21, %v4937_v35  ;;  %v4139_v29 = vrot.slane %v1785_v13, %v4937_v35 }
  0x7f   : > { %v4142_v12 = vrot.slane %v1799_v31, %v4937_v35  ;;  %v4145_v5 = vrot.slane %v1813_v25, %v4937_v35  ;;  %v4148_v15 = vrot.slane %v1827_v50, %v4937_v35  ;;  %v4151_v23 = vrot.slane %v1841_v17, %v4937_v35 }
  0x80   : > { %4938 = vst [vmem:[#allocation9_spill] sm:$0xff] %v4136_v30  ;;  %v4154_v8 = vrot.slane %v1855_v10, %v4937_v35  ;;  %v4157_v38 = vrot.slane %v1869_v3, %v4937_v35  ;;  %v1883_v58 = vrot.slane %v3842_v33, %v4937_v35  ;;  %v1897_v21 = vrot.slane %v3847_v36, %v4937_v35 }
  0x81   : > { %v1911_v13 = vrot.slane %v3852_v39, %v4937_v35  ;;  %v1925_v31 = vrot.slane %v3857_v34, %v4937_v35  ;;  %v1939_v25 = vrot.slane %v3862_v18, %v4937_v35  ;;  %v1953_v50 = vrot.slane %v3867_v41, %v4937_v35 }
  0x82   : > { %4939 = vst [vmem:[#allocation10_spill] sm:$0xff] %v4157_v38  ;;  %v1967_v17 = vrot.slane %v3872_v49, %v4937_v35  ;;  %v1981_v33 = vrot.slane %v3877_v53, %v4937_v35  ;;  %v4176_v36 = vrot.slane %v1883_v58, %v4937_v35  ;;  %v4179_v39 = vrot.slane %v1897_v21, %v4937_v35 }
  0x83   : > { %v4182_v34 = vrot.slane %v1911_v13, %v4937_v35  ;;  %v4185_v18 = vrot.slane %v1925_v31, %v4937_v35  ;;  %v4188_v41 = vrot.slane %v1939_v25, %v4937_v35  ;;  %v4191_v49 = vrot.slane %v1953_v50, %v4937_v35  ;;  %v4941_v31 = vld [vmem:[#allocation12_spill] sm:$0xff]  ;;  %v4942_v50 = vld [vmem:[#allocation13_spill] sm:$0xff] }
  0x84   : > { %v4194_v53 = vrot.slane %v1967_v17, %v4937_v35  ;;  %v4197_v10 = vrot.slane %v1981_v33, %v4937_v35  ;;  %v1995_v3 = vrot.slane %v3882_v42, %v4937_v35  ;;  %v2009_v58 = vrot.slane %v3887_v60, %v4937_v35  ;;  %v4943_v42 = vld [vmem:[#allocation14_spill] sm:$0xff] }
  0x85   : > { %v2023_v21 = vrot.slane %v3892_v1, %v4937_v35  ;;  %v2037_v13 = vrot.slane %v3897_v59, %v4937_v35  ;;  %v2051_v25 = vrot.slane %v4941_v31, %v4937_v35  ;;  %v2065_v17 = vrot.slane %v4942_v50, %v4937_v35 }
  0x86   : > { %4940 = vst [vmem:[#allocation11_spill] sm:$0xff] %v4197_v10  ;;  %v2079_v33 = vrot.slane %v3912_v6, %v4937_v35  ;;  %v2093_v10 = vrot.slane %v4943_v42, %v4937_v35  ;;  %v4216_v60 = vrot.slane %v1995_v3, %v4937_v35  ;;  %v4219_v1 = vrot.slane %v2009_v58, %v4937_v35  ;;  %v4948_v58 = vld [vmem:[#allocation15_spill] sm:$0xff] }
  0x87   : > { %v4222_v59 = vrot.slane %v2023_v21, %v4937_v35  ;;  %v4225_v31 = vrot.slane %v2037_v13, %v4937_v35  ;;  %v4228_v50 = vrot.slane %v2051_v25, %v4937_v35  ;;  %v4231_v6 = vrot.slane %v2065_v17, %v4937_v35  ;;  %v4949_v21 = vld [vmem:[#allocation22_spill] sm:$0xff] }
  0x88   : > { %4944 = vst [vmem:[#allocation16_spill] sm:$0xff] %v4216_v60  ;;  %4945 = vst [vmem:[#allocation17_spill] sm:$0xff] %v4219_v1  ;;  %v4234_v42 = vrot.slane %v2079_v33, %v4937_v35  ;;  %v4237_v3 = vrot.slane %v2093_v10, %v4937_v35  ;;  %v2107_v1 = vrot.slane %v4948_v58, %v4937_v35 }
  0x89   : > { %4946 = vst [vmem:[#allocation18_spill] sm:$0xff] %v4222_v59  ;;  %4947 = vst [vmem:[#allocation19_spill] sm:$0xff] %v4225_v31  ;;  %v2121_v59 = vrot.slane %v4949_v21, %v4937_v35  ;;  %v2135_v13 = vrot.slane %v3932_v7, %v4937_v35  ;;  %v2149_v25 = vrot.slane %v3937_v32, %v4937_v35 }
  0x8a   : > { %v2163_v17 = vrot.slane %v3942_v55, %v4937_v35  ;;  %v2177_v33 = vrot.slane %v3947_v26, %v4937_v35  ;;  %v2191_v10 = vrot.slane %v3952_v2, %v4937_v35  ;;  %v2205_v58 = vrot.slane %v3957_v40, %v4937_v35 }
  0x8b   : > { %v4256_v21 = vrot.slane %v2107_v1, %v4937_v35  ;;  %v4259_v7 = vrot.slane %v2121_v59, %v4937_v35  ;;  %v4262_v32 = vrot.slane %v2135_v13, %v4937_v35  ;;  %v4265_v55 = vrot.slane %v2149_v25, %v4937_v35  ;;  %v4954_v25 = vld [vmem:[#allocation23_spill] sm:$0xff] }
  0x8c   : > { %v4268_v26 = vrot.slane %v2163_v17, %v4937_v35  ;;  %v4271_v2 = vrot.slane %v2177_v33, %v4937_v35  ;;  %v4274_v40 = vrot.slane %v2191_v10, %v4937_v35  ;;  %v4277_v1 = vrot.slane %v2205_v58, %v4937_v35  ;;  %v4955_v17 = vld [vmem:[#allocation24_spill] sm:$0xff]  ;;  %v4957_v10 = vld [vmem:[#allocation3_spill] sm:$0xff] }
  0x8d   : > { %4950 = vst [vmem:[#allocation20_spill] sm:$0xff] %v4265_v55  ;;  %v2219_v59 = vrot.slane %v3962_v20, %v4937_v35  ;;  %v2233_v13 = vrot.slane %v3967_v46, %v4937_v35  ;;  %v2247_v55 = vrot.slane %v4954_v25, %v4937_v35  ;;  %v4956_v33 = vld [vmem:[#allocation4_spill] sm:$0xff]  ;;  %v2303_v58 = vrot.slane %v3992_v4, %v4937_v35 }
  0x8e   : > { %4951 = vst [vmem:[#allocation21_spill] sm:$0xff] %v4268_v26  ;;  %4952 = vst [vmem:[#allocation5_spill] sm:$0xff] %v4271_v2  ;;  %v2261_v26 = vrot.slane %v4955_v17, %v4937_v35  ;;  %v2275_v2 = vrot.slane %v4956_v33, %v4937_v35  ;;  %v2317_v20 = vrot.slane %v3997_v9, %v4937_v35 }
  0x8f   : > { %4953 = vst [vmem:[#allocation6_spill] sm:$0xff] %v4274_v40  ;;  %v2289_v40 = vrot.slane %v4957_v10, %v4937_v35  ;;  %v4296_v46 = vrot.slane %v2219_v59, %v4937_v35  ;;  %v4299_v25 = vrot.slane %v2233_v13, %v4937_v35  ;;  %v4302_v17 = vrot.slane %v2247_v55, %v4937_v35 }
  0x90   : > { %v4305_v33 = vrot.slane %v2261_v26, %v4937_v35  ;;  %v4308_v10 = vrot.slane %v2275_v2, %v4937_v35  ;;  %v4314_v9 = vrot.slane %v2303_v58, %v4937_v35  ;;  %v4317_v59 = vrot.slane %v2317_v20, %v4937_v35 }
  0x91   : > { %4958 = vst [vmem:[#allocation7_spill] sm:$0xff] %v4296_v46  ;;  %v4311_v4 = vrot.slane %v2289_v40, %v4937_v35  ;;  %v2331_v13 = vrot.slane %v4002_v52, %v4937_v35  ;;  %v2345_v55 = vrot.slane %v4007_v62, %v4937_v35  ;;  %v2359_v26 = vrot.slane %v4012_v54, %v4937_v35 }
  0x92   : > { %4959 = vst [vmem:[#allocation25_spill] sm:$0xff] %v4317_v59  ;;  %v2373_v2 = vrot.slane %v4017_v37, %v4937_v35  ;;  %v2387_v40 = vrot.slane %v4022_v27, %v4937_v35  ;;  %v2401_v58 = vrot.slane %v4027_v44, %v4937_v35  ;;  %v2415_v20 = vrot.slane %v4032_v51, %v4937_v35 }
  0x93   : > { %v2429_v52 = vrot.slane %v4037_v48, %v4937_v35  ;;  %v4336_v62 = vrot.slane %v2331_v13, %v4937_v35  ;;  %v4339_v54 = vrot.slane %v2345_v55, %v4937_v35  ;;  %v4342_v37 = vrot.slane %v2359_v26, %v4937_v35 }
  0x94   : > { %v4345_v27 = vrot.slane %v2373_v2, %v4937_v35  ;;  %v4348_v44 = vrot.slane %v2387_v40, %v4937_v35  ;;  %v4351_v51 = vrot.slane %v2401_v58, %v4937_v35  ;;  %v4354_v48 = vrot.slane %v2415_v20, %v4937_v35  ;;  %v4964_v40 = vld [vmem:[#allocation8_spill] sm:$0xff] }
  0x95   : > { %4960 = vst [vmem:[#allocation2_spill] sm:$0xff] %v4336_v62  ;;  %v4357_v13 = vrot.slane %v2429_v52, %v4937_v35  ;;  %v2443_v55 = vrot.slane %v4042_v22, %v4937_v35  ;;  %v2457_v26 = vrot.slane %v4047_v47, %v4937_v35  ;;  %v2471_v2 = vrot.slane %v4052_v63, %v4937_v35  ;;  %v4971_v60 = vld [vmem:[#allocation20_spill] sm:$0xff]  ;;  %v4972_v30 = vld [vmem:[#allocation21_spill] sm:$0xff] }
  0x96   : > { %4961 = vst [vmem:[#allocation12_spill] sm:$0xff] %v4345_v27  ;;  %4962 = vst [vmem:[#allocation13_spill] sm:$0xff] %v4348_v44  ;;  %v2485_v44 = vrot.slane %v4964_v40, %v4937_v35  ;;  %v2499_v58 = vrot.slane %v4062_v0, %v4937_v35  ;;  %v2513_v20 = vrot.slane %v4067_v56, %v4937_v35  ;;  %v4973_v38 = vld [vmem:[#allocation5_spill] sm:$0xff]  ;;  %v4974_v31 = vld [vmem:[#allocation6_spill] sm:$0xff] }
  0x97   : > { %4963 = vst [vmem:[#allocation14_spill] sm:$0xff] %v4351_v51  ;;  %v2527_v52 = vrot.slane %v4072_v11, %v4937_v35  ;;  %v2541_v22 = vrot.slane %v4077_v45, %v4937_v35  ;;  %v4376_v47 = vrot.slane %v2443_v55, %v4937_v35  ;;  %v4379_v63 = vrot.slane %v2457_v26, %v4937_v35 }
  0x98   : > { %v4382_v40 = vrot.slane %v2471_v2, %v4937_v35  ;;  %v4385_v0 = vrot.slane %v2485_v44, %v4937_v35  ;;  %v4388_v56 = vrot.slane %v2499_v58, %v4937_v35  ;;  %v4391_v11 = vrot.slane %v2513_v20, %v4937_v35 }
  0x99   : > { %v4394_v45 = vrot.slane %v2527_v52, %v4937_v35  ;;  %v4397_v55 = vrot.slane %v2541_v22, %v4937_v35  ;;  %v2550_v2 = vunpack.c.l.b16 %v4099_v24  ;;  %v4980_v20 = vunpack.c.l.b16 %v4105_v19 }
  0x9a   : > { %4965 = vst [vmem:[#allocation15_spill] sm:$0xff] %v4382_v40  ;;  %4966 = vst [vmem:[#allocation22_spill] sm:$0xff] %v4388_v56  ;;  %v4968_v40 = vld [vmem:[#allocation11_spill] sm:$0xff]  ;;  %v4977_v62 = vmov %v4388_v56  ;;  %v4979_v56 = vunpack.c.l.b16 %v4102_v61  ;;  %v4981_v35 = vunpack.c.l.b16 %v4108_v28  ;;  %v4982_v24 = vunpack.c.l.b16 %v4096_v16 }
  0x9b   : > { %4967 = vst [vmem:[#allocation23_spill] sm:$0xff] %v4394_v45  ;;  %v4978_v27 = vmov %v4394_v45  ;;  %v2613_v51 = vrot.slane %v2550_v2, 7  ;;  %v2619_v52 = vrot.slane %v4980_v20, 5  ;;  %v4983_v44 = vunpack.c.l.b16 %v4111_v43 }
  0x9c   : > { %v2616_v58 = vrot.slane %v4979_v56, 6  ;;  %v2622_v45 = vrot.slane %v4981_v35, 4  ;;  %v4984_v61 = vunpack.c.l.b16 %v4114_v57  ;;  %v4985_v19 = vunpack.c.l.b16 %v4117_v14 }
  0x9d   : > { %v4975_v46 = vld [vmem:[#allocation13_spill] sm:$0xff]  ;;  %v2615_v26 = vsel %vm2614_vm0, %v2613_v51, %v4982_v24  ;;  %v2625_v2 = vrot.slane %v4983_v44, 3  ;;  %v4986_v16 = vunpack.c.l.b16 %v4139_v29  ;;  %v4987_v51 = vunpack.c.l.b16 %v4142_v12 }
  0x9e   : > { %v2628_v56 = vrot.slane %v4984_v61, 2  ;;  %v2618_v22 = vsel %vm2617_vm1, %v2616_v58, %v2615_v26  ;;  %v2631_v20 = vrot.slane %v4985_v19, 1  ;;  %v4988_v44 = vunpack.c.l.b16 %v4145_v5 }
  0x9f   : > { %v2621_v28 = vsel %vm2620_vm2, %v2619_v52, %v2618_v22  ;;  %v2634_v35 = vrot.slane %v4986_v16, 7  ;;  %v2636_v43 = vrot.slane %v4987_v51, 6  ;;  %v4989_v26 = vunpack.c.l.b16 %v4148_v15  ;;  %v4992_v22 = vld [vmem:[#allocation9_spill] sm:$0xff]  ;;  %v4994_v51 = vld [vmem:[#allocation10_spill] sm:$0xff] }
  0xa0   : > { %v2638_v24 = vrot.slane %v4988_v44, 5  ;;  %v2624_v57 = vsel %vm2623_vm3, %v2622_v45, %v2621_v28  ;;  %v4990_v14 = vunpack.c.l.b16 %v4151_v23  ;;  %v4991_v19 = vunpack.c.l.b16 %v4154_v8 }
  0xa1   : > { %v4976_v59 = vld [vmem:[#allocation15_spill] sm:$0xff]  ;;  %v2640_v58 = vrot.slane %v4989_v26, 4  ;;  %v2627_v29 = vsel %vm2626_vm4, %v2625_v2, %v2624_v57  ;;  %v4993_v16 = vunpack.c.l.b16 %v4992_v22  ;;  %v4995_v5 = vunpack.c.l.b16 %v4994_v51 }
  0xa2   : > { %v2642_v61 = vrot.slane %v4990_v14, 3  ;;  %v2644_v52 = vrot.slane %v4991_v19, 2  ;;  %v4996_v45 = vunpack.c.l.b16 %v4179_v39  ;;  %v2630_v15 = vsel %vm2629_vm5, %v2628_v56, %v2627_v29 }
  0xa3   : > { %v2635_v12 = vsel %vm2614_vm0, %v2634_v35, %v4993_v16  ;;  %v2646_v44 = vrot.slane %v4995_v5, 1  ;;  %v4997_v26 = vunpack.c.l.b16 %v4182_v34  ;;  %v4998_v14 = vunpack.c.l.b16 %v4185_v18  ;;  %v5004_v5 = vld [vmem:[#allocation17_spill] sm:$0xff] }
  0xa4   : > { %v2648_v28 = vrot.slane %v4996_v45, 7  ;;  %v2637_v23 = vsel %vm2617_vm1, %v2636_v43, %v2635_v12  ;;  %v4508_v57 = vsel %vm2632_vm6, %v2631_v20, %v2630_v15  ;;  %v4999_v19 = vunpack.c.l.b16 %v4176_v36  ;;  %v5006_v15 = vld [vmem:[#allocation18_spill] sm:$0xff] }
  0xa5   : > { %v2650_v8 = vrot.slane %v4997_v26, 6  ;;  %v2652_v2 = vrot.slane %v4998_v14, 5  ;;  %v2639_v35 = vsel %vm2620_vm2, %v2638_v24, %v2637_v23  ;;  %v5000_v22 = vunpack.c.l.b16 %v4188_v41  ;;  %v5008_v26 = vld [vmem:[#allocation19_spill] sm:$0xff] }
  0xa6   : > { %v2649_v39 = vsel %vm2614_vm0, %v2648_v28, %v4999_v19  ;;  %v2641_v43 = vsel %vm2623_vm3, %v2640_v58, %v2639_v35  ;;  %v5001_v29 = vunpack.c.l.b16 %v4191_v49  ;;  %v5002_v16 = vunpack.c.l.b16 %v4194_v53 }
  0xa7   : > { %v2654_v56 = vrot.slane %v5000_v22, 4  ;;  %v2651_v34 = vsel %vm2617_vm1, %v2650_v8, %v2649_v39  ;;  %v2643_v12 = vsel %vm2626_vm4, %v2642_v61, %v2641_v43  ;;  %v5003_v36 = vunpack.c.l.b16 %v4968_v40  ;;  %v5010_v40 = vld [vmem:[#allocation16_spill] sm:$0xff] }
  0xa8   : > { %v2656_v18 = vrot.slane %v5001_v29, 3  ;;  %v2658_v20 = vrot.slane %v5002_v16, 2  ;;  %v2653_v24 = vsel %vm2620_vm2, %v2652_v2, %v2651_v34  ;;  %v5005_v41 = vunpack.c.l.b16 %v5004_v5 }
  0xa9   : > { %v2660_v51 = vrot.slane %v5003_v36, 1  ;;  %v2645_v58 = vsel %vm2629_vm5, %v2644_v52, %v2643_v12  ;;  %v2655_v28 = vsel %vm2623_vm3, %v2654_v56, %v2653_v24  ;;  %v5007_v49 = vunpack.c.l.b16 %v5006_v15 }
  0xaa   : > { %v2662_v45 = vrot.slane %v5005_v41, 7  ;;  %v5009_v53 = vunpack.c.l.b16 %v5008_v26  ;;  %v4535_v61 = vsel %vm2632_vm6, %v2646_v44, %v2645_v58  ;;  %v2657_v14 = vsel %vm2626_vm4, %v2656_v18, %v2655_v28 }
  0xab   : > { %v2664_v23 = vrot.slane %v5007_v49, 6  ;;  %v5011_v2 = vunpack.c.l.b16 %v5010_v40  ;;  %v5012_v19 = vunpack.c.l.b16 %v4228_v50  ;;  %v2659_v39 = vsel %vm2629_vm5, %v2658_v20, %v2657_v14 }
  0xac   : > { %v2666_v8 = vrot.slane %v5009_v53, 5  ;;  %v5013_v56 = vunpack.c.l.b16 %v4231_v6  ;;  %v5014_v34 = vunpack.c.l.b16 %v4234_v42  ;;  %v4550_v29 = vsel %vm2632_vm6, %v2660_v51, %v2659_v39 }
  0xad   : > { %v2663_v35 = vsel %vm2614_vm0, %v2662_v45, %v5011_v2  ;;  %v2668_v52 = vrot.slane %v5012_v19, 4  ;;  %v5015_v16 = vunpack.c.l.b16 %v4237_v3  ;;  %v5016_v50 = vunpack.c.l.b16 %v4259_v7 }
  0xae   : > { %v2665_v22 = vsel %vm2617_vm1, %v2664_v23, %v2663_v35  ;;  %v2670_v43 = vrot.slane %v5013_v56, 3  ;;  %v2672_v44 = vrot.slane %v5014_v34, 2  ;;  %v5017_v36 = vunpack.c.l.b16 %v4262_v32  ;;  %v5027_v35 = vld [vmem:[#allocation7_spill] sm:$0xff]  ;;  %v5032_v34 = vld [vmem:[#allocation25_spill] sm:$0xff] }
  0xaf   : > { %v2667_v18 = vsel %vm2620_vm2, %v2666_v8, %v2665_v22  ;;  %v2674_v12 = vrot.slane %v5015_v16, 1  ;;  %v2676_v24 = vrot.slane %v5016_v50, 7  ;;  %v5018_v5 = vunpack.c.l.b16 %v4971_v60 }
  0xb0   : > { %v2669_v20 = vsel %vm2623_vm3, %v2668_v52, %v2667_v18  ;;  %v2678_v6 = vrot.slane %v5017_v36, 6  ;;  %v5019_v41 = vunpack.c.l.b16 %v4972_v30  ;;  %v5020_v58 = vunpack.c.l.b16 %v4256_v21 }
  0xb1   : > { %v2680_v42 = vrot.slane %v5018_v5, 5  ;;  %v2671_v45 = vsel %vm2626_vm4, %v2670_v43, %v2669_v20  ;;  %v5021_v7 = vunpack.c.l.b16 %v4973_v38  ;;  %v5022_v15 = vunpack.c.l.b16 %v4974_v31 }
  0xb2   : > { %v2682_v51 = vrot.slane %v5019_v41, 4  ;;  %v2677_v3 = vsel %vm2614_vm0, %v2676_v24, %v5020_v58  ;;  %v2673_v32 = vsel %vm2629_vm5, %v2672_v44, %v2671_v45  ;;  %v5023_v23 = vunpack.c.l.b16 %v4277_v1  ;;  %v5039_v45 = vld [vmem:[#allocation2_spill] sm:$0xff] }
  0xb3   : > { %v2684_v28 = vrot.slane %v5021_v7, 3  ;;  %v2686_v49 = vrot.slane %v5022_v15, 2  ;;  %v2679_v60 = vsel %vm2617_vm1, %v2678_v6, %v2677_v3  ;;  %v5024_v26 = vunpack.c.l.b16 %v4299_v25  ;;  %v5041_v3 = vld [vmem:[#allocation14_spill] sm:$0xff] }
  0xb4   : > { %v2688_v30 = vrot.slane %v5023_v23, 1  ;;  %v2675_v21 = vsel %vm2632_vm6, %v2674_v12, %v2673_v32  ;;  %v2681_v8 = vsel %vm2620_vm2, %v2680_v42, %v2679_v60  ;;  %v5025_v38 = vunpack.c.l.b16 %v4302_v17 }
  0xb5   : > { %v2690_v53 = vrot.slane %v5024_v26, 7  ;;  %v5026_v31 = vunpack.c.l.b16 %v4305_v33  ;;  %v2683_v2 = vsel %vm2623_vm3, %v2682_v51, %v2681_v8  ;;  %v5028_v19 = vunpack.c.l.b16 %v5027_v35 }
  0xb6   : > { %v2692_v14 = vrot.slane %v5025_v38, 6  ;;  %v5029_v52 = vunpack.c.l.b16 %v4308_v10  ;;  %v5030_v39 = vunpack.c.l.b16 %v4311_v4  ;;  %v2685_v56 = vsel %vm2626_vm4, %v2684_v28, %v2683_v2 }
  0xb7   : > { %v2694_v40 = vrot.slane %v5026_v31, 5  ;;  %v2691_v1 = vsel %vm2614_vm0, %v2690_v53, %v5028_v19  ;;  %v5031_v43 = vunpack.c.l.b16 %v4314_v9  ;;  %v5033_v44 = vunpack.c.l.b16 %v5032_v34  ;;  %v5036_v9 = vld [vmem:[#allocation12_spill] sm:$0xff] }
  0xb8   : > { %v2696_v25 = vrot.slane %v5029_v52, 4  ;;  %v2698_v22 = vrot.slane %v5030_v39, 3  ;;  %v2693_v17 = vsel %vm2617_vm1, %v2692_v14, %v2691_v1  ;;  %v2687_v16 = vsel %vm2629_vm5, %v2686_v49, %v2685_v56 }
  0xb9   : > { %v2700_v33 = vrot.slane %v5031_v43, 2  ;;  %v2702_v18 = vrot.slane %v5033_v44, 1  ;;  %v2695_v12 = vsel %vm2620_vm2, %v2694_v40, %v2693_v17  ;;  %v5034_v10 = vunpack.c.l.b16 %v4339_v54 }
  0xba   : > { %v5035_v4 = vunpack.c.l.b16 %v4342_v37  ;;  %v2689_v20 = vsel %vm2632_vm6, %v2688_v30, %v2687_v16  ;;  %v2697_v36 = vsel %vm2623_vm3, %v2696_v25, %v2695_v12  ;;  %v5037_v6 = vunpack.c.l.b16 %v5036_v9 }
  0xbb   : > { %v2704_v50 = vrot.slane %v5034_v10, 7  ;;  %v5038_v42 = vunpack.c.l.b16 %v4975_v46  ;;  %v2699_v51 = vsel %vm2626_vm4, %v2698_v22, %v2697_v36  ;;  %v5040_v58 = vunpack.c.l.b16 %v5039_v45 }
  0xbc   : > { %v2706_v24 = vrot.slane %v5035_v4, 6  ;;  %v2708_v5 = vrot.slane %v5037_v6, 5  ;;  %v5042_v37 = vunpack.c.l.b16 %v5041_v3  ;;  %v5043_v28 = vunpack.c.l.b16 %v4354_v48 }
  0xbd   : > { %v2710_v41 = vrot.slane %v5038_v42, 4  ;;  %v2705_v54 = vsel %vm2614_vm0, %v2704_v50, %v5040_v58  ;;  %v2701_v49 = vsel %vm2629_vm5, %v2700_v33, %v2699_v51  ;;  %v5044_v60 = vunpack.c.l.b16 %v4357_v13 }
  0xbe   : > { %v2712_v7 = vrot.slane %v5042_v37, 3  ;;  %v2714_v15 = vrot.slane %v5043_v28, 2  ;;  %v2707_v32 = vsel %vm2617_vm1, %v2706_v24, %v2705_v54  ;;  %v5045_v23 = vunpack.c.l.b16 %v4379_v63 }
  0xbf   : > { %v2716_v46 = vrot.slane %v5044_v60, 1  ;;  %v2703_v26 = vsel %vm2632_vm6, %v2702_v18, %v2701_v49  ;;  %v2709_v53 = vsel %vm2620_vm2, %v2708_v5, %v2707_v32  ;;  %v5046_v8 = vunpack.c.l.b16 %v4976_v59 }
  0xc0   : > { %v2718_v30 = vrot.slane %v5045_v23, 7  ;;  %v5047_v48 = vunpack.c.l.b16 %v4385_v0  ;;  %v2711_v31 = vsel %vm2623_vm3, %v2710_v41, %v2709_v53  ;;  %v5048_v40 = vunpack.c.l.b16 %v4376_v47 }
  0xc1   : > { %v2720_v38 = vrot.slane %v5046_v8, 6  ;;  %v5049_v63 = vunpack.c.l.b16 %v4977_v62  ;;  %v5050_v35 = vunpack.c.l.b16 %v4391_v11  ;;  %v2713_v1 = vsel %vm2626_vm4, %v2712_v7, %v2711_v31 }
  0xc2   : > { %v2722_v14 = vrot.slane %v5047_v48, 5  ;;  %v2719_v13 = vsel %vm2614_vm0, %v2718_v30, %v5048_v40  ;;  %v5051_v0 = vunpack.c.l.b16 %v4978_v27  ;;  %v5052_v25 = vunpack.c.l.b16 %v4397_v55 }
  0xc3   : > { %v2724_v2 = vrot.slane %v5049_v63, 4  ;;  %v2726_v19 = vrot.slane %v5050_v35, 3  ;;  %v2721_v59 = vsel %vm2617_vm1, %v2720_v38, %v2719_v13  ;;  %v2715_v47 = vsel %vm2629_vm5, %v2714_v15, %v2713_v1 }
  0xc4   : > { %v2728_v52 = vrot.slane %v5051_v0, 2  ;;  %v2730_v39 = vrot.slane %v5052_v25, 1  ;;  %v2723_v22 = vsel %vm2620_vm2, %v2722_v14, %v2721_v59  ;;  %v2732_v62 = vpack.c.b16 %v4508_v57, %v4508_v57 }
  0xc5   : > { %v2733_v11 = vpack.c.b16 %v4535_v61, %v4535_v61  ;;  %v2717_v27 = vsel %vm2632_vm6, %v2716_v46, %v2715_v47  ;;  %v2725_v56 = vsel %vm2623_vm3, %v2724_v2, %v2723_v22  ;;  %v2734_v55 = vpack.c.b16 %v4550_v29, %v4550_v29 }
  0xc6   : > { %v2735_v17 = vpack.c.b16 %v2675_v21, %v2675_v21  ;;  %v2727_v43 = vsel %vm2626_vm4, %v2726_v19, %v2725_v56  ;;  %v2736_v33 = vpack.c.b16 %v2689_v20, %v2689_v20  ;;  %v2737_v34 = vpack.c.b16 %v2703_v26, %v2703_v26  ;;  %2749 = vst.msk [vmem:[%s116_s15] sm:$0xf] %vm2748_vm7, %v2732_v62 }
  0xc7   : > { %v2738_v57 = vpack.c.b16 %v2717_v27, %v2717_v27  ;;  %v2729_v44 = vsel %vm2629_vm5, %v2728_v52, %v2727_v43  ;;  %2750 = vst.msk [vmem:[%s116_s15 + $0x4] sm:$0xf] %vm2748_vm7, %v2733_v11  ;;  %2751 = vst.msk [vmem:[%s116_s15 + $0x8] sm:$0xf] %vm2748_vm7, %v2734_v55 }
  0xc8   : > { %v2731_v61 = vsel %vm2632_vm6, %v2730_v39, %v2729_v44  ;;  %2752 = vst.msk [vmem:[%s116_s15 + $0xc] sm:$0xf] %vm2748_vm7, %v2735_v17  ;;  %2753 = vst.msk [vmem:[%s116_s15 + $0x10] sm:$0xf] %vm2748_vm7, %v2736_v33 }
  0xc9   : > { %2754 = vst.msk [vmem:[%s116_s15 + $0x14] sm:$0xf] %vm2748_vm7, %v2737_v34  ;;  %2755 = vst.msk [vmem:[%s116_s15 + $0x18] sm:$0xf] %vm2748_vm7, %v2738_v57  ;;  %v2739_v18 = vpack.c.b16 %v2731_v61, %v2731_v61 }
  0xcb   : > { %2756 = vst.msk [vmem:[%s116_s15 + $0x1c] sm:$0xf] %vm2748_vm7, %v2739_v18 }
  0xcc PF: > { %s11_s6 = sadd.s32 1, %s2937_s6  }
  0xcd   : > { %p8_p4 = scmp.ge.s32.totalorder %s11_s6, 4  }
  0xcf   :  { %10 = sbr.rel (!%p8_p4) target bundleno = 1 (0x1), region = 54 }

// kernel: vgg_forward.11
= control target key start
LH: loop header
LB: loop body
LE: loop exit
PB: predicated region body
PF: predicated region fallthrough
CT: control target
= control target key end

     0   :  { %8 = vsyncpa [#allocation3], 0  ;;  %s2100_s0 = inlined_call_operand.vmem [shape: bf16[2,10,10,64], index: 0, kind: input, shape index: {}]   ;;  %s2101_s1 = inlined_call_operand.hbm [shape: bf16[576,128], index: 1, kind: input, shape index: {}]   ;;  %s2102_s2 = inlined_call_operand.hbm [shape: f32[1,128], index: 2, kind: input, shape index: {}]   ;;  %s2103_s3 = inlined_call_operand.vmem [shape: bf16[2,64,128], index: 3, kind: output, shape index: {}]  }
   0x1   :  { %9 = vsyncpa [#allocation5], 0  ;;  %s1698_s12 = smov 0   ;;  %s1700_s13 = smov 0  }
   0x2   :  { %s1702_s14 = smov 0  }
   0x3 LB: > { %s1247_s15 = sadd.s32 4294967295, %s1671_s14   ;;  %s27_s16 = sadd.s32 1, %s1667_s13  ;;  %s1671_s14 = sphi %s1702_s14, %s15_s14   ;;  %s1667_s13 = sphi %s1700_s13, %s2117_s13   ;;  %s1663_s12 = sphi %s1698_s12, %s2116_s12  }
   0x4   : > { %p29_p0 = scmp.ge.s32.totalorder %s27_s16, 2  ;;  %p1249_p1 = scmp.ge.s32.totalorder %s1671_s14, 1 }
   0x5   : > { %p138_p2 = scmp.lt.s32.totalorder %s1671_s14, 3  ;;  %p1723_p4 = scmp.eq.s32.totalorder %s1247_s15, 0 }
   0x6   : > { %s2119_s16 = smov (%p29_p0, %s27_s16), 0  ;;  %s1673_s19 = smov [#allocation2]  }
   0x7   : > { %p1719_p3 = pnand %p1249_p1, %p138_p2  ;;  %s152_s20 = sshll.u32 %s1673_s19, 4  ;;  %s153_s20 = int_to_ptr.vmem [resolvable:$true] %s152_s20 }
   0x8   : > { %s2108_s18 = scalar_select %p1723_p4, 1, 0 }
   0x9   : > { %s2107_s17 = scalar_select %p1719_p3, 1, 0 }
   0xa   : > { %p1500_p5 = pneg %p1719_p3  ;;  %s1674_s22 = smov [#allocation4]  }
   0xb   : > { %s168_s23 = sshll.u32 %s1674_s22, 4  ;;  %s1585_s26 = scalar_lea.hbm %s2101_s1, 4608  ;;  %s1735_s23 = int_to_ptr.vmem [resolvable:$true] %s168_s23 }
   0xc   : > { %p1731_p6 = pnand %p1723_p4, %p1500_p5  ;;  %p1586_p7 = scmp.ne.s32.totalorder %s2101_s1, %s1585_s26 }
   0xd   : > { %p1592_p11 = scmp.lt.u32.totalorder %s1585_s26, %s2101_s1 }
   0xe   : > { %p1587_p8 = pneg %p1731_p6 }
  0x10   : > { %p1588_p9 = pnand %p1587_p8, %p1586_p7 }
  0x12   : > { %p1589_p10 = pneg %p1588_p9 }
  0x14   : > { %p1594_p12 = pnand %p1592_p11, %p1589_p10 }
  0x16   : > { %1597 = shalt.err (!%p1594_p12)
}
  0x17   : > { %s1598_s4 = scalar_lea.vmem %s153_s20, 4608  ;;  %p1606_p2 = scmp.lt.s32.totalorder %s153_s20, %s153_s20 }
  0x18   : > { %p1599_p13 = scmp.ne.s32.totalorder %s153_s20, %s1598_s4  ;;  %p1607_p5 = scmp.lt.s32.totalorder %s1598_s4, %s1598_s4 }
  0x1a   : > { %p1601_p0 = pnand %p1599_p13, %p1587_p8  ;;  %p1608_p4 = por %p1607_p5, %p1606_p2 }
  0x1c   : > { %p1602_p1 = pneg %p1601_p0 }
  0x1e   : > { %p1609_p3 = pnand %p1608_p4, %p1602_p1 }
  0x20   : > { %1612 = shalt.err (!%p1609_p3)
}
  0x21   : > { %s1675_s5 = smov 64   ;;  %s1676_s6 = smov 4  }
  0x22   : > { %1503 = dma.hbm_to_vmem [thread:$0]  (!%p1731_p6), %s2101_s1, 4608, %s153_s20, [#allocation3], %s1675_s5, %s1675_s5, %s1676_s6  }
  0x23   : > { %s1613_s11 = scalar_lea.hbm %s2102_s2, 16 }
  0x24   : > { %p1614_p7 = scmp.ne.s32.totalorder %s2102_s2, %s1613_s11  ;;  %p1620_p9 = scmp.lt.u32.totalorder %s1613_s11, %s2102_s2 }
  0x26   : > { %p1616_p3 = pnand %p1614_p7, %p1587_p8 }
  0x28   : > { %p1617_p4 = pneg %p1616_p3 }
  0x2a   : > { %p1622_p10 = pnand %p1620_p9, %p1617_p4 }
  0x2c   : > { %1625 = shalt.err (!%p1622_p10)
}
  0x2d   : > { %s1626_s20 = scalar_lea.vmem %s1735_s23, 16  ;;  %s1633_s25 = scalar_lea.vmem %s1735_s23, 32 }
  0x2e   : > { %p1627_p11 = scmp.ne.s32.totalorder %s1735_s23, %s1626_s20  ;;  %p1634_p0 = scmp.lt.s32.totalorder %s1735_s23, %s1735_s23 }
  0x2f   : > { %p1635_p1 = scmp.lt.s32.totalorder %s1633_s25, %s1626_s20 }
  0x30   : > { %p1629_p12 = pnand %p1627_p11, %p1587_p8 }
  0x31   : > { %p1636_p2 = por %p1635_p1, %p1634_p0 }
  0x32   : > { %p1630_p13 = pneg %p1629_p12 }
  0x34   : > { %p1637_p5 = pnand %p1636_p2, %p1630_p13 }
  0x36   : > { %1640 = shalt.err (!%p1637_p5)
}
  0x37   : > { %1506 = dma.hbm_to_vmem [thread:$0]  (!%p1731_p6), %s2102_s2, 16, %s1735_s23, [#allocation5]  }
  0x38   : > { %p2110_p7 = scmp.ne.s32.totalorder %s2107_s17, 0 }
  0x39   : > { %p2111_p8 = scmp.ne.s32.totalorder (!%p2110_p7), %s2108_s18, 0 }
  0x3a   : > { %189 = sbr.rel (%p2110_p7) target bundleno = 469 (0x1d5), region = 32 }
  0x41   : > { %1654 = dma.done.wait (%p2111_p8), [#allocation3], 4608  }
  0x42   : > { %1656 = vsyncadd (%p2111_p8), [#allocation3], 4294962688 }
  0x43   : > { %1658 = dma.done.wait (%p2111_p8), [#allocation5], 16  }
  0x44   : > { %1660 = vsyncadd (%p2111_p8), [#allocation5], 4294967280  ;;  %p220_p3 = scmp.lt.s32.totalorder %s1663_s12, 1  ;;  %vm254_vm0 = vsmask.f32 3328  ;;  %vm385_vm2 = vcmask 1042432  }
  0x45   : > { %vm255_vm1 = vsmask.f32 7440  ;;  %vm386_vm3 = vcmask 1046532   ;;  %v1544_v29 = vld [vmem:[#allocation2 + $0x40] sm:$0xff]   ;;  %s1677_s18 = smov 64   ;;  %v1566_v30 = vld [vmem:[#allocation2 + $0x28] sm:$0xff]  }
  0x46   : > { %s2121_s12 = smov (!%p220_p3, %s1663_s12), 1  ;;  %vm1845_vm4 = vmor %vm254_vm0, %vm255_vm1  ;;  %1379 = vmatprep.subr.bf16.mxu0 %v1544_v29  ;;  %v1545_v52 = vld [vmem:[#allocation2 + $0xc0] sm:$0xff]   ;;  %v1571_v57 = vld [vmem:[#allocation2 + $0xb0] sm:$0xff]   ;;  %vm543_vm6 = vcmask 523264  }
  0x47   : > { %s1491_s17 = smul.u32 80, %s2121_s12  ;;  %vm1876_vm5 = vmor %vm385_vm2, %vm386_vm3  ;;  %1419 = vmatprep.subr.bf16.mxu1 %v1545_v52  ;;  %s1347_s29 = sshll.u32 %s2121_s12, 5 }
  0x48   : > { %s232_s5 = scalar_lea.vmem %s2103_s3, %s1347_s29 }
  0x49   : > { %s1803_s28 = scalar_lea.vmem %s2100_s0, %s1491_s17 }
  0x4a   : > { %v1806_v0 = vld [vmem:[%s1803_s28 + $0x10] sm:$0xf]  ;;  %v1809_v1 = vld [vmem:[%s1803_s28 + $0x14] sm:$0x1]  ;;  %v1812_v2 = vld [vmem:[%s1803_s28 + $0x18] sm:$0xf] }
  0x4b   : > { %v1815_v3 = vld [vmem:[%s1803_s28 + $0x1c] sm:$0x1]  ;;  %v1818_v4 = vld [vmem:[%s1803_s28 + $0x20] sm:$0xf]  ;;  %v1821_v5 = vld [vmem:[%s1803_s28 + $0x24] sm:$0x1] }
  0x4c   : > { %v286_v6 = vshrl.u32 %v1806_v0, 16  ;;  %v289_v7 = vshll.u32 %v1806_v0, 16  ;;  %v295_v8 = vshll.u32 %v1809_v1, 16  ;;  %v300_v9 = vshrl.u32 %v1812_v2, 16  ;;  %v1828_v10 = vld [vmem:[%s1803_s28] sm:$0xf] }
  0x4d   : > { %v303_v11 = vshll.u32 %v1812_v2, 16  ;;  %v309_v12 = vshll.u32 %v1815_v3, 16  ;;  %v314_v13 = vshrl.u32 %v1818_v4, 16  ;;  %v317_v14 = vshll.u32 %v1818_v4, 16  ;;  %v1835_v15 = vld [vmem:[%s1803_s28 + $0x4] sm:$0x1] }
  0x4e   : > { %v288_v16 = vrot.slane %v286_v6, 4  ;;  %v291_v17 = vrot.slane %v289_v7, 5  ;;  %v297_v18 = vrot.slane %v295_v8, 5  ;;  %v302_v19 = vrot.slane %v300_v9, 4  ;;  %v1838_v20 = vld [vmem:[%s1803_s28 + $0x8] sm:$0xf] }
  0x4f   : > { %v305_v21 = vrot.slane %v303_v11, 5  ;;  %v311_v22 = vrot.slane %v309_v12, 5  ;;  %v316_v23 = vrot.slane %v314_v13, 4  ;;  %v319_v24 = vrot.slane %v317_v14, 5  ;;  %v237_v33 = vld [vmem:[%s1803_s28 + $0xc] sm:$0x1] }
  0x50   : > { %v292_v25 = vor.u32 %v291_v17, %v288_v16  ;;  %v323_v26 = vshll.u32 %v1821_v5, 16  ;;  %v258_v27 = vshrl.u32 %v1828_v10, 16  ;;  %v261_v28 = vshll.u32 %v1828_v10, 16  ;;  %v1868_v51 = vld [vmem:[%s1803_s28 + $0x28] sm:$0xf]  ;;  %v1546_v17 = vld [vmem:[#allocation2] sm:$0xff]  }
  0x51   : > { %v306_v31 = vor.u32 %v305_v21, %v302_v19  ;;  %v320_v32 = vor.u32 %v319_v24, %v316_v23  ;;  %v267_v34 = vshll.u32 %v1835_v15, 16  ;;  %v272_v35 = vshrl.u32 %v1838_v20, 16  ;;  %v1881_v58 = vld [vmem:[%s1803_s28 + $0x2c] sm:$0x1]  ;;  %v1898_v14 = vld [vmem:[%s1803_s28 + $0x30] sm:$0xf]  ;;  %1380 = vmatpush3.bf16.msra.mxu0 %v1546_v17 }
  0x52   : > { %v293_v36 = vrot.slane %v292_v25, 4  ;;  %v325_v37 = vrot.slane %v323_v26, 5  ;;  %v260_v38 = vrot.slane %v258_v27, 4  ;;  %v263_v39 = vrot.slane %v261_v28, 5  ;;  %v1901_v16 = vld [vmem:[%s1803_s28 + $0x34] sm:$0x1] }
  0x53   : > { %v307_v40 = vrot.slane %v306_v31, 4  ;;  %v321_v41 = vrot.slane %v320_v32, 4  ;;  %v269_v42 = vrot.slane %v267_v34, 5  ;;  %v274_v43 = vrot.slane %v272_v35, 4  ;;  %v1547_v23 = vld [vmem:[#allocation2 + $0x80] sm:$0xff]   ;;  %v1548_v28 = vld [vmem:[#allocation2 + $0x48] sm:$0xff]  }
  0x54   : > { %v1854_v44 = vsel %vm1845_vm4, %v293_v36, %v297_v18  ;;  %v264_v45 = vor.u32 %v263_v39, %v260_v38  ;;  %v275_v46 = vshll.u32 %v1838_v20, 16  ;;  %v281_v47 = vshll.u32 %v237_v33, 16  ;;  %v1911_v27 = vld [vmem:[%s1803_s28 + $0x3c] sm:$0x1]  ;;  %1420 = vmatpush3.bf16.msra.mxu1 %v1547_v23  ;;  %1381 = vmatprep.subr.bf16.mxu0 %v1548_v28  ;;  %v253_v23 = vld [vmem:[%s1803_s28 + $0x4c] sm:$0x1] }
  0x55   : > { %v1859_v48 = vsel %vm1845_vm4, %v307_v40, %v311_v22  ;;  %v1863_v49 = vsel %vm1845_vm4, %v321_v41, %v325_v37  ;;  %v1281_v50 = vcombine.low %v1838_v20, %v1806_v0  ;;  %v1260_v60 = vrot.slane %v1838_v20, 9  ;;  %v1907_v22 = vld [vmem:[%s1803_s28 + $0x38] sm:$0xf]  ;;  %v1550_v41 = vld [vmem:[#allocation2 + $0x8] sm:$0xff]  }
  0x56   : > { %v1274_v53 = vcombine.low %v1854_v44, %v1859_v48  ;;  %v1286_v54 = vcombine.low %v1859_v48, %v1863_v49  ;;  %v265_v55 = vrot.slane %v264_v45, 4  ;;  %v277_v56 = vrot.slane %v275_v46, 5  ;;  %1382 = vmatpush3.bf16.msra.mxu0 %v1550_v41 }
  0x57   : > { %v283_v59 = vrot.slane %v281_v47, 5  ;;  %v394_v61 = vrot.slane %v237_v33, 5  ;;  %v1261_v62 = vrot.slane %v1806_v0, 9  ;;  %v398_v7 = vrot.slane %v1809_v1, 5  ;;  %v1549_v33 = vld [vmem:[#allocation2 + $0xc8] sm:$0xff]  }
  0x58   : > { %486 = vrot.lane.b32.xlu0 %v1274_v53, %s1677_s18  ;;  %v270_v63 = vsel %vm1845_vm4, %v265_v55, %v269_v42  ;;  %v278_v6 = vor.u32 %v277_v56, %v274_v43  ;;  %v328_v8 = vshrl.u32 %v1868_v51, 16  ;;  %v331_v11 = vshll.u32 %v1868_v51, 16  ;;  %1421 = vmatprep.subr.bf16.mxu1 %v1549_v33  ;;  %v1941_v47 = vld [vmem:[%s1803_s28 + $0x40] sm:$0xf] }
  0x59   : > { %v1892_v9 = vsel %vm1876_vm5, %v1260_v60, %v394_v61  ;;  %v337_v12 = vshll.u32 %v1881_v58, 16  ;;  %v1262_v13 = vrot.slane %v1812_v2, 9  ;;  %v399_v1 = vsel %vm1876_vm5, %v1261_v62, %v398_v7 }
  0x5a   : > { %v279_v18 = vrot.slane %v278_v6, 4  ;;  %v330_v19 = vrot.slane %v328_v8, 4  ;;  %v402_v21 = vrot.slane %v1815_v3, 5  ;;  %v333_v24 = vrot.slane %v331_v11, 5 }
  0x5b   : > { %v339_v25 = vrot.slane %v337_v12, 5  ;;  %v1263_v26 = vrot.slane %v1818_v4, 9  ;;  %v1289_v31 = vcombine.low %v1892_v9, %v399_v1  ;;  %v406_v32 = vrot.slane %v1821_v5, 5  ;;  %v1552_v12 = vld [vmem:[#allocation2 + $0x50] sm:$0xff]  }
  0x5c   : > { %v1915_v29 = vsel %vm1845_vm4, %v279_v18, %v283_v59  ;;  %509 = vrot.lane.b32.xlu0 %v1281_v50, %s1677_s18  ;;  %v1921_v3 = vsel %vm1876_vm5, %v1262_v13, %v402_v21  ;;  %v334_v36 = vor.u32 %v333_v24, %v330_v19  ;;  %v342_v39 = vshrl.u32 %v1898_v14, 16  ;;  %v1551_v50 = vld [vmem:[#allocation2 + $0x88] sm:$0xff]   ;;  %v1945_v59 = vld [vmem:[%s1803_s28 + $0x44] sm:$0x1]  ;;  %v1553_v13 = vld [vmem:[#allocation2 + $0xd0] sm:$0xff]   ;;  %1383 = vmatprep.subr.bf16.mxu0 %v1552_v12 }
  0x5d   : > { %v1273_v34 = vcombine.low %v270_v63, %v1915_v29  ;;  %v1285_v35 = vcombine.low %v1915_v29, %v1854_v44  ;;  %v1928_v37 = vcombine.low %v399_v1, %v1921_v3  ;;  %v407_v38 = vsel %vm1876_vm5, %v1263_v26, %v406_v32  ;;  %1422 = vmatpush3.bf16.msra.mxu1 %v1551_v50  ;;  %v1960_v21 = vld [vmem:[%s1803_s28 + $0x48] sm:$0xf]  ;;  %v1554_v24 = vld [vmem:[#allocation2 + $0x10] sm:$0xff]  }
  0x5e   : > { %v345_v5 = vshll.u32 %v1898_v14, 16  ;;  %v351_v40 = vshll.u32 %v1901_v16, 16  ;;  %v335_v42 = vrot.slane %v334_v36, 4  ;;  %v1282_v43 = vcombine.low %v1812_v2, %v1818_v4  ;;  %1423 = vmatprep.subr.bf16.mxu1 %v1553_v13  ;;  %1384 = vmatpush3.bf16.msra.mxu0 %v1554_v24 }
  0x5f   : > { %484 = vrot.lane.b32.xlu1 %v1273_v34, %s1677_s18  ;;  %v356_v45 = vshrl.u32 %v1907_v22, 16  ;;  %v359_v46 = vshll.u32 %v1907_v22, 16  ;;  %v344_v52 = vrot.slane %v342_v39, 4  ;;  %v365_v56 = vshll.u32 %v1911_v27, 16 }
  0x60   : > { %v347_v53 = vrot.slane %v345_v5, 5  ;;  %v353_v55 = vrot.slane %v351_v40, 5  ;;  %v1949_v60 = vsel %vm1845_vm4, %v335_v42, %v339_v25  ;;  %v1290_v61 = vcombine.low %v1921_v3, %v407_v38  ;;  %v1556_v40 = vld [vmem:[#allocation2 + $0x58] sm:$0xff]  }
  0x61   : > { %v358_v62 = vrot.slane %v356_v45, 4  ;;  %v361_v63 = vrot.slane %v359_v46, 5  ;;  %v1275_v6 = vcombine.low %v1863_v49, %v1949_v60  ;;  %v367_v8 = vrot.slane %v365_v56, 5  ;;  %1385 = vmatprep.subr.bf16.mxu0 %v1556_v40 }
  0x62   : > { %v348_v7 = vor.u32 %v347_v53, %v344_v52  ;;  %v1264_v11 = vrot.slane %v1868_v51, 9  ;;  %v410_v18 = vrot.slane %v1881_v58, 5  ;;  %v1265_v1 = vrot.slane %v1898_v14, 9  ;;  %v1555_v58 = vld [vmem:[#allocation2 + $0x90] sm:$0xff]  }
  0x63   : > { %527 = vrot.lane.b32.xlu1 %v1289_v31, %s1677_s18  ;;  %v362_v17 = vor.u32 %v361_v63, %v358_v62  ;;  %v414_v19 = vrot.slane %v1901_v16, 5  ;;  %488 = vrot.lane.b32.xlu0 %v1275_v6, %s1677_s18  ;;  %v1283_v26 = vcombine.low %v1868_v51, %v1898_v14  ;;  %v421_v28 = vshrl.u32 %v1941_v47, 16  ;;  %v1558_v6 = vld [vmem:[#allocation2 + $0x18] sm:$0xff]  }
  0x64   : > { %v349_v25 = vrot.slane %v348_v7, 4  ;;  %v424_v31 = vshll.u32 %v1941_v47, 16  ;;  %v411_v16 = vsel %vm1876_vm5, %v1264_v11, %v410_v18  ;;  %v430_v33 = vshll.u32 %v1945_v59, 16  ;;  %1424 = vmatpush3.bf16.msra.mxu1 %v1555_v58  ;;  %1386 = vmatpush3.bf16.msra.mxu0 %v1558_v6 }
  0x65   : > { %v363_v3 = vrot.slane %v362_v17, 4  ;;  %v415_v32 = vsel %vm1876_vm5, %v1265_v1, %v414_v19  ;;  %v1977_v36 = vcombine.low %v407_v38, %v411_v16  ;;  %v423_v5 = vrot.slane %v421_v28, 4 }
  0x66   : > { %v1975_v34 = vsel %vm1845_vm4, %v349_v25, %v353_v55  ;;  %v1291_v39 = vcombine.low %v411_v16, %v415_v32  ;;  %v426_v45 = vrot.slane %v424_v31, 5  ;;  %v432_v46 = vrot.slane %v430_v33, 5  ;;  %v1560_v31 = vld [vmem:[#allocation2 + $0x60] sm:$0xff]  }
  0x67   : > { %511 = vrot.lane.b32.xlu1 %v1282_v43, %s1677_s18  ;;  %v1982_v41 = vsel %vm1845_vm4, %v363_v3, %v367_v8  ;;  %v1287_v42 = vcombine.low %v1949_v60, %v1975_v34  ;;  %529 = vrot.lane.b32.xlu0 %v1290_v61, %s1677_s18  ;;  %v441_v50 = vshrl.u32 %v1960_v21, 16  ;;  %v444_v52 = vshll.u32 %v1960_v21, 16  ;;  %v1557_v43 = vld [vmem:[#allocation2 + $0xd8] sm:$0xff]   ;;  %v1562_v16 = vld [vmem:[#allocation2 + $0x20] sm:$0xff]  }
  0x68   : > { %v1276_v38 = vcombine.low %v1975_v34, %v1982_v41  ;;  %v450_v53 = vshll.u32 %v253_v23, 16  ;;  %v427_v55 = vor.u32 %v426_v45, %v423_v5  ;;  %v1266_v56 = vrot.slane %v1907_v22, 9  ;;  %1425 = vmatprep.subr.bf16.mxu1 %v1557_v43  ;;  %1387 = vmatprep.subr.bf16.mxu0 %v1560_v31  ;;  %v1563_v45 = vld [vmem:[#allocation2 + $0xa0] sm:$0xff]   ;;  %v1570_v43 = vld [vmem:[#allocation2 + $0x30] sm:$0xff]  }
  0x69   : > { %v418_v62 = vrot.slane %v1911_v27, 5  ;;  %v1267_v63 = vrot.slane %v1941_v47, 9  ;;  %v443_v7 = vrot.slane %v441_v50, 4  ;;  %v446_v61 = vrot.slane %v444_v52, 5  ;;  %v1559_v27 = vld [vmem:[#allocation2 + $0x98] sm:$0xff]   ;;  %1388 = vmatpush3.bf16.msra.mxu0 %v1562_v16  ;;  %v1567_v50 = vld [vmem:[#allocation2 + $0xa8] sm:$0xff]  }
  0x6a   : > { %v452_v8 = vrot.slane %v450_v53, 5  ;;  %v438_v11 = vrot.slane %v1945_v59, 5  ;;  %v428_v12 = vrot.slane %v427_v55, 4  ;;  %v1268_v17 = vrot.slane %v1960_v21, 9  ;;  %1426 = vmatpush3.bf16.msra.mxu1 %v1559_v27  ;;  %v1568_v52 = vld [vmem:[#allocation2 + $0x70] sm:$0xff]   ;;  %v1572_v55 = vld [vmem:[#allocation2 + $0x78] sm:$0xff]  }
  0x6b   : > { %490 = vrot.lane.b32.xlu1 %v1276_v38, %s1677_s18  ;;  %v419_v13 = vsel %vm1876_vm5, %v1266_v56, %v418_v62  ;;  %v458_v18 = vrot.slane %v253_v23, 5  ;;  %513 = vrot.lane.b32.xlu0 %v1283_v26, %s1677_s18  ;;  %v1284_v1 = vcombine.low %v1907_v22, %v1941_v47  ;;  %v447_v19 = vor.u32 %v446_v61, %v443_v7  ;;  %v1569_v53 = vld [vmem:[#allocation2 + $0xf0] sm:$0xff]   ;;  %v1575_v56 = vld [vmem:[#allocation2 + $0x38] sm:$0xff]   ;;  %v1296_v60 = vld [vmem:[#allocation4] ss:$0 sm:$0xff] }
  0x6c   : > { %v2002_v24 = vcombine.low %v415_v32, %v419_v13  ;;  %v1270_v59 = vcombine.low %v1806_v0, %v1812_v2  ;;  %v390_v25 = vrot.slane %v1835_v15, 5  ;;  %v2009_v28 = vsel %vm1845_vm4, %v428_v12, %v432_v46  ;;  %v1561_v15 = vld [vmem:[#allocation2 + $0xe0] sm:$0xff]   ;;  %v1564_v46 = vld [vmem:[#allocation2 + $0x68] sm:$0xff]   ;;  %v1576_v62 = vld [vmem:[#allocation2 + $0xb8] sm:$0xff]  }
  0x6d   : > { %v2013_v23 = vsel %vm1876_vm5, %v1267_v63, %v438_v11  ;;  %v2017_v26 = vsel %vm1876_vm5, %v1268_v17, %v458_v18  ;;  %v448_v58 = vrot.slane %v447_v19, 4  ;;  %v1288_v0 = vcombine.low %v1982_v41, %v2009_v28  ;;  %1427 = vmatprep.subr.bf16.mxu1 %v1561_v15  ;;  %1389 = vmatprep.subr.bf16.mxu0 %v1564_v46  ;;  %v1577_v63 = vld [vmem:[#allocation2 + $0x100] sm:$0xff]   ;;  %v1580_v12 = vld [vmem:[#allocation2 + $0x108] sm:$0xff]  }
  0x6e   : > { %v1295_v2 = vcombine.low %v2013_v23, %v2017_v26  ;;  %v1269_v3 = vcombine.low %v1828_v10, %v1838_v20  ;;  %v1259_v32 = vrot.slane %v1828_v10, 9  ;;  %v1271_v33 = vcombine.low %v1818_v4, %v1868_v51  ;;  %1428 = vmatpush3.bf16.msra.mxu1 %v1563_v45  ;;  %v1565_v51 = vld [vmem:[#allocation2 + $0xe8] sm:$0xff]   ;;  %1390 = vmatpush3.bf16.msra.mxu0 %v1566_v30 }
  0x6f   : > { %531 = vrot.lane.b32.xlu1 %v1291_v39, %s1677_s18  ;;  %v1272_v5 = vcombine.low %v1898_v14, %v1907_v22  ;;  %v1293_v40 = vcombine.low %v1941_v47, %v1960_v21  ;;  %515 = vrot.lane.b32.xlu0 %v1284_v1, %s1677_s18  ;;  %v453_v20 = vsel %vm1845_vm4, %v448_v58, %v452_v8  ;;  %v1582_v1 = vld [vmem:[#allocation2 + $0x110] sm:$0xff]   ;;  %v1584_v58 = vld [vmem:[#allocation2 + $0x118] sm:$0xff]  }
  0x70   : > { %v1292_v39 = vcombine.low %v419_v13, %v2013_v23  ;;  %v1294_v10 = vcombine.low %v2009_v28, %v453_v20  ;;  %v391_v4 = vsel %vm1876_vm5, %v1259_v32, %v390_v25  ;;  %1429 = vmatprep.subr.bf16.mxu1 %v1565_v51  ;;  %1391 = vmatprep.subr.bf16.mxu0 %v1568_v52 }
  0x71   : > { %v1277_v38 = vcombine.low %v391_v4, %v1892_v9  ;;  %v1573_v9 = vld [vmem:[#allocation2 + $0xf8] sm:$0xff]  }
  0x72   : > { %1430 = vmatpush3.bf16.msra.mxu1 %v1567_v50  ;;  %1392 = vmatpush3.bf16.msra.mxu0 %v1570_v43 }
  0x73   : > { %539 = vrot.lane.b32.xlu1 %v1294_v10, %s1677_s18  ;;  %533 = vrot.lane.b32.xlu0 %v1292_v39, %s1677_s18 }
  0x74   : > { %1431 = vmatprep.subr.bf16.mxu1 %v1569_v53  ;;  %1393 = vmatprep.subr.bf16.mxu0 %v1572_v55 }
  0x76   : > { %1432 = vmatpush3.bf16.msra.mxu1 %v1571_v57  ;;  %1394 = vmatpush3.bf16.msra.mxu0 %v1575_v56 }
  0x77   : > { %1433 = vmatprep.subr.bf16.mxu1 %v1573_v9  ;;  %1467 = vmatprep.subr.bf16.mxu0 %v1577_v63 }
  0x7a   : > { %1434 = vmatpush3.bf16.msra.mxu1 %v1576_v62 }
  0x7b   : > { %1483 = vmatprep.subr.bf16.mxu1 %v1577_v63 }
  0xca   : > { %v487_v6 = vpop.permute.xlu0 %486 }
  0xcb   : > { %v550_v7 = vsel %vm543_vm6, %v1270_v59, %v487_v6 }
  0xcc   : > { %997 = vmatprep.mubr.bf16.mxu1 %v550_v7 }
  0xce   : > { %v510_v61 = vpop.permute.xlu0 %509 }
  0xcf   : > { %v562_v8 = vsel %vm543_vm6, %v1277_v38, %v510_v61 }
  0xd0   : > { %932 = vmatprep.mubr.bf16.mxu0 %v562_v8 }
  0xd1   : > { %v485_v11 = vpop.permute.xlu1 %484 }
  0xd2   : > { %v546_v13 = vsel %vm543_vm6, %v1269_v3, %v485_v11 }
  0xd3   : > { %933 = vmatmul.mubr.bf16.vlgmr.msra.gmra.mrb[0].mxu0 %v546_v13 }
  0xd4   : > { %1468 = vmatpush3.bf16.msra.mxu0 %v1577_v63 }
  0xd5   : > { %v528_v17 = vpop.permute.xlu1 %527  ;;  %1469 = vmatprep.subr.bf16.mxu0 %v1580_v12  ;;  %v489_v27 = vpop.permute.xlu0 %488 }
  0xd6   : > { %v578_v18 = vsel %vm543_vm6, %v1285_v35, %v528_v17  ;;  %v554_v19 = vsel %vm543_vm6, %v1271_v33, %v489_v27 }
  0xd7   : > { %998 = vmatmul.mubr.bf16.vlgmr.msra.gmra.mrb[0].mxu1 %v578_v18 }
  0xd8   : > { %1487 = vmatpush3.bf16.msra.mxu1 %v1577_v63  ;;  %1005 = vmatprep.mubr.bf16.mxu1 %v554_v19 }
  0xd9   : > { %v512_v59 = vpop.permute.xlu1 %511  ;;  %1484 = vmatprep.subr.bf16.mxu1 %v1580_v12  ;;  %1470 = vmatpush3.bf16.msra.mxu0 %v1580_v12  ;;  %v530_v25 = vpop.permute.xlu0 %529 }
  0xda   : > { %v566_v31 = vsel %vm543_vm6, %v1928_v37, %v512_v59  ;;  %1471 = vmatprep.subr.bf16.mxu0 %v1582_v1  ;;  %v582_v44 = vsel %vm543_vm6, %v1286_v54, %v530_v25 }
  0xdb   : > { %940 = vmatprep.mubr.bf16.mxu0 %v566_v31 }
  0xdc   : > { %941 = vmatmul.mubr.bf16.gmra.mrb[4].mxu0 %v550_v7  ;;  %1488 = vmatpush3.bf16.msra.mxu1 %v1580_v12 }
  0xdd   : > { %v491_v29 = vpop.permute.xlu1 %490  ;;  %1485 = vmatprep.subr.bf16.mxu1 %v1582_v1  ;;  %1472 = vmatpush3.bf16.msra.mxu0 %v1582_v1  ;;  %v514_v15 = vpop.permute.xlu0 %513 }
  0xde   : > { %v558_v35 = vsel %vm543_vm6, %v1272_v5, %v491_v29  ;;  %1473 = vmatprep.subr.bf16.mxu0 %v1584_v58  ;;  %v570_v3 = vsel %vm543_vm6, %v1977_v36, %v514_v15 }
  0xdf   : > { %1006 = vmatmul.mubr.bf16.gmra.mrb[4].mxu1 %v582_v44  ;;  %948 = vmatprep.mubr.bf16.mxu0 %v570_v3 }
  0xe0   : > { %1013 = vmatprep.mubr.bf16.mxu1 %v558_v35  ;;  %1489 = vmatpush3.bf16.msra.mxu1 %v1582_v1 }
  0xe1   : > { %v532_v48 = vpop.permute.xlu1 %531  ;;  %1474 = vmatpush3.bf16.msra.mxu0 %v1584_v58  ;;  %v516_v49 = vpop.permute.xlu0 %515  ;;  %1486 = vmatprep.subr.bf16.mxu1 %v1584_v58 }
  0xe2   : > { %v574_v54 = vsel %vm543_vm6, %v2002_v24, %v516_v49  ;;  %v586_v14 = vsel %vm543_vm6, %v1287_v42, %v532_v48 }
  0xe4   : > { %949 = vmatmul.mubr.bf16.gmra.mrb[8].mxu0 %v554_v19  ;;  %1490 = vmatpush3.bf16.msra.mxu1 %v1584_v58 }
  0xe5   : > { %956 = vmatprep.mubr.bf16.mxu0 %v574_v54  ;;  %v540_v22 = vpop.permute.xlu1 %539  ;;  %v534_v32 = vpop.permute.xlu0 %533 }
  0xe6   : > { %v594_v16 = vsel %vm543_vm6, %v1293_v40, %v540_v22  ;;  %v590_v33 = vsel %vm543_vm6, %v1288_v0, %v534_v32 }
  0xe7   : > { %1014 = vmatmul.mubr.bf16.gmra.mrb[8].mxu1 %v586_v14 }
  0xe8   : > { %1021 = vmatprep.mubr.bf16.mxu1 %v594_v16 }
  0xec   : > { %957 = vmatmul.mubr.bf16.gmra.mrb[12].mxu0 %v558_v35 }
  0xed   : > { %1475 = vmatprep.mubr.msk.bf16.mxu0 %vm543_vm6, %v1928_v37 }
  0xef   : > { %1022 = vmatmul.mubr.bf16.gmra.mrb[12].mxu1 %v590_v33 }
  0xf0   : > { %1479 = vmatprep.mubr.msk.bf16.mxu1 %vm543_vm6, %v2002_v24 }
  0xf4   : > { %1476 = vmatmul.mubr.msk.bf16.vlgmr.msra.gmra.mrb[16].mxu0 %vm543_vm6, %v1977_v36 }
  0xf7   : > { %1480 = vmatmul.mubr.msk.bf16.vlgmr.msra.gmra.mrb[16].mxu1 %vm543_vm6, %v1295_v2 }
 0x1a6   : > { %v1395_v47 = vpop.f32.mrb[0].mxu0 }
 0x1a7   : > { %v1396_v21 = vpop.f32.mrb[1].mxu0 }
 0x1a8   : > { %v1397_v34 = vadd.f32 %v1396_v21, %v1395_v47  ;;  %v1398_v41 = vpop.f32.mrb[2].mxu0 }
 0x1a9   : > { %v1399_v42 = vpop.f32.mrb[3].mxu0 }
 0x1aa   : > { %v1435_v28 = vpop.f32.mrb[0].mxu1  ;;  %v935_v37 = vadd.f32 %v1397_v34, %v1296_v60  ;;  %v1400_v0 = vadd.f32 %v1399_v42, %v1398_v41 }
 0x1ab   : > { %v1436_v5 = vpop.f32.mrb[1].mxu1 }
 0x1ac   : > { %v1437_v40 = vadd.f32 %v1436_v5, %v1435_v28  ;;  %v1438_v24 = vpop.f32.mrb[2].mxu1  ;;  %v938_v20 = vadd.f32 %v1400_v0, %v1296_v60 }
 0x1ad   : > { %v1439_v39 = vpop.f32.mrb[3].mxu1 }
 0x1ae   : > { %v1440_v36 = vadd.f32 %v1439_v39, %v1438_v24  ;;  %v1000_v45 = vadd.f32 %v1437_v40, %v935_v37 }
 0x1af   : > { %v1401_v10 = vpop.f32.mrb[4].mxu0 }
 0x1b0   : > { %v1402_v23 = vpop.f32.mrb[5].mxu0  ;;  %v1003_v26 = vadd.f32 %v1440_v36, %v938_v20 }
 0x1b1   : > { %v1403_v2 = vadd.f32 %v1402_v23, %v1401_v10  ;;  %v1404_v46 = vpop.f32.mrb[6].mxu0 }
 0x1b2   : > { %v1441_v4 = vpop.f32.mrb[4].mxu1  ;;  %v1405_v51 = vpop.f32.mrb[7].mxu0 }
 0x1b3   : > { %v1442_v38 = vpop.f32.mrb[5].mxu1  ;;  %v943_v30 = vadd.f32 %v1403_v2, %v1296_v60  ;;  %v1406_v50 = vadd.f32 %v1405_v51, %v1404_v46 }
 0x1b4   : > { %v1443_v52 = vadd.f32 %v1442_v38, %v1441_v4  ;;  %v1444_v53 = vpop.f32.mrb[6].mxu1 }
 0x1b5   : > { %v1445_v43 = vpop.f32.mrb[7].mxu1  ;;  %v946_v57 = vadd.f32 %v1406_v50, %v1296_v60 }
 0x1b6   : > { %v1446_v55 = vadd.f32 %v1445_v43, %v1444_v53  ;;  %v1008_v9 = vadd.f32 %v1443_v52, %v943_v30 }
 0x1b7   : > { %v1407_v56 = vpop.f32.mrb[8].mxu0 }
 0x1b8   : > { %v1408_v62 = vpop.f32.mrb[9].mxu0  ;;  %v1011_v63 = vadd.f32 %v1446_v55, %v946_v57 }
 0x1b9   : > { %v1409_v6 = vadd.f32 %v1408_v62, %v1407_v56  ;;  %v1410_v7 = vpop.f32.mrb[10].mxu0 }
 0x1ba   : > { %v1447_v61 = vpop.f32.mrb[8].mxu1  ;;  %v1411_v8 = vpop.f32.mrb[11].mxu0 }
 0x1bb   : > { %v1448_v11 = vpop.f32.mrb[9].mxu1  ;;  %v951_v12 = vadd.f32 %v1409_v6, %v1296_v60  ;;  %v1412_v13 = vadd.f32 %v1411_v8, %v1410_v7 }
 0x1bc   : > { %v1449_v17 = vadd.f32 %v1448_v11, %v1447_v61  ;;  %v1450_v18 = vpop.f32.mrb[10].mxu1 }
 0x1bd   : > { %v1451_v27 = vpop.f32.mrb[11].mxu1  ;;  %v954_v1 = vadd.f32 %v1412_v13, %v1296_v60 }
 0x1be   : > { %v1452_v19 = vadd.f32 %v1451_v27, %v1450_v18  ;;  %v1016_v59 = vadd.f32 %v1449_v17, %v951_v12 }
 0x1bf   : > { %v1413_v25 = vpop.f32.mrb[12].mxu0 }
 0x1c0   : > { %v1414_v31 = vpop.f32.mrb[13].mxu0  ;;  %v1019_v58 = vadd.f32 %v1452_v19, %v954_v1 }
 0x1c1   : > { %v1415_v44 = vadd.f32 %v1414_v31, %v1413_v25  ;;  %v1416_v29 = vpop.f32.mrb[14].mxu0 }
 0x1c2   : > { %v1453_v35 = vpop.f32.mrb[12].mxu1  ;;  %v1417_v15 = vpop.f32.mrb[15].mxu0 }
 0x1c3   : > { %v1454_v3 = vpop.f32.mrb[13].mxu1  ;;  %v959_v48 = vadd.f32 %v1415_v44, %v1296_v60  ;;  %v1418_v49 = vadd.f32 %v1417_v15, %v1416_v29 }
 0x1c4   : > { %v1455_v54 = vadd.f32 %v1454_v3, %v1453_v35  ;;  %v1456_v14 = vpop.f32.mrb[14].mxu1 }
 0x1c5   : > { %v1457_v22 = vpop.f32.mrb[15].mxu1  ;;  %v962_v16 = vadd.f32 %v1418_v49, %v1296_v60 }
 0x1c6   : > { %v1458_v32 = vadd.f32 %v1457_v22, %v1456_v14  ;;  %v1024_v33 = vadd.f32 %v1455_v54, %v959_v48 }
 0x1c7   : > { %v1477_v47 = vpop.f32.mrb[16].mxu0 }
 0x1c8   : > { %v1073_v21 = vadd.f32 %v1477_v47, %v1008_v9  ;;  %v1064_v34 = vpop.f32.mrb[17].mxu0  ;;  %v1027_v41 = vadd.f32 %v1458_v32, %v962_v16 }
 0x1c9   : > { %v1065_v42 = vadd.f32 %v1064_v34, %v1000_v45  ;;  %v1478_v28 = vpop.f32.mrb[18].mxu0 }
 0x1ca   : > { %v1481_v37 = vpop.f32.mrb[16].mxu1  ;;  %v1076_v0 = vadd.f32 %v1478_v28, %v1011_v63  ;;  %v1067_v5 = vpop.f32.mrb[19].mxu0  ;;  %v1097_v39 = vmax.f32 %v1073_v21, 0.0 }
 0x1cb   : > { %v1089_v40 = vadd.f32 %v1481_v37, %v1024_v33  ;;  %v1080_v24 = vpop.f32.mrb[17].mxu1  ;;  %v1068_v20 = vadd.f32 %v1067_v5, %v1003_v26  ;;  %v1095_v60 = vmax.f32 %v1065_v42, 0.0 }
 0x1cc   : > { %v1081_v36 = vadd.f32 %v1080_v24, %v1016_v59  ;;  %v1482_v10 = vpop.f32.mrb[18].mxu1  ;;  %v1098_v23 = vmax.f32 %v1076_v0, 0.0 }
 0x1cd   : > { %v1092_v2 = vadd.f32 %v1482_v10, %v1027_v41  ;;  %v1083_v46 = vpop.f32.mrb[19].mxu1  ;;  %v1096_v45 = vmax.f32 %v1068_v20, 0.0  ;;  %v1101_v38 = vmax.f32 %v1089_v40, 0.0 }
 0x1ce   : > { %v1364_v4 = vpack.c.bf16 %v1098_v23, %v1097_v39  ;;  %v1084_v51 = vadd.f32 %v1083_v46, %v1019_v58  ;;  %v1099_v52 = vmax.f32 %v1081_v36, 0.0 }
 0x1cf   : > { %v1102_v30 = vmax.f32 %v1092_v2, 0.0  ;;  %v1359_v50 = vpack.c.bf16 %v1096_v45, %v1095_v60 }
 0x1d0   : > { %1376 = vst [vmem:[%s232_s5 + $0x8] sm:$0xff] %v1364_v4   ;;  %v1100_v26 = vmax.f32 %v1084_v51, 0.0 }
 0x1d1   : > { %v1374_v53 = vpack.c.bf16 %v1102_v30, %v1101_v38  ;;  %1360 = vst [vmem:[%s232_s5] sm:$0xff] %v1359_v50  }
 0x1d2   : > { %v1369_v43 = vpack.c.bf16 %v1100_v26, %v1099_v52 }
 0x1d3   : > { %1378 = vst [vmem:[%s232_s5 + $0x18] sm:$0xff] %v1374_v53  }
 0x1d4   : > { %1377 = vst [vmem:[%s232_s5 + $0x10] sm:$0xff] %v1369_v43  }
 0x1d5 PF: > { %s15_s14 = sadd.s32 1, %s1671_s14   ;;  %s2116_s12 = smov %s1667_s13 }
 0x1d6   : > { %p12_p6 = scmp.ge.s32.totalorder %s15_s14, 4   ;;  %s2117_s13 = smov %s2119_s16 }
 0x1d8   :  { %14 = sbr.rel (!%p12_p6) target bundleno = 3 (0x3), region = 73 }
 0x1df   :  { %1170 = vsyncpa [#allocation3], 1 }
 0x1e0   :  { %1172 = vsyncpa [#allocation3 + $0x1], 1 }
 0x1e1   :  { %1173 = vsyncpa [#allocation5], 1 }

// kernel: vgg_forward.9
= control target key start
LH: loop header
LB: loop body
LE: loop exit
PB: predicated region body
PF: predicated region fallthrough
CT: control target
= control target key end

     0   :  { %8 = vsyncpa [#allocation3], 0  ;;  %s2861_s12 = smov 0   ;;  %s2863_s13 = smov 0   ;;  %s4099_s0 = inlined_call_operand.vmem [shape: bf16[2,18,18,32], index: 0, kind: input, shape index: {}]   ;;  %s4100_s1 = inlined_call_operand.vmem [shape: bf16[288,64], index: 1, kind: input, shape index: {}]   ;;  %s4101_s2 = inlined_call_operand.hbm [shape: f32[1,64], index: 2, kind: input, shape index: {}]   ;;  %s4102_s3 = inlined_call_operand.vmem [shape: bf16[2,256,64], index: 3, kind: output, shape index: {}]  }
   0x1   :  { %s2865_s14 = smov 0  }
   0x2 LB: > { %s2335_s15 = sadd.s32 4294967295, %s2835_s14   ;;  %s26_s16 = sadd.s32 1, %s2831_s13  ;;  %s2835_s14 = sphi %s2865_s14, %s14_s14   ;;  %s2831_s13 = sphi %s2863_s13, %s4144_s13   ;;  %s2827_s12 = sphi %s2861_s12, %s4143_s12  }
   0x3   : > { %p28_p0 = scmp.ge.s32.totalorder %s26_s16, 2  ;;  %p2337_p1 = scmp.ge.s32.totalorder %s2835_s14, 1 }
   0x4   : > { %p137_p2 = scmp.lt.s32.totalorder %s2835_s14, 3  ;;  %p2886_p4 = scmp.eq.s32.totalorder %s2335_s15, 0 }
   0x5   : > { %s4146_s16 = smov (%p28_p0, %s26_s16), 0  ;;  %s2837_s19 = smov [#allocation2]  }
   0x6   : > { %p2882_p3 = pnand %p2337_p1, %p137_p2  ;;  %s159_s20 = sshll.u32 %s2837_s19, 4  ;;  %s160_s20 = int_to_ptr.vmem [resolvable:$true] %s159_s20 }
   0x7   : > { %s4116_s18 = scalar_select %p2886_p4, 1, 0 }
   0x8   : > { %s4115_s17 = scalar_select %p2882_p3, 1, 0 }
   0x9   : > { %p2707_p5 = pneg %p2882_p3  ;;  %s2781_s24 = scalar_lea.hbm %s4101_s2, 16 }
   0xa   : > { %p2782_p7 = scmp.ne.s32.totalorder %s4101_s2, %s2781_s24  ;;  %p2788_p11 = scmp.lt.u32.totalorder %s2781_s24, %s4101_s2 }
   0xb   : > { %p2894_p6 = pnand %p2886_p4, %p2707_p5 }
   0xd   : > { %p2783_p8 = pneg %p2894_p6 }
   0xf   : > { %p2784_p9 = pnand %p2783_p8, %p2782_p7 }
  0x11   : > { %p2785_p10 = pneg %p2784_p9 }
  0x13   : > { %p2790_p12 = pnand %p2788_p11, %p2785_p10 }
  0x15   : > { %2793 = shalt.err (!%p2790_p12)
}
  0x16   : > { %s2794_s29 = scalar_lea.vmem %s160_s20, 16  ;;  %s2801_s30 = scalar_lea.vmem %s160_s20, 32 }
  0x17   : > { %p2795_p13 = scmp.ne.s32.totalorder %s160_s20, %s2794_s29  ;;  %p2802_p2 = scmp.lt.s32.totalorder %s160_s20, %s160_s20 }
  0x18   : > { %p2803_p5 = scmp.lt.s32.totalorder %s2801_s30, %s2794_s29 }
  0x19   : > { %p2797_p0 = pnand %p2795_p13, %p2783_p8 }
  0x1a   : > { %p2804_p4 = por %p2803_p5, %p2802_p2 }
  0x1b   : > { %p2798_p1 = pneg %p2797_p0 }
  0x1d   : > { %p2805_p3 = pnand %p2804_p4, %p2798_p1 }
  0x1f   : > { %2808 = shalt.err (!%p2805_p3)
}
  0x20   : > { %2710 = dma.hbm_to_vmem [thread:$0]  (!%p2894_p6), %s4101_s2, 16, %s160_s20, [#allocation3]  }
  0x21   : > { %p4118_p7 = scmp.ne.s32.totalorder %s4115_s17, 0 }
  0x23   : > { %180 = sbr.rel (%p4118_p7) target bundleno = 597 (0x255), region = 32 }
  0x2a   : > { %p4119_p9 = scmp.ne.s32.totalorder %s4116_s18, 0 }
  0x2c   : > { %2822 = dma.done.wait (%p4119_p9), [#allocation3], 16  }
  0x2d   : > { %2824 = vsyncadd (%p4119_p9), [#allocation3], 4294967280  ;;  %p211_p8 = scmp.lt.s32.totalorder %s2827_s12, 1  ;;  %vm718_vm0 = vcmask 1042432   ;;  %vm719_vm1 = vcmask 1046532   ;;  %v2752_v8 = vld [vmem:[%s4100_s1 + $0x40] sm:$0xff]  }
  0x2e   : > { %v2753_v14 = vld [vmem:[%s4100_s1] sm:$0xff]   ;;  %s2838_s18 = smov 64   ;;  %vm2977_vm2 = vmor %vm718_vm0, %vm719_vm1  ;;  %2520 = vmatprep.subr.bf16.mxu0 %v2752_v8  ;;  %v2754_v25 = vld [vmem:[%s4100_s1 + $0x48] sm:$0xff]   ;;  %2686 = vmatprep.subr.bf16.mxu1 %v2752_v8  ;;  %vm283_vm3 = vsmask.f32 3328  ;;  %s2839_s23 = smov 96  }
  0x2f   : > { %s4148_s12 = smov (!%p211_p8, %s2827_s12), 1  ;;  %2521 = vmatpush3.bf16.msra.mxu0 %v2753_v14  ;;  %vm284_vm4 = vsmask.f32 7440  ;;  %2694 = vmatpush3.bf16.msra.mxu1 %v2753_v14  ;;  %v2755_v35 = vld [vmem:[%s4100_s1 + $0x8] sm:$0xff]   ;;  %v2756_v51 = vld [vmem:[%s4100_s1 + $0x50] sm:$0xff]   ;;  %s2840_s26 = smov 32  }
  0x30   : > { %s2702_s6 = smul.u32 216, %s4148_s12  ;;  %2522 = vmatprep.subr.bf16.mxu0 %v2754_v25  ;;  %2687 = vmatprep.subr.bf16.mxu1 %v2754_v25  ;;  %v2757_v8 = vld [vmem:[%s4100_s1 + $0x10] sm:$0xff]   ;;  %vm3061_vm5 = vmor %vm283_vm3, %vm284_vm4  ;;  %vm1255_vm6 = vcmask 261120   ;;  %vm1304_vm7 = vcmask 523264   ;;  %vm1337_vm8 = vcmask 785408   ;;  %vm2195_vm9 = vcmask 519168  }
  0x32   : > { %s2928_s9 = scalar_lea.vmem %s4099_s0, %s2702_s6 }
  0x33   : > { %v2931_v0 = vld [vmem:[%s2928_s9 + $0x18] sm:$0xf]  ;;  %v2934_v1 = vld [vmem:[%s2928_s9 + $0x1c] sm:$0xf]  ;;  %v2937_v2 = vld [vmem:[%s2928_s9 + $0xa8] sm:$0xf]  ;;  %2523 = vmatpush3.bf16.msra.mxu0 %v2755_v35  ;;  %2695 = vmatpush3.bf16.msra.mxu1 %v2755_v35 }
  0x34   : > { %v348_v3 = vshrl.u32 %v2934_v1, 16  ;;  %v2942_v4 = vcombine.low %v2931_v0, %v2934_v1  ;;  %v335_v5 = vshrl.u32 %v2931_v0, 16  ;;  %v338_v6 = vshll.u32 %v2931_v0, 16  ;;  %v2947_v7 = vld [vmem:[%s2928_s9 + $0xac] sm:$0xf]  ;;  %2524 = vmatprep.subr.bf16.mxu0 %v2756_v51  ;;  %2688 = vmatprep.subr.bf16.mxu1 %v2756_v51 }
  0x35   : > { %v636_v9 = vshrl.u32 %v2947_v7, 16  ;;  %v2955_v10 = vcombine.low %v2937_v2, %v2947_v7  ;;  %v623_v11 = vshrl.u32 %v2937_v2, 16  ;;  %v626_v12 = vshll.u32 %v2937_v2, 16  ;;  %v2960_v13 = vld [vmem:[%s2928_s9 + $0xc] sm:$0xf] }
  0x36   : > { %1185 = vrot.lane.b32.xlu1 %v2942_v4, %s2838_s18  ;;  %v2968_v15 = vld [vmem:[%s2928_s9 + $0x10] sm:$0xf]  ;;  %v311_v16 = vshrl.u32 %v2960_v13, 16  ;;  %v314_v17 = vshll.u32 %v2960_v13, 16  ;;  %v2973_v18 = vld [vmem:[%s2928_s9 + $0x14] sm:$0x1] }
  0x37   : > { %1209 = vrot.lane.b32.xlu0 %v2955_v10, %s2838_s18  ;;  %v324_v20 = vshrl.u32 %v2968_v15, 16  ;;  %v2986_v21 = vcombine.low %v2960_v13, %v2968_v15  ;;  %v2347_v22 = vrot.slane %v2960_v13, 9  ;;  %v730_v23 = vrot.slane %v2968_v15, 5  ;;  %v229_v24 = vld [vmem:[%s2928_s9] sm:$0xf]  ;;  %2525 = vmatpush3.bf16.msra.mxu0 %v2757_v8 }
  0x38   : > { %v733_v26 = vrot.slane %v2973_v18, 5  ;;  %v230_v27 = vld [vmem:[%s2928_s9 + $0x4] sm:$0xf]  ;;  %v2997_v28 = vld [vmem:[%s2928_s9 + $0x8] sm:$0x1]  ;;  %v2346_v29 = vrot.slane %v229_v24, 9  ;;  %2696 = vmatpush3.bf16.msra.mxu1 %v2757_v8 }
  0x39   : > { %v731_v30 = vsel %vm2977_vm2, %v2347_v22, %v730_v23  ;;  %v732_v31 = vrot.slane %v730_v23, 4  ;;  %v723_v32 = vrot.slane %v230_v27, 5  ;;  %v726_v33 = vrot.slane %v2997_v28, 5  ;;  %v3003_v34 = vld [vmem:[%s2928_s9 + $0x9c] sm:$0xf] }
  0x3a   : > { %1112 = vrot.lane.b32.xlu1 %v2986_v21, %s2839_s23  ;;  %v3011_v36 = vld [vmem:[%s2928_s9 + $0xa0] sm:$0xf]  ;;  %v3014_v37 = vld [vmem:[%s2928_s9 + $0xa4] sm:$0x1]  ;;  %v2359_v38 = vrot.slane %v3003_v34, 9  ;;  %v287_v39 = vshrl.u32 %v229_v24, 16 }
  0x3b   : > { %v734_v40 = vsel %vm2977_vm2, %v732_v31, %v733_v26  ;;  %v724_v41 = vsel %vm2977_vm2, %v2346_v29, %v723_v32  ;;  %v725_v42 = vrot.slane %v723_v32, 4  ;;  %v814_v43 = vrot.slane %v3011_v36, 5  ;;  %v265_v44 = vld [vmem:[%s2928_s9 + $0x90] sm:$0xf]  ;;  %v266_v45 = vld [vmem:[%s2928_s9 + $0x94] sm:$0xf] }
  0x3c   : > { %v3024_v46 = vcombine.low %v731_v30, %v734_v40  ;;  %v817_v47 = vrot.slane %v3014_v37, 5  ;;  %v267_v48 = vld [vmem:[%s2928_s9 + $0x98] sm:$0x1]  ;;  %v2358_v49 = vrot.slane %v265_v44, 9  ;;  %v807_v50 = vrot.slane %v266_v45, 5 }
  0x3d   : > { %v727_v52 = vsel %vm2977_vm2, %v725_v42, %v726_v33  ;;  %v815_v53 = vsel %vm2977_vm2, %v2359_v38, %v814_v43  ;;  %v816_v54 = vrot.slane %v814_v43, 4  ;;  %v810_v55 = vrot.slane %v267_v48, 5  ;;  %v2759_v30 = vld [vmem:[%s4100_s1 + $0x58] sm:$0xff]  }
  0x3e   : > { %1150 = vrot.lane.b32.xlu0 %v3024_v46, %s2840_s26  ;;  %v2396_v56 = vcombine.low %v724_v41, %v727_v52  ;;  %v808_v57 = vsel %vm2977_vm2, %v2358_v49, %v807_v50  ;;  %v809_v58 = vrot.slane %v807_v50, 4  ;;  %v289_v59 = vrot.slane %v287_v39, 4  ;;  %2526 = vmatprep.subr.bf16.mxu0 %v2759_v30 }
  0x3f   : > { %v818_v60 = vsel %vm2977_vm2, %v816_v54, %v817_v47  ;;  %v290_v61 = vshll.u32 %v229_v24, 16  ;;  %v296_v62 = vshll.u32 %v230_v27, 16  ;;  %v300_v63 = vshrl.u32 %v230_v27, 16  ;;  %2689 = vmatprep.subr.bf16.mxu1 %v2759_v30  ;;  %v3066_v47 = vld [vmem:[%s2928_s9 + $0x20] sm:$0x1] }
  0x40   : > { %1077 = vrot.lane.b32.xlu1 %v2396_v56, %s2838_s18  ;;  %v3045_v14 = vcombine.low %v815_v53, %v818_v60  ;;  %v811_v22 = vsel %vm2977_vm2, %v809_v58, %v810_v55  ;;  %v306_v23 = vshll.u32 %v2997_v28, 16  ;;  %v575_v25 = vshrl.u32 %v265_v44, 16  ;;  %v2760_v58 = vld [vmem:[%s4100_s1 + $0x18] sm:$0xff]  }
  0x41   : > { %v3050_v26 = vcombine.low %v808_v57, %v811_v22  ;;  %v292_v24 = vrot.slane %v290_v61, 5  ;;  %v298_v29 = vrot.slane %v296_v62, 5  ;;  %v302_v27 = vrot.slane %v300_v63, 4  ;;  %v3084_v63 = vld [vmem:[%s2928_s9 + $0xb0] sm:$0x1]  ;;  %2527 = vmatpush3.bf16.msra.mxu0 %v2760_v58  ;;  %2697 = vmatpush3.bf16.msra.mxu1 %v2760_v58 }
  0x42   : > { %4122 = vst [vmem:[#allocation5_spill] sm:$0xff] %v3045_v14  ;;  %1174 = vrot.lane.b32.xlu0 %v3045_v14, %s2840_s26  ;;  %v308_v31 = vrot.slane %v306_v23, 5  ;;  %v577_v32 = vrot.slane %v575_v25, 4  ;;  %v578_v33 = vshll.u32 %v265_v44, 16  ;;  %v584_v28 = vshll.u32 %v266_v45, 16 }
  0x43   : > { %v293_v35 = vor.u32 %v292_v24, %v289_v59  ;;  %v303_v38 = vor.u32 %v302_v27, %v298_v29  ;;  %v588_v39 = vshrl.u32 %v266_v45, 16  ;;  %v594_v40 = vshll.u32 %v267_v48, 16  ;;  %v2762_v24 = vld [vmem:[%s4100_s1 + $0x20] sm:$0xff]  }
  0x44   : > { %1101 = vrot.lane.b32.xlu1 %v3050_v26, %s2838_s18  ;;  %v580_v42 = vrot.slane %v578_v33, 5  ;;  %v586_v43 = vrot.slane %v584_v28, 5  ;;  %v337_v44 = vrot.slane %v335_v5, 4  ;;  %v340_v45 = vrot.slane %v338_v6, 5 }
  0x45   : > { %v294_v48 = vrot.slane %v293_v35, 4  ;;  %v304_v49 = vrot.slane %v303_v38, 4  ;;  %v590_v50 = vrot.slane %v588_v39, 4  ;;  %v596_v51 = vrot.slane %v594_v40, 5 }
  0x46   : > { %v581_v52 = vor.u32 %v580_v42, %v577_v32  ;;  %v341_v53 = vor.u32 %v340_v45, %v337_v44  ;;  %v344_v54 = vshll.u32 %v2934_v1, 16  ;;  %v350_v55 = vrot.slane %v348_v3, 4  ;;  %v2761_v3 = vld [vmem:[%s4100_s1 + $0x60] sm:$0xff]  }
  0x47   : > { %v299_v56 = vsel %vm3061_vm5, %v294_v48, %v298_v29  ;;  %v309_v5 = vsel %vm3061_vm5, %v304_v49, %v308_v31  ;;  %v591_v57 = vor.u32 %v590_v50, %v586_v43  ;;  %v354_v6 = vshll.u32 %v3066_v47, 16  ;;  %2528 = vmatprep.subr.bf16.mxu0 %v2761_v3  ;;  %2690 = vmatprep.subr.bf16.mxu1 %v2761_v3  ;;  %v3125_v48 = vld [vmem:[%s2928_s9 + $0x24] sm:$0xf] }
  0x48   : > { %v2380_v59 = vcombine.low %v299_v56, %v309_v5  ;;  %v582_v60 = vrot.slane %v581_v52, 4  ;;  %v342_v61 = vrot.slane %v341_v53, 4  ;;  %v346_v62 = vrot.slane %v344_v54, 5  ;;  %2529 = vmatpush3.bf16.msra.mxu0 %v2762_v24  ;;  %2698 = vmatpush3.bf16.msra.mxu1 %v2762_v24 }
  0x49   : > { %v592_v8 = vrot.slane %v591_v57, 4  ;;  %v356_v22 = vrot.slane %v354_v6, 5  ;;  %v3091_v23 = vcombine.low %v3003_v34, %v3011_v36  ;;  %v625_v25 = vrot.slane %v623_v11, 4  ;;  %v2763_v11 = vld [vmem:[%s4100_s1 + $0x68] sm:$0xff]  }
  0x4a   : > { %997 = vrot.lane.b32.xlu0 %v2380_v59, %s2840_s26  ;;  %v587_v29 = vsel %vm3061_vm5, %v582_v60, %v586_v43  ;;  %v347_v27 = vsel %vm3061_vm5, %v342_v61, %v346_v62  ;;  %v351_v30 = vor.u32 %v350_v55, %v346_v62  ;;  %v628_v31 = vrot.slane %v626_v12, 5  ;;  %v2764_v12 = vld [vmem:[%s4100_s1 + $0x28] sm:$0xff]   ;;  %2530 = vmatprep.subr.bf16.mxu0 %v2763_v11  ;;  %v2767_v60 = vld [vmem:[%s4100_s1 + $0x30] sm:$0xff]  }
  0x4b   : > { %v597_v32 = vsel %vm3061_vm5, %v592_v8, %v596_v51  ;;  %v632_v33 = vshll.u32 %v2947_v7, 16  ;;  %v638_v28 = vrot.slane %v636_v9, 4  ;;  %v642_v35 = vshll.u32 %v3084_v63, 16  ;;  %v3140_v55 = vld [vmem:[%s2928_s9 + $0x28] sm:$0xf]  ;;  %2691 = vmatprep.subr.bf16.mxu1 %v2763_v11 }
  0x4c   : > { %v3117_v38 = vcombine.low %v587_v29, %v597_v32  ;;  %v352_v39 = vrot.slane %v351_v30, 4  ;;  %v629_v40 = vor.u32 %v628_v31, %v625_v25  ;;  %v313_v42 = vrot.slane %v311_v16, 4  ;;  %v3150_v59 = vld [vmem:[%s2928_s9 + $0x2c] sm:$0x1]  ;;  %2531 = vmatpush3.bf16.msra.mxu0 %v2764_v12  ;;  %2699 = vmatpush3.bf16.msra.mxu1 %v2764_v12 }
  0x4d   : > { %v634_v43 = vrot.slane %v632_v33, 5  ;;  %v644_v44 = vrot.slane %v642_v35, 5  ;;  %v316_v45 = vrot.slane %v314_v17, 5  ;;  %v320_v9 = vshll.u32 %v2968_v15, 16  ;;  %v2766_v17 = vld [vmem:[%s4100_s1 + $0x70] sm:$0xff]  }
  0x4e   : > { %1021 = vrot.lane.b32.xlu1 %v3117_v38, %s2840_s26  ;;  %v357_v49 = vsel %vm3061_vm5, %v352_v39, %v356_v22  ;;  %v630_v50 = vrot.slane %v629_v40, 4  ;;  %v326_v16 = vrot.slane %v324_v20, 4  ;;  %v330_v13 = vshll.u32 %v2973_v18, 16  ;;  %2532 = vmatprep.subr.bf16.mxu0 %v2766_v17 }
  0x4f   : > { %v3137_v51 = vcombine.low %v347_v27, %v357_v49  ;;  %v639_v52 = vor.u32 %v638_v28, %v634_v43  ;;  %v317_v53 = vor.u32 %v316_v45, %v313_v42  ;;  %v322_v54 = vrot.slane %v320_v9, 5  ;;  %2692 = vmatprep.subr.bf16.mxu1 %v2766_v17  ;;  %v2771_v28 = vld [vmem:[%s4100_s1 + $0x38] sm:$0xff]   ;;  %v3194_v9 = vld [vmem:[%s2928_s9 + $0xb4] sm:$0xf] }
  0x50   : > { %v635_v15 = vsel %vm3061_vm5, %v630_v50, %v634_v43  ;;  %v332_v20 = vrot.slane %v330_v13, 5  ;;  %v2348_v18 = vrot.slane %v2931_v0, 9  ;;  %v737_v56 = vrot.slane %v2934_v1, 5  ;;  %2533 = vmatpush3.bf16.msra.mxu0 %v2767_v60  ;;  %2700 = vmatpush3.bf16.msra.mxu1 %v2767_v60 }
  0x51   : > { %1220 = vrot.lane.b32.xlu0 %v3137_v51, %s2839_s23  ;;  %v640_v5 = vrot.slane %v639_v52, 4  ;;  %v318_v57 = vrot.slane %v317_v53, 4  ;;  %v327_v6 = vor.u32 %v326_v16, %v322_v54  ;;  %v740_v58 = vrot.slane %v3066_v47, 5  ;;  %v2769_v47 = vld [vmem:[%s4100_s1 + $0x78] sm:$0xff]  }
  0x52   : > { %1136 = vrot.lane.b32.xlu1 %v3091_v23, %s2839_s23  ;;  %v738_v0 = vsel %vm2977_vm2, %v2348_v18, %v737_v56  ;;  %v739_v1 = vrot.slane %v737_v56, 4  ;;  %v359_v61 = vshrl.u32 %v3125_v48, 16  ;;  %v362_v62 = vshll.u32 %v3125_v48, 16  ;;  %2534 = vmatprep.subr.bf16.mxu0 %v2769_v47  ;;  %v3205_v56 = vld [vmem:[%s2928_s9 + $0xb8] sm:$0xf] }
  0x53   : > { %v645_v3 = vsel %vm3061_vm5, %v640_v5, %v644_v44  ;;  %v323_v8 = vsel %vm3061_vm5, %v318_v57, %v322_v54  ;;  %v328_v22 = vrot.slane %v327_v6, 4  ;;  %v372_v25 = vshrl.u32 %v3140_v55, 16  ;;  %2693 = vmatprep.subr.bf16.mxu1 %v2769_v47  ;;  %v3211_v6 = vld [vmem:[%s2928_s9 + $0xbc] sm:$0x1] }
  0x54   : > { %v3169_v24 = vcombine.low %v635_v15, %v645_v3  ;;  %v741_v29 = vsel %vm2977_vm2, %v739_v1, %v740_v58  ;;  %v3175_v27 = vcombine.low %v3125_v48, %v3140_v55  ;;  %v361_v30 = vrot.slane %v359_v61, 4  ;;  %2535 = vmatpush3.bf16.msra.mxu0 %v2771_v28  ;;  %2701 = vmatpush3.bf16.msra.mxu1 %v2771_v28 }
  0x55   : > { %v333_v31 = vsel %vm3061_vm5, %v328_v22, %v332_v20  ;;  %v3179_v11 = vcombine.low %v738_v0, %v741_v29  ;;  %v364_v32 = vrot.slane %v362_v62, 5  ;;  %v368_v33 = vshll.u32 %v3140_v55, 16 }
  0x56   : > { %1244 = vrot.lane.b32.xlu0 %v3169_v24, %s2839_s23  ;;  %v3187_v35 = vcombine.low %v323_v8, %v333_v31  ;;  %v374_v12 = vrot.slane %v372_v25, 4  ;;  %v378_v39 = vshll.u32 %v3150_v59, 16  ;;  %v599_v40 = vshrl.u32 %v3003_v34, 16  ;;  %v3231_v25 = vld [vmem:[%s2928_s9 + $0x30] sm:$0xf] }
  0x57   : > { %v365_v42 = vor.u32 %v364_v32, %v361_v30  ;;  %v370_v43 = vrot.slane %v368_v33, 5  ;;  %v602_v44 = vshll.u32 %v3003_v34, 16  ;;  %v608_v45 = vshll.u32 %v3011_v36, 16 }
  0x58   : > { %999 = vrot.lane.b32.xlu1 %v3187_v35, %s2840_s26  ;;  %v380_v49 = vrot.slane %v378_v39, 5  ;;  %v601_v50 = vrot.slane %v599_v40, 4  ;;  %v612_v16 = vshrl.u32 %v3011_v36, 16  ;;  %v618_v13 = vshll.u32 %v3014_v37, 16 }
  0x59   : > { %v366_v17 = vrot.slane %v365_v42, 4  ;;  %v375_v52 = vor.u32 %v374_v12, %v370_v43  ;;  %v604_v34 = vrot.slane %v602_v44, 5  ;;  %v610_v53 = vrot.slane %v608_v45, 5  ;;  %v3242_v12 = vld [vmem:[%s2928_s9 + $0x34] sm:$0xf] }
  0x5a   : > { %1152 = vrot.lane.b32.xlu0 %v3179_v11, %s2840_s26  ;;  %v614_v54 = vrot.slane %v612_v16, 4  ;;  %v620_v15 = vrot.slane %v618_v13, 5  ;;  %v2360_v20 = vrot.slane %v2937_v2, 9  ;;  %v821_v18 = vrot.slane %v2947_v7, 5  ;;  %v3255_v13 = vld [vmem:[%s2928_s9 + $0x38] sm:$0x1] }
  0x5b   : > { %v371_v36 = vsel %vm3061_vm5, %v366_v17, %v370_v43  ;;  %v376_v37 = vrot.slane %v375_v52, 4  ;;  %v605_v5 = vor.u32 %v604_v34, %v601_v50  ;;  %v824_v57 = vrot.slane %v3084_v63, 5 }
  0x5c   : > { %1079 = vrot.lane.b32.xlu1 %v3024_v46, %s2838_s18  ;;  %v615_v58 = vor.u32 %v614_v54, %v610_v53  ;;  %v823_v2 = vrot.slane %v821_v18, 4  ;;  %v647_v7 = vshrl.u32 %v3194_v9, 16  ;;  %v650_v1 = vshll.u32 %v3194_v9, 16 }
  0x5d   : > { %v381_v60 = vsel %vm3061_vm5, %v376_v37, %v380_v49  ;;  %v606_v0 = vrot.slane %v605_v5, 4  ;;  %v660_v61 = vshrl.u32 %v3205_v56, 16  ;;  %v822_v62 = vsel %vm2977_vm2, %v2360_v20, %v821_v18 }
  0x5e   : > { %1187 = vrot.lane.b32.xlu0 %v3175_v27, %s2838_s18  ;;  %v3222_v63 = vcombine.low %v371_v36, %v381_v60  ;;  %v616_v46 = vrot.slane %v615_v58, 4  ;;  %v825_v3 = vsel %vm2977_vm2, %v823_v2, %v824_v57  ;;  %v649_v8 = vrot.slane %v647_v7, 4  ;;  %v3282_v60 = vld [vmem:[%s2928_s9 + $0xc0] sm:$0xf] }
  0x5f   : > { %v611_v47 = vsel %vm3061_vm5, %v606_v0, %v610_v53  ;;  %v652_v22 = vrot.slane %v650_v1, 5  ;;  %v656_v30 = vshll.u32 %v3205_v56, 16  ;;  %v662_v31 = vrot.slane %v660_v61, 4  ;;  %v3287_v0 = vld [vmem:[%s2928_s9 + $0xc4] sm:$0xf] }
  0x60   : > { %1114 = vrot.lane.b32.xlu1 %v2942_v4, %s2839_s23  ;;  %v621_v29 = vsel %vm3061_vm5, %v616_v46, %v620_v15  ;;  %v666_v32 = vshll.u32 %v3211_v6, 16  ;;  %v3246_v39 = vcombine.low %v822_v62, %v825_v3  ;;  %v383_v42 = vshrl.u32 %v3231_v25, 16 }
  0x61   : > { %v3239_v33 = vcombine.low %v611_v47, %v621_v29  ;;  %v653_v28 = vor.u32 %v652_v22, %v649_v8  ;;  %v658_v40 = vrot.slane %v656_v30, 5  ;;  %v744_v44 = vrot.slane %v3140_v55, 5 }
  0x62   : > { %1222 = vrot.lane.b32.xlu0 %v3222_v63, %s2839_s23  ;;  %4125 = vst [vmem:[#allocation6_spill] sm:$0xff] %v3246_v39  ;;  %v386_v45 = vshll.u32 %v3231_v25, 16  ;;  %v668_v50 = vrot.slane %v666_v32, 5  ;;  %v396_v16 = vshrl.u32 %v3242_v12, 16  ;;  %v3259_v17 = vcombine.low %v3194_v9, %v3205_v56 }
  0x63   : > { %v654_v43 = vrot.slane %v653_v28, 4  ;;  %v663_v49 = vor.u32 %v662_v31, %v658_v40  ;;  %v2349_v52 = vrot.slane %v3125_v48, 9  ;;  %v392_v34 = vshll.u32 %v3242_v12, 16 }
  0x64   : > { %1023 = vrot.lane.b32.xlu1 %v3239_v33, %s2840_s26  ;;  %v747_v53 = vrot.slane %v3150_v59, 5  ;;  %v385_v54 = vrot.slane %v383_v42, 4  ;;  %v388_v15 = vrot.slane %v386_v45, 5  ;;  %v746_v18 = vrot.slane %v744_v44, 4 }
  0x65   : > { %v664_v55 = vrot.slane %v663_v49, 4  ;;  %v659_v20 = vsel %vm3061_vm5, %v654_v43, %v658_v40  ;;  %v394_v36 = vrot.slane %v392_v34, 5  ;;  %v398_v37 = vrot.slane %v396_v16, 4  ;;  %v3313_v43 = vld [vmem:[%s2928_s9 + $0xc8] sm:$0x1] }
  0x66   : > { %1176 = vrot.lane.b32.xlu0 %v3246_v39, %s2840_s26  ;;  %v402_v5 = vshll.u32 %v3255_v13, 16  ;;  %v389_v57 = vor.u32 %v388_v15, %v385_v54  ;;  %v745_v58 = vsel %vm2977_vm2, %v2349_v52, %v744_v44  ;;  %v748_v2 = vsel %vm2977_vm2, %v746_v18, %v747_v53  ;;  %v3332_v53 = vld [vmem:[%s2928_s9 + $0x40] sm:$0xf] }
  0x67   : > { %v669_v48 = vsel %vm3061_vm5, %v664_v55, %v668_v50  ;;  %v399_v7 = vor.u32 %v398_v37, %v394_v36  ;;  %v828_v61 = vrot.slane %v3205_v56, 5  ;;  %v3292_v46 = vcombine.low %v745_v58, %v748_v2  ;;  %v3327_v55 = vld [vmem:[%s2928_s9 + $0x3c] sm:$0xf] }
  0x68   : > { %1103 = vrot.lane.b32.xlu1 %v3045_v14, %s2838_s18  ;;  %v3275_v59 = vcombine.low %v659_v20, %v669_v48  ;;  %v404_v1 = vrot.slane %v402_v5, 5  ;;  %v390_v62 = vrot.slane %v389_v57, 4  ;;  %v834_v47 = vshrl.u32 %v3282_v60, 16  ;;  %v3579_v14 = vld [vmem:[%s2928_s9 + $0x74] sm:$0x1] }
  0x69   : > { %v400_v3 = vrot.slane %v399_v7, 4  ;;  %v837_v8 = vshll.u32 %v3282_v60, 16  ;;  %v847_v22 = vshrl.u32 %v3287_v0, 16  ;;  %v843_v29 = vshll.u32 %v3287_v0, 16 }
  0x6a   : > { %1211 = vrot.lane.b32.xlu0 %v3259_v17, %s2838_s18  ;;  %v3302_v56 = vcombine.low %v3231_v25, %v3242_v12  ;;  %v2361_v30 = vrot.slane %v3194_v9, 9  ;;  %v395_v31 = vsel %vm3061_vm5, %v390_v62, %v394_v36  ;;  %v830_v32 = vrot.slane %v828_v61, 4 }
  0x6b   : > { %v831_v28 = vrot.slane %v3211_v6, 5  ;;  %v836_v40 = vrot.slane %v834_v47, 4  ;;  %v405_v42 = vsel %vm3061_vm5, %v400_v3, %v404_v1  ;;  %v839_v44 = vrot.slane %v837_v8, 5  ;;  %v3358_v3 = vld [vmem:[%s2928_s9 + $0x44] sm:$0x1] }
  0x6c   : > { %1138 = vrot.lane.b32.xlu1 %v2955_v10, %s2839_s23  ;;  %v845_v45 = vrot.slane %v843_v29, 5  ;;  %v849_v9 = vrot.slane %v847_v22, 4  ;;  %v3319_v49 = vcombine.low %v395_v31, %v405_v42  ;;  %v829_v6 = vsel %vm2977_vm2, %v2361_v30, %v828_v61 }
  0x6d   : > { %v832_v50 = vsel %vm2977_vm2, %v830_v32, %v831_v28  ;;  %v853_v16 = vshll.u32 %v3313_v43, 16  ;;  %v840_v52 = vor.u32 %v839_v44, %v836_v40  ;;  %v751_v20 = vrot.slane %v3242_v12, 5  ;;  %v3372_v28 = vld [vmem:[%s2928_s9 + $0xcc] sm:$0xf]  ;;  %v3377_v40 = vld [vmem:[%s2928_s9 + $0xd0] sm:$0xf] }
  0x6e   : > { %1246 = vrot.lane.b32.xlu0 %v3275_v59, %s2839_s23  ;;  %v850_v34 = vor.u32 %v849_v9, %v845_v45  ;;  %v3334_v54 = vcombine.low %v829_v6, %v832_v50  ;;  %v407_v18 = vshrl.u32 %v3327_v55, 16  ;;  %v410_v36 = vshll.u32 %v3327_v55, 16 }
  0x6f   : > { %v855_v15 = vrot.slane %v853_v16, 5  ;;  %v841_v37 = vrot.slane %v840_v52, 4  ;;  %v420_v5 = vshrl.u32 %v3332_v53, 16  ;;  %v416_v57 = vshll.u32 %v3332_v53, 16 }
  0x70   : > { %1001 = vrot.lane.b32.xlu1 %v3137_v51, %s2840_s26  ;;  %4126 = vst [vmem:[#allocation7_spill] sm:$0xff] %v3334_v54  ;;  %v851_v48 = vrot.slane %v850_v34, 4  ;;  %v3347_v58 = vcombine.low %v3282_v60, %v3287_v0  ;;  %v2350_v12 = vrot.slane %v3231_v25, 9  ;;  %v753_v2 = vrot.slane %v751_v20, 4 }
  0x71   : > { %v754_v7 = vrot.slane %v3255_v13, 5  ;;  %v409_v1 = vrot.slane %v407_v18, 4  ;;  %v412_v61 = vrot.slane %v410_v36, 5  ;;  %v846_v62 = vsel %vm3061_vm5, %v841_v37, %v845_v45 }
  0x72   : > { %1154 = vrot.lane.b32.xlu0 %v3292_v46, %s2840_s26  ;;  %v856_v47 = vsel %vm3061_vm5, %v851_v48, %v855_v15  ;;  %v418_v8 = vrot.slane %v416_v57, 5  ;;  %v422_v25 = vrot.slane %v420_v5, 4  ;;  %v752_v13 = vsel %vm2977_vm2, %v2350_v12, %v751_v20  ;;  %v3403_v5 = vld [vmem:[%s2928_s9 + $0xd4] sm:$0x1] }
  0x73   : > { %v3366_v22 = vcombine.low %v846_v62, %v856_v47  ;;  %v755_v29 = vsel %vm2977_vm2, %v753_v2, %v754_v7  ;;  %v413_v30 = vor.u32 %v412_v61, %v409_v1  ;;  %v426_v31 = vshll.u32 %v3358_v3, 16  ;;  %v3417_v47 = vld [vmem:[%s2928_s9 + $0x48] sm:$0xf] }
  0x74   : > { %1081 = vrot.lane.b32.xlu1 %v3179_v11, %s2838_s18  ;;  %v423_v32 = vor.u32 %v422_v25, %v418_v8  ;;  %v3379_v42 = vcombine.low %v752_v13, %v755_v29  ;;  %v862_v9 = vrot.slane %v3287_v0, 5  ;;  %v868_v6 = vshrl.u32 %v3372_v28, 16  ;;  %v3429_v13 = vld [vmem:[%s4100_s1 + $0x80] sm:$0xff]  }
  0x75   : > { %v414_v44 = vrot.slane %v413_v30, 4  ;;  %v428_v45 = vrot.slane %v426_v31, 5  ;;  %v871_v16 = vshll.u32 %v3372_v28, 16  ;;  %v881_v52 = vshrl.u32 %v3377_v40, 16  ;;  %2650 = vmatprep.subr.bf16.mxu1 %v3429_v13 }
  0x76   : > { %1189 = vrot.lane.b32.xlu0 %v3302_v56, %s2838_s18  ;;  %v424_v50 = vrot.slane %v423_v32, 4  ;;  %v877_v34 = vshll.u32 %v3377_v40, 16  ;;  %v3392_v15 = vcombine.low %v3327_v55, %v3332_v53  ;;  %v2362_v20 = vrot.slane %v3282_v60, 9 }
  0x77   : > { %v419_v0 = vsel %vm3061_vm5, %v414_v44, %v418_v8  ;;  %v864_v18 = vrot.slane %v862_v9, 4  ;;  %v865_v36 = vrot.slane %v3313_v43, 5  ;;  %v870_v37 = vrot.slane %v868_v6, 4  ;;  %v3422_v8 = vld [vmem:[%s2928_s9 + $0x4c] sm:$0xf] }
  0x78   : > { %1116 = vrot.lane.b32.xlu1 %v3175_v27, %s2839_s23  ;;  %4127 = vst [vmem:[#allocation8_spill] sm:$0xff] %v3392_v15  ;;  %v429_v48 = vsel %vm3061_vm5, %v424_v50, %v428_v45  ;;  %v873_v57 = vrot.slane %v871_v16, 5  ;;  %v879_v12 = vrot.slane %v877_v34, 5  ;;  %v883_v60 = vrot.slane %v881_v52, 4 }
  0x79   : > { %v3409_v2 = vcombine.low %v419_v0, %v429_v48  ;;  %v863_v43 = vsel %vm2977_vm2, %v2362_v20, %v862_v9  ;;  %v866_v7 = vsel %vm2977_vm2, %v864_v18, %v865_v36  ;;  %v887_v1 = vshll.u32 %v3403_v5, 16 }
  0x7a   : > { %1224 = vrot.lane.b32.xlu0 %v3319_v49, %s2839_s23  ;;  %v874_v61 = vor.u32 %v873_v57, %v870_v37  ;;  %v884_v62 = vor.u32 %v883_v60, %v879_v12  ;;  %v3424_v25 = vcombine.low %v863_v43, %v866_v7  ;;  %v758_v30 = vrot.slane %v3332_v53, 5  ;;  %v3460_v7 = vld [vmem:[%s2928_s9 + $0x54] sm:$0xf] }
  0x7b   : > { %v889_v29 = vrot.slane %v887_v1, 5  ;;  %v431_v31 = vshrl.u32 %v3417_v47, 16  ;;  %v434_v32 = vshll.u32 %v3417_v47, 16  ;;  %v444_v9 = vshrl.u32 %v3422_v8, 16  ;;  %v3465_v1 = vld [vmem:[%s2928_s9 + $0x58] sm:$0xf] }
  0x7c   : > { %1025 = vrot.lane.b32.xlu1 %v3169_v24, %s2840_s26  ;;  %4128 = vst [vmem:[#allocation9_spill] sm:$0xff] %v3424_v25  ;;  %v875_v44 = vrot.slane %v874_v61, 4  ;;  %v885_v45 = vrot.slane %v884_v62, 4  ;;  %v440_v6 = vshll.u32 %v3422_v8, 16  ;;  %v2415_v50 = vcombine.low %v3372_v28, %v3377_v40 }
  0x7d   : > { %v2351_v53 = vrot.slane %v3327_v55, 9  ;;  %v760_v16 = vrot.slane %v758_v30, 4  ;;  %v761_v52 = vrot.slane %v3358_v3, 5  ;;  %v433_v34 = vrot.slane %v431_v31, 4  ;;  %v249_v55 = vld [vmem:[%s2928_s9 + $0x50] sm:$0x1] }
  0x7e   : > { %1178 = vrot.lane.b32.xlu0 %v3334_v54, %s2840_s26  ;;  %v436_v20 = vrot.slane %v434_v32, 5  ;;  %v880_v0 = vsel %vm3061_vm5, %v875_v44, %v879_v12  ;;  %v890_v18 = vsel %vm3061_vm5, %v885_v45, %v889_v29  ;;  %v442_v36 = vrot.slane %v440_v6, 5 }
  0x7f   : > { %v446_v37 = vrot.slane %v444_v9, 4  ;;  %v2416_v48 = vcombine.low %v880_v0, %v890_v18  ;;  %v759_v3 = vsel %vm2977_vm2, %v2351_v53, %v758_v30  ;;  %v762_v57 = vsel %vm2977_vm2, %v760_v16, %v761_v52  ;;  %v252_v0 = vld [vmem:[%s2928_s9 + $0x5c] sm:$0x1] }
  0x80   : > { %1105 = vrot.lane.b32.xlu1 %v3246_v39, %s2838_s18  ;;  %v437_v60 = vor.u32 %v436_v20, %v433_v34  ;;  %v450_v43 = vshll.u32 %v249_v55, 16  ;;  %v3467_v61 = vcombine.low %v759_v3, %v762_v57  ;;  %v765_v29 = vrot.slane %v3422_v8, 5  ;;  %v3500_v57 = vld [vmem:[%s2928_s9 + $0x60] sm:$0xf] }
  0x81   : > { %v447_v12 = vor.u32 %v446_v37, %v442_v36  ;;  %v455_v30 = vshrl.u32 %v3460_v7, 16  ;;  %v458_v31 = vshll.u32 %v3460_v7, 16  ;;  %v468_v45 = vshrl.u32 %v3465_v1, 16 }
  0x82   : > { %1213 = vrot.lane.b32.xlu0 %v3347_v58, %s2838_s18  ;;  %v438_v62 = vrot.slane %v437_v60, 4  ;;  %v452_v44 = vrot.slane %v450_v43, 5  ;;  %v3479_v9 = vcombine.low %v3417_v47, %v3422_v8  ;;  %v2352_v6 = vrot.slane %v3417_v47, 9 }
  0x83   : > { %v448_v32 = vrot.slane %v447_v12, 4  ;;  %v768_v53 = vrot.slane %v249_v55, 5  ;;  %v457_v16 = vrot.slane %v455_v30, 4  ;;  %v460_v52 = vrot.slane %v458_v31, 5  ;;  %v3507_v12 = vld [vmem:[%s2928_s9 + $0x64] sm:$0xf] }
  0x84   : > { %1140 = vrot.lane.b32.xlu1 %v3259_v17, %s2839_s23  ;;  %4129 = vst [vmem:[#allocation10_spill] sm:$0xff] %v3479_v9  ;;  %v443_v34 = vsel %vm3061_vm5, %v438_v62, %v442_v36  ;;  %v470_v18 = vrot.slane %v468_v45, 4  ;;  %v766_v47 = vsel %vm2977_vm2, %v2352_v6, %v765_v29  ;;  %v772_v31 = vrot.slane %v3465_v1, 5 }
  0x85   : > { %v453_v20 = vsel %vm3061_vm5, %v448_v32, %v452_v44  ;;  %v461_v55 = vor.u32 %v460_v52, %v457_v16  ;;  %v479_v32 = vshrl.u32 %v3500_v57, 16  ;;  %v482_v45 = vshll.u32 %v3500_v57, 16 }
  0x86   : > { %1248 = vrot.lane.b32.xlu0 %v3366_v22, %s2839_s23  ;;  %v3495_v37 = vcombine.low %v443_v34, %v453_v20  ;;  %v488_v6 = vshll.u32 %v3507_v12, 16  ;;  %v774_v34 = vrot.slane %v772_v31, 4  ;;  %v775_v20 = vrot.slane %v252_v0, 5 }
  0x88   : > { %1003 = vrot.lane.b32.xlu1 %v3222_v63, %s2840_s26  ;;  %4130 = vst [vmem:[#allocation11_spill] sm:$0xff] %v3495_v37 }
  0x8a   : > { %1156 = vrot.lane.b32.xlu0 %v3379_v42, %s2840_s26 }
  0x8c   : > { %1083 = vrot.lane.b32.xlu1 %v3292_v46, %s2838_s18 }
  0x8e   : > { %1191 = vrot.lane.b32.xlu0 %v3392_v15, %s2838_s18 }
  0x90   : > { %1118 = vrot.lane.b32.xlu1 %v3302_v56, %s2839_s23 }
  0x92   : > { %1226 = vrot.lane.b32.xlu0 %v3409_v2, %s2839_s23 }
  0x94   : > { %1027 = vrot.lane.b32.xlu1 %v3275_v59, %s2840_s26 }
  0x96   : > { %1180 = vrot.lane.b32.xlu0 %v3424_v25, %s2840_s26 }
  0x98   : > { %1107 = vrot.lane.b32.xlu1 %v3334_v54, %s2838_s18  ;;  %v2354_v54 = vrot.slane %v3500_v57, 9 }
  0x9a   : > { %1215 = vrot.lane.b32.xlu0 %v2415_v50, %s2838_s18  ;;  %v767_v50 = vrot.slane %v765_v29, 4  ;;  %v462_v29 = vrot.slane %v461_v55, 4  ;;  %v490_v55 = vrot.slane %v488_v6, 5 }
  0x9c   : > { %1142 = vrot.lane.b32.xlu1 %v3347_v58, %s2839_s23  ;;  %v464_v58 = vshll.u32 %v3465_v1, 16  ;;  %v769_v36 = vsel %vm2977_vm2, %v767_v50, %v768_v53  ;;  %v3524_v50 = vcombine.low %v3460_v7, %v3465_v1  ;;  %v2353_v53 = vrot.slane %v3460_v7, 9 }
  0x9d   : > { %v3509_v43 = vcombine.low %v766_v47, %v769_v36  ;;  %v255_v36 = vld [vmem:[%s2928_s9 + $0x68] sm:$0x1]  ;;  %v484_v1 = vrot.slane %v482_v45, 5 }
  0x9e   : > { %1250 = vrot.lane.b32.xlu0 %v2416_v48, %s2839_s23  ;;  %v466_v8 = vrot.slane %v464_v58, 5  ;;  %v474_v48 = vshll.u32 %v252_v0, 16  ;;  %v492_v58 = vshrl.u32 %v3507_v12, 16  ;;  %v773_v0 = vsel %vm2977_vm2, %v2353_v53, %v772_v31 }
  0x9f   : > { %4131 = vst [vmem:[#allocation12_spill] sm:$0xff] %v3509_v43  ;;  %v782_v39 = vrot.slane %v255_v36, 5 }
  0xa0   : > { %1005 = vrot.lane.b32.xlu1 %v3319_v49, %s2840_s26  ;;  %v471_v3 = vor.u32 %v470_v18, %v466_v8  ;;  %v476_v30 = vrot.slane %v474_v48, 5  ;;  %v467_v16 = vsel %vm3061_vm5, %v462_v29, %v466_v8  ;;  %v481_v18 = vrot.slane %v479_v32, 4 }
  0xa1   : > { %v494_v7 = vrot.slane %v492_v58, 4  ;;  %v498_v29 = vshll.u32 %v255_v36, 16  ;;  %v3552_v58 = vld [vmem:[%s2928_s9 + $0x70] sm:$0xf] }
  0xa2   : > { %1158 = vrot.lane.b32.xlu0 %v3467_v61, %s2840_s26  ;;  %v472_v44 = vrot.slane %v471_v3, 4  ;;  %v776_v3 = vsel %vm2977_vm2, %v774_v34, %v775_v20 }
  0xa3   : > { %v495_v32 = vor.u32 %v494_v7, %v490_v55  ;;  %v3554_v6 = vcombine.low %v773_v0, %v776_v3  ;;  %v500_v53 = vrot.slane %v498_v29, 5  ;;  %v512_v7 = vshll.u32 %v3552_v58, 16  ;;  %v2777_v3 = vld [vmem:[%s2928_s9] sm:$0xf]  ;;  %v2778_v29 = vld [vmem:[%s2928_s9 + $0x4] sm:$0xf] }
  0xa4   : > { %1085 = vrot.lane.b32.xlu1 %v3379_v42, %s2838_s18  ;;  %v477_v47 = vsel %vm3061_vm5, %v472_v44, %v476_v30  ;;  %v485_v30 = vor.u32 %v484_v1, %v481_v18  ;;  %v3547_v44 = vld [vmem:[%s2928_s9 + $0x6c] sm:$0xf]  ;;  %v516_v1 = vshrl.u32 %v3552_v58, 16  ;;  %v3569_v0 = vcombine.low %v3500_v57, %v3507_v12 }
  0xa5   : > { %v3540_v8 = vcombine.low %v467_v16, %v477_v47  ;;  %v779_v16 = vrot.slane %v3507_v12, 5  ;;  %v503_v34 = vshrl.u32 %v3547_v44, 16  ;;  %v506_v20 = vshll.u32 %v3547_v44, 16 }
  0xa6   : > { %1193 = vrot.lane.b32.xlu0 %v3479_v9, %s2838_s18  ;;  %v486_v18 = vrot.slane %v485_v30, 4  ;;  %v496_v47 = vrot.slane %v495_v32, 4  ;;  %v2364_v25 = vcombine.low %v2777_v3, %v2778_v29  ;;  %v3585_v29 = vrot.slane %v512_v7, 5  ;;  %v3601_v7 = vld [vmem:[%s2928_s9 + $0x78] sm:$0xf] }
  0xa7   : > { %v781_v32 = vrot.slane %v779_v16, 4  ;;  %v518_v57 = vrot.slane %v516_v1, 4 }
  0xa8   : > { %1120 = vrot.lane.b32.xlu1 %v3392_v15, %s2839_s23  ;;  %v3504_v60 = vpop.permute.xlu1 %1185  ;;  %v491_v12 = vsel %vm3061_vm5, %v486_v18, %v490_v55  ;;  %v501_v3 = vsel %vm3061_vm5, %v496_v47, %v500_v53  ;;  %v780_v53 = vsel %vm2977_vm2, %v2354_v54, %v779_v16  ;;  %v527_v16 = vshrl.u32 %v3601_v7, 16 }
  0xa9   : > { %v3513_v62 = vpop.permute.xlu0 %1209  ;;  %v3592_v55 = vcombine.low %v491_v12, %v501_v3  ;;  %v519_v1 = vor.u32 %v518_v57, %v3585_v29  ;;  %v2779_v12 = vld [vmem:[%s2928_s9 + $0x90] sm:$0xf]  ;;  %v2780_v3 = vld [vmem:[%s2928_s9 + $0x94] sm:$0xf] }
  0xaa   : > { %1228 = vrot.lane.b32.xlu0 %v3495_v37, %s2839_s23 }
  0xac   : > { %1007 = vrot.lane.b32.xlu1 %v3409_v2, %s2840_s26  ;;  %v3531_v52 = vpop.permute.xlu1 %1112 }
  0xae   : > { %1160 = vrot.lane.b32.xlu0 %v3509_v43, %s2840_s26 }
  0xb0   : > { %1087 = vrot.lane.b32.xlu1 %v3467_v61, %s2838_s18  ;;  %v1151_v48 = vpop.permute.xlu0 %1150 }
  0xb1   : > { %v1388_v15 = vsel %vm1255_vm6, %v3187_v35, %v1151_v48 }
  0xb2   : > { %1195 = vrot.lane.b32.xlu0 %v3524_v50, %s2838_s18  ;;  %v1078_v45 = vpop.permute.xlu1 %1077 }
  0xb4   : > { %1122 = vrot.lane.b32.xlu1 %v3479_v9, %s2839_s23  ;;  %v3558_v31 = vpop.permute.xlu0 %1174  ;;  %v505_v9 = vrot.slane %v503_v34, 4  ;;  %v522_v34 = vshll.u32 %v3579_v14, 16 }
  0xb6   : > { %1230 = vrot.lane.b32.xlu0 %v3540_v8, %s2839_s23  ;;  %v3576_v30 = vpop.permute.xlu1 %1101 }
  0xb8   : > { %1009 = vrot.lane.b32.xlu1 %v3495_v37, %s2840_s26  ;;  %v508_v37 = vrot.slane %v506_v20, 5  ;;  %v783_v20 = vsel %vm2977_vm2, %v781_v32, %v782_v39  ;;  %v3612_v39 = vld [vmem:[%s2928_s9 + $0x7c] sm:$0xf]  ;;  %v530_v32 = vshll.u32 %v3601_v7, 16 }
  0xba   : > { %1162 = vrot.lane.b32.xlu0 %v3554_v6, %s2840_s26  ;;  %v509_v18 = vor.u32 %v508_v37, %v505_v9  ;;  %v3614_v9 = vcombine.low %v780_v53, %v783_v20  ;;  %v786_v37 = vrot.slane %v3552_v58, 5  ;;  %v520_v53 = vrot.slane %v519_v1, 4 }
  0xbb   : > { %v540_v20 = vshrl.u32 %v3612_v39, 16  ;;  %v789_v1 = vrot.slane %v3579_v14, 5 }
  0xbc   : > { %1089 = vrot.lane.b32.xlu1 %v3509_v43, %s2838_s18  ;;  %v998_v36 = vpop.permute.xlu0 %997  ;;  %v3609_v43 = vcombine.low %v2779_v12, %v2780_v3  ;;  %v510_v48 = vrot.slane %v509_v18, 4  ;;  %v2355_v18 = vrot.slane %v3547_v44, 9 }
  0xbd   : > { %v1258_v47 = vsel %vm1255_vm6, %v2364_v25, %v998_v36  ;;  %v524_v25 = vrot.slane %v522_v34, 5  ;;  %v1435_v36 = vsel %vm1304_vm7, %v1388_v15, %v3504_v60  ;;  %v536_v34 = vshll.u32 %v3612_v39, 16 }
  0xbe   : > { %1197 = vrot.lane.b32.xlu0 %v3569_v0, %s2838_s18  ;;  %v1306_v35 = vsel %vm1304_vm7, %v1258_v47, %v1078_v45  ;;  %v1424_v47 = vsel %vm1255_vm6, %v3239_v33, %v3558_v31  ;;  %v788_v60 = vrot.slane %v786_v37, 4  ;;  %v529_v31 = vrot.slane %v527_v16, 4 }
  0xbf   : > { %v1339_v15 = vsel %vm1337_vm8, %v1306_v35, %v3531_v52  ;;  %v515_v52 = vsel %vm3061_vm5, %v510_v48, %v3585_v29  ;;  %v525_v14 = vsel %vm3061_vm5, %v520_v53, %v524_v25  ;;  %v3649_v35 = vrot.slane %v536_v34, 5 }
  0xc0   : > { %1124 = vrot.lane.b32.xlu1 %v3524_v50, %s2839_s23  ;;  %v1022_v54 = vpop.permute.xlu1 %1021  ;;  %v787_v25 = vsel %vm2977_vm2, %v2355_v18, %v786_v37  ;;  %v790_v48 = vsel %vm2977_vm2, %v788_v60, %v789_v1  ;;  %v3684_v1 = vld [vmem:[%s2928_s9 + $0x88] sm:$0xf] }
  0xc1   : > { %v1294_v3 = vsel %vm1255_vm6, %v3609_v43, %v1022_v54  ;;  %v542_v54 = vrot.slane %v540_v20, 4  ;;  %v3672_v20 = vcombine.low %v515_v52, %v525_v14 }
  0xc2   : > { %1232 = vrot.lane.b32.xlu0 %v3592_v55, %s2839_s23  ;;  %v1330_v29 = vsel %vm1304_vm7, %v1294_v3, %v3576_v30  ;;  %v793_v3 = vrot.slane %v3612_v39, 5 }
  0xc3   : > { %v1221_v57 = vpop.permute.xlu0 %1220  ;;  %v543_v34 = vor.u32 %v542_v54, %v3649_v35 }
  0xc4   : > { %1011 = vrot.lane.b32.xlu1 %v3540_v8, %s2840_s26  ;;  %v1467_v12 = vsel %vm1337_vm8, %v1435_v36, %v1221_v57  ;;  %v1137_v45 = vpop.permute.xlu1 %1136  ;;  %v3642_v57 = vcombine.low %v3547_v44, %v3552_v58  ;;  %v532_v36 = vrot.slane %v530_v32, 5  ;;  %v1459_v44 = vsel %vm1304_vm7, %v1424_v47, %v3513_v62  ;;  %v3656_v58 = vld [vmem:[%s2928_s9 + $0x80] sm:$0x1]  ;;  %v2776_v32 = vld [vmem:[%s4100_s1 + $0x88] sm:$0xff]   ;;  %v3677_v47 = vld [vmem:[%s2928_s9 + $0x84] sm:$0xf] }
  0xc5   : > { %1745 = vmatprep.mubr.bf16.mxu0 %v1467_v12  ;;  %v896_v62 = vrot.slane %v3377_v40, 5  ;;  %v1375_v30 = vsel %vm1337_vm8, %v1330_v29, %v1137_v45  ;;  %v546_v18 = vshll.u32 %v3656_v58, 16  ;;  %v899_v40 = vrot.slane %v3403_v5, 5 }
  0xc6   : > { %1164 = vrot.lane.b32.xlu0 %v3614_v9, %s2840_s26  ;;  %1746 = vmatmul.mubr.bf16.vlgmr.msra.gmra.mrb[0].mxu0 %v1339_v15  ;;  %v533_v37 = vor.u32 %v532_v36, %v529_v31  ;;  %v2363_v15 = vrot.slane %v3372_v28, 9  ;;  %v3687_v45 = vcombine.low %v787_v25, %v790_v48  ;;  %v551_v5 = vshrl.u32 %v3677_v47, 16 }
  0xc7   : > { %v554_v36 = vshll.u32 %v3677_v47, 16  ;;  %v898_v52 = vrot.slane %v896_v62, 4  ;;  %v544_v14 = vrot.slane %v543_v34, 4  ;;  %v548_v54 = vrot.slane %v546_v18, 5  ;;  %v264_v34 = vld [vmem:[%s2928_s9 + $0x8c] sm:$0x1] }
  0xc8   : > { %v1245_v12 = vpop.permute.xlu0 %1244  ;;  %1091 = vrot.lane.b32.xlu1 %v3554_v6, %s2838_s18  ;;  %v534_v28 = vrot.slane %v533_v37, 4  ;;  %v3704_v29 = vsel %vm2977_vm2, %v2363_v15, %v896_v62  ;;  %v2356_v48 = vrot.slane %v3601_v7, 9  ;;  %v796_v37 = vrot.slane %v3656_v58, 5  ;;  %s2487_s9 = sshll.u32 %s4148_s12, 7 }
  0xc9   : > { %v1503_v16 = vsel %vm1337_vm8, %v1459_v44, %v1245_v12  ;;  %v564_v12 = vshrl.u32 %v3684_v1, 16  ;;  %v3708_v25 = vsel %vm2977_vm2, %v898_v52, %v899_v40  ;;  %v553_v18 = vrot.slane %v551_v5, 4 }
  0xca   : > { %1199 = vrot.lane.b32.xlu0 %v3642_v57, %s2838_s18  ;;  %1841 = vmatprep.mubr.bf16.mxu1 %v1503_v16  ;;  %v1000_v53 = vpop.permute.xlu1 %999  ;;  %v3700_v16 = vcombine.low %v3601_v7, %v3612_v39  ;;  %4132 = vst [vmem:[#allocation13_spill] sm:$0xff] %v3708_v25  ;;  %v539_v62 = vsel %vm3061_vm5, %v534_v28, %v3649_v35  ;;  %v556_v7 = vrot.slane %v554_v36, 5 }
  0xcb   : > { %1842 = vmatmul.mubr.bf16.vlgmr.msra.gmra.mrb[0].mxu1 %v1375_v30  ;;  %v795_v30 = vrot.slane %v793_v3, 4  ;;  %v1261_v39 = vsel %vm1255_vm6, %v2986_v21, %v1000_v53  ;;  %v549_v58 = vsel %vm3061_vm5, %v544_v14, %v548_v54  ;;  %v566_v52 = vrot.slane %v564_v12, 4 }
  0xcc   : > { %v1153_v60 = vpop.permute.xlu0 %1152  ;;  %1126 = vrot.lane.b32.xlu1 %v3569_v0, %s2839_s23  ;;  %2651 = vmatpush3.bf16.msra.mxu1 %v3429_v13  ;;  %v560_v13 = vshll.u32 %v3684_v1, 16  ;;  %v3734_v28 = vcombine.low %v539_v62, %v549_v58  ;;  %v794_v5 = vsel %vm2977_vm2, %v2356_v48, %v793_v3  ;;  %v557_v14 = vor.u32 %v556_v7, %v553_v18 }
  0xcd   : > { %2652 = vmatprep.subr.bf16.mxu1 %v2776_v32  ;;  %v1391_v15 = vsel %vm1255_vm6, %v3137_v51, %v1153_v60  ;;  %v797_v36 = vsel %vm2977_vm2, %v795_v30, %v796_v37  ;;  %v570_v54 = vshll.u32 %v264_v34, 16  ;;  %v800_v48 = vrot.slane %v3684_v1, 5 }
  0xce   : > { %1234 = vrot.lane.b32.xlu0 %v3672_v20, %s2839_s23  ;;  %v1080_v31 = vpop.permute.xlu1 %1079  ;;  %v562_v40 = vrot.slane %v560_v13, 5  ;;  %v3755_v62 = vcombine.low %v3677_v47, %v3684_v1  ;;  %v2357_v18 = vrot.slane %v3677_v47, 9  ;;  %v803_v7 = vrot.slane %v264_v34, 5 }
  0xcf   : > { %v1308_v25 = vsel %vm1304_vm7, %v1261_v39, %v1080_v31  ;;  %v572_v3 = vrot.slane %v570_v54, 5 }
  0xd0   : > { %v1188_v44 = vpop.permute.xlu0 %1187  ;;  %1013 = vrot.lane.b32.xlu1 %v3592_v55, %s2840_s26  ;;  %2653 = vmatpush3.bf16.msra.mxu1 %v2776_v32  ;;  %v567_v31 = vor.u32 %v566_v52, %v562_v40 }
  0xd1   : > { %v1437_v21 = vsel %vm1304_vm7, %v1391_v15, %v1188_v44  ;;  %v3744_v44 = vcombine.low %v794_v5, %v797_v36 }
  0xd2   : > { %1166 = vrot.lane.b32.xlu0 %v3687_v45, %s2840_s26  ;;  %v1115_v32 = vpop.permute.xlu1 %1114  ;;  %v568_v39 = vrot.slane %v567_v31, 4 }
  0xd3   : > { %v1342_v60 = vsel %vm1337_vm8, %v1308_v25, %v1115_v32  ;;  %v558_v25 = vrot.slane %v557_v14, 4 }
  0xd4   : > { %v1223_v53 = vpop.permute.xlu0 %1222  ;;  %1093 = vrot.lane.b32.xlu1 %v3614_v9, %s2838_s18  ;;  %v573_v52 = vsel %vm3061_vm5, %v568_v39, %v572_v3 }
  0xd5   : > { %v1470_v35 = vsel %vm1337_vm8, %v1437_v21, %v1223_v53  ;;  %v563_v58 = vsel %vm3061_vm5, %v558_v25, %v562_v40  ;;  %v802_v21 = vrot.slane %v800_v48, 4  ;;  %v801_v40 = vsel %vm2977_vm2, %v2357_v18, %v800_v48 }
  0xd6   : > { %1201 = vrot.lane.b32.xlu0 %v3700_v16, %s2838_s18  ;;  %1753 = vmatprep.mubr.bf16.mxu0 %v1470_v35  ;;  %v1024_v51 = vpop.permute.xlu1 %1023  ;;  %v3772_v41 = vcombine.low %v563_v58, %v573_v52 }
  0xd7   : > { %1754 = vmatmul.mubr.bf16.gmra.mrb[4].mxu0 %v1342_v60  ;;  %v1297_v30 = vsel %vm1255_vm6, %v3091_v23, %v1024_v51  ;;  %v804_v51 = vsel %vm2977_vm2, %v802_v21, %v803_v7 }
  0xd8   : > { %v1177_v12 = vpop.permute.xlu0 %1176  ;;  %1128 = vrot.lane.b32.xlu1 %v3642_v57, %s2839_s23  ;;  %v3782_v36 = vcombine.low %v801_v40, %v804_v51 }
  0xd9   : > { %v1427_v15 = vsel %vm1255_vm6, %v3169_v24, %v1177_v12 }
  0xda   : > { %1236 = vrot.lane.b32.xlu0 %v3734_v28, %s2839_s23  ;;  %v1104_v13 = vpop.permute.xlu1 %1103 }
  0xdb   : > { %v1332_v1 = vsel %vm1304_vm7, %v1297_v30, %v1104_v13 }
  0xdc   : > { %v1212_v32 = vpop.permute.xlu0 %1211  ;;  %1015 = vrot.lane.b32.xlu1 %v3672_v20, %s2840_s26 }
  0xdd   : > { %v1461_v53 = vsel %vm1304_vm7, %v1427_v15, %v1212_v32 }
  0xde   : > { %1168 = vrot.lane.b32.xlu0 %v3744_v44, %s2840_s26  ;;  %v1139_v37 = vpop.permute.xlu1 %1138 }
  0xdf   : > { %v1378_v34 = vsel %vm1337_vm8, %v1332_v1, %v1139_v37 }
  0xe0   : > { %v1247_v35 = vpop.permute.xlu0 %1246  ;;  %1095 = vrot.lane.b32.xlu1 %v3687_v45, %s2838_s18 }
  0xe1   : > { %v1506_v47 = vsel %vm1337_vm8, %v1461_v53, %v1247_v35 }
  0xe2   : > { %1203 = vrot.lane.b32.xlu0 %v3755_v62, %s2838_s18  ;;  %1849 = vmatprep.mubr.bf16.mxu1 %v1506_v47  ;;  %v1002_v24 = vpop.permute.xlu1 %1001 }
  0xe3   : > { %1850 = vmatmul.mubr.bf16.gmra.mrb[4].mxu1 %v1378_v34  ;;  %v1264_v31 = vsel %vm1255_vm6, %v2942_v4, %v1002_v24 }
  0xe4   : > { %v1155_v60 = vpop.permute.xlu0 %1154  ;;  %1130 = vrot.lane.b32.xlu1 %v3700_v16, %s2839_s23 }
  0xe5   : > { %v1394_v54 = vsel %vm1255_vm6, %v3222_v63, %v1155_v60 }
  0xe6   : > { %1238 = vrot.lane.b32.xlu0 %v3772_v41, %s2839_s23  ;;  %v1082_v5 = vpop.permute.xlu1 %1081 }
  0xe7   : > { %v1310_v25 = vsel %vm1304_vm7, %v1264_v31, %v1082_v5 }
  0xe8   : > { %v1190_v14 = vpop.permute.xlu0 %1189  ;;  %1017 = vrot.lane.b32.xlu1 %v3734_v28, %s2840_s26 }
  0xe9   : > { %v1439_v12 = vsel %vm1304_vm7, %v1394_v54, %v1190_v14 }
  0xea   : > { %1170 = vrot.lane.b32.xlu0 %v3782_v36, %s2840_s26  ;;  %v1117_v19 = vpop.permute.xlu1 %1116 }
  0xeb   : > { %v1345_v3 = vsel %vm1337_vm8, %v1310_v25, %v1117_v19 }
  0xec   : > { %v1225_v13 = vpop.permute.xlu0 %1224  ;;  %1097 = vrot.lane.b32.xlu1 %v3744_v44, %s2838_s18 }
  0xed   : > { %v1473_v39 = vsel %vm1337_vm8, %v1439_v12, %v1225_v13 }
  0xee   : > { %1205 = vrot.lane.b32.xlu0 %v3609_v43, %s2838_s18  ;;  %1761 = vmatprep.mubr.bf16.mxu0 %v1473_v39  ;;  %v1026_v4 = vpop.permute.xlu1 %1025 }
  0xef   : > { %1762 = vmatmul.mubr.bf16.gmra.mrb[8].mxu0 %v1345_v3  ;;  %v1300_v30 = vsel %vm1255_vm6, %v2955_v10, %v1026_v4 }
  0xf0   : > { %v1179_v48 = vpop.permute.xlu0 %1178  ;;  %1132 = vrot.lane.b32.xlu1 %v3755_v62, %s2839_s23 }
  0xf1   : > { %v1430_v18 = vsel %vm1255_vm6, %v3275_v59, %v1179_v48 }
  0xf2   : > { %1240 = vrot.lane.b32.xlu0 %v3117_v38, %s2839_s23  ;;  %v1106_v63 = vpop.permute.xlu1 %1105 }
  0xf3   : > { %v1334_v58 = vsel %vm1304_vm7, %v1300_v30, %v1106_v63 }
  0xf4   : > { %v1214_v32 = vpop.permute.xlu0 %1213  ;;  %1019 = vrot.lane.b32.xlu1 %v3772_v41, %s2840_s26 }
  0xf5   : > { %v1463_v7 = vsel %vm1304_vm7, %v1430_v18, %v1214_v32 }
  0xf6   : > { %1172 = vrot.lane.b32.xlu0 %v3050_v26, %s2840_s26  ;;  %v1141_v37 = vpop.permute.xlu1 %1140  ;;  %s3964_s26 = scalar_lea.vmem %s4102_s3, %s2487_s9 }
  0xf7   : > { %v1381_v21 = vsel %vm1337_vm8, %v1334_v58, %v1141_v37  ;;  %v4134_v58 = vld [vmem:[#allocation8_spill] sm:$0xff] }
  0xf8   : > { %v1249_v15 = vpop.permute.xlu0 %1248  ;;  %1099 = vrot.lane.b32.xlu1 %v3782_v36, %s2838_s18 }
  0xf9   : > { %v1509_v52 = vsel %vm1337_vm8, %v1463_v7, %v1249_v15  ;;  %v4133_v15 = vld [vmem:[#allocation12_spill] sm:$0xff] }
  0xfa   : > { %1207 = vrot.lane.b32.xlu0 %v3091_v23, %s2838_s18  ;;  %1857 = vmatprep.mubr.bf16.mxu1 %v1509_v52  ;;  %v1004_v10 = vpop.permute.xlu1 %1003 }
  0xfb   : > { %1858 = vmatmul.mubr.bf16.gmra.mrb[8].mxu1 %v1381_v21  ;;  %v1267_v1 = vsel %vm1255_vm6, %v3175_v27, %v1004_v10  ;;  %v4135_v10 = vld [vmem:[#allocation11_spill] sm:$0xff] }
  0xfc   : > { %v1157_v53 = vpop.permute.xlu0 %1156  ;;  %1134 = vrot.lane.b32.xlu1 %v3609_v43, %s2839_s23 }
  0xfd   : > { %v1397_v23 = vsel %vm1255_vm6, %v3319_v49, %v1157_v53 }
  0xfe   : > { %1242 = vrot.lane.b32.xlu0 %v3239_v33, %s2839_s23  ;;  %v1084_v59 = vpop.permute.xlu1 %1083 }
  0xff   : > { %v1312_v40 = vsel %vm1304_vm7, %v1267_v1, %v1084_v59 }
 0x100   : > { %v1192_v35 = vpop.permute.xlu0 %1191 }
 0x101   : > { %v1441_v24 = vsel %vm1304_vm7, %v1397_v23, %v1192_v35 }
 0x102   : > { %v1119_v47 = vpop.permute.xlu1 %1118 }
 0x103   : > { %v1348_v33 = vsel %vm1337_vm8, %v1312_v40, %v1119_v47  ;;  %v4136_v40 = vld [vmem:[#allocation10_spill] sm:$0xff] }
 0x104   : > { %v1227_v34 = vpop.permute.xlu0 %1226 }
 0x105   : > { %v1476_v51 = vsel %vm1337_vm8, %v1441_v24, %v1227_v34 }
 0x106   : > { %1769 = vmatprep.mubr.bf16.mxu0 %v1476_v51  ;;  %v1028_v43 = vpop.permute.xlu1 %1027 }
 0x107   : > { %1770 = vmatmul.mubr.bf16.gmra.mrb[12].mxu0 %v1348_v33  ;;  %v1303_v27 = vsel %vm1255_vm6, %v3259_v17, %v1028_v43 }
 0x108   : > { %v1181_v60 = vpop.permute.xlu0 %1180 }
 0x109   : > { %v1433_v49 = vsel %vm1255_vm6, %v3366_v22, %v1181_v60 }
 0x10a   : > { %v1108_v5 = vpop.permute.xlu1 %1107 }
 0x10b   : > { %v1336_v12 = vsel %vm1304_vm7, %v1303_v27, %v1108_v5 }
 0x10c   : > { %v1216_v14 = vpop.permute.xlu0 %1215 }
 0x10d   : > { %v1465_v19 = vsel %vm1304_vm7, %v1433_v49, %v1216_v14 }
 0x10e   : > { %v1143_v31 = vpop.permute.xlu1 %1142 }
 0x10f   : > { %v1384_v39 = vsel %vm1337_vm8, %v1336_v12, %v1143_v31 }
 0x110   : > { %v1251_v54 = vpop.permute.xlu0 %1250 }
 0x111   : > { %v1512_v13 = vsel %vm1337_vm8, %v1465_v19, %v1251_v54 }
 0x112   : > { %1865 = vmatprep.mubr.bf16.mxu1 %v1512_v13  ;;  %v1006_v25 = vpop.permute.xlu1 %1005 }
 0x113   : > { %1866 = vmatmul.mubr.bf16.gmra.mrb[12].mxu1 %v1384_v39  ;;  %v1270_v22 = vsel %vm1255_vm6, %v3302_v56, %v1006_v25 }
 0x114   : > { %v1159_v4 = vpop.permute.xlu0 %1158  ;;  %2654 = vmatprep.mubr.msk.bf16.mxu1 %vm1255_vm6, %v3179_v11 }
 0x115   : > { %v1400_v63 = vsel %vm1255_vm6, %v3409_v2, %v1159_v4  ;;  %v4138_v4 = vld [vmem:[#allocation6_spill] sm:$0xff] }
 0x116   : > { %v1086_v17 = vpop.permute.xlu1 %1085 }
 0x117   : > { %v1314_v11 = vsel %vm1304_vm7, %v1270_v22, %v1086_v17 }
 0x118   : > { %v1194_v3 = vpop.permute.xlu0 %1193 }
 0x119   : > { %v1443_v32 = vsel %vm1304_vm7, %v1400_v63, %v1194_v3  ;;  %v4139_v63 = vld [vmem:[#allocation7_spill] sm:$0xff] }
 0x11a   : > { %v1121_v48 = vpop.permute.xlu1 %1120 }
 0x11b   : > { %2655 = vmatmul.mubr.msk.bf16.vlgmr.msra.gmra.mrb[16].mxu1 %vm1255_vm6, %v3292_v46  ;;  %v1351_v56 = vsel %vm1337_vm8, %v1314_v11, %v1121_v48  ;;  %v4140_v11 = vld [vmem:[#allocation9_spill] sm:$0xff] }
 0x11c   : > { %v1229_v30 = vpop.permute.xlu0 %1228  ;;  %2658 = vmatprep.mubr.msk.bf16.mxu1 %vm1255_vm6, %v3379_v42 }
 0x11d   : > { %v1479_v37 = vsel %vm1337_vm8, %v1443_v32, %v1229_v30 }
 0x11e   : > { %1777 = vmatprep.mubr.bf16.mxu0 %v1479_v37  ;;  %v1008_v18 = vpop.permute.xlu1 %1007 }
 0x11f   : > { %1778 = vmatmul.mubr.bf16.gmra.mrb[16].mxu0 %v1351_v56  ;;  %v1273_v42 = vsel %vm1255_vm6, %v4134_v58, %v1008_v18 }
 0x120   : > { %v1161_v7 = vpop.permute.xlu0 %1160 }
 0x121   : > { %v1403_v21 = vsel %vm1255_vm6, %v4135_v10, %v1161_v7 }
 0x122   : > { %v1088_v2 = vpop.permute.xlu1 %1087 }
 0x123   : > { %2659 = vmatmul.mubr.msk.bf16.gmra.mrb[20].mxu1 %vm1255_vm6, %v3467_v61  ;;  %v1316_v35 = vsel %vm1304_vm7, %v1273_v42, %v1088_v2  ;;  %v4141_v2 = vld [vmem:[#allocation13_spill] sm:$0xff] }
 0x124   : > { %v1196_v46 = vpop.permute.xlu0 %1195  ;;  %2662 = vmatprep.mubr.msk.bf16.mxu1 %vm1255_vm6, %v4133_v15 }
 0x125   : > { %v1445_v53 = vsel %vm1304_vm7, %v1403_v21, %v1196_v46  ;;  %v4142_v46 = vcombine.low %v3704_v29, %v4141_v2 }
 0x126   : > { %v1123_v52 = vpop.permute.xlu1 %1122 }
 0x127   : > { %v1354_v47 = vsel %vm1337_vm8, %v1316_v35, %v1123_v52 }
 0x128   : > { %v1231_v59 = vpop.permute.xlu0 %1230 }
 0x129   : > { %v1482_v1 = vsel %vm1337_vm8, %v1445_v53, %v1231_v59 }
 0x12a   : > { %1785 = vmatprep.mubr.bf16.mxu0 %v1482_v1  ;;  %v1010_v61 = vpop.permute.xlu1 %1009 }
 0x12b   : > { %1786 = vmatmul.mubr.bf16.gmra.mrb[20].mxu0 %v1354_v47  ;;  %2663 = vmatmul.mubr.msk.bf16.gmra.mrb[24].mxu1 %vm1255_vm6, %v3554_v6  ;;  %v1276_v51 = vsel %vm1255_vm6, %v4136_v40, %v1010_v61 }
 0x12c   : > { %v1163_v23 = vpop.permute.xlu0 %1162  ;;  %2666 = vmatprep.mubr.msk.bf16.mxu1 %vm1255_vm6, %v3614_v9 }
 0x12d   : > { %v1406_v33 = vsel %vm1255_vm6, %v3540_v8, %v1163_v23 }
 0x12e   : > { %v1090_v24 = vpop.permute.xlu1 %1089 }
 0x12f   : > { %v1318_v6 = vsel %vm1304_vm7, %v1276_v51, %v1090_v24 }
 0x130   : > { %v1198_v34 = vpop.permute.xlu0 %1197 }
 0x131   : > { %v1447_v60 = vsel %vm1304_vm7, %v1406_v33, %v1198_v34 }
 0x132   : > { %v1125_v43 = vpop.permute.xlu1 %1124 }
 0x133   : > { %2667 = vmatmul.mubr.msk.bf16.gmra.mrb[28].mxu1 %vm1255_vm6, %v3687_v45  ;;  %v1357_v27 = vsel %vm1337_vm8, %v1318_v6, %v1125_v43 }
 0x134   : > { %v1233_v5 = vpop.permute.xlu0 %1232  ;;  %2670 = vmatprep.mubr.msk.bf16.mxu1 %vm1255_vm6, %v3744_v44 }
 0x135   : > { %v1485_v9 = vsel %vm1337_vm8, %v1447_v60, %v1233_v5 }
 0x136   : > { %1793 = vmatprep.mubr.bf16.mxu0 %v1485_v9  ;;  %v1012_v14 = vpop.permute.xlu1 %1011 }
 0x137   : > { %1794 = vmatmul.mubr.bf16.gmra.mrb[24].mxu0 %v1357_v27  ;;  %v1279_v44 = vsel %vm1255_vm6, %v3524_v50, %v1012_v14 }
 0x138   : > { %v1165_v31 = vpop.permute.xlu0 %1164 }
 0x139   : > { %v1409_v19 = vsel %vm1255_vm6, %v3592_v55, %v1165_v31 }
 0x13a   : > { %v1092_v8 = vpop.permute.xlu1 %1091 }
 0x13b   : > { %2671 = vmatmul.mubr.msk.bf16.gmra.mrb[32].mxu1 %vm1255_vm6, %v3782_v36  ;;  %v1320_v13 = vsel %vm1304_vm7, %v1279_v44, %v1092_v8 }
 0x13c   : > { %v1200_v45 = vpop.permute.xlu0 %1199  ;;  %2674 = vmatprep.mubr.msk.bf16.mxu1 %vm1255_vm6, %v3050_v26  ;;  %v4137_v26 = vld [vmem:[#allocation5_spill] sm:$0xff] }
 0x13d   : > { %v1449_v54 = vsel %vm1304_vm7, %v1409_v19, %v1200_v45 }
 0x13e   : > { %v1127_v49 = vpop.permute.xlu1 %1126 }
 0x13f   : > { %v1360_v39 = vsel %vm1337_vm8, %v1320_v13, %v1127_v49 }
 0x140   : > { %v1235_v12 = vpop.permute.xlu0 %1234 }
 0x141   : > { %v1488_v25 = vsel %vm1337_vm8, %v1449_v54, %v1235_v12 }
 0x142   : > { %1801 = vmatprep.mubr.bf16.mxu0 %v1488_v25  ;;  %v1014_v36 = vpop.permute.xlu1 %1013 }
 0x143   : > { %1802 = vmatmul.mubr.bf16.gmra.mrb[28].mxu0 %v1360_v39  ;;  %2675 = vmatmul.mubr.msk.bf16.gmra.mrb[36].mxu1 %vm1255_vm6, %v4137_v26  ;;  %v1282_v3 = vsel %vm1255_vm6, %v3569_v0, %v1014_v36 }
 0x144   : > { %v1167_v50 = vpop.permute.xlu0 %1166  ;;  %2678 = vmatprep.mubr.msk.bf16.mxu1 %vm1255_vm6, %v4138_v4 }
 0x145   : > { %v1412_v48 = vsel %vm1255_vm6, %v3672_v20, %v1167_v50 }
 0x146   : > { %v1094_v55 = vpop.permute.xlu1 %1093 }
 0x147   : > { %v1322_v37 = vsel %vm1304_vm7, %v1282_v3, %v1094_v55 }
 0x148   : > { %v1202_v17 = vpop.permute.xlu0 %1201 }
 0x149   : > { %v1451_v32 = vsel %vm1304_vm7, %v1412_v48, %v1202_v17 }
 0x14a   : > { %v1129_v22 = vpop.permute.xlu1 %1128 }
 0x14b   : > { %2679 = vmatmul.mubr.msk.bf16.gmra.mrb[40].mxu1 %vm1255_vm6, %v4139_v63  ;;  %v1363_v0 = vsel %vm1337_vm8, %v1322_v37, %v1129_v22 }
 0x14c   : > { %v1237_v30 = vpop.permute.xlu0 %1236  ;;  %2682 = vmatprep.mubr.msk.bf16.mxu1 %vm1255_vm6, %v4140_v11 }
 0x14d   : > { %v1491_v18 = vsel %vm1337_vm8, %v1451_v32, %v1237_v30 }
 0x14e   : > { %1809 = vmatprep.mubr.bf16.mxu0 %v1491_v18  ;;  %v1016_v56 = vpop.permute.xlu1 %1015 }
 0x14f   : > { %1810 = vmatmul.mubr.bf16.gmra.mrb[32].mxu0 %v1363_v0  ;;  %v1285_v58 = vsel %vm1255_vm6, %v3642_v57, %v1016_v56 }
 0x150   : > { %v1169_v7 = vpop.permute.xlu0 %1168 }
 0x151   : > { %v1415_v52 = vsel %vm1255_vm6, %v3734_v28, %v1169_v7 }
 0x152   : > { %v1096_v20 = vpop.permute.xlu1 %1095 }
 0x153   : > { %2683 = vmatmul.mubr.msk.bf16.gmra.mrb[44].mxu1 %vm1255_vm6, %v4142_v46  ;;  %v1324_v53 = vsel %vm1304_vm7, %v1285_v58, %v1096_v20 }
 0x154   : > { %v1204_v15 = vpop.permute.xlu0 %1203 }
 0x155   : > { %v1453_v10 = vsel %vm1304_vm7, %v1415_v52, %v1204_v15 }
 0x156   : > { %v1131_v42 = vpop.permute.xlu1 %1130 }
 0x157   : > { %v1366_v29 = vsel %vm1337_vm8, %v1324_v53, %v1131_v42 }
 0x158   : > { %v1239_v21 = vpop.permute.xlu0 %1238 }
 0x159   : > { %v1494_v59 = vsel %vm1337_vm8, %v1453_v10, %v1239_v21 }
 0x15a   : > { %1817 = vmatprep.mubr.bf16.mxu0 %v1494_v59  ;;  %v1018_v35 = vpop.permute.xlu1 %1017 }
 0x15b   : > { %1818 = vmatmul.mubr.bf16.gmra.mrb[36].mxu0 %v1366_v29  ;;  %v1288_v57 = vsel %vm1255_vm6, %v3700_v16, %v1018_v35 }
 0x15c   : > { %v1171_v1 = vpop.permute.xlu0 %1170 }
 0x15d   : > { %v1418_v28 = vsel %vm1255_vm6, %v3772_v41, %v1171_v1 }
 0x15e   : > { %v1098_v61 = vpop.permute.xlu1 %1097 }
 0x15f   : > { %v1326_v40 = vsel %vm1304_vm7, %v1288_v57, %v1098_v61 }
 0x160   : > { %v1206_v47 = vpop.permute.xlu0 %1205 }
 0x161   : > { %v1455_v24 = vsel %vm1304_vm7, %v1418_v28, %v1206_v47 }
 0x162   : > { %v1133_v23 = vpop.permute.xlu1 %1132 }
 0x163   : > { %v1369_v33 = vsel %vm1337_vm8, %v1326_v40, %v1133_v23 }
 0x164   : > { %v1241_v34 = vpop.permute.xlu0 %1240 }
 0x165   : > { %v1497_v51 = vsel %vm1337_vm8, %v1455_v24, %v1241_v34  ;;  %v3954_v34 = vld [vmem:[#allocation2] ss:$0 sm:$0xff] }
 0x166   : > { %1825 = vmatprep.mubr.bf16.mxu0 %v1497_v51  ;;  %v1020_v43 = vpop.permute.xlu1 %1019 }
 0x167   : > { %1826 = vmatmul.mubr.bf16.gmra.mrb[40].mxu0 %v1369_v33  ;;  %v1291_v16 = vsel %vm1255_vm6, %v3755_v62, %v1020_v43 }
 0x168   : > { %v1173_v60 = vpop.permute.xlu0 %1172 }
 0x169   : > { %v1421_v41 = vsel %vm1255_vm6, %v3117_v38, %v1173_v60 }
 0x16a   : > { %v1100_v5 = vpop.permute.xlu1 %1099 }
 0x16b   : > { %v1328_v31 = vsel %vm1304_vm7, %v1291_v16, %v1100_v5 }
 0x16c   : > { %v1208_v6 = vpop.permute.xlu0 %1207 }
 0x16d   : > { %v1457_v14 = vsel %vm1304_vm7, %v1421_v41, %v1208_v6 }
 0x16e   : > { %v1135_v9 = vpop.permute.xlu1 %1134 }
 0x16f   : > { %v1372_v45 = vsel %vm1337_vm8, %v1328_v31, %v1135_v9 }
 0x170   : > { %v1243_v27 = vpop.permute.xlu0 %1242 }
 0x171   : > { %v1500_v8 = vsel %vm1337_vm8, %v1457_v14, %v1243_v27 }
 0x172   : > { %1833 = vmatprep.mubr.bf16.mxu0 %v1500_v8 }
 0x173   : > { %1834 = vmatmul.mubr.bf16.gmra.mrb[44].mxu0 %v1372_v45 }
 0x199   : > { %v2536_v44 = vpop.f32.mrb[0].mxu0 }
 0x19a   : > { %v2537_v49 = vpop.f32.mrb[1].mxu0 }
 0x19b   : > { %v2538_v19 = vadd.f32 %v2537_v49, %v2536_v44  ;;  %v2539_v54 = vpop.f32.mrb[2].mxu0 }
 0x19c   : > { %v2540_v62 = vpop.f32.mrb[3].mxu0 }
 0x19d   : > { %v2541_v12 = vadd.f32 %v2540_v62, %v2539_v54  ;;  %v1748_v43 = vadd.f32 %v2538_v19, %v3954_v34 }
 0x19e   : > { %v2608_v13 = vpop.f32.mrb[0].mxu1 }
 0x19f   : > { %v2609_v38 = vpop.f32.mrb[1].mxu1  ;;  %v1751_v41 = vadd.f32 %v2541_v12, %v3954_v34 }
 0x1a0   : > { %v3938_v25 = vadd.f32 %v2609_v38, %v2608_v13  ;;  %v2611_v36 = vpop.f32.mrb[2].mxu1 }
 0x1a1   : > { %v2612_v39 = vpop.f32.mrb[3].mxu1 }
 0x1a2   : > { %v3940_v26 = vadd.f32 %v2612_v39, %v2611_v36 }
 0x1aa   : > { %v2542_v50 = vpop.f32.mrb[4].mxu0 }
 0x1ab   : > { %v2543_v4 = vpop.f32.mrb[5].mxu0 }
 0x1ac   : > { %v2544_v55 = vadd.f32 %v2543_v4, %v2542_v50  ;;  %v2545_v17 = vpop.f32.mrb[6].mxu0 }
 0x1ad   : > { %v2546_v3 = vpop.f32.mrb[7].mxu0 }
 0x1ae   : > { %v2547_v22 = vadd.f32 %v2546_v3, %v2545_v17  ;;  %v1756_v40 = vadd.f32 %v2544_v55, %v3954_v34 }
 0x1b0   : > { %v1759_v5 = vadd.f32 %v2547_v22, %v3954_v34 }
 0x1b6   : > { %v2614_v48 = vpop.f32.mrb[4].mxu1 }
 0x1b7   : > { %v2615_v63 = vpop.f32.mrb[5].mxu1 }
 0x1b8   : > { %v3942_v32 = vadd.f32 %v2615_v63, %v2614_v48  ;;  %v2617_v30 = vpop.f32.mrb[6].mxu1 }
 0x1b9   : > { %v2618_v11 = vpop.f32.mrb[7].mxu1 }
 0x1ba   : > { %v3944_v37 = vadd.f32 %v2618_v11, %v2617_v30 }
 0x1c2   : > { %v2548_v18 = vpop.f32.mrb[8].mxu0 }
 0x1c3   : > { %v2549_v56 = vpop.f32.mrb[9].mxu0 }
 0x1c4   : > { %v2550_v0 = vadd.f32 %v2549_v56, %v2548_v18  ;;  %v2551_v7 = vpop.f32.mrb[10].mxu0 }
 0x1c5   : > { %v2552_v20 = vpop.f32.mrb[11].mxu0 }
 0x1c6   : > { %v2553_v2 = vadd.f32 %v2552_v20, %v2551_v7  ;;  %v1764_v17 = vadd.f32 %v2550_v0, %v3954_v34 }
 0x1c8   : > { %v1767_v11 = vadd.f32 %v2553_v2, %v3954_v34 }
 0x1ce   : > { %v2620_v46 = vpop.f32.mrb[8].mxu1 }
 0x1cf   : > { %v2621_v15 = vpop.f32.mrb[9].mxu1 }
 0x1d0   : > { %v3946_v58 = vadd.f32 %v2621_v15, %v2620_v46  ;;  %v2623_v42 = vpop.f32.mrb[10].mxu1 }
 0x1d1   : > { %v2624_v52 = vpop.f32.mrb[11].mxu1 }
 0x1d2   : > { %v3948_v10 = vadd.f32 %v2624_v52, %v2623_v42 }
 0x1da   : > { %v2554_v21 = vpop.f32.mrb[12].mxu0 }
 0x1db   : > { %v2555_v53 = vpop.f32.mrb[13].mxu0 }
 0x1dc   : > { %v2556_v59 = vadd.f32 %v2555_v53, %v2554_v21  ;;  %v2557_v35 = vpop.f32.mrb[14].mxu0 }
 0x1dd   : > { %v2558_v29 = vpop.f32.mrb[15].mxu0 }
 0x1de   : > { %v2559_v1 = vadd.f32 %v2558_v29, %v2557_v35  ;;  %v1772_v39 = vadd.f32 %v2556_v59, %v3954_v34 }
 0x1e0   : > { %v1775_v48 = vadd.f32 %v2559_v1, %v3954_v34 }
 0x1e6   : > { %v2626_v61 = vpop.f32.mrb[12].mxu1 }
 0x1e7   : > { %v2627_v47 = vpop.f32.mrb[13].mxu1 }
 0x1e8   : > { %v3950_v57 = vadd.f32 %v2627_v47, %v2626_v61  ;;  %v2629_v23 = vpop.f32.mrb[14].mxu1 }
 0x1e9   : > { %v2630_v28 = vpop.f32.mrb[15].mxu1 }
 0x1ea   : > { %v3952_v24 = vadd.f32 %v2630_v28, %v2629_v23 }
 0x1ee   : > { %v2656_v51 = vpop.f32.mrb[16].mxu1 }
 0x1ef   : > { %v1917_v33 = vadd.f32 %v2656_v51, %v1756_v40  ;;  %v1908_v60 = vpop.f32.mrb[17].mxu1 }
 0x1f0   : > { %v1909_v6 = vadd.f32 %v1908_v60, %v1748_v43  ;;  %v2657_v16 = vpop.f32.mrb[18].mxu1 }
 0x1f1   : > { %v2037_v9 = vmax.f32 %v1917_v33, 0.0  ;;  %v1920_v14 = vadd.f32 %v2657_v16, %v1759_v5  ;;  %v1911_v27 = vpop.f32.mrb[19].mxu1 }
 0x1f2   : > { %v2035_v31 = vmax.f32 %v1909_v6, 0.0  ;;  %v1912_v8 = vadd.f32 %v1911_v27, %v1751_v41  ;;  %v2560_v45 = vpop.f32.mrb[16].mxu0 }
 0x1f3   : > { %v2490_v44 = vpack.c.bf16 %v2037_v9, %v2037_v9  ;;  %v2038_v49 = vmax.f32 %v1920_v14, 0.0  ;;  %v2561_v19 = vpop.f32.mrb[17].mxu0 }
 0x1f4   : > { %v2488_v54 = vpack.c.bf16 %v2035_v31, %v2035_v31  ;;  %v2036_v62 = vmax.f32 %v1912_v8, 0.0  ;;  %v2562_v12 = vadd.f32 %v2561_v19, %v2560_v45  ;;  %v2563_v13 = vpop.f32.mrb[18].mxu0 }
 0x1f5   : > { %2198 = vst.msk [vmem:[%s3964_s26 + $0x8] sm:$0xf] %vm2195_vm9, %v2490_v44  ;;  %v2491_v38 = vpack.c.bf16 %v2038_v49, %v2038_v49  ;;  %v2564_v36 = vpop.f32.mrb[19].mxu0 }
 0x1f6   : > { %2196 = vst.msk [vmem:[%s3964_s26] sm:$0xf] %vm2195_vm9, %v2488_v54  ;;  %v2489_v50 = vpack.c.bf16 %v2036_v62, %v2036_v62  ;;  %v2565_v4 = vadd.f32 %v2564_v36, %v2563_v13  ;;  %v2660_v55 = vpop.f32.mrb[20].mxu1  ;;  %v1780_v2 = vadd.f32 %v2562_v12, %v3954_v34 }
 0x1f7   : > { %2199 = vst.msk [vmem:[%s3964_s26 + $0xc] sm:$0xf] %vm2195_vm9, %v2491_v38  ;;  %v1933_v3 = vadd.f32 %v2660_v55, %v1772_v39  ;;  %v1924_v22 = vpop.f32.mrb[21].mxu1 }
 0x1f8   : > { %2197 = vst.msk [vmem:[%s3964_s26 + $0x4] sm:$0xf] %vm2195_vm9, %v2489_v50  ;;  %v1925_v63 = vadd.f32 %v1924_v22, %v1764_v17  ;;  %v2661_v30 = vpop.f32.mrb[22].mxu1  ;;  %v1783_v40 = vadd.f32 %v2565_v4, %v3954_v34 }
 0x1f9   : > { %v2041_v18 = vmax.f32 %v1933_v3, 0.0  ;;  %v1936_v56 = vadd.f32 %v2661_v30, %v1775_v48  ;;  %v1927_v7 = vpop.f32.mrb[23].mxu1 }
 0x1fa   : > { %v2039_v20 = vmax.f32 %v1925_v63, 0.0  ;;  %v1928_v0 = vadd.f32 %v1927_v7, %v1767_v11 }
 0x1fb   : > { %v2494_v46 = vpack.c.bf16 %v2041_v18, %v2041_v18  ;;  %v2042_v15 = vmax.f32 %v1936_v56, 0.0 }
 0x1fc   : > { %v2492_v42 = vpack.c.bf16 %v2039_v20, %v2039_v20  ;;  %v2040_v52 = vmax.f32 %v1928_v0, 0.0 }
 0x1fd   : > { %2202 = vst.msk [vmem:[%s3964_s26 + $0x18] sm:$0xf] %vm2195_vm9, %v2494_v46  ;;  %v2495_v21 = vpack.c.bf16 %v2042_v15, %v2042_v15 }
 0x1fe   : > { %2200 = vst.msk [vmem:[%s3964_s26 + $0x10] sm:$0xf] %vm2195_vm9, %v2492_v42  ;;  %v2493_v53 = vpack.c.bf16 %v2040_v52, %v2040_v52  ;;  %v2566_v59 = vpop.f32.mrb[20].mxu0  ;;  %v2664_v35 = vpop.f32.mrb[24].mxu1 }
 0x1ff   : > { %2203 = vst.msk [vmem:[%s3964_s26 + $0x1c] sm:$0xf] %vm2195_vm9, %v2495_v21  ;;  %v2567_v29 = vpop.f32.mrb[21].mxu0  ;;  %v1940_v1 = vpop.f32.mrb[25].mxu1 }
 0x200   : > { %2201 = vst.msk [vmem:[%s3964_s26 + $0x14] sm:$0xf] %vm2195_vm9, %v2493_v53  ;;  %v2568_v61 = vadd.f32 %v2567_v29, %v2566_v59  ;;  %v1941_v47 = vadd.f32 %v1940_v1, %v1780_v2  ;;  %v2569_v23 = vpop.f32.mrb[22].mxu0  ;;  %v2665_v28 = vpop.f32.mrb[26].mxu1 }
 0x201   : > { %v2570_v51 = vpop.f32.mrb[23].mxu0  ;;  %v1943_v43 = vpop.f32.mrb[27].mxu1 }
 0x202   : > { %v1788_v33 = vadd.f32 %v2568_v61, %v3954_v34  ;;  %v2043_v60 = vmax.f32 %v1941_v47, 0.0  ;;  %v2571_v5 = vadd.f32 %v2570_v51, %v2569_v23  ;;  %v1944_v6 = vadd.f32 %v1943_v43, %v1783_v40 }
 0x203   : > { %v1852_v47 = vadd.f32 %v3942_v32, %v3954_v34  ;;  %v1844_v51 = vadd.f32 %v3938_v25, %v3954_v34  ;;  %v1847_v32 = vadd.f32 %v3940_v26, %v3954_v34 }
 0x204   : > { %v1949_v16 = vadd.f32 %v2664_v35, %v1788_v33  ;;  %v2496_v41 = vpack.c.bf16 %v2043_v60, %v2043_v60  ;;  %v1791_v9 = vadd.f32 %v2571_v5, %v3954_v34  ;;  %v2044_v14 = vmax.f32 %v1944_v6, 0.0 }
 0x205   : > { %v1855_v60 = vadd.f32 %v3944_v37, %v3954_v34 }
 0x206   : > { %v2045_v27 = vmax.f32 %v1949_v16, 0.0  ;;  %2204 = vst.msk [vmem:[%s3964_s26 + $0x20] sm:$0xf] %vm2195_vm9, %v2496_v41  ;;  %v1952_v31 = vadd.f32 %v2665_v28, %v1791_v9  ;;  %v2497_v8 = vpack.c.bf16 %v2044_v14, %v2044_v14  ;;  %v2668_v45 = vpop.f32.mrb[28].mxu1 }
 0x207   : > { %v1956_v44 = vpop.f32.mrb[29].mxu1 }
 0x208   : > { %v2498_v49 = vpack.c.bf16 %v2045_v27, %v2045_v27  ;;  %v2046_v19 = vmax.f32 %v1952_v31, 0.0  ;;  %2205 = vst.msk [vmem:[%s3964_s26 + $0x24] sm:$0xf] %vm2195_vm9, %v2497_v8  ;;  %v2669_v54 = vpop.f32.mrb[30].mxu1 }
 0x209   : > { %v1959_v62 = vpop.f32.mrb[31].mxu1 }
 0x20a   : > { %2206 = vst.msk [vmem:[%s3964_s26 + $0x28] sm:$0xf] %vm2195_vm9, %v2498_v49  ;;  %v2499_v12 = vpack.c.bf16 %v2046_v19, %v2046_v19  ;;  %v2572_v13 = vpop.f32.mrb[24].mxu0 }
 0x20b   : > { %v2573_v38 = vpop.f32.mrb[25].mxu0 }
 0x20c   : > { %2207 = vst.msk [vmem:[%s3964_s26 + $0x2c] sm:$0xf] %vm2195_vm9, %v2499_v12  ;;  %v2574_v36 = vadd.f32 %v2573_v38, %v2572_v13  ;;  %v2575_v39 = vpop.f32.mrb[26].mxu0  ;;  %v1868_v38 = vadd.f32 %v3950_v57, %v3954_v34 }
 0x20d   : > { %v2576_v50 = vpop.f32.mrb[27].mxu0 }
 0x20e   : > { %v2577_v4 = vadd.f32 %v2576_v50, %v2575_v39  ;;  %v1796_v55 = vadd.f32 %v2574_v36, %v3954_v34  ;;  %v3999_v17 = vpop.f32.mrb[32].mxu1 }
 0x20f   : > { %v4001_v3 = vpop.f32.mrb[33].mxu1 }
 0x210   : > { %v1957_v22 = vadd.f32 %v1956_v44, %v1796_v55  ;;  %v1799_v48 = vadd.f32 %v2577_v4, %v3954_v34  ;;  %v4004_v63 = vpop.f32.mrb[34].mxu1  ;;  %v1860_v55 = vadd.f32 %v3946_v58, %v3954_v34 }
 0x211   : > { %v4006_v30 = vpop.f32.mrb[35].mxu1 }
 0x212   : > { %v2047_v11 = vmax.f32 %v1957_v22, 0.0  ;;  %v1960_v18 = vadd.f32 %v1959_v62, %v1799_v48 }
 0x214   : > { %v2500_v56 = vpack.c.bf16 %v2047_v11, %v2047_v11  ;;  %v2048_v7 = vmax.f32 %v1960_v18, 0.0  ;;  %v1871_v11 = vadd.f32 %v3952_v24, %v3954_v34 }
 0x216   : > { %2208 = vst.msk [vmem:[%s3964_s26 + $0x30] sm:$0xf] %vm2195_vm9, %v2500_v56  ;;  %v2501_v20 = vpack.c.bf16 %v2048_v7, %v2048_v7  ;;  %v2578_v0 = vpop.f32.mrb[28].mxu0  ;;  %v4010_v46 = vpop.f32.mrb[36].mxu1 }
 0x217   : > { %v2579_v15 = vpop.f32.mrb[29].mxu0  ;;  %v4012_v42 = vpop.f32.mrb[37].mxu1 }
 0x218   : > { %2209 = vst.msk [vmem:[%s3964_s26 + $0x34] sm:$0xf] %vm2195_vm9, %v2501_v20  ;;  %v2580_v52 = vadd.f32 %v2579_v15, %v2578_v0  ;;  %v2581_v21 = vpop.f32.mrb[30].mxu0  ;;  %v4016_v53 = vpop.f32.mrb[38].mxu1  ;;  %v1863_v20 = vadd.f32 %v3948_v10, %v3954_v34 }
 0x219   : > { %v2582_v59 = vpop.f32.mrb[31].mxu0  ;;  %v4018_v35 = vpop.f32.mrb[39].mxu1 }
 0x21a   : > { %v1804_v2 = vadd.f32 %v2580_v52, %v3954_v34  ;;  %v2583_v29 = vadd.f32 %v2582_v59, %v2581_v21 }
 0x21c   : > { %v1965_v1 = vadd.f32 %v2668_v45, %v1804_v2  ;;  %v1807_v61 = vadd.f32 %v2583_v29, %v3954_v34 }
 0x21e   : > { %v2049_v23 = vmax.f32 %v1965_v1, 0.0  ;;  %v1968_v28 = vadd.f32 %v2669_v54, %v1807_v61  ;;  %v2680_v40 = vpop.f32.mrb[40].mxu1 }
 0x21f   : > { %v2013_v43 = vadd.f32 %v2680_v40, %v1852_v47  ;;  %v2004_v33 = vpop.f32.mrb[41].mxu1 }
 0x220   : > { %v2502_v5 = vpack.c.bf16 %v2049_v23, %v2049_v23  ;;  %v2050_v6 = vmax.f32 %v1968_v28, 0.0  ;;  %v2005_v16 = vadd.f32 %v2004_v33, %v1844_v51  ;;  %v2681_v41 = vpop.f32.mrb[42].mxu1 }
 0x221   : > { %v2061_v9 = vmax.f32 %v2013_v43, 0.0  ;;  %v2016_v14 = vadd.f32 %v2681_v41, %v1855_v60  ;;  %v2007_v27 = vpop.f32.mrb[43].mxu1 }
 0x222   : > { %2210 = vst.msk [vmem:[%s3964_s26 + $0x38] sm:$0xf] %vm2195_vm9, %v2502_v5  ;;  %v2503_v25 = vpack.c.bf16 %v2050_v6, %v2050_v6  ;;  %v2059_v31 = vmax.f32 %v2005_v16, 0.0  ;;  %v2008_v8 = vadd.f32 %v2007_v27, %v1847_v32  ;;  %v2584_v45 = vpop.f32.mrb[32].mxu0 }
 0x223   : > { %v2514_v37 = vpack.c.bf16 %v2061_v9, %v2061_v9  ;;  %v2062_v44 = vmax.f32 %v2016_v14, 0.0  ;;  %v2585_v49 = vpop.f32.mrb[33].mxu0 }
 0x224   : > { %2211 = vst.msk [vmem:[%s3964_s26 + $0x3c] sm:$0xf] %vm2195_vm9, %v2503_v25  ;;  %v2512_v19 = vpack.c.bf16 %v2059_v31, %v2059_v31  ;;  %v2060_v54 = vmax.f32 %v2008_v8, 0.0  ;;  %v2586_v26 = vadd.f32 %v2585_v49, %v2584_v45  ;;  %v2587_v62 = vpop.f32.mrb[34].mxu0 }
 0x225   : > { %2222 = vst.msk [vmem:[%s3964_s26 + $0x68] sm:$0xf] %vm2195_vm9, %v2514_v37  ;;  %v2515_v12 = vpack.c.bf16 %v2062_v44, %v2062_v44  ;;  %v2588_v13 = vpop.f32.mrb[35].mxu0 }
 0x226   : > { %2220 = vst.msk [vmem:[%s3964_s26 + $0x60] sm:$0xf] %vm2195_vm9, %v2512_v19  ;;  %v2513_v36 = vpack.c.bf16 %v2060_v54, %v2060_v54  ;;  %v1812_v39 = vadd.f32 %v2586_v26, %v3954_v34  ;;  %v2589_v50 = vadd.f32 %v2588_v13, %v2587_v62  ;;  %v2684_v4 = vpop.f32.mrb[44].mxu1 }
 0x227   : > { %2223 = vst.msk [vmem:[%s3964_s26 + $0x6c] sm:$0xf] %vm2195_vm9, %v2515_v12  ;;  %v2029_v22 = vadd.f32 %v2684_v4, %v1868_v38  ;;  %v2020_v48 = vpop.f32.mrb[45].mxu1 }
 0x228   : > { %2221 = vst.msk [vmem:[%s3964_s26 + $0x64] sm:$0xf] %vm2195_vm9, %v2513_v36  ;;  %v1973_v57 = vadd.f32 %v4001_v3, %v1812_v39  ;;  %v1815_v18 = vadd.f32 %v2589_v50, %v3954_v34  ;;  %v2021_v56 = vadd.f32 %v2020_v48, %v1860_v55  ;;  %v2685_v7 = vpop.f32.mrb[46].mxu1 }
 0x229   : > { %v2065_v58 = vmax.f32 %v2029_v22, 0.0  ;;  %v2032_v0 = vadd.f32 %v2685_v7, %v1871_v11  ;;  %v2023_v15 = vpop.f32.mrb[47].mxu1 }
 0x22a   : > { %v2051_v52 = vmax.f32 %v1973_v57, 0.0  ;;  %v1976_v24 = vadd.f32 %v4006_v30, %v1815_v18  ;;  %v2063_v21 = vmax.f32 %v2021_v56, 0.0  ;;  %v2024_v59 = vadd.f32 %v2023_v15, %v1863_v20 }
 0x22b   : > { %v2518_v3 = vpack.c.bf16 %v2065_v58, %v2065_v58  ;;  %v2066_v2 = vmax.f32 %v2032_v0, 0.0 }
 0x22c   : > { %v2504_v29 = vpack.c.bf16 %v2051_v52, %v2051_v52  ;;  %v2052_v1 = vmax.f32 %v1976_v24, 0.0  ;;  %v2516_v61 = vpack.c.bf16 %v2063_v21, %v2063_v21  ;;  %v2064_v47 = vmax.f32 %v2024_v59, 0.0 }
 0x22d   : > { %2226 = vst.msk [vmem:[%s3964_s26 + $0x78] sm:$0xf] %vm2195_vm9, %v2518_v3  ;;  %v2519_v10 = vpack.c.bf16 %v2066_v2, %v2066_v2 }
 0x22e   : > { %2212 = vst.msk [vmem:[%s3964_s26 + $0x40] sm:$0xf] %vm2195_vm9, %v2504_v29  ;;  %v2505_v23 = vpack.c.bf16 %v2052_v1, %v2052_v1  ;;  %2224 = vst.msk [vmem:[%s3964_s26 + $0x70] sm:$0xf] %vm2195_vm9, %v2516_v61  ;;  %v2517_v30 = vpack.c.bf16 %v2064_v47, %v2064_v47  ;;  %v2590_v28 = vpop.f32.mrb[36].mxu0 }
 0x22f   : > { %2227 = vst.msk [vmem:[%s3964_s26 + $0x7c] sm:$0xf] %vm2195_vm9, %v2519_v10  ;;  %v2591_v40 = vpop.f32.mrb[37].mxu0 }
 0x230   : > { %2213 = vst.msk [vmem:[%s3964_s26 + $0x44] sm:$0xf] %vm2195_vm9, %v2505_v23  ;;  %2225 = vst.msk [vmem:[%s3964_s26 + $0x74] sm:$0xf] %vm2195_vm9, %v2517_v30  ;;  %v2592_v51 = vadd.f32 %v2591_v40, %v2590_v28  ;;  %v2593_v43 = vpop.f32.mrb[38].mxu0 }
 0x231   : > { %v2594_v33 = vpop.f32.mrb[39].mxu0 }
 0x232   : > { %v1820_v60 = vadd.f32 %v2592_v51, %v3954_v34  ;;  %v2595_v5 = vadd.f32 %v2594_v33, %v2593_v43 }
 0x234   : > { %v1981_v6 = vadd.f32 %v3999_v17, %v1820_v60  ;;  %v1823_v16 = vadd.f32 %v2595_v5, %v3954_v34 }
 0x236   : > { %v2053_v41 = vmax.f32 %v1981_v6, 0.0  ;;  %v1984_v32 = vadd.f32 %v4004_v63, %v1823_v16 }
 0x238   : > { %v2506_v9 = vpack.c.bf16 %v2053_v41, %v2053_v41  ;;  %v2054_v14 = vmax.f32 %v1984_v32, 0.0 }
 0x23a   : > { %2214 = vst.msk [vmem:[%s3964_s26 + $0x48] sm:$0xf] %vm2195_vm9, %v2506_v9  ;;  %v2507_v27 = vpack.c.bf16 %v2054_v14, %v2054_v14  ;;  %v2596_v25 = vpop.f32.mrb[40].mxu0 }
 0x23b   : > { %v2597_v31 = vpop.f32.mrb[41].mxu0 }
 0x23c   : > { %2215 = vst.msk [vmem:[%s3964_s26 + $0x4c] sm:$0xf] %vm2195_vm9, %v2507_v27  ;;  %v2598_v8 = vadd.f32 %v2597_v31, %v2596_v25  ;;  %v2599_v45 = vpop.f32.mrb[42].mxu0 }
 0x23d   : > { %v2600_v37 = vpop.f32.mrb[43].mxu0 }
 0x23e   : > { %v1828_v17 = vadd.f32 %v2598_v8, %v3954_v34  ;;  %v2601_v44 = vadd.f32 %v2600_v37, %v2599_v45 }
 0x240   : > { %v1989_v49 = vadd.f32 %v4012_v42, %v1828_v17  ;;  %v1831_v63 = vadd.f32 %v2601_v44, %v3954_v34 }
 0x242   : > { %v2055_v19 = vmax.f32 %v1989_v49, 0.0  ;;  %v1992_v54 = vadd.f32 %v4018_v35, %v1831_v63 }
 0x244   : > { %v2508_v26 = vpack.c.bf16 %v2055_v19, %v2055_v19  ;;  %v2056_v62 = vmax.f32 %v1992_v54, 0.0 }
 0x246   : > { %2216 = vst.msk [vmem:[%s3964_s26 + $0x50] sm:$0xf] %vm2195_vm9, %v2508_v26  ;;  %v2509_v12 = vpack.c.bf16 %v2056_v62, %v2056_v62  ;;  %v2602_v13 = vpop.f32.mrb[44].mxu0 }
 0x247   : > { %v2603_v38 = vpop.f32.mrb[45].mxu0 }
 0x248   : > { %2217 = vst.msk [vmem:[%s3964_s26 + $0x54] sm:$0xf] %vm2195_vm9, %v2509_v12  ;;  %v2604_v36 = vadd.f32 %v2603_v38, %v2602_v13  ;;  %v2605_v39 = vpop.f32.mrb[46].mxu0 }
 0x249   : > { %v2606_v50 = vpop.f32.mrb[47].mxu0 }
 0x24a   : > { %v1836_v42 = vadd.f32 %v2604_v36, %v3954_v34  ;;  %v2607_v4 = vadd.f32 %v2606_v50, %v2605_v39 }
 0x24c   : > { %v1997_v55 = vadd.f32 %v4010_v46, %v1836_v42  ;;  %v1839_v35 = vadd.f32 %v2607_v4, %v3954_v34 }
 0x24e   : > { %v2057_v22 = vmax.f32 %v1997_v55, 0.0  ;;  %v2000_v48 = vadd.f32 %v4016_v53, %v1839_v35 }
 0x250   : > { %v2510_v11 = vpack.c.bf16 %v2057_v22, %v2057_v22  ;;  %v2058_v57 = vmax.f32 %v2000_v48, 0.0 }
 0x252   : > { %2218 = vst.msk [vmem:[%s3964_s26 + $0x58] sm:$0xf] %vm2195_vm9, %v2510_v11  ;;  %v2511_v18 = vpack.c.bf16 %v2058_v57, %v2058_v57 }
 0x254   : > { %2219 = vst.msk [vmem:[%s3964_s26 + $0x5c] sm:$0xf] %vm2195_vm9, %v2511_v18 }
 0x255 PF: > { %s14_s14 = sadd.s32 1, %s2835_s14   ;;  %s4143_s12 = smov %s2831_s13 }
 0x256   : > { %p11_p3 = scmp.ge.s32.totalorder %s14_s14, 4   ;;  %s4144_s13 = smov %s4146_s16 }
 0x258   :  { %13 = sbr.rel (!%p11_p3) target bundleno = 2 (0x2), region = 71 }
 0x25f   :  { %2255 = vsyncpa [#allocation3], 1 }
 0x260   :  { %2257 = vsyncpa [#allocation3 + $0x1], 1 }

// kernel: vgg_forward.14
= control target key start
LH: loop header
LB: loop body
LE: loop exit
PB: predicated region body
PF: predicated region fallthrough
CT: control target
= control target key end

     0   :  { %s476_s6 = smov 0   ;;  %s505_s0 = inlined_call_operand.vmem [shape: bf16[2,4,4,512], index: 0, kind: input, shape index: {}]   ;;  %s506_s1 = inlined_call_operand.vmem [shape: bf16[2,2,2,512], index: 1, kind: output, shape index: {}]  }
   0x1 LB: > { %s425_s7 = sadd.s32 4294967295, %s462_s6   ;;  %p429_p0 = scmp.ge.s32.totalorder %s462_s6, 1  ;;  %s462_s6 = sphi %s476_s6, %s11_s6  }
   0x2   : > { %p87_p1 = scmp.lt.s32.totalorder %s462_s6, 3 }
   0x4   : > { %p88_p2 = pnand %p429_p0, %p87_p1 }
   0x5   : > { %p106_p3 = scmp.lt.s32.totalorder (!%p88_p2), %s425_s7, 1  ;;  %v202_v0 = vlaneseq (!%p88_p2)  ;;  %v464_v1 = vmov (!%p88_p2), 1935823168   ;;  %v465_v15 = vmov (!%p88_p2), 1966171168   ;;  %vm304_vm0 = vcmask (!%p88_p2), 1041409  }
   0x6   : > { %91 = sbr.rel (%p88_p2) target bundleno = 46 (0x2e), region = 24  ;;  %v200_v2 = vunpack.c.l.s4 (!%p88_p2), %v464_v1  ;;  %v325_v16 = vunpack.c.l.s4 (!%p88_p2), %v465_v15 }
   0x7   : > { %v203_v3 = vshrl.u32 (!%p88_p2), %v202_v0, 7 }
   0x8   : > { %v201_v11 = vunpack.c.0.s8 (!%p88_p2), %v200_v2  ;;  %v326_v26 = vunpack.c.0.s8 (!%p88_p2), %v325_v16 }
   0xa   : > { %v204_v23 = vsub.s32 (!%p88_p2), %v201_v11, %v203_v3  ;;  %v329_v34 = vsub.s32 (!%p88_p2), %v326_v26, %v203_v3 }
   0xd   : > { %s508_s7 = smov (!%p106_p3, %s425_s7), 1 }
   0xe   : > { %s445_s8 = sshll.u32 %s508_s7, 5  ;;  %s432_s12 = sshll.u32 %s508_s7, 3 }
   0xf   : > { %s110_s11 = scalar_lea.vmem %s505_s0, %s445_s8  ;;  %s114_s15 = scalar_lea.vmem %s506_s1, %s432_s12 }
  0x10   : > { %v433_v4 = vld.sshfl [vmem:[%s110_s11] sm:$0xff pattern:$0x75316420]  ;;  %v434_v5 = vld.sshfl [vmem:[%s110_s11 + $0x8] sm:$0xff pattern:$0x75316420] }
  0x11   : > { %v435_v6 = vld.sshfl [vmem:[%s110_s11 + $0x10] sm:$0xff pattern:$0x75316420]  ;;  %v436_v7 = vld.sshfl [vmem:[%s110_s11 + $0x18] sm:$0xff pattern:$0x75316420]  ;;  %v130_v8 = vcombine.high %v433_v4, %v433_v4  ;;  %v138_v9 = vcombine.high %v434_v5, %v434_v5  ;;  %v163_v10 = vmax.bf16 %v434_v5, %v433_v4 }
  0x12   : > { %v146_v12 = vcombine.high %v435_v6, %v435_v6  ;;  %v154_v13 = vcombine.high %v436_v7, %v436_v7  ;;  %v165_v14 = vmax.bf16 %v436_v7, %v435_v6 }
  0x13   : > { %v164_v17 = vmax.bf16 %v138_v9, %v130_v8  ;;  %v168_v18 = vshrl.u32 %v163_v10, 16 }
  0x14   : > { %v166_v19 = vmax.bf16 %v154_v13, %v146_v12  ;;  %v178_v20 = vshrl.u32 %v165_v14, 16 }
  0x15   : > { %v173_v21 = vshrl.u32 %v164_v17, 16  ;;  %v191_v22 = vmax.bf16 %v168_v18, %v163_v10 }
  0x16   : > { %v183_v24 = vshrl.u32 %v166_v19, 16  ;;  %v193_v25 = vmax.bf16 %v178_v20, %v165_v14 }
  0x17   : > { %v192_v27 = vmax.bf16 %v173_v21, %v164_v17  ;;  %v205_v28 = vrot.slane %v191_v22, %v204_v23 }
  0x18   : > { %v194_v29 = vmax.bf16 %v183_v24, %v166_v19  ;;  %v249_v30 = vrot.slane %v193_v25, %v204_v23 }
  0x19   : > { %v206_v31 = vcombine.high %v205_v28, %v205_v28  ;;  %v213_v32 = vrot.slane %v205_v28, %v204_v23  ;;  %v227_v33 = vrot.slane %v192_v27, %v204_v23 }
  0x1a   : > { %v250_v35 = vcombine.high %v249_v30, %v249_v30  ;;  %v257_v36 = vrot.slane %v249_v30, %v204_v23  ;;  %v271_v37 = vrot.slane %v194_v29, %v204_v23 }
  0x1b   : > { %v220_v38 = vrot.slane %v206_v31, %v204_v23  ;;  %v228_v39 = vcombine.high %v227_v33, %v227_v33  ;;  %v235_v40 = vrot.slane %v227_v33, %v204_v23  ;;  %v287_v41 = vunpack.c.l.b16 %v213_v32 }
  0x1c   : > { %v288_v42 = vunpack.c.h.b16 %v213_v32  ;;  %v264_v43 = vrot.slane %v250_v35, %v204_v23  ;;  %v272_v44 = vcombine.high %v271_v37, %v271_v37  ;;  %v279_v45 = vrot.slane %v271_v37, %v204_v23 }
  0x1d   : > { %v242_v46 = vrot.slane %v228_v39, %v204_v23  ;;  %v289_v47 = vunpack.c.l.b16 %v220_v38  ;;  %v290_v48 = vunpack.c.h.b16 %v220_v38  ;;  %v291_v49 = vunpack.c.l.b16 %v235_v40 }
  0x1e   : > { %v292_v50 = vunpack.c.h.b16 %v235_v40  ;;  %v286_v51 = vrot.slane %v272_v44, %v204_v23  ;;  %v295_v52 = vunpack.c.l.b16 %v257_v36  ;;  %v296_v53 = vunpack.c.h.b16 %v257_v36 }
  0x1f   : > { %v293_v54 = vunpack.c.l.b16 %v242_v46  ;;  %v294_v55 = vunpack.c.h.b16 %v242_v46  ;;  %v303_v56 = vrot.slane %v291_v49, 7  ;;  %v297_v57 = vunpack.c.l.b16 %v264_v43 }
  0x20   : > { %v306_v58 = vrot.slane %v292_v50, 7  ;;  %v298_v59 = vunpack.c.h.b16 %v264_v43  ;;  %v299_v60 = vunpack.c.l.b16 %v279_v45  ;;  %v300_v61 = vunpack.c.h.b16 %v279_v45 }
  0x21   : > { %v305_v62 = vsel %vm304_vm0, %v303_v56, %v287_v41  ;;  %v308_v63 = vrot.slane %v293_v54, 7  ;;  %v310_v0 = vrot.slane %v294_v55, 7  ;;  %v301_v1 = vunpack.c.l.b16 %v286_v51 }
  0x22   : > { %v307_v2 = vsel %vm304_vm0, %v306_v58, %v288_v42  ;;  %v302_v3 = vunpack.c.h.b16 %v286_v51  ;;  %v312_v4 = vrot.slane %v299_v60, 7  ;;  %v314_v5 = vrot.slane %v300_v61, 7 }
  0x23   : > { %v309_v6 = vsel %vm304_vm0, %v308_v63, %v289_v47  ;;  %v311_v7 = vsel %vm304_vm0, %v310_v0, %v290_v48  ;;  %v320_v8 = vpack.c.b16 %v307_v2, %v305_v62  ;;  %v316_v9 = vrot.slane %v301_v1, 7 }
  0x24   : > { %v321_v10 = vpack.c.b16 %v311_v7, %v309_v6  ;;  %v313_v11 = vsel %vm304_vm0, %v312_v4, %v295_v52  ;;  %v315_v12 = vsel %vm304_vm0, %v314_v5, %v296_v53  ;;  %v318_v13 = vrot.slane %v302_v3, 7 }
  0x25   : > { %v330_v14 = vrot.slane %v320_v8, %v329_v34  ;;  %v317_v15 = vsel %vm304_vm0, %v316_v9, %v297_v57  ;;  %v322_v16 = vpack.c.b16 %v315_v12, %v313_v11 }
  0x26   : > { %v337_v17 = vrot.slane %v321_v10, %v329_v34  ;;  %v319_v18 = vsel %vm304_vm0, %v318_v13, %v298_v59 }
  0x27   : > { %v323_v19 = vpack.c.b16 %v319_v18, %v317_v15  ;;  %v352_v20 = vrot.slane %v322_v16, %v329_v34 }
  0x28   : > { %v338_v21 = vcombine.low %v330_v14, %v337_v17 }
  0x29   : > { %v359_v22 = vrot.slane %v323_v19, %v329_v34 }
  0x2a   : > { %441 = vst.sshfl [vmem:[%s114_s15] sm:$0x55 pattern:$0x73625140] %v338_v21 }
  0x2b   : > { %v360_v23 = vcombine.low %v352_v20, %v359_v22 }
  0x2d   : > { %442 = vst.sshfl [vmem:[%s114_s15 + $0x4] sm:$0x55 pattern:$0x73625140] %v360_v23 }
  0x2e PF: > { %s11_s6 = sadd.s32 1, %s462_s6  }
  0x2f   : > { %p8_p4 = scmp.ge.s32.totalorder %s11_s6, 4  }
  0x31   :  { %10 = sbr.rel (!%p8_p4) target bundleno = 1 (0x1), region = 54 }

// kernel: vgg_forward.13
= control target key start
LH: loop header
LB: loop body
LE: loop exit
PB: predicated region body
PF: predicated region fallthrough
CT: control target
= control target key end

     0   :  { %s3130_s0 = inlined_call_operand.vmem [shape: bf16[2,6,6,128], index: 0, kind: input, shape index: {}]   ;;  %s3131_s1 = inlined_call_operand.hbm [shape: bf16[1152,512], index: 1, kind: input, shape index: {}]   ;;  %s3132_s2 = inlined_call_operand.hbm [shape: f32[1,512], index: 2, kind: input, shape index: {}]   ;;  %s3133_s3 = inlined_call_operand.vmem [shape: bf16[2,16,512], index: 3, kind: output, shape index: {}]  }
   0x1   :  { %3138 = sst [smem:[#allocation12_spill]] %s3131_s1 }
   0x2   :  { %8 = vsyncpa [#allocation3], 0 }
   0x3   :  { %10 = vsyncpa [#allocation3 + $0x1], 0 }
   0x4   :  { %11 = vsyncpa [#allocation5], 0 }
   0x5   :  { %13 = vsyncpa [#allocation5 + $0x1], 0  ;;  %s2540_s12 = smov 0   ;;  %s2542_s13 = smov 0  }
   0x6   :  { %s2544_s14 = smov 0   ;;  %s2546_s15 = smov 0  }
   0x7   :  { %s2548_s16 = smov 0   ;;  %s2550_s17 = smov 0  }
   0x8   :  { %s2552_s18 = smov 0   ;;  %s2554_s19 = smov 0  }
   0x9   :  { %s2556_s20 = smov 0   ;;  %s2558_s21 = smov 0  }
   0xa LB: > { %3139 = sst [smem:[#allocation9_spill]] %s2507_s20  ;;  %s1849_s22 = sadd.s32 4294967295, %s2511_s21   ;;  %s2511_s21 = sphi %s2558_s21, %s19_s21   ;;  %s2507_s20 = sphi %s2556_s20, %s3165_s20   ;;  %s2503_s19 = sphi %s2554_s19, %s3172_s19   ;;  %s2499_s18 = sphi %s2552_s18, %s3163_s18   ;;  %s2495_s17 = sphi %s2550_s17, %s3171_s17   ;;  %s2491_s16 = sphi %s2548_s16, %s3170_s16   ;;  %s2487_s15 = sphi %s2546_s15, %s3169_s15   ;;  %s2483_s14 = sphi %s2544_s14, %s3168_s14   ;;  %s2479_s13 = sphi %s2542_s13, %s3167_s13   ;;  %s2475_s12 = sphi %s2540_s12, %s3166_s12  }
   0xb   : > { %s28_s23 = sadd.s32 1, %s2503_s19  ;;  %s31_s24 = sadd.s32 1, %s2507_s20 }
   0xc   : > { %p29_p0 = scmp.ge.s32.totalorder %s28_s23, 2  ;;  %s64_s25 = sadd.s32 1, %s2491_s16 }
   0xd   : > { %p71_p1 = scmp.ne.s32.totalorder %s2491_s16, %s2487_s15  ;;  %p72_p2 = scmp.eq.s32.totalorder %s2511_s21, 0 }
   0xe   : > { %s3174_s23 = smov (%p29_p0, %s28_s23), 0  ;;  %s3176_s24 = smov (!%p29_p0, %s31_s24), %s2507_s20 }
   0xf   : > { %3140 = sst [smem:[#allocation10_spill]] %s3174_s23  ;;  %s61_s26 = ssub.s32 %s2503_s19, %s3174_s23 }
  0x10   : > { %p33_p3 = scmp.ge.s32.totalorder %s3176_s24, 2  ;;  %p62_p4 = scmp.eq.s32.totalorder %s61_s26, 0 }
  0x11   : > { %p2600_p5 = por %p72_p2, %p71_p1  ;;  %p77_p6 = scmp.ne.s32.totalorder %s2487_s15, %s2483_s14 }
  0x12   : > { %s3178_s24 = smov (%p33_p3, %s3176_s24), 0  ;;  %p78_p7 = scmp.eq.s32.totalorder %s1849_s22, 0 }
  0x13   : > { %3142 = sst [smem:[#allocation11_spill]] %s3178_s24  ;;  %s113_s29 = ssub.s32 %s2507_s20, %s3178_s24 }
  0x14   : > { %s2608_s28 = scalar_select %p62_p4, %s2491_s16, %s64_s25  }
  0x15   : > { %s115_s30 = sor.u32 %s113_s29, %s61_s26  ;;  %s118_s4 = sadd.s32 1, %s2479_s13 }
  0x16   : > { %p2613_p8 = por %p78_p7, %p77_p6  ;;  %p116_p9 = scmp.eq.s32.totalorder %s115_s30, 0 }
  0x17   : > { %p128_p10 = scmp.ne.s32.totalorder %s2479_s13, %s2475_s12  ;;  %p129_p11 = scmp.eq.s32.totalorder %s1849_s22, 3 }
  0x18   : > { %s3143_s5 = scalar_select %p2613_p8, 1, 0 }
  0x19   : > { %s2620_s6 = scalar_select %p116_p9, %s2479_s13, %s118_s4  }
  0x1a   : > { %p2622_p12 = por %p129_p11, %p128_p10  ;;  %p2058_p13 = scmp.lt.s32.totalorder %s2511_s21, 4 }
  0x1b   : > { %s2628_s8 = sand.u32 1, %s2491_s16   ;;  %s2020_s10 = sshll.u32 %s2503_s19, 7 }
  0x1c   : > { %s3144_s7 = scalar_select %p2622_p12, 1, 0 }
  0x1d   : > { %s2044_s9 = smul.u32 1152, %s2628_s8  ;;  %p2634_p0 = pnand %p2058_p13, %p2600_p5 }
  0x1e   : > { %s3146_s1 = sld [smem:[#allocation12_spill]]  ;;  %s164_s27 = scalar_lea.sflag [#allocation3], %s2628_s8 }
  0x1f   : > { %s167_s26 = scalar_lea.vmem [#allocation2], %s2044_s9  ;;  %p2367_p2 = pneg %p2634_p0 }
  0x20   : > { %s174_s29 = sshll.u32 %s167_s26, 4  ;;  %s2643_s29 = int_to_ptr.vmem [resolvable:$true] %s174_s29 }
  0x24   : > { %s2641_s25 = scalar_lea.hbm %s3146_s1, %s2020_s10  ;;  %s2370_s14 = scalar_lea.hbm %s3146_s1, 36864 }
  0x25   : > { %s2365_s30 = scalar_lea.hbm %s2641_s25, 18432  ;;  %p2371_p5 = scmp.lt.u32.totalorder %s2641_s25, %s3146_s1 }
  0x26   : > { %p2366_p1 = scmp.ne.s32.totalorder %s2641_s25, %s2365_s30  ;;  %p2372_p6 = scmp.lt.u32.totalorder %s2370_s14, %s2365_s30 }
  0x27   : > { %p2374_p9 = scmp.lt.u32.totalorder %s2365_s30, %s2641_s25 }
  0x28   : > { %p2368_p3 = pnand %p2367_p2, %p2366_p1  ;;  %p2373_p7 = por %p2372_p6, %p2371_p5 }
  0x2a   : > { %p2369_p4 = pneg %p2368_p3  ;;  %p2375_p10 = por %p2374_p9, %p2373_p7 }
  0x2c   : > { %p2376_p11 = pnand %p2375_p10, %p2369_p4 }
  0x2e   : > { %2379 = shalt.err (!%p2376_p11)
}
  0x2f   : > { %s2380_s9 = scalar_lea.vmem %s2643_s29, 18432  ;;  %s2513_s26 = smov [#allocation2]  }
  0x30   : > { %p2381_p13 = scmp.ne.s32.totalorder %s2643_s29, %s2380_s9  ;;  %s2385_s4 = sshll.u32 %s2513_s26, 4  ;;  %s2386_s4 = int_to_ptr.vmem [resolvable:$false] %s2385_s4 }
  0x31   : > { %s2387_s24 = scalar_lea.vmem %s2386_s4, 36864  ;;  %p2388_p12 = scmp.lt.s32.totalorder %s2643_s29, %s2386_s4 }
  0x32   : > { %p2383_p1 = pnand %p2381_p13, %p2367_p2  ;;  %p2389_p5 = scmp.lt.s32.totalorder %s2387_s24, %s2380_s9 }
  0x34   : > { %p2384_p3 = pneg %p2383_p1  ;;  %p2390_p6 = por %p2389_p5, %p2388_p12 }
  0x36   : > { %p2391_p7 = pnand %p2390_p6, %p2384_p3 }
  0x38   : > { %2394 = shalt.err (!%p2391_p7)
}
  0x39   : > { %s2514_s30 = smov 256   ;;  %s2515_s10 = smov 128  }
  0x3a   : > { %s2516_s14 = smov 8   ;;  %p1858_p4 = scmp.ge.s32.totalorder %s2511_s21, 1 }
  0x3b   : > { %2054 = dma.hbm_to_vmem [thread:$0]  (!%p2634_p0), %s2641_s25, 18432, %s2643_s29, %s164_s27, %s2514_s30, %s2515_s10, %s2516_s14  }
  0x3c   : > { %p201_p12 = scmp.lt.s32.totalorder %s2511_s21, 5  ;;  %s1855_s22 = sshll.u32 %s2628_s8, 1 }
  0x3d   : > { %s2021_s26 = sshll.u32 %s2503_s19, 5  ;;  %s188_s4 = scalar_lea.vmem [#allocation4], %s1855_s22 }
  0x3e   : > { %p2676_p9 = pnand %p1858_p4, %p201_p12  ;;  %s196_s24 = sshll.u32 %s188_s4, 4  ;;  %s197_s24 = int_to_ptr.vmem [resolvable:$true] %s196_s24 }
  0x3f   : > { %s2684_s20 = scalar_lea.hbm %s3132_s2, %s2021_s26  ;;  %s185_s25 = scalar_lea.sflag [#allocation5], %s2628_s8 }
  0x40   : > { %s3147_s9 = scalar_select %p2676_p9, 1, 0 }
  0x41   : > { %s2395_s29 = scalar_lea.hbm %s2684_s20, 32  ;;  %s2400_s10 = scalar_lea.hbm %s3132_s2, 64 }
  0x42   : > { %p2396_p10 = scmp.ne.s32.totalorder %s2684_s20, %s2395_s29  ;;  %p2401_p1 = scmp.lt.u32.totalorder %s2684_s20, %s3132_s2 }
  0x43   : > { %p2402_p3 = scmp.lt.u32.totalorder %s2400_s10, %s2395_s29  ;;  %p2404_p6 = scmp.lt.u32.totalorder %s2395_s29, %s2684_s20 }
  0x44   : > { %p2398_p11 = pnand %p2396_p10, %p2367_p2 }
  0x45   : > { %p2403_p5 = por %p2402_p3, %p2401_p1 }
  0x46   : > { %p2399_p13 = pneg %p2398_p11 }
  0x47   : > { %p2405_p7 = por %p2404_p6, %p2403_p5 }
  0x49   : > { %p2406_p4 = pnand %p2405_p7, %p2399_p13 }
  0x4b   : > { %2409 = shalt.err (!%p2406_p4)
}
  0x4c   : > { %s2410_s23 = scalar_lea.vmem %s197_s24, 32  ;;  %s2517_s8 = smov [#allocation4]  }
  0x4d   : > { %p2411_p12 = scmp.ne.s32.totalorder %s197_s24, %s2410_s23  ;;  %s2415_s22 = sshll.u32 %s2517_s8, 4  ;;  %s2416_s22 = int_to_ptr.vmem [resolvable:$false] %s2415_s22 }
  0x4e   : > { %s2417_s26 = scalar_lea.vmem %s2416_s22, 64  ;;  %p2418_p8 = scmp.lt.s32.totalorder %s197_s24, %s2416_s22 }
  0x4f   : > { %p2413_p10 = pnand %p2411_p12, %p2367_p2  ;;  %p2419_p9 = scmp.lt.s32.totalorder %s2417_s26, %s2410_s23 }
  0x51   : > { %p2414_p11 = pneg %p2413_p10  ;;  %p2420_p1 = por %p2419_p9, %p2418_p8 }
  0x53   : > { %p2421_p3 = pnand %p2420_p1, %p2414_p11 }
  0x55   : > { %2424 = shalt.err (!%p2421_p3)
}
  0x56   : > { %2057 = dma.hbm_to_vmem [thread:$0]  (!%p2634_p0), %s2684_s20, 32, %s197_s24, %s185_s25  }
  0x57   : > { %p3148_p13 = scmp.ne.s32.totalorder %s3147_s9, 0 }
  0x58   : > { %s207_s4 = sand.u32 (!%p3148_p13), 1, %s2487_s15   ;;  %p3149_p2 = scmp.ne.s32.totalorder (!%p3148_p13), %s3143_s5, 0 }
  0x59   : > { %205 = sbr.rel (%p3148_p13) target bundleno = 492 (0x1ec), region = 32  ;;  %s208_s27 = scalar_lea.sflag (!%p3148_p13), [#allocation3], %s207_s4 }
  0x5a   : > { %s2045_s29 = smul.u32 (!%p3148_p13), 1152, %s207_s4 }
  0x5c   : > { %s2709_s30 = scalar_lea.vmem (!%p3148_p13), [#allocation2], %s2045_s29 }
  0x60   : > { %2466 = dma.done.wait (%p3149_p2), %s208_s27, 18432  }
  0x61   : > { %2468 = vsyncadd (%p3149_p2), %s208_s27, 4294948864  ;;  %s1859_s10 = sshll.u32 %s207_s4, 1  ;;  %s217_s11 = scalar_lea.sflag [#allocation5], %s207_s4 }
  0x62   : > { %s2715_s14 = scalar_lea.vmem [#allocation4], %s1859_s10 }
  0x63   : > { %2470 = dma.done.wait (%p3149_p2), %s217_s11, 32  }
  0x64   : > { %2472 = vsyncadd (%p3149_p2), %s217_s11, 4294967264  ;;  %v2144_v0 = vld [vmem:[%s2709_s30 + $0x4] ss:$8 sps:$4 sm:$0xff]   ;;  %v2148_v2 = vld [vmem:[%s2709_s30] ss:$8 sps:$4 sm:$0xff]   ;;  %p252_p8 = scmp.lt.s32.totalorder %s2499_s18, 1  ;;  %v274_v38 = vlaneseq }
  0x65   : > { %v2146_v1 = vld [vmem:[%s2709_s30 + $0x204] ss:$8 sps:$4 sm:$0xff]   ;;  %1457 = vmatprep.subr.bf16.mxu1 %v2144_v0  ;;  %v2149_v3 = vld [vmem:[%s2709_s30 + $0x200] ss:$8 sps:$4 sm:$0xff]   ;;  %v2150_v4 = vld [vmem:[%s2709_s30 + $0x14] ss:$8 sps:$4 sm:$0xff]  }
  0x66   : > { %1543 = vmatprep.subr.bf16.mxu0 %v2146_v1  ;;  %1458 = vmatpush1.bf16.msra.mxu1 %v2148_v2  ;;  %v2152_v5 = vld [vmem:[%s2709_s30 + $0x214] ss:$8 sps:$4 sm:$0xff]   ;;  %v2154_v6 = vld [vmem:[%s2709_s30 + $0x10] ss:$8 sps:$4 sm:$0xff]   ;;  %v2156_v8 = vld [vmem:[%s2709_s30 + $0x24] ss:$8 sps:$4 sm:$0xff]  }
  0x67   : > { %1544 = vmatpush1.bf16.msra.mxu0 %v2149_v3  ;;  %1459 = vmatprep.subr.bf16.mxu1 %v2150_v4  ;;  %v2155_v7 = vld [vmem:[%s2709_s30 + $0x210] ss:$8 sps:$4 sm:$0xff]   ;;  %v2158_v9 = vld [vmem:[%s2709_s30 + $0x224] ss:$8 sps:$4 sm:$0xff]   ;;  %v2160_v10 = vld [vmem:[%s2709_s30 + $0x20] ss:$8 sps:$4 sm:$0xff]  }
  0x68   : > { %1545 = vmatprep.subr.bf16.mxu0 %v2152_v5  ;;  %v2161_v11 = vld [vmem:[%s2709_s30 + $0x220] ss:$8 sps:$4 sm:$0xff]   ;;  %v2162_v12 = vld [vmem:[%s2709_s30 + $0x34] ss:$8 sps:$4 sm:$0xff]   ;;  %v2166_v14 = vld [vmem:[%s2709_s30 + $0x30] ss:$8 sps:$4 sm:$0xff]  }
  0x69   : > { %v2164_v13 = vld [vmem:[%s2709_s30 + $0x234] ss:$8 sps:$4 sm:$0xff]   ;;  %v2167_v15 = vld [vmem:[%s2709_s30 + $0x230] ss:$8 sps:$4 sm:$0xff]   ;;  %v2168_v16 = vld [vmem:[%s2709_s30 + $0x44] ss:$8 sps:$4 sm:$0xff]  }
  0x6a   : > { %1460 = vmatpush1.bf16.msra.mxu1 %v2154_v6  ;;  %v2170_v17 = vld [vmem:[%s2709_s30 + $0x244] ss:$8 sps:$4 sm:$0xff]   ;;  %v2172_v18 = vld [vmem:[%s2709_s30 + $0x40] ss:$8 sps:$4 sm:$0xff]   ;;  %v2174_v20 = vld [vmem:[%s2709_s30 + $0x54] ss:$8 sps:$4 sm:$0xff]  }
  0x6b   : > { %1546 = vmatpush1.bf16.msra.mxu0 %v2155_v7  ;;  %1461 = vmatprep.subr.bf16.mxu1 %v2156_v8  ;;  %v2173_v19 = vld [vmem:[%s2709_s30 + $0x240] ss:$8 sps:$4 sm:$0xff]   ;;  %v2176_v21 = vld [vmem:[%s2709_s30 + $0x254] ss:$8 sps:$4 sm:$0xff]   ;;  %v2178_v22 = vld [vmem:[%s2709_s30 + $0x50] ss:$8 sps:$4 sm:$0xff]  }
  0x6c   : > { %1547 = vmatprep.subr.bf16.mxu0 %v2158_v9  ;;  %v2179_v23 = vld [vmem:[%s2709_s30 + $0x250] ss:$8 sps:$4 sm:$0xff]   ;;  %v2180_v24 = vld [vmem:[%s2709_s30 + $0x64] ss:$8 sps:$4 sm:$0xff]   ;;  %v2184_v26 = vld [vmem:[%s2709_s30 + $0x60] ss:$8 sps:$4 sm:$0xff]  }
  0x6d   : > { %v2182_v25 = vld [vmem:[%s2709_s30 + $0x264] ss:$8 sps:$4 sm:$0xff]   ;;  %v2185_v27 = vld [vmem:[%s2709_s30 + $0x260] ss:$8 sps:$4 sm:$0xff]   ;;  %v2186_v28 = vld [vmem:[%s2709_s30 + $0x74] ss:$8 sps:$4 sm:$0xff]  }
  0x6e   : > { %1462 = vmatpush1.bf16.msra.mxu1 %v2160_v10  ;;  %v2188_v29 = vld [vmem:[%s2709_s30 + $0x274] ss:$8 sps:$4 sm:$0xff]   ;;  %v2190_v30 = vld [vmem:[%s2709_s30 + $0x70] ss:$8 sps:$4 sm:$0xff]   ;;  %v2192_v32 = vld [vmem:[%s2709_s30 + $0x84] ss:$8 sps:$4 sm:$0xff]  }
  0x6f   : > { %1548 = vmatpush1.bf16.msra.mxu0 %v2161_v11  ;;  %1463 = vmatprep.subr.bf16.mxu1 %v2162_v12  ;;  %v2191_v31 = vld [vmem:[%s2709_s30 + $0x270] ss:$8 sps:$4 sm:$0xff]   ;;  %v2194_v33 = vld [vmem:[%s2709_s30 + $0x284] ss:$8 sps:$4 sm:$0xff]   ;;  %v2196_v34 = vld [vmem:[%s2709_s30 + $0x80] ss:$8 sps:$4 sm:$0xff]  }
  0x70   : > { %1549 = vmatprep.subr.bf16.mxu0 %v2164_v13  ;;  %v2197_v35 = vld [vmem:[%s2709_s30 + $0x280] ss:$8 sps:$4 sm:$0xff]   ;;  %s253_s20 = scalar_select %p252_p8, %s2499_s18, 1  ;;  %v2518_v36 = vmov 1983009808   ;;  %v2762_v43 = vshrl.u32 %v274_v38, 7 }
  0x71   : > { %v272_v37 = vunpack.c.l.s4 %v2518_v36  ;;  %v2198_v39 = vld [vmem:[%s2709_s30 + $0x94] ss:$8 sps:$4 sm:$0xff]   ;;  %vm303_vm0 = vsmask.f32 1280  ;;  %vm304_vm1 = vsmask.f32 3336 }
  0x72   : > { %1464 = vmatpush1.bf16.msra.mxu1 %v2166_v14  ;;  %v2200_v40 = vld [vmem:[%s2709_s30 + $0x294] ss:$8 sps:$4 sm:$0xff]   ;;  %v2202_v41 = vld [vmem:[%s2709_s30 + $0x90] ss:$8 sps:$4 sm:$0xff]   ;;  %s2046_s5 = smul.u32 24, %s253_s20  ;;  %vm2779_vm2 = vmor %vm303_vm0, %vm304_vm1  ;;  %vm366_vm5 = vcmask 1040384  }
  0x73   : > { %1550 = vmatpush1.bf16.msra.mxu0 %v2167_v15  ;;  %1465 = vmatprep.subr.bf16.mxu1 %v2168_v16  ;;  %v273_v42 = vunpack.c.0.s8 %v272_v37  ;;  %v2203_v44 = vld [vmem:[%s2709_s30 + $0x290] ss:$8 sps:$4 sm:$0xff]   ;;  %v2204_v45 = vld [vmem:[%s2709_s30 + $0xa4] ss:$8 sps:$4 sm:$0xff]   ;;  %v2208_v47 = vld [vmem:[%s2709_s30 + $0xa0] ss:$8 sps:$4 sm:$0xff]  }
  0x74   : > { %1551 = vmatprep.subr.bf16.mxu0 %v2170_v17  ;;  %v2206_v46 = vld [vmem:[%s2709_s30 + $0x2a4] ss:$8 sps:$4 sm:$0xff]   ;;  %v2209_v48 = vld [vmem:[%s2709_s30 + $0x2a0] ss:$8 sps:$4 sm:$0xff]   ;;  %s2772_s25 = scalar_lea.vmem %s3130_s0, %s2046_s5  ;;  %vm306_vm3 = vsmask.f32 5392 }
  0x75   : > { %v2775_v49 = vsub.s32 %v273_v42, %v2762_v43  ;;  %v2210_v51 = vld [vmem:[%s2709_s30 + $0xb4] ss:$8 sps:$4 sm:$0xff]   ;;  %vm308_vm4 = vsmask.f32 7448  ;;  %vm367_vm6 = vcmask 1042434   ;;  %vm369_vm7 = vcmask 1044484   ;;  %vm2849_vm9 = vmor %vm2779_vm2, %vm306_vm3 }
  0x76   : > { %1466 = vmatpush1.bf16.msra.mxu1 %v2172_v18  ;;  %v2212_v52 = vld [vmem:[%s2709_s30 + $0x2b4] ss:$8 sps:$4 sm:$0xff]   ;;  %v2214_v53 = vld [vmem:[%s2709_s30 + $0xb0] ss:$8 sps:$4 sm:$0xff]   ;;  %v2788_v55 = vld [vmem:[%s2772_s25] sm:$0x7] }
  0x77   : > { %1552 = vmatpush1.bf16.msra.mxu0 %v2173_v19  ;;  %1467 = vmatprep.subr.bf16.mxu1 %v2174_v20  ;;  %v2215_v54 = vld [vmem:[%s2709_s30 + $0x2b0] ss:$8 sps:$4 sm:$0xff]   ;;  %v2791_v56 = vld [vmem:[%s2772_s25 + $0x4] sm:$0x7]  ;;  %v2794_v57 = vld [vmem:[%s2772_s25 + $0x8] sm:$0x7]  ;;  %v2801_v59 = vrot.slane %v2788_v55, %v2775_v49 }
  0x78   : > { %1553 = vmatprep.subr.bf16.mxu0 %v2176_v21  ;;  %v2797_v58 = vld [vmem:[%s2772_s25 + $0xc] sm:$0x7]  ;;  %v2804_v60 = vld [vmem:[%s2772_s25 + $0x10] sm:$0x7]  ;;  %v2808_v61 = vrot.slane %v2791_v56, %v2775_v49  ;;  %v2812_v62 = vrot.slane %v2794_v57, %v2775_v49  ;;  %v2220_v6 = vld [vmem:[%s2709_s30 + $0xc0] ss:$8 sps:$4 sm:$0xff]  }
  0x79   : > { %v2816_v63 = vrot.slane %v2797_v58, %v2775_v49  ;;  %v2216_v0 = vld [vmem:[%s2709_s30 + $0xc4] ss:$8 sps:$4 sm:$0xff]   ;;  %v2822_v2 = vcombine.high %v2801_v59, %v2801_v59  ;;  %v311_v3 = vshrl.u32 %v2801_v59, 16  ;;  %v314_v4 = vshll.u32 %v2801_v59, 16  ;;  %v2221_v7 = vld [vmem:[%s2709_s30 + $0x2c0] ss:$8 sps:$4 sm:$0xff]   ;;  %vm2864_vm10 = vmor %vm2849_vm9, %vm308_vm4 }
  0x7a   : > { %1468 = vmatpush1.bf16.msra.mxu1 %v2178_v22  ;;  %v2218_v1 = vld [vmem:[%s2709_s30 + $0x2c4] ss:$8 sps:$4 sm:$0xff]   ;;  %v2828_v5 = vrot.slane %v2804_v60, %v2775_v49  ;;  %v2834_v8 = vcombine.high %v2808_v61, %v2808_v61  ;;  %v2838_v9 = vcombine.high %v2812_v62, %v2812_v62  ;;  %v325_v11 = vshrl.u32 %v2808_v61, 16  ;;  %v2222_v12 = vld [vmem:[%s2709_s30 + $0xd4] ss:$8 sps:$4 sm:$0xff]   ;;  %vm2873_vm11 = vmor %vm366_vm5, %vm367_vm6  ;;  %s249_s1 = sand.u32 1, %s2475_s12  }
  0x7b   : > { %1554 = vmatpush1.bf16.msra.mxu0 %v2179_v23  ;;  %1469 = vmatprep.subr.bf16.mxu1 %v2180_v24  ;;  %v2842_v10 = vcombine.high %v2816_v63, %v2816_v63  ;;  %vm371_vm8 = vcmask 1046534   ;;  %v313_v14 = vrot.slane %v311_v3, 6  ;;  %v316_v15 = vrot.slane %v314_v4, 7  ;;  %v2224_v18 = vld [vmem:[%s2709_s30 + $0x2d4] ss:$8 sps:$4 sm:$0xff]   ;;  %vm2892_vm12 = vmor %vm2873_vm11, %vm369_vm7  ;;  %s1860_s23 = sshll.u32 %s249_s1, 4 }
  0x7c   : > { %1555 = vmatprep.subr.bf16.mxu0 %v2182_v25  ;;  %v320_v16 = vshll.u32 %v2822_v2, 16  ;;  %v328_v17 = vshll.u32 %v2808_v61, 16  ;;  %v327_v19 = vrot.slane %v325_v11, 6  ;;  %v334_v20 = vshll.u32 %v2834_v8, 16  ;;  %v2233_v11 = vld [vmem:[%s2709_s30 + $0x2e0] ss:$8 sps:$4 sm:$0xff]   ;;  %vm2912_vm13 = vmor %vm2892_vm12, %vm371_vm8 }
  0x7d   : > { %v339_v21 = vshrl.u32 %v2812_v62, 16  ;;  %v342_v22 = vshll.u32 %v2812_v62, 16  ;;  %v317_v23 = vor.u32 %v316_v15, %v313_v14  ;;  %v356_v37 = vshll.u32 %v2816_v63, 16  ;;  %s251_s8 = scalar_lea.vmem [#allocation6], %s1860_s23  ;;  %p3162_p0 = scmp.ne.s32.totalorder %s3144_s7, 0 }
  0x7e   : > { %1470 = vmatpush1.bf16.msra.mxu1 %v2184_v26  ;;  %v322_v24 = vrot.slane %v320_v16, 7  ;;  %v330_v25 = vrot.slane %v328_v17, 7  ;;  %v348_v26 = vshll.u32 %v2838_v9, 16  ;;  %v399_v50 = vshrl.u32 %v2828_v5, 16  ;;  %v2236_v17 = vld [vmem:[%s2709_s30 + $0x2f4] ss:$8 sps:$4 sm:$0xff]  }
  0x7f   : > { %1556 = vmatpush1.bf16.msra.mxu0 %v2185_v27  ;;  %1471 = vmatprep.subr.bf16.mxu1 %v2186_v28  ;;  %v2226_v27 = vld [vmem:[%s2709_s30 + $0xd0] ss:$8 sps:$4 sm:$0xff]   ;;  %s2015_s12 = sshll.u32 (%p3162_p0), %s2495_s17, 1  ;;  %s2016_s22 = sshll.u32 (%p3162_p0), %s2499_s18, 3 }
  0x80   : > { %1557 = vmatprep.subr.bf16.mxu0 %v2188_v29  ;;  %v336_v29 = vrot.slane %v334_v20, 7  ;;  %v350_v36 = vrot.slane %v348_v26, 7  ;;  %v375_v20 = vrot.slane %v2822_v2, 7  ;;  %v1864_v26 = vrot.slane %v2812_v62, 9  ;;  %s1699_s26 = sadd.s32 (%p3162_p0), %s2016_s22, %s2015_s12 }
  0x81   : > { %s2017_s4 = sshll.u32 (%p3162_p0), %s1699_s26, 2 }
  0x82   : > { %1472 = vmatpush1.bf16.msra.mxu1 %v2190_v30  ;;  %v341_v30 = vrot.slane %v339_v21, 6  ;;  %v1863_v21 = vrot.slane %v2808_v61, 9  ;;  %v383_v61 = vrot.slane %v2838_v9, 7 }
  0x83   : > { %1558 = vmatpush1.bf16.msra.mxu0 %v2191_v31  ;;  %1473 = vmatprep.subr.bf16.mxu1 %v2192_v32  ;;  %v344_v31 = vrot.slane %v342_v22, 7  ;;  %v353_v32 = vshrl.u32 %v2816_v63, 16 }
  0x84   : > { %1559 = vmatprep.subr.bf16.mxu0 %v2194_v33  ;;  %v2227_v33 = vld [vmem:[%s2709_s30 + $0x2d0] ss:$8 sps:$4 sm:$0xff]  }
  0x85   : > { %v355_v42 = vrot.slane %v353_v32, 6 }
  0x86   : > { %1474 = vmatpush1.bf16.msra.mxu1 %v2196_v34  ;;  %v318_v34 = vrot.slane %v317_v23, 2 }
  0x87   : > { %1560 = vmatpush1.bf16.msra.mxu0 %v2197_v35  ;;  %1475 = vmatprep.subr.bf16.mxu1 %v2198_v39  ;;  %v331_v35 = vor.u32 %v330_v25, %v327_v19  ;;  %v2228_v39 = vld [vmem:[%s2709_s30 + $0xe4] ss:$8 sps:$4 sm:$0xff]   ;;  %v379_v25 = vrot.slane %v2834_v8, 7 }
  0x88   : > { %1561 = vmatprep.subr.bf16.mxu0 %v2200_v40  ;;  %v2230_v40 = vld [vmem:[%s2709_s30 + $0x2e4] ss:$8 sps:$4 sm:$0xff]  }
  0x89   : > { %v2242_v8 = vld [vmem:[%s2709_s30 + $0x104] ss:$8 sps:$4 sm:$0xff]   ;;  %v380_v62 = vsel %vm2912_vm13, %v1863_v21, %v379_v25 }
  0x8a   : > { %1476 = vmatpush1.bf16.msra.mxu1 %v2202_v41  ;;  %v345_v41 = vor.u32 %v344_v31, %v341_v30  ;;  %v1865_v31 = vrot.slane %v2816_v63, 9 }
  0x8b   : > { %1562 = vmatpush1.bf16.msra.mxu0 %v2203_v44  ;;  %1477 = vmatprep.subr.bf16.mxu1 %v2204_v45  ;;  %v362_v44 = vshll.u32 %v2842_v10, 16  ;;  %v2882_v45 = vcombine.high %v2828_v5, %v2828_v5 }
  0x8c   : > { %1563 = vmatprep.subr.bf16.mxu0 %v2206_v46  ;;  %v323_v46 = vsel %vm2864_vm10, %v318_v34, %v322_v24  ;;  %v2920_v24 = vld [vmem:[%s2772_s25 + $0x14] sm:$0x7]  ;;  %v387_v34 = vrot.slane %v2842_v10, 7 }
  0x8d   : > { %v414_v9 = vrot.slane %v2882_v45, 7  ;;  %v423_v63 = vrot.slane %v2920_v24, %v2775_v49 }
  0x8e   : > { %1478 = vmatpush1.bf16.msra.mxu1 %v2208_v47  ;;  %v332_v47 = vrot.slane %v331_v35, 2  ;;  %v384_v35 = vsel %vm2912_vm13, %v1864_v26, %v383_v61  ;;  %v388_v10 = vsel %vm2912_vm13, %v1865_v31, %v387_v34  ;;  %v551_v26 = vcombine.low %v2804_v60, %v2920_v24  ;;  %v2259_v24 = vld [vmem:[%s2709_s30 + $0x324] ss:$8 sps:$4 sm:$0xff]  }
  0x8f   : > { %1564 = vmatpush1.bf16.msra.mxu0 %v2209_v48  ;;  %1479 = vmatprep.subr.bf16.mxu1 %v2210_v51  ;;  %v358_v48 = vrot.slane %v356_v37, 7  ;;  %v346_v51 = vrot.slane %v345_v41, 2  ;;  %v2245_v37 = vld [vmem:[%s2709_s30 + $0x304] ss:$8 sps:$4 sm:$0xff]  }
  0x90   : > { %1565 = vmatprep.subr.bf16.mxu0 %v2212_v52  ;;  %v364_v52 = vrot.slane %v362_v44, 7  ;;  %v2899_v3 = vsel %vm2864_vm10, %v332_v47, %v336_v29  ;;  %v2239_v29 = vld [vmem:[%s2709_s30 + $0x2f0] ss:$8 sps:$4 sm:$0xff]   ;;  %v1867_v44 = vrot.slane %v423_v63, 9  ;;  %v2999_v31 = vrot.slane %v551_v26, %v2775_v49  ;;  %v2317_v26 = vld [vmem:[%s2709_s30 + $0x3c0] ss:$8 sps:$4 sm:$0xff]  }
  0x91   : > { %v359_v4 = vor.u32 %v358_v48, %v355_v42  ;;  %v351_v13 = vsel %vm2864_vm10, %v346_v51, %v350_v36  ;;  %v461_v16 = vcombine.low %v323_v46, %v2899_v3  ;;  %v1866_v36 = vrot.slane %v2828_v5, 9 }
  0x92   : > { %1480 = vmatpush1.bf16.msra.mxu1 %v2214_v53  ;;  %v402_v53 = vshll.u32 %v2828_v5, 16  ;;  %v424_v42 = vcombine.high %v423_v63, %v423_v63  ;;  %v480_v46 = vcombine.low %v384_v35, %v388_v10  ;;  %v426_v48 = vshrl.u32 %v423_v63, 16 }
  0x93   : > { %1566 = vmatpush1.bf16.msra.mxu0 %v2215_v54  ;;  %1481 = vmatprep.subr.bf16.mxu1 %v2216_v0  ;;  %v408_v54 = vshll.u32 %v2882_v45, 16  ;;  %v469_v23 = vrot.slane %v461_v16, %v2775_v49  ;;  %v415_v5 = vsel %vm2912_vm13, %v1866_v36, %v414_v9  ;;  %v533_v51 = vcombine.low %v380_v62, %v384_v35  ;;  %v2257_v35 = vld [vmem:[%s2709_s30 + $0x320] ss:$8 sps:$4 sm:$0xff]   ;;  %v2262_v36 = vld [vmem:[%s2709_s30 + $0x134] ss:$8 sps:$4 sm:$0xff]  }
  0x94   : > { %1567 = vmatprep.subr.bf16.mxu0 %v2218_v1  ;;  %v2232_v1 = vld [vmem:[%s2709_s30 + $0xe0] ss:$8 sps:$4 sm:$0xff]   ;;  %v404_v14 = vrot.slane %v402_v53, 7  ;;  %v443_v53 = vcombine.low %v2788_v55, %v2791_v56  ;;  %v444_v0 = vcombine.low %v2794_v57, %v2797_v58  ;;  %v428_v19 = vrot.slane %v426_v48, 6  ;;  %v2265_v9 = vld [vmem:[%s2709_s30 + $0x334] ss:$8 sps:$4 sm:$0xff]  }
  0x95   : > { %v410_v15 = vrot.slane %v408_v54, 7  ;;  %v2962_v54 = vrot.slane %v480_v46, %v2775_v49  ;;  %v2277_v46 = vld [vmem:[%s2709_s30 + $0x354] ss:$8 sps:$4 sm:$0xff]   ;;  %v2280_v48 = vld [vmem:[%s2709_s30 + $0x164] ss:$8 sps:$4 sm:$0xff]  }
  0x96   : > { %1482 = vmatpush1.bf16.msra.mxu1 %v2220_v6  ;;  %v401_v6 = vrot.slane %v399_v50, 6  ;;  %v441_v50 = vrot.slane %v424_v42, 7 }
  0x97   : > { %1568 = vmatpush1.bf16.msra.mxu0 %v2221_v7  ;;  %1483 = vmatprep.subr.bf16.mxu1 %v2222_v12  ;;  %v1862_v7 = vrot.slane %v2801_v59, 9  ;;  %v2234_v12 = vld [vmem:[%s2709_s30 + $0xf4] ss:$8 sps:$4 sm:$0xff]   ;;  %v515_v59 = vcombine.low %v2899_v3, %v351_v13 }
  0x98   : > { %1569 = vmatprep.subr.bf16.mxu0 %v2224_v18  ;;  %v360_v18 = vrot.slane %v359_v4, 2  ;;  %v405_v22 = vor.u32 %v404_v14, %v401_v6  ;;  %v442_v4 = vsel %vm2912_vm13, %v1867_v44, %v441_v50  ;;  %v541_v6 = vrot.slane %v533_v51, %v2775_v49  ;;  %v2266_v44 = vld [vmem:[%s2709_s30 + $0x140] ss:$8 sps:$4 sm:$0xff]   ;;  %v2283_v50 = vld [vmem:[%s2709_s30 + $0x364] ss:$8 sps:$4 sm:$0xff]  }
  0x99   : > { %v376_v2 = vsel %vm2912_vm13, %v1862_v7, %v375_v20  ;;  %v451_v7 = vrot.slane %v443_v53, %v2775_v49  ;;  %v2278_v51 = vld [vmem:[%s2709_s30 + $0x160] ss:$8 sps:$4 sm:$0xff]   ;;  %v2286_v53 = vld [vmem:[%s2709_s30 + $0x174] ss:$8 sps:$4 sm:$0xff]  }
  0x9a   : > { %1484 = vmatpush1.bf16.msra.mxu1 %v2226_v27  ;;  %v2238_v27 = vld [vmem:[%s2709_s30 + $0xf0] ss:$8 sps:$4 sm:$0xff]   ;;  %v365_v30 = vsel %vm2864_vm10, %v360_v18, %v364_v52  ;;  %v406_v32 = vrot.slane %v405_v22, 2  ;;  %v534_v52 = vcombine.low %v388_v10, %v415_v5  ;;  %v498_v18 = vcombine.low %v2797_v58, %v2804_v60  ;;  %v2250_v22 = vld [vmem:[%s2709_s30 + $0x114] ss:$8 sps:$4 sm:$0xff]  }
  0x9b   : > { %1570 = vmatpush1.bf16.msra.mxu0 %v2227_v33  ;;  %1485 = vmatprep.subr.bf16.mxu1 %v2228_v39  ;;  %v462_v33 = vcombine.low %v351_v13, %v365_v30  ;;  %v2975_v13 = vrot.slane %v444_v0, %v2775_v49  ;;  %v435_v58 = vshll.u32 %v424_v42, 16  ;;  %v2256_v60 = vld [vmem:[%s2709_s30 + $0x124] ss:$8 sps:$4 sm:$0xff]   ;;  %v2260_v10 = vld [vmem:[%s2709_s30 + $0x130] ss:$8 sps:$4 sm:$0xff]  }
  0x9c   : > { %1571 = vmatprep.subr.bf16.mxu0 %v2230_v40  ;;  %v2945_v38 = vsel %vm2864_vm10, %v406_v32, %v410_v15  ;;  %v479_v40 = vcombine.low %v376_v2, %v380_v62  ;;  %v548_v55 = vrot.slane %v534_v52, %v2775_v49  ;;  %v497_v15 = vcombine.low %v2791_v56, %v2794_v57  ;;  %v2251_v2 = vld [vmem:[%s2709_s30 + $0x310] ss:$8 sps:$4 sm:$0xff]   ;;  %v2254_v62 = vld [vmem:[%s2709_s30 + $0x120] ss:$8 sps:$4 sm:$0xff]   ;;  %v2271_v42 = vld [vmem:[%s2709_s30 + $0x344] ss:$8 sps:$4 sm:$0xff]  }
  0x9d   : > { %v2948_v39 = vrot.slane %v462_v33, %v2775_v49  ;;  %v516_v41 = vcombine.low %v365_v30, %v2945_v38  ;;  %v459_v21 = vcombine.low %v451_v7, %v2975_v13  ;;  %v429_v57 = vshll.u32 %v423_v63, 16  ;;  %v2281_v52 = vld [vmem:[%s2709_s30 + $0x360] ss:$8 sps:$4 sm:$0xff]   ;;  %v2289_v0 = vld [vmem:[%s2709_s30 + $0x374] ss:$8 sps:$4 sm:$0xff]  }
  0x9e   : > { %1486 = vmatpush1.bf16.msra.mxu1 %v2232_v1  ;;  %v2957_v47 = vrot.slane %v479_v40, %v2775_v49  ;;  %v523_v1 = vrot.slane %v515_v59, %v2775_v49  ;;  %v549_v16 = vcombine.low %v541_v6, %v548_v55  ;;  %v505_v56 = vrot.slane %v497_v15, %v2775_v49  ;;  %v2263_v40 = vld [vmem:[%s2709_s30 + $0x330] ss:$8 sps:$4 sm:$0xff]   ;;  %v2295_v6 = vld [vmem:[%s2709_s30 + $0x384] ss:$8 sps:$4 sm:$0xff]   ;;  %v2290_v55 = vld [vmem:[%s2709_s30 + $0x180] ss:$8 sps:$4 sm:$0xff]  }
  0x9f   : > { %1572 = vmatpush1.bf16.msra.mxu0 %v2233_v11  ;;  %1487 = vmatprep.subr.bf16.mxu1 %v2234_v12  ;;  %v477_v45 = vcombine.low %v469_v23, %v2948_v39  ;;  %v530_v3 = vrot.slane %v516_v41, %v2775_v49  ;;  %v2240_v11 = vld [vmem:[%s2709_s30 + $0x100] ss:$8 sps:$4 sm:$0xff]   ;;  %v571_v12 = vcombine.low %v415_v5, %v442_v4  ;;  %v2253_v23 = vld [vmem:[%s2709_s30 + $0x314] ss:$8 sps:$4 sm:$0xff]   ;;  %v437_v33 = vrot.slane %v435_v58, 7 }
  0xa0   : > { %1573 = vmatprep.subr.bf16.mxu0 %v2236_v17  ;;  %v2243_v17 = vld [vmem:[%s2709_s30 + $0x300] ss:$8 sps:$4 sm:$0xff]   ;;  %v495_v59 = vcombine.low %v2957_v47, %v2962_v54  ;;  %1575 = vmatprep.mubr.bf16.mxu0 %v549_v16  ;;  %v512_v25 = vrot.slane %v498_v18, %v2775_v49  ;;  %v2268_v5 = vld [vmem:[%s2709_s30 + $0x144] ss:$8 sps:$4 sm:$0xff]   ;;  %v2299_v15 = vld [vmem:[%s2709_s30 + $0x390] ss:$8 sps:$4 sm:$0xff]  }
  0xa1   : > { %1489 = vmatprep.mubr.bf16.mxu1 %v477_v45  ;;  %v531_v14 = vcombine.low %v523_v1, %v530_v3  ;;  %v2985_v20 = vrot.slane %v571_v12, %v2775_v49  ;;  %v2274_v45 = vld [vmem:[%s2709_s30 + $0x154] ss:$8 sps:$4 sm:$0xff]   ;;  %v2284_v1 = vld [vmem:[%s2709_s30 + $0x170] ss:$8 sps:$4 sm:$0xff]   ;;  %v2292_v4 = vld [vmem:[%s2709_s30 + $0x184] ss:$8 sps:$4 sm:$0xff]  }
  0xa2   : > { %1488 = vmatpush1.bf16.msra.mxu1 %v2238_v27  ;;  %v2248_v27 = vld [vmem:[%s2709_s30 + $0x110] ss:$8 sps:$4 sm:$0xff]   ;;  %v513_v61 = vcombine.low %v505_v56, %v512_v25  ;;  %v2293_v7 = vld [vmem:[%s2709_s30 + $0x380] ss:$8 sps:$4 sm:$0xff]   ;;  %v2301_v12 = vld [vmem:[%s2709_s30 + $0x394] ss:$8 sps:$4 sm:$0xff]  }
  0xa3   : > { %1574 = vmatpush1.bf16.msra.mxu0 %v2239_v29  ;;  %1500 = vmatprep.subr.bf16.mxu1 %v2242_v8  ;;  %v431_v29 = vrot.slane %v429_v57, 7  ;;  %v579_v30 = vcombine.low %v2962_v54, %v2985_v20  ;;  %v559_v8 = vcombine.low %v2975_v13, %v2999_v31  ;;  %v2287_v3 = vld [vmem:[%s2709_s30 + $0x370] ss:$8 sps:$4 sm:$0xff]   ;;  %v2304_v16 = vld [vmem:[%s2709_s30 + $0x1a4] ss:$8 sps:$4 sm:$0xff]  }
  0xa4   : > { %1586 = vmatprep.subr.bf16.mxu0 %v2245_v37  ;;  %v2302_v18 = vld [vmem:[%s2709_s30 + $0x1a0] ss:$8 sps:$4 sm:$0xff]   ;;  %v2311_v56 = vld [vmem:[%s2709_s30 + $0x3b0] ss:$8 sps:$4 sm:$0xff]   ;;  %v2316_v57 = vld [vmem:[%s2709_s30 + $0x1c4] ss:$8 sps:$4 sm:$0xff]  }
  0xa5   : > { %1490 = vmatmul.mubr.bf16.vlgmr.msra.gmra.mrb[0].mxu1 %v459_v21  ;;  %v432_v32 = vor.u32 %v431_v29, %v428_v19  ;;  %v2305_v19 = vld [vmem:[%s2709_s30 + $0x3a0] ss:$8 sps:$4 sm:$0xff]   ;;  %v2310_v21 = vld [vmem:[%s2709_s30 + $0x1b4] ss:$8 sps:$4 sm:$0xff]   ;;  %v2319_v25 = vld [vmem:[%s2709_s30 + $0x3c4] ss:$8 sps:$4 sm:$0xff]  }
  0xa6   : > { %1576 = vmatmul.mubr.bf16.vlgmr.msra.gmra.mrb[0].mxu0 %v531_v14  ;;  %1501 = vmatpush1.bf16.msra.mxu1 %v2240_v11  ;;  %v2298_v11 = vld [vmem:[%s2709_s30 + $0x194] ss:$8 sps:$4 sm:$0xff]   ;;  %v2296_v14 = vld [vmem:[%s2709_s30 + $0x190] ss:$8 sps:$4 sm:$0xff]   ;;  %v2314_v58 = vld [vmem:[%s2709_s30 + $0x1c0] ss:$8 sps:$4 sm:$0xff]  }
  0xa7   : > { %1587 = vmatpush1.bf16.msra.mxu0 %v2243_v17  ;;  %1502 = vmatprep.subr.bf16.mxu1 %v2250_v22  ;;  %v433_v34 = vrot.slane %v432_v32, 2  ;;  %v2307_v17 = vld [vmem:[%s2709_s30 + $0x3a4] ss:$8 sps:$4 sm:$0xff]   ;;  %v2313_v22 = vld [vmem:[%s2709_s30 + $0x3b4] ss:$8 sps:$4 sm:$0xff]  }
  0xa8   : > { %1588 = vmatprep.subr.bf16.mxu0 %v2253_v23  ;;  %1532 = vmatprep.mubr.bf16.mxu1 %v513_v61  ;;  %v2308_v23 = vld [vmem:[%s2709_s30 + $0x1b0] ss:$8 sps:$4 sm:$0xff]   ;;  %v2325_v29 = vld [vmem:[%s2709_s30 + $0x3d4] ss:$8 sps:$4 sm:$0xff]   ;;  %v2326_v32 = vld [vmem:[%s2709_s30 + $0x1e0] ss:$8 sps:$4 sm:$0xff]  }
  0xa9   : > { %v438_v63 = vsel %vm2864_vm10, %v433_v34, %v437_v33  ;;  %v2323_v61 = vld [vmem:[%s2709_s30 + $0x3d0] ss:$8 sps:$4 sm:$0xff]   ;;  %v2329_v33 = vld [vmem:[%s2709_s30 + $0x3e0] ss:$8 sps:$4 sm:$0xff]   ;;  %v2337_v34 = vld [vmem:[%s2709_s30 + $0x3f4] ss:$8 sps:$4 sm:$0xff]  }
  0xaa   : > { %1503 = vmatpush1.bf16.msra.mxu1 %v2248_v27  ;;  %v561_v37 = vcombine.low %v2945_v38, %v438_v63  ;;  %v2269_v38 = vld [vmem:[%s2709_s30 + $0x340] ss:$8 sps:$4 sm:$0xff]   ;;  %v2322_v27 = vld [vmem:[%s2709_s30 + $0x1d4] ss:$8 sps:$4 sm:$0xff]   ;;  %v2355_v13 = vld [vmem:[%s2709_s30 + $0x444] ss:$8 sps:$4 sm:$0xff]  }
  0xab   : > { %1589 = vmatpush1.bf16.msra.mxu0 %v2251_v2  ;;  %1504 = vmatprep.subr.bf16.mxu1 %v2256_v60  ;;  %v2320_v2 = vld [vmem:[%s2709_s30 + $0x1d0] ss:$8 sps:$4 sm:$0xff]   ;;  %v2328_v60 = vld [vmem:[%s2709_s30 + $0x1e4] ss:$8 sps:$4 sm:$0xff]   ;;  %v2340_v63 = vld [vmem:[%s2709_s30 + $0x400] ss:$8 sps:$4 sm:$0xff]  }
  0xac   : > { %1590 = vmatprep.subr.bf16.mxu0 %v2259_v24  ;;  %v568_v41 = vrot.slane %v561_v37, %v2775_v49  ;;  %v2272_v49 = vld [vmem:[%s2709_s30 + $0x150] ss:$8 sps:$4 sm:$0xff]   ;;  %v2331_v24 = vld [vmem:[%s2709_s30 + $0x3e4] ss:$8 sps:$4 sm:$0xff]   ;;  %v2346_v37 = vld [vmem:[%s2709_s30 + $0x414] ss:$8 sps:$4 sm:$0xff]  }
  0xad   : > { %v2352_v47 = vld [vmem:[%s2709_s30 + $0x434] ss:$8 sps:$4 sm:$0xff]   ;;  %v2353_v31 = vld [vmem:[%s2709_s30 + $0x440] ss:$8 sps:$4 sm:$0xff]  }
  0xae   : > { %1505 = vmatpush1.bf16.msra.mxu1 %v2254_v62  ;;  %v569_v28 = vcombine.low %v2948_v39, %v568_v41  ;;  %v2275_v39 = vld [vmem:[%s2709_s30 + $0x350] ss:$8 sps:$4 sm:$0xff]   ;;  %v2334_v62 = vld [vmem:[%s2709_s30 + $0x1f4] ss:$8 sps:$4 sm:$0xff]   ;;  %v2349_v41 = vld [vmem:[%s2709_s30 + $0x424] ss:$8 sps:$4 sm:$0xff]  }
  0xaf   : > { %1591 = vmatpush1.bf16.msra.mxu0 %v2257_v35  ;;  %1506 = vmatprep.subr.bf16.mxu1 %v2262_v36  ;;  %v2332_v35 = vld [vmem:[%s2709_s30 + $0x1f0] ss:$8 sps:$4 sm:$0xff]  }
  0xb0   : > { %1592 = vmatprep.subr.bf16.mxu0 %v2265_v9  ;;  %1618 = vmatprep.mubr.bf16.mxu0 %v569_v28  ;;  %v2335_v36 = vld [vmem:[%s2709_s30 + $0x3f0] ss:$8 sps:$4 sm:$0xff]   ;;  %v2342_v9 = vld [vmem:[%s2709_s30 + $0x404] ss:$8 sps:$4 sm:$0xff]  }
  0xb1   : > { %v2361_v28 = vld [vmem:[%s2709_s30 + $0x464] ss:$8 sps:$4 sm:$0xff]  }
  0xb2   : > { %1507 = vmatpush1.bf16.msra.mxu1 %v2260_v10  ;;  %v2344_v10 = vld [vmem:[%s2709_s30 + $0x410] ss:$8 sps:$4 sm:$0xff]  }
  0xb3   : > { %1593 = vmatpush1.bf16.msra.mxu0 %v2263_v40  ;;  %1508 = vmatprep.subr.bf16.mxu1 %v2268_v5  ;;  %v2519_v40 = vmov 0   ;;  %v2347_v5 = vld [vmem:[%s2709_s30 + $0x420] ss:$8 sps:$4 sm:$0xff]  }
  0xb4   : > { %1594 = vmatprep.subr.bf16.mxu0 %v2271_v42  ;;  %v2356_v42 = vld [vmem:[%s2709_s30 + $0x450] ss:$8 sps:$4 sm:$0xff]  }
  0xb6   : > { %1509 = vmatpush1.bf16.msra.mxu1 %v2266_v44  ;;  %v2359_v44 = vld [vmem:[%s2709_s30 + $0x460] ss:$8 sps:$4 sm:$0xff]  }
  0xb7   : > { %1595 = vmatpush1.bf16.msra.mxu0 %v2269_v38  ;;  %1510 = vmatprep.subr.bf16.mxu1 %v2274_v45  ;;  %v2364_v38 = vld [vmem:[%s2709_s30 + $0x474] ss:$8 sps:$4 sm:$0xff]   ;;  %v2362_v45 = vld [vmem:[%s2709_s30 + $0x470] ss:$8 sps:$4 sm:$0xff]  }
  0xb8   : > { %1596 = vmatprep.subr.bf16.mxu0 %v2277_v46 }
  0xba   : > { %1511 = vmatpush1.bf16.msra.mxu1 %v2272_v49 }
  0xbb   : > { %1597 = vmatpush1.bf16.msra.mxu0 %v2275_v39  ;;  %1512 = vmatprep.subr.bf16.mxu1 %v2280_v48 }
  0xbc   : > { %1598 = vmatprep.subr.bf16.mxu0 %v2283_v50  ;;  %v729_v50 = vsub.s32 0, %v2762_v43 }
  0xbe   : > { %1513 = vmatpush1.bf16.msra.mxu1 %v2278_v51  ;;  %v725_v51 = vld [vmem:[%s2715_s14] sm:$0x3] }
  0xbf   : > { %1599 = vmatpush1.bf16.msra.mxu0 %v2281_v52  ;;  %1514 = vmatprep.subr.bf16.mxu1 %v2286_v53  ;;  %v733_v52 = vsub.s32 1, %v2762_v43  ;;  %v730_v53 = vrot.slane %v725_v51, %v729_v50 }
  0xc0   : > { %1600 = vmatprep.subr.bf16.mxu0 %v2289_v0 }
  0xc1   : > { %v734_v0 = vrot.slane %v725_v51, %v733_v52 }
  0xc2   : > { %1515 = vmatpush1.bf16.msra.mxu1 %v2284_v1 }
  0xc3   : > { %1601 = vmatpush1.bf16.msra.mxu0 %v2287_v3  ;;  %1516 = vmatprep.subr.bf16.mxu1 %v2292_v4 }
  0xc4   : > { %1602 = vmatprep.subr.bf16.mxu0 %v2295_v6 }
  0xc6   : > { %1517 = vmatpush1.bf16.msra.mxu1 %v2290_v55 }
  0xc7   : > { %1603 = vmatpush1.bf16.msra.mxu0 %v2293_v7  ;;  %1518 = vmatprep.subr.bf16.mxu1 %v2298_v11 }
  0xc8   : > { %1604 = vmatprep.subr.bf16.mxu0 %v2301_v12 }
  0xca   : > { %1519 = vmatpush1.bf16.msra.mxu1 %v2296_v14 }
  0xcb   : > { %1605 = vmatpush1.bf16.msra.mxu0 %v2299_v15  ;;  %1520 = vmatprep.subr.bf16.mxu1 %v2304_v16 }
  0xcc   : > { %1606 = vmatprep.subr.bf16.mxu0 %v2307_v17 }
  0xce   : > { %1521 = vmatpush1.bf16.msra.mxu1 %v2302_v18 }
  0xcf   : > { %1607 = vmatpush1.bf16.msra.mxu0 %v2305_v19  ;;  %1522 = vmatprep.subr.bf16.mxu1 %v2310_v21 }
  0xd0   : > { %1608 = vmatprep.subr.bf16.mxu0 %v2313_v22 }
  0xd2   : > { %1523 = vmatpush1.bf16.msra.mxu1 %v2308_v23 }
  0xd3   : > { %1609 = vmatpush1.bf16.msra.mxu0 %v2311_v56  ;;  %1524 = vmatprep.subr.bf16.mxu1 %v2316_v57 }
  0xd4   : > { %1610 = vmatprep.subr.bf16.mxu0 %v2319_v25 }
  0xd6   : > { %1525 = vmatpush1.bf16.msra.mxu1 %v2314_v58 }
  0xd7   : > { %1611 = vmatpush1.bf16.msra.mxu0 %v2317_v26  ;;  %1526 = vmatprep.subr.bf16.mxu1 %v2322_v27 }
  0xd8   : > { %1612 = vmatprep.subr.bf16.mxu0 %v2325_v29 }
  0xda   : > { %1527 = vmatpush1.bf16.msra.mxu1 %v2320_v2 }
  0xdb   : > { %1613 = vmatpush1.bf16.msra.mxu0 %v2323_v61  ;;  %1528 = vmatprep.subr.bf16.mxu1 %v2328_v60 }
  0xdc   : > { %1614 = vmatprep.subr.bf16.mxu0 %v2331_v24 }
  0xde   : > { %1529 = vmatpush1.bf16.msra.mxu1 %v2326_v32 }
  0xdf   : > { %1615 = vmatpush1.bf16.msra.mxu0 %v2329_v33  ;;  %1530 = vmatprep.subr.bf16.mxu1 %v2334_v62 }
  0xe0   : > { %1616 = vmatprep.subr.bf16.mxu0 %v2337_v34 }
  0xe2   : > { %1531 = vmatpush1.bf16.msra.mxu1 %v2332_v35 }
  0xe3   : > { %1617 = vmatpush1.bf16.msra.mxu0 %v2335_v36 }
  0xe4   : > { %1629 = vmatprep.subr.bf16.mxu0 %v2342_v9 }
  0xe5   : > { %1533 = vmatmul.mubr.bf16.vlgmr.msra.gmra.mrb[0].mxu1 %v495_v59  ;;  %v2350_v59 = vld [vmem:[%s2709_s30 + $0x430] ss:$8 sps:$4 sm:$0xff]  }
  0xe6   : > { %1619 = vmatmul.mubr.bf16.vlgmr.msra.gmra.mrb[0].mxu0 %v559_v8  ;;  %v2358_v8 = vld [vmem:[%s2709_s30 + $0x454] ss:$8 sps:$4 sm:$0xff]   ;;  %s1701_s30 = scalar_lea.vmem (%p3162_p0), %s3133_s3, %s2017_s4 }
  0xe7   : > { %1630 = vmatpush1.bf16.msra.mxu0 %v2340_v63  ;;  %1661 = vmatprep.mubr.bf16.mxu0 %v2519_v40 }
  0xe8   : > { %1631 = vmatprep.subr.bf16.mxu0 %v2346_v37 }
  0xeb   : > { %1632 = vmatpush1.bf16.msra.mxu0 %v2344_v10 }
  0xec   : > { %1633 = vmatprep.subr.bf16.mxu0 %v2349_v41 }
  0xef   : > { %1634 = vmatpush1.bf16.msra.mxu0 %v2347_v5 }
  0xf0   : > { %1635 = vmatprep.subr.bf16.mxu0 %v2352_v47 }
  0xf3   : > { %1636 = vmatpush1.bf16.msra.mxu0 %v2350_v59 }
  0xf4   : > { %1637 = vmatprep.subr.bf16.mxu0 %v2355_v13 }
  0xf7   : > { %1638 = vmatpush1.bf16.msra.mxu0 %v2353_v31 }
  0xf8   : > { %1639 = vmatprep.subr.bf16.mxu0 %v2358_v8 }
  0xfb   : > { %1640 = vmatpush1.bf16.msra.mxu0 %v2356_v42 }
  0xfc   : > { %1641 = vmatprep.subr.bf16.mxu0 %v2361_v28 }
  0xff   : > { %1642 = vmatpush1.bf16.msra.mxu0 %v2359_v44 }
 0x100   : > { %1643 = vmatprep.subr.bf16.mxu0 %v2364_v38 }
 0x103   : > { %1644 = vmatpush1.bf16.msra.mxu0 %v2362_v45 }
 0x106   : > { %1662 = vmatmul.mubr.bf16.vlgmr.msra.gmra.mrb[0].mxu0 %v579_v30 }
 0x1b8   : > { %v1534_v46 = vpop.f32.mrb[0].mxu1 }
 0x1b9   : > { %v1536_v49 = vpop.f32.mrb[1].mxu1  ;;  %v2024_v1 = vadd.f32 %v1534_v46, %v730_v53 }
 0x1ba   : > { %v1538_v39 = vpop.f32.mrb[2].mxu1  ;;  %v2026_v3 = vadd.f32 %v1536_v49, %v734_v0 }
 0x1bb   : > { %v1540_v48 = vpop.f32.mrb[3].mxu1  ;;  %v2028_v6 = vadd.f32 %v1538_v39, %v730_v53 }
 0x1bc   : > { %v2030_v54 = vadd.f32 %v1540_v48, %v734_v0 }
 0x1d9   : > { %v1663_v4 = vpop.f32.mrb[0].mxu0 }
 0x1da   : > { %v2025_v55 = vadd.f32 %v2024_v1, %v1663_v4  ;;  %v1665_v7 = vpop.f32.mrb[1].mxu0 }
 0x1db   : > { %v2027_v20 = vadd.f32 %v2026_v3, %v1665_v7  ;;  %v1667_v30 = vpop.f32.mrb[2].mxu0 }
 0x1dc   : > { %v1672_v11 = vmax.f32 %v2025_v55, 0.0  ;;  %v2029_v12 = vadd.f32 %v2028_v6, %v1667_v30  ;;  %v1669_v14 = vpop.f32.mrb[3].mxu0 }
 0x1dd   : > { %v1673_v15 = vmax.f32 %v2027_v20, 0.0  ;;  %v2031_v16 = vadd.f32 %v2030_v54, %v1669_v14  ;;  %1696 = sbr.rel (!%p3162_p0) target bundleno = 492 (0x1ec), region = 44 }
 0x1de   : > { %v1674_v17 = vmax.f32 %v2029_v12, 0.0 }
 0x1df   : > { %v2022_v43 = vpack.c.bf16 %v1673_v15, %v1672_v11  ;;  %v1675_v18 = vmax.f32 %v2031_v16, 0.0 }
 0x1e1   : > { %1688 = vst [vmem:[%s251_s8] sm:$0xff] %v2022_v43  ;;  %v2023_v19 = vpack.c.bf16 %v1675_v18, %v1674_v17 }
 0x1e3   : > { %1689 = vst [vmem:[%s251_s8 + $0x8] sm:$0xff] %v2023_v19 }
 0x1e8   : > { %v1731_v21 = vld [vmem:[%s251_s8] sm:$0xff] }
 0x1e9   : > { %1732 = vst [vmem:[%s1701_s30] sm:$0xff] %v1731_v21 }
 0x1ea   : > { %v1733_v22 = vld [vmem:[%s251_s8 + $0x8] sm:$0xff] }
 0x1eb   : > { %1734 = vst [vmem:[%s1701_s30 + $0x10] sm:$0xff] %v1733_v22 }
 0x1ec PF: > { %s19_s21 = sadd.s32 1, %s2511_s21   ;;  %s3163_s18 = sld [smem:[#allocation9_spill]] }
 0x1ed   : > { %p16_p9 = scmp.ge.s32.totalorder %s19_s21, 6   ;;  %s3164_s7 = sld [smem:[#allocation10_spill]] }
 0x1ee   : > { %s3165_s20 = sld [smem:[#allocation11_spill]]  ;;  %s3166_s12 = smov %s2479_s13 }
 0x1ef   : > { %s3167_s13 = smov %s2620_s6  ;;  %s3168_s14 = smov %s2487_s15 }
 0x1f0   : > { %s3169_s15 = smov %s2491_s16  ;;  %s3170_s16 = smov %s2608_s28 }
 0x1f1   : > { %s3171_s17 = smov %s2503_s19  ;;  %18 = sbr.rel (!%p16_p9) target bundleno = 10 (0xa), region = 126 }
 0x1f3   : > { %s3172_s19 = smov %s3164_s7 }
 0x1f8   :  { %1750 = vsyncpa [#allocation3], 1 }
 0x1f9   :  { %1752 = vsyncpa [#allocation3 + $0x1], 1 }
 0x1fa   :  { %1753 = vsyncpa [#allocation5], 1 }
 0x1fb   :  { %1755 = vsyncpa [#allocation5 + $0x1], 1 }

// kernel: vgg_forward.16
= control target key start
LH: loop header
LB: loop body
LE: loop exit
PB: predicated region body
PF: predicated region fallthrough
CT: control target
= control target key end

     0   :  { %s1349_s12 = smov 0   ;;  %s1351_s13 = smov 0   ;;  %s1660_s0 = inlined_call_operand.vmem [shape: bf16[8,1024], index: 0, kind: input, shape index: {}]   ;;  %s1661_s1 = inlined_call_operand.vmem [shape: bf16[1024,1024], index: 1, kind: input, shape index: {}]   ;;  %s1662_s2 = inlined_call_operand.vmem [shape: f32[1,1024], index: 2, kind: input, shape index: {}]   ;;  %s1663_s3 = inlined_call_operand.vmem [shape: bf16[8,1024], index: 3, kind: output, shape index: {}]  }
   0x1   :  { %s1353_s14 = smov 0   ;;  %s1355_s15 = smov 0  }
   0x2   :  { %s1357_s16 = smov 0   ;;  %s1359_s17 = smov 0  }
   0x3   :  { %s1361_s18 = smov 0  }
   0x4 LB: > { %s22_s19 = sadd.s32 1, %s1318_s16  ;;  %s25_s20 = sadd.s32 1, %s1322_s17  ;;  %s1326_s18 = sphi %s1361_s18, %s13_s18   ;;  %s1322_s17 = sphi %s1359_s17, %s1669_s17   ;;  %s1318_s16 = sphi %s1357_s16, %s1668_s16   ;;  %s1314_s15 = sphi %s1355_s15, %s1667_s15   ;;  %s1310_s14 = sphi %s1353_s14, %s1666_s14   ;;  %s1306_s13 = sphi %s1351_s13, %s1665_s13   ;;  %s1302_s12 = sphi %s1349_s12, %s1664_s12  }
   0x5   : > { %p23_p0 = scmp.ge.s32.totalorder %s22_s19, 4  ;;  %p67_p1 = scmp.ne.s32.totalorder %s1306_s13, %s1302_s12 }
   0x6   : > { %p68_p2 = scmp.eq.s32.totalorder %s1326_s18, 0  ;;  %s60_s24 = sadd.s32 1, %s1306_s13 }
   0x7   : > { %s1671_s19 = smov (%p23_p0, %s22_s19), 0  ;;  %s1673_s20 = smov (!%p23_p0, %s25_s20), %s1322_s17 }
   0x8   : > { %p69_p3 = por %p68_p2, %p67_p1  ;;  %p27_p4 = scmp.ge.s32.totalorder %s1673_s20, 2 }
   0x9   : > { %s55_s21 = ssub.s32 %s1318_s16, %s1671_s19  ;;  %p1029_p6 = scmp.ge.s32.totalorder %s1326_s18, 8 }
   0xa   : > { %s1675_s20 = smov (%p27_p4, %s1673_s20), 0 }
   0xb   : > { %s56_s22 = ssub.s32 %s1322_s17, %s1675_s20  ;;  %145 = sbr.rel (%p1029_p6) target bundleno = 57 (0x39), region = 16 }
   0xc   : > { %s57_s23 = sor.u32 %s56_s22, %s55_s21 }
   0xd   : > { %p58_p5 = scmp.eq.s32.totalorder %s57_s23, 0 }
   0xf   : > { %s1400_s25 = scalar_select %p58_p5, %s1306_s13, %s60_s24  }
  0x12   : > { %157 = sbr.rel (!%p69_p3) target bundleno = 57 (0x39), region = 24  ;;  %s159_s26 = sand.u32 (%p69_p3), 1, %s1306_s13  }
  0x13   : > { %s1032_s27 = sshll.u32 (%p69_p3), %s1322_s17, 2  ;;  %s1030_s28 = sshll.u32 (%p69_p3), %s159_s26, 9 }
  0x14   : > { %s1114_s29 = sshll.u32 (%p69_p3), %s1318_s16, 8  ;;  %s1414_s8 = scalar_lea.vmem (%p69_p3), [#allocation3], %s1030_s28 }
  0x15   : > { %s165_s30 = sadd.s32 (%p69_p3), %s1114_s29, %s1032_s27 }
  0x16   : > { %s1034_s4 = sshll.u32 (%p69_p3), %s165_s30, 2 }
  0x17   : > { %s1409_s7 = scalar_lea.vmem (%p69_p3), %s1661_s1, %s1034_s4 }
  0x18   : > { %v180_v0 = vld [vmem:[%s1409_s7] sm:$0xff] (%p69_p3)  ;;  %v182_v1 = vld [vmem:[%s1409_s7 + $0x8] sm:$0xff] (%p69_p3) }
  0x19   : > { %v184_v2 = vld [vmem:[%s1409_s7 + $0x20] sm:$0xff]  ;;  %181 = vst [vmem:[%s1414_s8] sm:$0xff] %v180_v0  ;;  %183 = vst [vmem:[%s1414_s8 + $0x8] sm:$0xff] %v182_v1  ;;  %v186_v3 = vld [vmem:[%s1409_s7 + $0x28] sm:$0xff] }
  0x1a   : > { %185 = vst [vmem:[%s1414_s8 + $0x10] sm:$0xff] %v184_v2  ;;  %v188_v4 = vld [vmem:[%s1409_s7 + $0x40] sm:$0xff]  ;;  %v190_v5 = vld [vmem:[%s1409_s7 + $0x48] sm:$0xff]  ;;  %187 = vst [vmem:[%s1414_s8 + $0x18] sm:$0xff] %v186_v3 }
  0x1b   : > { %189 = vst [vmem:[%s1414_s8 + $0x20] sm:$0xff] %v188_v4  ;;  %191 = vst [vmem:[%s1414_s8 + $0x28] sm:$0xff] %v190_v5  ;;  %v192_v6 = vld [vmem:[%s1409_s7 + $0x60] sm:$0xff]  ;;  %v194_v7 = vld [vmem:[%s1409_s7 + $0x68] sm:$0xff] }
  0x1c   : > { %v196_v8 = vld [vmem:[%s1409_s7 + $0x80] sm:$0xff]  ;;  %193 = vst [vmem:[%s1414_s8 + $0x30] sm:$0xff] %v192_v6  ;;  %195 = vst [vmem:[%s1414_s8 + $0x38] sm:$0xff] %v194_v7  ;;  %v198_v9 = vld [vmem:[%s1409_s7 + $0x88] sm:$0xff] }
  0x1d   : > { %197 = vst [vmem:[%s1414_s8 + $0x40] sm:$0xff] %v196_v8  ;;  %v200_v10 = vld [vmem:[%s1409_s7 + $0xa0] sm:$0xff]  ;;  %v202_v11 = vld [vmem:[%s1409_s7 + $0xa8] sm:$0xff]  ;;  %199 = vst [vmem:[%s1414_s8 + $0x48] sm:$0xff] %v198_v9 }
  0x1e   : > { %201 = vst [vmem:[%s1414_s8 + $0x50] sm:$0xff] %v200_v10  ;;  %203 = vst [vmem:[%s1414_s8 + $0x58] sm:$0xff] %v202_v11  ;;  %v204_v12 = vld [vmem:[%s1409_s7 + $0xc0] sm:$0xff]  ;;  %v206_v13 = vld [vmem:[%s1409_s7 + $0xc8] sm:$0xff] }
  0x1f   : > { %v208_v14 = vld [vmem:[%s1409_s7 + $0xe0] sm:$0xff]  ;;  %205 = vst [vmem:[%s1414_s8 + $0x60] sm:$0xff] %v204_v12  ;;  %207 = vst [vmem:[%s1414_s8 + $0x68] sm:$0xff] %v206_v13  ;;  %v210_v15 = vld [vmem:[%s1409_s7 + $0xe8] sm:$0xff] }
  0x20   : > { %209 = vst [vmem:[%s1414_s8 + $0x70] sm:$0xff] %v208_v14  ;;  %v212_v16 = vld [vmem:[%s1409_s7 + $0x100] sm:$0xff]  ;;  %v214_v17 = vld [vmem:[%s1409_s7 + $0x108] sm:$0xff]  ;;  %211 = vst [vmem:[%s1414_s8 + $0x78] sm:$0xff] %v210_v15 }
  0x21   : > { %213 = vst [vmem:[%s1414_s8 + $0x80] sm:$0xff] %v212_v16  ;;  %215 = vst [vmem:[%s1414_s8 + $0x88] sm:$0xff] %v214_v17  ;;  %v216_v18 = vld [vmem:[%s1409_s7 + $0x120] sm:$0xff]  ;;  %v218_v19 = vld [vmem:[%s1409_s7 + $0x128] sm:$0xff] }
  0x22   : > { %v220_v20 = vld [vmem:[%s1409_s7 + $0x140] sm:$0xff]  ;;  %217 = vst [vmem:[%s1414_s8 + $0x90] sm:$0xff] %v216_v18  ;;  %219 = vst [vmem:[%s1414_s8 + $0x98] sm:$0xff] %v218_v19  ;;  %v222_v21 = vld [vmem:[%s1409_s7 + $0x148] sm:$0xff] }
  0x23   : > { %221 = vst [vmem:[%s1414_s8 + $0xa0] sm:$0xff] %v220_v20  ;;  %v224_v22 = vld [vmem:[%s1409_s7 + $0x160] sm:$0xff]  ;;  %v226_v23 = vld [vmem:[%s1409_s7 + $0x168] sm:$0xff]  ;;  %223 = vst [vmem:[%s1414_s8 + $0xa8] sm:$0xff] %v222_v21 }
  0x24   : > { %225 = vst [vmem:[%s1414_s8 + $0xb0] sm:$0xff] %v224_v22  ;;  %227 = vst [vmem:[%s1414_s8 + $0xb8] sm:$0xff] %v226_v23  ;;  %v228_v24 = vld [vmem:[%s1409_s7 + $0x180] sm:$0xff]  ;;  %v230_v25 = vld [vmem:[%s1409_s7 + $0x188] sm:$0xff] }
  0x25   : > { %v232_v26 = vld [vmem:[%s1409_s7 + $0x1a0] sm:$0xff]  ;;  %229 = vst [vmem:[%s1414_s8 + $0xc0] sm:$0xff] %v228_v24  ;;  %231 = vst [vmem:[%s1414_s8 + $0xc8] sm:$0xff] %v230_v25  ;;  %v234_v27 = vld [vmem:[%s1409_s7 + $0x1a8] sm:$0xff] }
  0x26   : > { %233 = vst [vmem:[%s1414_s8 + $0xd0] sm:$0xff] %v232_v26  ;;  %v236_v28 = vld [vmem:[%s1409_s7 + $0x1c0] sm:$0xff]  ;;  %v238_v29 = vld [vmem:[%s1409_s7 + $0x1c8] sm:$0xff]  ;;  %235 = vst [vmem:[%s1414_s8 + $0xd8] sm:$0xff] %v234_v27 }
  0x27   : > { %237 = vst [vmem:[%s1414_s8 + $0xe0] sm:$0xff] %v236_v28  ;;  %239 = vst [vmem:[%s1414_s8 + $0xe8] sm:$0xff] %v238_v29  ;;  %v240_v30 = vld [vmem:[%s1409_s7 + $0x1e0] sm:$0xff]  ;;  %v242_v31 = vld [vmem:[%s1409_s7 + $0x1e8] sm:$0xff] }
  0x28   : > { %v244_v32 = vld [vmem:[%s1409_s7 + $0x200] sm:$0xff]  ;;  %241 = vst [vmem:[%s1414_s8 + $0xf0] sm:$0xff] %v240_v30  ;;  %243 = vst [vmem:[%s1414_s8 + $0xf8] sm:$0xff] %v242_v31  ;;  %v246_v33 = vld [vmem:[%s1409_s7 + $0x208] sm:$0xff] }
  0x29   : > { %245 = vst [vmem:[%s1414_s8 + $0x100] sm:$0xff] %v244_v32  ;;  %v248_v34 = vld [vmem:[%s1409_s7 + $0x220] sm:$0xff]  ;;  %v250_v35 = vld [vmem:[%s1409_s7 + $0x228] sm:$0xff]  ;;  %247 = vst [vmem:[%s1414_s8 + $0x108] sm:$0xff] %v246_v33 }
  0x2a   : > { %249 = vst [vmem:[%s1414_s8 + $0x110] sm:$0xff] %v248_v34  ;;  %251 = vst [vmem:[%s1414_s8 + $0x118] sm:$0xff] %v250_v35  ;;  %v252_v36 = vld [vmem:[%s1409_s7 + $0x240] sm:$0xff]  ;;  %v254_v37 = vld [vmem:[%s1409_s7 + $0x248] sm:$0xff] }
  0x2b   : > { %v256_v38 = vld [vmem:[%s1409_s7 + $0x260] sm:$0xff]  ;;  %253 = vst [vmem:[%s1414_s8 + $0x120] sm:$0xff] %v252_v36  ;;  %255 = vst [vmem:[%s1414_s8 + $0x128] sm:$0xff] %v254_v37  ;;  %v258_v39 = vld [vmem:[%s1409_s7 + $0x268] sm:$0xff] }
  0x2c   : > { %257 = vst [vmem:[%s1414_s8 + $0x130] sm:$0xff] %v256_v38  ;;  %v260_v40 = vld [vmem:[%s1409_s7 + $0x280] sm:$0xff]  ;;  %v262_v41 = vld [vmem:[%s1409_s7 + $0x288] sm:$0xff]  ;;  %259 = vst [vmem:[%s1414_s8 + $0x138] sm:$0xff] %v258_v39 }
  0x2d   : > { %261 = vst [vmem:[%s1414_s8 + $0x140] sm:$0xff] %v260_v40  ;;  %263 = vst [vmem:[%s1414_s8 + $0x148] sm:$0xff] %v262_v41  ;;  %v264_v42 = vld [vmem:[%s1409_s7 + $0x2a0] sm:$0xff]  ;;  %v266_v43 = vld [vmem:[%s1409_s7 + $0x2a8] sm:$0xff] }
  0x2e   : > { %v268_v44 = vld [vmem:[%s1409_s7 + $0x2c0] sm:$0xff]  ;;  %265 = vst [vmem:[%s1414_s8 + $0x150] sm:$0xff] %v264_v42  ;;  %267 = vst [vmem:[%s1414_s8 + $0x158] sm:$0xff] %v266_v43  ;;  %v270_v45 = vld [vmem:[%s1409_s7 + $0x2c8] sm:$0xff] }
  0x2f   : > { %269 = vst [vmem:[%s1414_s8 + $0x160] sm:$0xff] %v268_v44  ;;  %v272_v46 = vld [vmem:[%s1409_s7 + $0x2e0] sm:$0xff]  ;;  %v274_v47 = vld [vmem:[%s1409_s7 + $0x2e8] sm:$0xff]  ;;  %271 = vst [vmem:[%s1414_s8 + $0x168] sm:$0xff] %v270_v45 }
  0x30   : > { %273 = vst [vmem:[%s1414_s8 + $0x170] sm:$0xff] %v272_v46  ;;  %275 = vst [vmem:[%s1414_s8 + $0x178] sm:$0xff] %v274_v47  ;;  %v276_v48 = vld [vmem:[%s1409_s7 + $0x300] sm:$0xff]  ;;  %v278_v49 = vld [vmem:[%s1409_s7 + $0x308] sm:$0xff] }
  0x31   : > { %v280_v50 = vld [vmem:[%s1409_s7 + $0x320] sm:$0xff]  ;;  %277 = vst [vmem:[%s1414_s8 + $0x180] sm:$0xff] %v276_v48  ;;  %279 = vst [vmem:[%s1414_s8 + $0x188] sm:$0xff] %v278_v49  ;;  %v282_v51 = vld [vmem:[%s1409_s7 + $0x328] sm:$0xff] }
  0x32   : > { %281 = vst [vmem:[%s1414_s8 + $0x190] sm:$0xff] %v280_v50  ;;  %v284_v52 = vld [vmem:[%s1409_s7 + $0x340] sm:$0xff]  ;;  %v286_v53 = vld [vmem:[%s1409_s7 + $0x348] sm:$0xff]  ;;  %283 = vst [vmem:[%s1414_s8 + $0x198] sm:$0xff] %v282_v51 }
  0x33   : > { %285 = vst [vmem:[%s1414_s8 + $0x1a0] sm:$0xff] %v284_v52  ;;  %287 = vst [vmem:[%s1414_s8 + $0x1a8] sm:$0xff] %v286_v53  ;;  %v288_v54 = vld [vmem:[%s1409_s7 + $0x360] sm:$0xff]  ;;  %v290_v55 = vld [vmem:[%s1409_s7 + $0x368] sm:$0xff] }
  0x34   : > { %v292_v56 = vld [vmem:[%s1409_s7 + $0x380] sm:$0xff]  ;;  %289 = vst [vmem:[%s1414_s8 + $0x1b0] sm:$0xff] %v288_v54  ;;  %291 = vst [vmem:[%s1414_s8 + $0x1b8] sm:$0xff] %v290_v55  ;;  %v294_v57 = vld [vmem:[%s1409_s7 + $0x388] sm:$0xff] }
  0x35   : > { %293 = vst [vmem:[%s1414_s8 + $0x1c0] sm:$0xff] %v292_v56  ;;  %v296_v58 = vld [vmem:[%s1409_s7 + $0x3a0] sm:$0xff]  ;;  %v298_v59 = vld [vmem:[%s1409_s7 + $0x3a8] sm:$0xff]  ;;  %295 = vst [vmem:[%s1414_s8 + $0x1c8] sm:$0xff] %v294_v57 }
  0x36   : > { %297 = vst [vmem:[%s1414_s8 + $0x1d0] sm:$0xff] %v296_v58  ;;  %299 = vst [vmem:[%s1414_s8 + $0x1d8] sm:$0xff] %v298_v59  ;;  %v300_v60 = vld [vmem:[%s1409_s7 + $0x3c0] sm:$0xff]  ;;  %v302_v61 = vld [vmem:[%s1409_s7 + $0x3c8] sm:$0xff] }
  0x37   : > { %v304_v62 = vld [vmem:[%s1409_s7 + $0x3e0] sm:$0xff]  ;;  %301 = vst [vmem:[%s1414_s8 + $0x1e0] sm:$0xff] %v300_v60  ;;  %303 = vst [vmem:[%s1414_s8 + $0x1e8] sm:$0xff] %v302_v61  ;;  %v306_v63 = vld [vmem:[%s1409_s7 + $0x3e8] sm:$0xff] }
  0x38   : > { %305 = vst [vmem:[%s1414_s8 + $0x1f0] sm:$0xff] %v304_v62  ;;  %307 = vst [vmem:[%s1414_s8 + $0x1f8] sm:$0xff] %v306_v63 }
  0x39 PF: > { %p1035_p7 = scmp.ge.s32.totalorder %s1326_s18, 1  ;;  %p320_p8 = scmp.lt.s32.totalorder %s1326_s18, 9 }
  0x3b   : > { %p321_p9 = pnand %p1035_p7, %p320_p8 }
  0x3c   : > { %s327_s9 = sand.u32 (!%p321_p9), 1, %s1302_s12   ;;  %s1037_s10 = sshll.u32 (!%p321_p9), %s1310_s14, 1 }
  0x3d   : > { %324 = sbr.rel (%p321_p9) target bundleno = 373 (0x175), region = 51  ;;  %s1036_s11 = sshll.u32 (!%p321_p9), %s327_s9, 9 }
  0x3e   : > { %p360_p10 = scmp.lt.s32.totalorder (!%p321_p9), %s1037_s10, 7  ;;  %s1039_s21 = sshll.u32 (!%p321_p9), %s1314_s15, 2 }
  0x3f   : > { %p368_p11 = scmp.lt.s32.totalorder (!%p321_p9), %s1039_s21, 7  ;;  %s1563_s5 = scalar_lea.vmem (!%p321_p9), [#allocation3], %s1036_s11 }
  0x40   : > { %p1042_p12 = scmp.ne.s32.totalorder (!%p321_p9), %s1310_s14, 0 }
  0x44   : > { %s1677_s10 = smov (!%p360_p10, %s1037_s10), 7  ;;  %s1679_s21 = smov (!%p368_p11, %s1039_s21), 7 }
  0x45   : > { %s1038_s22 = sshll.u32 %s1677_s10, 2  ;;  %s370_s12 = scalar_lea.vmem %s1662_s2, %s1679_s21  ;;  %v1328_v0 = vmov (!%p1042_p12), 0.0  }
  0x46   : > { %s1549_s26 = scalar_lea.vmem %s1660_s0, %s1038_s22  ;;  %s1041_s29 = sshll.u32 %s1679_s21, 2  ;;  %382 = vst [vmem:[#allocation2] sm:$0xff] (!%p1042_p12), %v1328_v0  ;;  %383 = vst [vmem:[#allocation2 + $0x8] sm:$0xff] (!%p1042_p12), %v1328_v0 }
  0x47   : > { %s1561_s15 = scalar_lea.vmem %s1663_s3, %s1041_s29  ;;  %381 = sbr.rel (%p1042_p12) target bundleno = 78 (0x4e), region = 59  ;;  %384 = vst [vmem:[#allocation2 + $0x10] sm:$0xff] (!%p1042_p12), %v1328_v0  ;;  %385 = vst [vmem:[#allocation2 + $0x18] sm:$0xff] (!%p1042_p12), %v1328_v0 }
  0x4e PF: > { %v1174_v1 = vld [vmem:[%s1563_s5 + $0x4] ss:$16 sps:$4 sm:$0xff]   ;;  %v1176_v2 = vld [vmem:[%s1563_s5 + $0xc] ss:$16 sps:$4 sm:$0xff]   ;;  %v1178_v3 = vld [vmem:[%s1563_s5] ss:$16 sps:$4 sm:$0xff]  }
  0x4f   : > { %782 = vmatprep.subr.bf16.mxu0 %v1174_v1  ;;  %v1179_v4 = vld [vmem:[%s1563_s5 + $0x8] ss:$16 sps:$4 sm:$0xff]   ;;  %823 = vmatprep.subr.bf16.mxu1 %v1176_v2  ;;  %v1180_v5 = vld [vmem:[%s1563_s5 + $0x24] ss:$16 sps:$4 sm:$0xff]   ;;  %v1182_v6 = vld [vmem:[%s1563_s5 + $0x2c] ss:$16 sps:$4 sm:$0xff]  }
  0x50   : > { %783 = vmatpush1.bf16.msra.mxu0 %v1178_v3  ;;  %824 = vmatpush1.bf16.msra.mxu1 %v1179_v4  ;;  %v1184_v7 = vld [vmem:[%s1563_s5 + $0x20] ss:$16 sps:$4 sm:$0xff]   ;;  %v1185_v8 = vld [vmem:[%s1563_s5 + $0x28] ss:$16 sps:$4 sm:$0xff]   ;;  %v1186_v9 = vld [vmem:[%s1563_s5 + $0x44] ss:$16 sps:$4 sm:$0xff]  }
  0x51   : > { %784 = vmatprep.subr.bf16.mxu0 %v1180_v5  ;;  %825 = vmatprep.subr.bf16.mxu1 %v1182_v6  ;;  %v1188_v10 = vld [vmem:[%s1563_s5 + $0x4c] ss:$16 sps:$4 sm:$0xff]   ;;  %v1190_v11 = vld [vmem:[%s1563_s5 + $0x40] ss:$16 sps:$4 sm:$0xff]   ;;  %v1191_v12 = vld [vmem:[%s1563_s5 + $0x48] ss:$16 sps:$4 sm:$0xff]  }
  0x52   : > { %v1192_v13 = vld [vmem:[%s1563_s5 + $0x64] ss:$16 sps:$4 sm:$0xff]   ;;  %v1194_v14 = vld [vmem:[%s1563_s5 + $0x6c] ss:$16 sps:$4 sm:$0xff]   ;;  %v1196_v15 = vld [vmem:[%s1563_s5 + $0x60] ss:$16 sps:$4 sm:$0xff]  }
  0x53   : > { %v1197_v16 = vld [vmem:[%s1563_s5 + $0x68] ss:$16 sps:$4 sm:$0xff]   ;;  %v1198_v17 = vld [vmem:[%s1563_s5 + $0x84] ss:$16 sps:$4 sm:$0xff]   ;;  %v1200_v18 = vld [vmem:[%s1563_s5 + $0x8c] ss:$16 sps:$4 sm:$0xff]  }
  0x54   : > { %785 = vmatpush1.bf16.msra.mxu0 %v1184_v7  ;;  %826 = vmatpush1.bf16.msra.mxu1 %v1185_v8  ;;  %v1202_v19 = vld [vmem:[%s1563_s5 + $0x80] ss:$16 sps:$4 sm:$0xff]   ;;  %v1203_v20 = vld [vmem:[%s1563_s5 + $0x88] ss:$16 sps:$4 sm:$0xff]   ;;  %v1204_v21 = vld [vmem:[%s1563_s5 + $0xa4] ss:$16 sps:$4 sm:$0xff]  }
  0x55   : > { %786 = vmatprep.subr.bf16.mxu0 %v1186_v9  ;;  %827 = vmatprep.subr.bf16.mxu1 %v1188_v10  ;;  %v1206_v22 = vld [vmem:[%s1563_s5 + $0xac] ss:$16 sps:$4 sm:$0xff]   ;;  %v1208_v23 = vld [vmem:[%s1563_s5 + $0xa0] ss:$16 sps:$4 sm:$0xff]   ;;  %v1209_v24 = vld [vmem:[%s1563_s5 + $0xa8] ss:$16 sps:$4 sm:$0xff]  }
  0x56   : > { %v1210_v25 = vld [vmem:[%s1563_s5 + $0xc4] ss:$16 sps:$4 sm:$0xff]   ;;  %v1212_v26 = vld [vmem:[%s1563_s5 + $0xcc] ss:$16 sps:$4 sm:$0xff]   ;;  %v1214_v27 = vld [vmem:[%s1563_s5 + $0xc0] ss:$16 sps:$4 sm:$0xff]  }
  0x57   : > { %v1215_v28 = vld [vmem:[%s1563_s5 + $0xc8] ss:$16 sps:$4 sm:$0xff]   ;;  %v1216_v29 = vld [vmem:[%s1563_s5 + $0xe4] ss:$16 sps:$4 sm:$0xff]   ;;  %v1218_v30 = vld [vmem:[%s1563_s5 + $0xec] ss:$16 sps:$4 sm:$0xff]  }
  0x58   : > { %787 = vmatpush1.bf16.msra.mxu0 %v1190_v11  ;;  %828 = vmatpush1.bf16.msra.mxu1 %v1191_v12  ;;  %v1220_v31 = vld [vmem:[%s1563_s5 + $0xe0] ss:$16 sps:$4 sm:$0xff]   ;;  %v1221_v32 = vld [vmem:[%s1563_s5 + $0xe8] ss:$16 sps:$4 sm:$0xff]   ;;  %v1222_v33 = vld [vmem:[%s1563_s5 + $0x104] ss:$16 sps:$4 sm:$0xff]  }
  0x59   : > { %788 = vmatprep.subr.bf16.mxu0 %v1192_v13  ;;  %829 = vmatprep.subr.bf16.mxu1 %v1194_v14  ;;  %v1224_v34 = vld [vmem:[%s1563_s5 + $0x10c] ss:$16 sps:$4 sm:$0xff]   ;;  %v1226_v35 = vld [vmem:[%s1563_s5 + $0x100] ss:$16 sps:$4 sm:$0xff]   ;;  %v1227_v36 = vld [vmem:[%s1563_s5 + $0x108] ss:$16 sps:$4 sm:$0xff]  }
  0x5a   : > { %v1228_v37 = vld [vmem:[%s1563_s5 + $0x124] ss:$16 sps:$4 sm:$0xff]   ;;  %v1230_v38 = vld [vmem:[%s1563_s5 + $0x12c] ss:$16 sps:$4 sm:$0xff]   ;;  %v1232_v39 = vld [vmem:[%s1563_s5 + $0x120] ss:$16 sps:$4 sm:$0xff]  }
  0x5b   : > { %v1233_v40 = vld [vmem:[%s1563_s5 + $0x128] ss:$16 sps:$4 sm:$0xff]   ;;  %v1234_v41 = vld [vmem:[%s1563_s5 + $0x144] ss:$16 sps:$4 sm:$0xff]   ;;  %v1236_v42 = vld [vmem:[%s1563_s5 + $0x14c] ss:$16 sps:$4 sm:$0xff]  }
  0x5c   : > { %789 = vmatpush1.bf16.msra.mxu0 %v1196_v15  ;;  %830 = vmatpush1.bf16.msra.mxu1 %v1197_v16  ;;  %v1238_v43 = vld [vmem:[%s1563_s5 + $0x140] ss:$16 sps:$4 sm:$0xff]   ;;  %v1239_v44 = vld [vmem:[%s1563_s5 + $0x148] ss:$16 sps:$4 sm:$0xff]   ;;  %v1240_v45 = vld [vmem:[%s1563_s5 + $0x164] ss:$16 sps:$4 sm:$0xff]  }
  0x5d   : > { %790 = vmatprep.subr.bf16.mxu0 %v1198_v17  ;;  %831 = vmatprep.subr.bf16.mxu1 %v1200_v18  ;;  %v1242_v46 = vld [vmem:[%s1563_s5 + $0x16c] ss:$16 sps:$4 sm:$0xff]   ;;  %v390_v47 = vld [vmem:[%s1549_s26] sm:$0xff]  ;;  %v1245_v50 = vld [vmem:[%s1563_s5 + $0x168] ss:$16 sps:$4 sm:$0xff]   ;;  %p1109_p13 = scmp.ne.s32.totalorder %s1310_s14, 3 }
  0x5e   : > { %v1044_v48 = vcombine.high %v390_v47, %v390_v47  ;;  %v1244_v49 = vld [vmem:[%s1563_s5 + $0x160] ss:$16 sps:$4 sm:$0xff]   ;;  %v1246_v51 = vld [vmem:[%s1563_s5 + $0x184] ss:$16 sps:$4 sm:$0xff]   ;;  %v1248_v52 = vld [vmem:[%s1563_s5 + $0x18c] ss:$16 sps:$4 sm:$0xff]   ;;  %v1043_v3 = vcombine.low %v390_v47, %v390_v47 }
  0x5f   : > { %v1250_v53 = vld [vmem:[%s1563_s5 + $0x180] ss:$16 sps:$4 sm:$0xff]   ;;  %v1251_v54 = vld [vmem:[%s1563_s5 + $0x188] ss:$16 sps:$4 sm:$0xff]   ;;  %v1252_v55 = vld [vmem:[%s1563_s5 + $0x1a4] ss:$16 sps:$4 sm:$0xff]  }
  0x60   : > { %791 = vmatpush1.bf16.msra.mxu0 %v1202_v19  ;;  %832 = vmatpush1.bf16.msra.mxu1 %v1203_v20  ;;  %v1254_v56 = vld [vmem:[%s1563_s5 + $0x1ac] ss:$16 sps:$4 sm:$0xff]   ;;  %v1256_v57 = vld [vmem:[%s1563_s5 + $0x1a0] ss:$16 sps:$4 sm:$0xff]   ;;  %v1257_v58 = vld [vmem:[%s1563_s5 + $0x1a8] ss:$16 sps:$4 sm:$0xff]   ;;  %v882_v20 = vlaneseq (!%p1109_p13) }
  0x61   : > { %792 = vmatprep.subr.bf16.mxu0 %v1204_v21  ;;  %833 = vmatprep.subr.bf16.mxu1 %v1206_v22  ;;  %v1258_v59 = vld [vmem:[%s1563_s5 + $0x1c4] ss:$16 sps:$4 sm:$0xff]   ;;  %v1260_v60 = vld [vmem:[%s1563_s5 + $0x1cc] ss:$16 sps:$4 sm:$0xff]   ;;  %v1262_v61 = vld [vmem:[%s1563_s5 + $0x1c0] ss:$16 sps:$4 sm:$0xff]  }
  0x62   : > { %814 = vmatprep.mubr.bf16.mxu0 %v1044_v48  ;;  %855 = vmatprep.mubr.bf16.mxu1 %v1044_v48  ;;  %v1263_v62 = vld [vmem:[%s1563_s5 + $0x1c8] ss:$16 sps:$4 sm:$0xff]   ;;  %v1264_v63 = vld [vmem:[%s1563_s5 + $0x1e4] ss:$16 sps:$4 sm:$0xff]   ;;  %v1266_v0 = vld [vmem:[%s1563_s5 + $0x1ec] ss:$16 sps:$4 sm:$0xff]  }
  0x63   : > { %v1268_v1 = vld [vmem:[%s1563_s5 + $0x1e0] ss:$16 sps:$4 sm:$0xff]   ;;  %v1269_v2 = vld [vmem:[%s1563_s5 + $0x1e8] ss:$16 sps:$4 sm:$0xff]   ;;  %v883_v21 = vshrl.u32 (!%p1109_p13), %v882_v20, 7 }
  0x64   : > { %793 = vmatpush1.bf16.msra.mxu0 %v1208_v23  ;;  %834 = vmatpush1.bf16.msra.mxu1 %v1209_v24  ;;  %v386_v4 = vld [vmem:[#allocation2] sm:$0xff]  ;;  %v388_v5 = vld [vmem:[#allocation2 + $0x10] sm:$0xff]  ;;  %v387_v6 = vld [vmem:[#allocation2 + $0x8] sm:$0xff] }
  0x65   : > { %794 = vmatprep.subr.bf16.mxu0 %v1210_v25  ;;  %835 = vmatprep.subr.bf16.mxu1 %v1212_v26  ;;  %v389_v7 = vld [vmem:[#allocation2 + $0x18] sm:$0xff]  ;;  %v880_v22 = vld [vmem:[%s370_s12] sm:$0xf] (!%p1109_p13)  ;;  %v884_v24 = vsub.s32 (!%p1109_p13), 0, %v883_v21  ;;  %v888_v25 = vsub.s32 (!%p1109_p13), 1, %v883_v21  ;;  %v892_v26 = vsub.s32 (!%p1109_p13), 2, %v883_v21 }
  0x68   : > { %795 = vmatpush1.bf16.msra.mxu0 %v1214_v27  ;;  %836 = vmatpush1.bf16.msra.mxu1 %v1215_v28  ;;  %v896_v27 = vsub.s32 (!%p1109_p13), 3, %v883_v21 }
  0x69   : > { %796 = vmatprep.subr.bf16.mxu0 %v1216_v29  ;;  %837 = vmatprep.subr.bf16.mxu1 %v1218_v30 }
  0x6c   : > { %797 = vmatpush1.bf16.msra.mxu0 %v1220_v31  ;;  %838 = vmatpush1.bf16.msra.mxu1 %v1221_v32  ;;  %v885_v31 = vrot.slane (!%p1109_p13), %v880_v22, %v884_v24  ;;  %v889_v32 = vrot.slane (!%p1109_p13), %v880_v22, %v888_v25 }
  0x6d   : > { %798 = vmatprep.subr.bf16.mxu0 %v1222_v33  ;;  %839 = vmatprep.subr.bf16.mxu1 %v1224_v34  ;;  %v893_v33 = vrot.slane (!%p1109_p13), %v880_v22, %v892_v26  ;;  %v897_v34 = vrot.slane (!%p1109_p13), %v880_v22, %v896_v27 }
  0x70   : > { %799 = vmatpush1.bf16.msra.mxu0 %v1226_v35  ;;  %840 = vmatpush1.bf16.msra.mxu1 %v1227_v36 }
  0x71   : > { %800 = vmatprep.subr.bf16.mxu0 %v1228_v37  ;;  %841 = vmatprep.subr.bf16.mxu1 %v1230_v38 }
  0x74   : > { %801 = vmatpush1.bf16.msra.mxu0 %v1232_v39  ;;  %842 = vmatpush1.bf16.msra.mxu1 %v1233_v40 }
  0x75   : > { %802 = vmatprep.subr.bf16.mxu0 %v1234_v41  ;;  %843 = vmatprep.subr.bf16.mxu1 %v1236_v42 }
  0x78   : > { %803 = vmatpush1.bf16.msra.mxu0 %v1238_v43  ;;  %844 = vmatpush1.bf16.msra.mxu1 %v1239_v44 }
  0x79   : > { %804 = vmatprep.subr.bf16.mxu0 %v1240_v45  ;;  %845 = vmatprep.subr.bf16.mxu1 %v1242_v46 }
  0x7c   : > { %805 = vmatpush1.bf16.msra.mxu0 %v1244_v49  ;;  %846 = vmatpush1.bf16.msra.mxu1 %v1245_v50 }
  0x7d   : > { %806 = vmatprep.subr.bf16.mxu0 %v1246_v51  ;;  %847 = vmatprep.subr.bf16.mxu1 %v1248_v52 }
  0x80   : > { %807 = vmatpush1.bf16.msra.mxu0 %v1250_v53  ;;  %848 = vmatpush1.bf16.msra.mxu1 %v1251_v54 }
  0x81   : > { %808 = vmatprep.subr.bf16.mxu0 %v1252_v55  ;;  %849 = vmatprep.subr.bf16.mxu1 %v1254_v56 }
  0x84   : > { %809 = vmatpush1.bf16.msra.mxu0 %v1256_v57  ;;  %850 = vmatpush1.bf16.msra.mxu1 %v1257_v58 }
  0x85   : > { %810 = vmatprep.subr.bf16.mxu0 %v1258_v59  ;;  %851 = vmatprep.subr.bf16.mxu1 %v1260_v60 }
  0x88   : > { %811 = vmatpush1.bf16.msra.mxu0 %v1262_v61  ;;  %852 = vmatpush1.bf16.msra.mxu1 %v1263_v62 }
  0x89   : > { %812 = vmatprep.subr.bf16.mxu0 %v1264_v63  ;;  %853 = vmatprep.subr.bf16.mxu1 %v1266_v0 }
  0x8c   : > { %813 = vmatpush1.bf16.msra.mxu0 %v1268_v1  ;;  %854 = vmatpush1.bf16.msra.mxu1 %v1269_v2 }
  0x8f   : > { %815 = vmatmul.mubr.bf16.vlgmr.msra.gmra.mrb[0].mxu0 %v1043_v3  ;;  %856 = vmatmul.mubr.bf16.vlgmr.msra.gmra.mrb[0].mxu1 %v1043_v3 }
 0x160   : > { %875 = sbr.rel (%p1109_p13) target bundleno = 373 (0x175), region = 63 }
 0x162   : > { %v816_v8 = vpop.f32.mrb[0].mxu0  ;;  %v857_v9 = vpop.f32.mrb[0].mxu1 }
 0x163   : > { %v864_v10 = vadd.f32 %v816_v8, %v386_v4  ;;  %v866_v11 = vadd.f32 %v857_v9, %v388_v5  ;;  %v818_v12 = vpop.f32.mrb[1].mxu0  ;;  %v859_v13 = vpop.f32.mrb[1].mxu1 }
 0x164   : > { %v865_v14 = vadd.f32 %v818_v12, %v387_v6  ;;  %v867_v15 = vadd.f32 %v859_v13, %v389_v7  ;;  %v820_v16 = vpop.f32.mrb[2].mxu0  ;;  %v861_v17 = vpop.f32.mrb[2].mxu1 }
 0x165   : > { %868 = vst [vmem:[#allocation2] sm:$0xff] %v864_v10  ;;  %870 = vst [vmem:[#allocation2 + $0x10] sm:$0xff] %v866_v11  ;;  %v821_v18 = vpop.f32.mrb[3].mxu0  ;;  %v862_v19 = vpop.f32.mrb[3].mxu1 }
 0x166   : > { %869 = vst [vmem:[#allocation2 + $0x8] sm:$0xff] %v865_v14  ;;  %871 = vst [vmem:[#allocation2 + $0x18] sm:$0xff] %v867_v15 }
 0x16c   : > { %v876_v23 = vld [vmem:[#allocation2] sm:$0xff]  ;;  %v878_v29 = vld [vmem:[#allocation2 + $0x10] sm:$0xff] }
 0x16d   : > { %v877_v28 = vld [vmem:[#allocation2 + $0x8] sm:$0xff]  ;;  %v879_v30 = vld [vmem:[#allocation2 + $0x18] sm:$0xff]  ;;  %v902_v35 = vadd.f32 %v885_v31, %v876_v23  ;;  %v904_v37 = vadd.f32 %v893_v33, %v878_v29 }
 0x16e   : > { %v903_v36 = vadd.f32 %v889_v32, %v877_v28  ;;  %v905_v38 = vadd.f32 %v897_v34, %v879_v30 }
 0x16f   : > { %v906_v39 = vmax.f32 %v902_v35, 0.0  ;;  %v908_v41 = vmax.f32 %v904_v37, 0.0 }
 0x170   : > { %v907_v40 = vmax.f32 %v903_v36, 0.0  ;;  %v909_v42 = vmax.f32 %v905_v38, 0.0 }
 0x172   : > { %v1115_v43 = vpack.c.bf16 %v907_v40, %v906_v39  ;;  %v1116_v44 = vpack.c.bf16 %v909_v42, %v908_v41 }
 0x174   : > { %926 = vst [vmem:[%s1561_s15] sm:$0xff] %v1115_v43  ;;  %927 = vst [vmem:[%s1561_s15 + $0x8] sm:$0xff] %v1116_v44 }
 0x175 PF: > { %s13_s18 = sadd.s32 1, %s1326_s18   ;;  %s1664_s12 = smov %s1306_s13 }
 0x176   : > { %p10_p0 = scmp.ge.s32.totalorder %s13_s18, 10   ;;  %s1665_s13 = smov %s1400_s25 }
 0x177   : > { %s1666_s14 = smov %s1318_s16  ;;  %s1667_s15 = smov %s1322_s17 }
 0x178   : > { %s1668_s16 = smov %s1671_s19  ;;  %s1669_s17 = smov %s1675_s20 }
 0x179   :  { %12 = sbr.rel (!%p10_p0) target bundleno = 4 (0x4), region = 104 }

// kernel: vgg_forward.15
= control target key start
LH: loop header
LB: loop body
LE: loop exit
PB: predicated region body
PF: predicated region fallthrough
CT: control target
= control target key end

     0   :  { %s1349_s12 = smov 0   ;;  %s1351_s13 = smov 0   ;;  %s1660_s0 = inlined_call_operand.vmem [shape: bf16[8,2048], index: 0, kind: input, shape index: {}]   ;;  %s1661_s1 = inlined_call_operand.vmem [shape: bf16[2048,1024], index: 1, kind: input, shape index: {}]   ;;  %s1662_s2 = inlined_call_operand.vmem [shape: f32[1,1024], index: 2, kind: input, shape index: {}]   ;;  %s1663_s3 = inlined_call_operand.vmem [shape: bf16[8,1024], index: 3, kind: output, shape index: {}]  }
   0x1   :  { %s1353_s14 = smov 0   ;;  %s1355_s15 = smov 0  }
   0x2   :  { %s1357_s16 = smov 0   ;;  %s1359_s17 = smov 0  }
   0x3   :  { %s1361_s18 = smov 0  }
   0x4 LB: > { %s22_s19 = sadd.s32 1, %s1318_s16  ;;  %s25_s20 = sadd.s32 1, %s1322_s17  ;;  %s1326_s18 = sphi %s1361_s18, %s13_s18   ;;  %s1322_s17 = sphi %s1359_s17, %s1669_s17   ;;  %s1318_s16 = sphi %s1357_s16, %s1668_s16   ;;  %s1314_s15 = sphi %s1355_s15, %s1667_s15   ;;  %s1310_s14 = sphi %s1353_s14, %s1666_s14   ;;  %s1306_s13 = sphi %s1351_s13, %s1665_s13   ;;  %s1302_s12 = sphi %s1349_s12, %s1664_s12  }
   0x5   : > { %p23_p0 = scmp.ge.s32.totalorder %s22_s19, 8  ;;  %p67_p1 = scmp.ne.s32.totalorder %s1306_s13, %s1302_s12 }
   0x6   : > { %p68_p2 = scmp.eq.s32.totalorder %s1326_s18, 0  ;;  %s60_s24 = sadd.s32 1, %s1306_s13 }
   0x7   : > { %s1671_s19 = smov (%p23_p0, %s22_s19), 0  ;;  %s1673_s20 = smov (!%p23_p0, %s25_s20), %s1322_s17 }
   0x8   : > { %p69_p3 = por %p68_p2, %p67_p1  ;;  %p27_p4 = scmp.ge.s32.totalorder %s1673_s20, 2 }
   0x9   : > { %s55_s21 = ssub.s32 %s1318_s16, %s1671_s19  ;;  %p1029_p6 = scmp.ge.s32.totalorder %s1326_s18, 16 }
   0xa   : > { %s1675_s20 = smov (%p27_p4, %s1673_s20), 0 }
   0xb   : > { %s56_s22 = ssub.s32 %s1322_s17, %s1675_s20  ;;  %145 = sbr.rel (%p1029_p6) target bundleno = 57 (0x39), region = 16 }
   0xc   : > { %s57_s23 = sor.u32 %s56_s22, %s55_s21 }
   0xd   : > { %p58_p5 = scmp.eq.s32.totalorder %s57_s23, 0 }
   0xf   : > { %s1400_s25 = scalar_select %p58_p5, %s1306_s13, %s60_s24  }
  0x12   : > { %157 = sbr.rel (!%p69_p3) target bundleno = 57 (0x39), region = 24  ;;  %s159_s26 = sand.u32 (%p69_p3), 1, %s1306_s13  }
  0x13   : > { %s1032_s27 = sshll.u32 (%p69_p3), %s1322_s17, 2  ;;  %s1030_s28 = sshll.u32 (%p69_p3), %s159_s26, 9 }
  0x14   : > { %s1114_s29 = sshll.u32 (%p69_p3), %s1318_s16, 8  ;;  %s1414_s8 = scalar_lea.vmem (%p69_p3), [#allocation3], %s1030_s28 }
  0x15   : > { %s165_s30 = sadd.s32 (%p69_p3), %s1114_s29, %s1032_s27 }
  0x16   : > { %s1034_s4 = sshll.u32 (%p69_p3), %s165_s30, 2 }
  0x17   : > { %s1409_s7 = scalar_lea.vmem (%p69_p3), %s1661_s1, %s1034_s4 }
  0x18   : > { %v180_v0 = vld [vmem:[%s1409_s7] sm:$0xff] (%p69_p3)  ;;  %v182_v1 = vld [vmem:[%s1409_s7 + $0x8] sm:$0xff] (%p69_p3) }
  0x19   : > { %v184_v2 = vld [vmem:[%s1409_s7 + $0x20] sm:$0xff]  ;;  %181 = vst [vmem:[%s1414_s8] sm:$0xff] %v180_v0  ;;  %183 = vst [vmem:[%s1414_s8 + $0x8] sm:$0xff] %v182_v1  ;;  %v186_v3 = vld [vmem:[%s1409_s7 + $0x28] sm:$0xff] }
  0x1a   : > { %185 = vst [vmem:[%s1414_s8 + $0x10] sm:$0xff] %v184_v2  ;;  %v188_v4 = vld [vmem:[%s1409_s7 + $0x40] sm:$0xff]  ;;  %v190_v5 = vld [vmem:[%s1409_s7 + $0x48] sm:$0xff]  ;;  %187 = vst [vmem:[%s1414_s8 + $0x18] sm:$0xff] %v186_v3 }
  0x1b   : > { %189 = vst [vmem:[%s1414_s8 + $0x20] sm:$0xff] %v188_v4  ;;  %191 = vst [vmem:[%s1414_s8 + $0x28] sm:$0xff] %v190_v5  ;;  %v192_v6 = vld [vmem:[%s1409_s7 + $0x60] sm:$0xff]  ;;  %v194_v7 = vld [vmem:[%s1409_s7 + $0x68] sm:$0xff] }
  0x1c   : > { %v196_v8 = vld [vmem:[%s1409_s7 + $0x80] sm:$0xff]  ;;  %193 = vst [vmem:[%s1414_s8 + $0x30] sm:$0xff] %v192_v6  ;;  %195 = vst [vmem:[%s1414_s8 + $0x38] sm:$0xff] %v194_v7  ;;  %v198_v9 = vld [vmem:[%s1409_s7 + $0x88] sm:$0xff] }
  0x1d   : > { %197 = vst [vmem:[%s1414_s8 + $0x40] sm:$0xff] %v196_v8  ;;  %v200_v10 = vld [vmem:[%s1409_s7 + $0xa0] sm:$0xff]  ;;  %v202_v11 = vld [vmem:[%s1409_s7 + $0xa8] sm:$0xff]  ;;  %199 = vst [vmem:[%s1414_s8 + $0x48] sm:$0xff] %v198_v9 }
  0x1e   : > { %201 = vst [vmem:[%s1414_s8 + $0x50] sm:$0xff] %v200_v10  ;;  %203 = vst [vmem:[%s1414_s8 + $0x58] sm:$0xff] %v202_v11  ;;  %v204_v12 = vld [vmem:[%s1409_s7 + $0xc0] sm:$0xff]  ;;  %v206_v13 = vld [vmem:[%s1409_s7 + $0xc8] sm:$0xff] }
  0x1f   : > { %v208_v14 = vld [vmem:[%s1409_s7 + $0xe0] sm:$0xff]  ;;  %205 = vst [vmem:[%s1414_s8 + $0x60] sm:$0xff] %v204_v12  ;;  %207 = vst [vmem:[%s1414_s8 + $0x68] sm:$0xff] %v206_v13  ;;  %v210_v15 = vld [vmem:[%s1409_s7 + $0xe8] sm:$0xff] }
  0x20   : > { %209 = vst [vmem:[%s1414_s8 + $0x70] sm:$0xff] %v208_v14  ;;  %v212_v16 = vld [vmem:[%s1409_s7 + $0x100] sm:$0xff]  ;;  %v214_v17 = vld [vmem:[%s1409_s7 + $0x108] sm:$0xff]  ;;  %211 = vst [vmem:[%s1414_s8 + $0x78] sm:$0xff] %v210_v15 }
  0x21   : > { %213 = vst [vmem:[%s1414_s8 + $0x80] sm:$0xff] %v212_v16  ;;  %215 = vst [vmem:[%s1414_s8 + $0x88] sm:$0xff] %v214_v17  ;;  %v216_v18 = vld [vmem:[%s1409_s7 + $0x120] sm:$0xff]  ;;  %v218_v19 = vld [vmem:[%s1409_s7 + $0x128] sm:$0xff] }
  0x22   : > { %v220_v20 = vld [vmem:[%s1409_s7 + $0x140] sm:$0xff]  ;;  %217 = vst [vmem:[%s1414_s8 + $0x90] sm:$0xff] %v216_v18  ;;  %219 = vst [vmem:[%s1414_s8 + $0x98] sm:$0xff] %v218_v19  ;;  %v222_v21 = vld [vmem:[%s1409_s7 + $0x148] sm:$0xff] }
  0x23   : > { %221 = vst [vmem:[%s1414_s8 + $0xa0] sm:$0xff] %v220_v20  ;;  %v224_v22 = vld [vmem:[%s1409_s7 + $0x160] sm:$0xff]  ;;  %v226_v23 = vld [vmem:[%s1409_s7 + $0x168] sm:$0xff]  ;;  %223 = vst [vmem:[%s1414_s8 + $0xa8] sm:$0xff] %v222_v21 }
  0x24   : > { %225 = vst [vmem:[%s1414_s8 + $0xb0] sm:$0xff] %v224_v22  ;;  %227 = vst [vmem:[%s1414_s8 + $0xb8] sm:$0xff] %v226_v23  ;;  %v228_v24 = vld [vmem:[%s1409_s7 + $0x180] sm:$0xff]  ;;  %v230_v25 = vld [vmem:[%s1409_s7 + $0x188] sm:$0xff] }
  0x25   : > { %v232_v26 = vld [vmem:[%s1409_s7 + $0x1a0] sm:$0xff]  ;;  %229 = vst [vmem:[%s1414_s8 + $0xc0] sm:$0xff] %v228_v24  ;;  %231 = vst [vmem:[%s1414_s8 + $0xc8] sm:$0xff] %v230_v25  ;;  %v234_v27 = vld [vmem:[%s1409_s7 + $0x1a8] sm:$0xff] }
  0x26   : > { %233 = vst [vmem:[%s1414_s8 + $0xd0] sm:$0xff] %v232_v26  ;;  %v236_v28 = vld [vmem:[%s1409_s7 + $0x1c0] sm:$0xff]  ;;  %v238_v29 = vld [vmem:[%s1409_s7 + $0x1c8] sm:$0xff]  ;;  %235 = vst [vmem:[%s1414_s8 + $0xd8] sm:$0xff] %v234_v27 }
  0x27   : > { %237 = vst [vmem:[%s1414_s8 + $0xe0] sm:$0xff] %v236_v28  ;;  %239 = vst [vmem:[%s1414_s8 + $0xe8] sm:$0xff] %v238_v29  ;;  %v240_v30 = vld [vmem:[%s1409_s7 + $0x1e0] sm:$0xff]  ;;  %v242_v31 = vld [vmem:[%s1409_s7 + $0x1e8] sm:$0xff] }
  0x28   : > { %v244_v32 = vld [vmem:[%s1409_s7 + $0x200] sm:$0xff]  ;;  %241 = vst [vmem:[%s1414_s8 + $0xf0] sm:$0xff] %v240_v30  ;;  %243 = vst [vmem:[%s1414_s8 + $0xf8] sm:$0xff] %v242_v31  ;;  %v246_v33 = vld [vmem:[%s1409_s7 + $0x208] sm:$0xff] }
  0x29   : > { %245 = vst [vmem:[%s1414_s8 + $0x100] sm:$0xff] %v244_v32  ;;  %v248_v34 = vld [vmem:[%s1409_s7 + $0x220] sm:$0xff]  ;;  %v250_v35 = vld [vmem:[%s1409_s7 + $0x228] sm:$0xff]  ;;  %247 = vst [vmem:[%s1414_s8 + $0x108] sm:$0xff] %v246_v33 }
  0x2a   : > { %249 = vst [vmem:[%s1414_s8 + $0x110] sm:$0xff] %v248_v34  ;;  %251 = vst [vmem:[%s1414_s8 + $0x118] sm:$0xff] %v250_v35  ;;  %v252_v36 = vld [vmem:[%s1409_s7 + $0x240] sm:$0xff]  ;;  %v254_v37 = vld [vmem:[%s1409_s7 + $0x248] sm:$0xff] }
  0x2b   : > { %v256_v38 = vld [vmem:[%s1409_s7 + $0x260] sm:$0xff]  ;;  %253 = vst [vmem:[%s1414_s8 + $0x120] sm:$0xff] %v252_v36  ;;  %255 = vst [vmem:[%s1414_s8 + $0x128] sm:$0xff] %v254_v37  ;;  %v258_v39 = vld [vmem:[%s1409_s7 + $0x268] sm:$0xff] }
  0x2c   : > { %257 = vst [vmem:[%s1414_s8 + $0x130] sm:$0xff] %v256_v38  ;;  %v260_v40 = vld [vmem:[%s1409_s7 + $0x280] sm:$0xff]  ;;  %v262_v41 = vld [vmem:[%s1409_s7 + $0x288] sm:$0xff]  ;;  %259 = vst [vmem:[%s1414_s8 + $0x138] sm:$0xff] %v258_v39 }
  0x2d   : > { %261 = vst [vmem:[%s1414_s8 + $0x140] sm:$0xff] %v260_v40  ;;  %263 = vst [vmem:[%s1414_s8 + $0x148] sm:$0xff] %v262_v41  ;;  %v264_v42 = vld [vmem:[%s1409_s7 + $0x2a0] sm:$0xff]  ;;  %v266_v43 = vld [vmem:[%s1409_s7 + $0x2a8] sm:$0xff] }
  0x2e   : > { %v268_v44 = vld [vmem:[%s1409_s7 + $0x2c0] sm:$0xff]  ;;  %265 = vst [vmem:[%s1414_s8 + $0x150] sm:$0xff] %v264_v42  ;;  %267 = vst [vmem:[%s1414_s8 + $0x158] sm:$0xff] %v266_v43  ;;  %v270_v45 = vld [vmem:[%s1409_s7 + $0x2c8] sm:$0xff] }
  0x2f   : > { %269 = vst [vmem:[%s1414_s8 + $0x160] sm:$0xff] %v268_v44  ;;  %v272_v46 = vld [vmem:[%s1409_s7 + $0x2e0] sm:$0xff]  ;;  %v274_v47 = vld [vmem:[%s1409_s7 + $0x2e8] sm:$0xff]  ;;  %271 = vst [vmem:[%s1414_s8 + $0x168] sm:$0xff] %v270_v45 }
  0x30   : > { %273 = vst [vmem:[%s1414_s8 + $0x170] sm:$0xff] %v272_v46  ;;  %275 = vst [vmem:[%s1414_s8 + $0x178] sm:$0xff] %v274_v47  ;;  %v276_v48 = vld [vmem:[%s1409_s7 + $0x300] sm:$0xff]  ;;  %v278_v49 = vld [vmem:[%s1409_s7 + $0x308] sm:$0xff] }
  0x31   : > { %v280_v50 = vld [vmem:[%s1409_s7 + $0x320] sm:$0xff]  ;;  %277 = vst [vmem:[%s1414_s8 + $0x180] sm:$0xff] %v276_v48  ;;  %279 = vst [vmem:[%s1414_s8 + $0x188] sm:$0xff] %v278_v49  ;;  %v282_v51 = vld [vmem:[%s1409_s7 + $0x328] sm:$0xff] }
  0x32   : > { %281 = vst [vmem:[%s1414_s8 + $0x190] sm:$0xff] %v280_v50  ;;  %v284_v52 = vld [vmem:[%s1409_s7 + $0x340] sm:$0xff]  ;;  %v286_v53 = vld [vmem:[%s1409_s7 + $0x348] sm:$0xff]  ;;  %283 = vst [vmem:[%s1414_s8 + $0x198] sm:$0xff] %v282_v51 }
  0x33   : > { %285 = vst [vmem:[%s1414_s8 + $0x1a0] sm:$0xff] %v284_v52  ;;  %287 = vst [vmem:[%s1414_s8 + $0x1a8] sm:$0xff] %v286_v53  ;;  %v288_v54 = vld [vmem:[%s1409_s7 + $0x360] sm:$0xff]  ;;  %v290_v55 = vld [vmem:[%s1409_s7 + $0x368] sm:$0xff] }
  0x34   : > { %v292_v56 = vld [vmem:[%s1409_s7 + $0x380] sm:$0xff]  ;;  %289 = vst [vmem:[%s1414_s8 + $0x1b0] sm:$0xff] %v288_v54  ;;  %291 = vst [vmem:[%s1414_s8 + $0x1b8] sm:$0xff] %v290_v55  ;;  %v294_v57 = vld [vmem:[%s1409_s7 + $0x388] sm:$0xff] }
  0x35   : > { %293 = vst [vmem:[%s1414_s8 + $0x1c0] sm:$0xff] %v292_v56  ;;  %v296_v58 = vld [vmem:[%s1409_s7 + $0x3a0] sm:$0xff]  ;;  %v298_v59 = vld [vmem:[%s1409_s7 + $0x3a8] sm:$0xff]  ;;  %295 = vst [vmem:[%s1414_s8 + $0x1c8] sm:$0xff] %v294_v57 }
  0x36   : > { %297 = vst [vmem:[%s1414_s8 + $0x1d0] sm:$0xff] %v296_v58  ;;  %299 = vst [vmem:[%s1414_s8 + $0x1d8] sm:$0xff] %v298_v59  ;;  %v300_v60 = vld [vmem:[%s1409_s7 + $0x3c0] sm:$0xff]  ;;  %v302_v61 = vld [vmem:[%s1409_s7 + $0x3c8] sm:$0xff] }
  0x37   : > { %v304_v62 = vld [vmem:[%s1409_s7 + $0x3e0] sm:$0xff]  ;;  %301 = vst [vmem:[%s1414_s8 + $0x1e0] sm:$0xff] %v300_v60  ;;  %303 = vst [vmem:[%s1414_s8 + $0x1e8] sm:$0xff] %v302_v61  ;;  %v306_v63 = vld [vmem:[%s1409_s7 + $0x3e8] sm:$0xff] }
  0x38   : > { %305 = vst [vmem:[%s1414_s8 + $0x1f0] sm:$0xff] %v304_v62  ;;  %307 = vst [vmem:[%s1414_s8 + $0x1f8] sm:$0xff] %v306_v63 }
  0x39 PF: > { %p1035_p7 = scmp.ge.s32.totalorder %s1326_s18, 1  ;;  %p320_p8 = scmp.lt.s32.totalorder %s1326_s18, 17 }
  0x3b   : > { %p321_p9 = pnand %p1035_p7, %p320_p8 }
  0x3c   : > { %s327_s9 = sand.u32 (!%p321_p9), 1, %s1302_s12   ;;  %s1037_s10 = sshll.u32 (!%p321_p9), %s1310_s14, 1 }
  0x3d   : > { %324 = sbr.rel (%p321_p9) target bundleno = 373 (0x175), region = 51  ;;  %s1036_s11 = sshll.u32 (!%p321_p9), %s327_s9, 9 }
  0x3e   : > { %p360_p10 = scmp.lt.s32.totalorder (!%p321_p9), %s1037_s10, 15  ;;  %s1039_s21 = sshll.u32 (!%p321_p9), %s1314_s15, 2 }
  0x3f   : > { %p368_p11 = scmp.lt.s32.totalorder (!%p321_p9), %s1039_s21, 7  ;;  %s1563_s5 = scalar_lea.vmem (!%p321_p9), [#allocation3], %s1036_s11 }
  0x40   : > { %p1042_p12 = scmp.ne.s32.totalorder (!%p321_p9), %s1310_s14, 0 }
  0x44   : > { %s1677_s10 = smov (!%p360_p10, %s1037_s10), 15  ;;  %s1679_s21 = smov (!%p368_p11, %s1039_s21), 7 }
  0x45   : > { %s1038_s22 = sshll.u32 %s1677_s10, 2  ;;  %s370_s12 = scalar_lea.vmem %s1662_s2, %s1679_s21  ;;  %v1328_v0 = vmov (!%p1042_p12), 0.0  }
  0x46   : > { %s1549_s26 = scalar_lea.vmem %s1660_s0, %s1038_s22  ;;  %s1041_s29 = sshll.u32 %s1679_s21, 2  ;;  %382 = vst [vmem:[#allocation2] sm:$0xff] (!%p1042_p12), %v1328_v0  ;;  %383 = vst [vmem:[#allocation2 + $0x8] sm:$0xff] (!%p1042_p12), %v1328_v0 }
  0x47   : > { %s1561_s15 = scalar_lea.vmem %s1663_s3, %s1041_s29  ;;  %381 = sbr.rel (%p1042_p12) target bundleno = 78 (0x4e), region = 59  ;;  %384 = vst [vmem:[#allocation2 + $0x10] sm:$0xff] (!%p1042_p12), %v1328_v0  ;;  %385 = vst [vmem:[#allocation2 + $0x18] sm:$0xff] (!%p1042_p12), %v1328_v0 }
  0x4e PF: > { %v1174_v1 = vld [vmem:[%s1563_s5 + $0x4] ss:$16 sps:$4 sm:$0xff]   ;;  %v1176_v2 = vld [vmem:[%s1563_s5 + $0xc] ss:$16 sps:$4 sm:$0xff]   ;;  %v1178_v3 = vld [vmem:[%s1563_s5] ss:$16 sps:$4 sm:$0xff]  }
  0x4f   : > { %782 = vmatprep.subr.bf16.mxu0 %v1174_v1  ;;  %v1179_v4 = vld [vmem:[%s1563_s5 + $0x8] ss:$16 sps:$4 sm:$0xff]   ;;  %823 = vmatprep.subr.bf16.mxu1 %v1176_v2  ;;  %v1180_v5 = vld [vmem:[%s1563_s5 + $0x24] ss:$16 sps:$4 sm:$0xff]   ;;  %v1182_v6 = vld [vmem:[%s1563_s5 + $0x2c] ss:$16 sps:$4 sm:$0xff]  }
  0x50   : > { %783 = vmatpush1.bf16.msra.mxu0 %v1178_v3  ;;  %824 = vmatpush1.bf16.msra.mxu1 %v1179_v4  ;;  %v1184_v7 = vld [vmem:[%s1563_s5 + $0x20] ss:$16 sps:$4 sm:$0xff]   ;;  %v1185_v8 = vld [vmem:[%s1563_s5 + $0x28] ss:$16 sps:$4 sm:$0xff]   ;;  %v1186_v9 = vld [vmem:[%s1563_s5 + $0x44] ss:$16 sps:$4 sm:$0xff]  }
  0x51   : > { %784 = vmatprep.subr.bf16.mxu0 %v1180_v5  ;;  %825 = vmatprep.subr.bf16.mxu1 %v1182_v6  ;;  %v1188_v10 = vld [vmem:[%s1563_s5 + $0x4c] ss:$16 sps:$4 sm:$0xff]   ;;  %v1190_v11 = vld [vmem:[%s1563_s5 + $0x40] ss:$16 sps:$4 sm:$0xff]   ;;  %v1191_v12 = vld [vmem:[%s1563_s5 + $0x48] ss:$16 sps:$4 sm:$0xff]  }
  0x52   : > { %v1192_v13 = vld [vmem:[%s1563_s5 + $0x64] ss:$16 sps:$4 sm:$0xff]   ;;  %v1194_v14 = vld [vmem:[%s1563_s5 + $0x6c] ss:$16 sps:$4 sm:$0xff]   ;;  %v1196_v15 = vld [vmem:[%s1563_s5 + $0x60] ss:$16 sps:$4 sm:$0xff]  }
  0x53   : > { %v1197_v16 = vld [vmem:[%s1563_s5 + $0x68] ss:$16 sps:$4 sm:$0xff]   ;;  %v1198_v17 = vld [vmem:[%s1563_s5 + $0x84] ss:$16 sps:$4 sm:$0xff]   ;;  %v1200_v18 = vld [vmem:[%s1563_s5 + $0x8c] ss:$16 sps:$4 sm:$0xff]  }
  0x54   : > { %785 = vmatpush1.bf16.msra.mxu0 %v1184_v7  ;;  %826 = vmatpush1.bf16.msra.mxu1 %v1185_v8  ;;  %v1202_v19 = vld [vmem:[%s1563_s5 + $0x80] ss:$16 sps:$4 sm:$0xff]   ;;  %v1203_v20 = vld [vmem:[%s1563_s5 + $0x88] ss:$16 sps:$4 sm:$0xff]   ;;  %v1204_v21 = vld [vmem:[%s1563_s5 + $0xa4] ss:$16 sps:$4 sm:$0xff]  }
  0x55   : > { %786 = vmatprep.subr.bf16.mxu0 %v1186_v9  ;;  %827 = vmatprep.subr.bf16.mxu1 %v1188_v10  ;;  %v1206_v22 = vld [vmem:[%s1563_s5 + $0xac] ss:$16 sps:$4 sm:$0xff]   ;;  %v1208_v23 = vld [vmem:[%s1563_s5 + $0xa0] ss:$16 sps:$4 sm:$0xff]   ;;  %v1209_v24 = vld [vmem:[%s1563_s5 + $0xa8] ss:$16 sps:$4 sm:$0xff]  }
  0x56   : > { %v1210_v25 = vld [vmem:[%s1563_s5 + $0xc4] ss:$16 sps:$4 sm:$0xff]   ;;  %v1212_v26 = vld [vmem:[%s1563_s5 + $0xcc] ss:$16 sps:$4 sm:$0xff]   ;;  %v1214_v27 = vld [vmem:[%s1563_s5 + $0xc0] ss:$16 sps:$4 sm:$0xff]  }
  0x57   : > { %v1215_v28 = vld [vmem:[%s1563_s5 + $0xc8] ss:$16 sps:$4 sm:$0xff]   ;;  %v1216_v29 = vld [vmem:[%s1563_s5 + $0xe4] ss:$16 sps:$4 sm:$0xff]   ;;  %v1218_v30 = vld [vmem:[%s1563_s5 + $0xec] ss:$16 sps:$4 sm:$0xff]  }
  0x58   : > { %787 = vmatpush1.bf16.msra.mxu0 %v1190_v11  ;;  %828 = vmatpush1.bf16.msra.mxu1 %v1191_v12  ;;  %v1220_v31 = vld [vmem:[%s1563_s5 + $0xe0] ss:$16 sps:$4 sm:$0xff]   ;;  %v1221_v32 = vld [vmem:[%s1563_s5 + $0xe8] ss:$16 sps:$4 sm:$0xff]   ;;  %v1222_v33 = vld [vmem:[%s1563_s5 + $0x104] ss:$16 sps:$4 sm:$0xff]  }
  0x59   : > { %788 = vmatprep.subr.bf16.mxu0 %v1192_v13  ;;  %829 = vmatprep.subr.bf16.mxu1 %v1194_v14  ;;  %v1224_v34 = vld [vmem:[%s1563_s5 + $0x10c] ss:$16 sps:$4 sm:$0xff]   ;;  %v1226_v35 = vld [vmem:[%s1563_s5 + $0x100] ss:$16 sps:$4 sm:$0xff]   ;;  %v1227_v36 = vld [vmem:[%s1563_s5 + $0x108] ss:$16 sps:$4 sm:$0xff]  }
  0x5a   : > { %v1228_v37 = vld [vmem:[%s1563_s5 + $0x124] ss:$16 sps:$4 sm:$0xff]   ;;  %v1230_v38 = vld [vmem:[%s1563_s5 + $0x12c] ss:$16 sps:$4 sm:$0xff]   ;;  %v1232_v39 = vld [vmem:[%s1563_s5 + $0x120] ss:$16 sps:$4 sm:$0xff]  }
  0x5b   : > { %v1233_v40 = vld [vmem:[%s1563_s5 + $0x128] ss:$16 sps:$4 sm:$0xff]   ;;  %v1234_v41 = vld [vmem:[%s1563_s5 + $0x144] ss:$16 sps:$4 sm:$0xff]   ;;  %v1236_v42 = vld [vmem:[%s1563_s5 + $0x14c] ss:$16 sps:$4 sm:$0xff]  }
  0x5c   : > { %789 = vmatpush1.bf16.msra.mxu0 %v1196_v15  ;;  %830 = vmatpush1.bf16.msra.mxu1 %v1197_v16  ;;  %v1238_v43 = vld [vmem:[%s1563_s5 + $0x140] ss:$16 sps:$4 sm:$0xff]   ;;  %v1239_v44 = vld [vmem:[%s1563_s5 + $0x148] ss:$16 sps:$4 sm:$0xff]   ;;  %v1240_v45 = vld [vmem:[%s1563_s5 + $0x164] ss:$16 sps:$4 sm:$0xff]  }
  0x5d   : > { %790 = vmatprep.subr.bf16.mxu0 %v1198_v17  ;;  %831 = vmatprep.subr.bf16.mxu1 %v1200_v18  ;;  %v1242_v46 = vld [vmem:[%s1563_s5 + $0x16c] ss:$16 sps:$4 sm:$0xff]   ;;  %v390_v47 = vld [vmem:[%s1549_s26] sm:$0xff]  ;;  %v1245_v50 = vld [vmem:[%s1563_s5 + $0x168] ss:$16 sps:$4 sm:$0xff]   ;;  %p1109_p13 = scmp.ne.s32.totalorder %s1310_s14, 7 }
  0x5e   : > { %v1044_v48 = vcombine.high %v390_v47, %v390_v47  ;;  %v1244_v49 = vld [vmem:[%s1563_s5 + $0x160] ss:$16 sps:$4 sm:$0xff]   ;;  %v1246_v51 = vld [vmem:[%s1563_s5 + $0x184] ss:$16 sps:$4 sm:$0xff]   ;;  %v1248_v52 = vld [vmem:[%s1563_s5 + $0x18c] ss:$16 sps:$4 sm:$0xff]   ;;  %v1043_v3 = vcombine.low %v390_v47, %v390_v47 }
  0x5f   : > { %v1250_v53 = vld [vmem:[%s1563_s5 + $0x180] ss:$16 sps:$4 sm:$0xff]   ;;  %v1251_v54 = vld [vmem:[%s1563_s5 + $0x188] ss:$16 sps:$4 sm:$0xff]   ;;  %v1252_v55 = vld [vmem:[%s1563_s5 + $0x1a4] ss:$16 sps:$4 sm:$0xff]  }
  0x60   : > { %791 = vmatpush1.bf16.msra.mxu0 %v1202_v19  ;;  %832 = vmatpush1.bf16.msra.mxu1 %v1203_v20  ;;  %v1254_v56 = vld [vmem:[%s1563_s5 + $0x1ac] ss:$16 sps:$4 sm:$0xff]   ;;  %v1256_v57 = vld [vmem:[%s1563_s5 + $0x1a0] ss:$16 sps:$4 sm:$0xff]   ;;  %v1257_v58 = vld [vmem:[%s1563_s5 + $0x1a8] ss:$16 sps:$4 sm:$0xff]   ;;  %v882_v20 = vlaneseq (!%p1109_p13) }
  0x61   : > { %792 = vmatprep.subr.bf16.mxu0 %v1204_v21  ;;  %833 = vmatprep.subr.bf16.mxu1 %v1206_v22  ;;  %v1258_v59 = vld [vmem:[%s1563_s5 + $0x1c4] ss:$16 sps:$4 sm:$0xff]   ;;  %v1260_v60 = vld [vmem:[%s1563_s5 + $0x1cc] ss:$16 sps:$4 sm:$0xff]   ;;  %v1262_v61 = vld [vmem:[%s1563_s5 + $0x1c0] ss:$16 sps:$4 sm:$0xff]  }
  0x62   : > { %814 = vmatprep.mubr.bf16.mxu0 %v1044_v48  ;;  %855 = vmatprep.mubr.bf16.mxu1 %v1044_v48  ;;  %v1263_v62 = vld [vmem:[%s1563_s5 + $0x1c8] ss:$16 sps:$4 sm:$0xff]   ;;  %v1264_v63 = vld [vmem:[%s1563_s5 + $0x1e4] ss:$16 sps:$4 sm:$0xff]   ;;  %v1266_v0 = vld [vmem:[%s1563_s5 + $0x1ec] ss:$16 sps:$4 sm:$0xff]  }
  0x63   : > { %v1268_v1 = vld [vmem:[%s1563_s5 + $0x1e0] ss:$16 sps:$4 sm:$0xff]   ;;  %v1269_v2 = vld [vmem:[%s1563_s5 + $0x1e8] ss:$16 sps:$4 sm:$0xff]   ;;  %v883_v21 = vshrl.u32 (!%p1109_p13), %v882_v20, 7 }
  0x64   : > { %793 = vmatpush1.bf16.msra.mxu0 %v1208_v23  ;;  %834 = vmatpush1.bf16.msra.mxu1 %v1209_v24  ;;  %v386_v4 = vld [vmem:[#allocation2] sm:$0xff]  ;;  %v388_v5 = vld [vmem:[#allocation2 + $0x10] sm:$0xff]  ;;  %v387_v6 = vld [vmem:[#allocation2 + $0x8] sm:$0xff] }
  0x65   : > { %794 = vmatprep.subr.bf16.mxu0 %v1210_v25  ;;  %835 = vmatprep.subr.bf16.mxu1 %v1212_v26  ;;  %v389_v7 = vld [vmem:[#allocation2 + $0x18] sm:$0xff]  ;;  %v880_v22 = vld [vmem:[%s370_s12] sm:$0xf] (!%p1109_p13)  ;;  %v884_v24 = vsub.s32 (!%p1109_p13), 0, %v883_v21  ;;  %v888_v25 = vsub.s32 (!%p1109_p13), 1, %v883_v21  ;;  %v892_v26 = vsub.s32 (!%p1109_p13), 2, %v883_v21 }
  0x68   : > { %795 = vmatpush1.bf16.msra.mxu0 %v1214_v27  ;;  %836 = vmatpush1.bf16.msra.mxu1 %v1215_v28  ;;  %v896_v27 = vsub.s32 (!%p1109_p13), 3, %v883_v21 }
  0x69   : > { %796 = vmatprep.subr.bf16.mxu0 %v1216_v29  ;;  %837 = vmatprep.subr.bf16.mxu1 %v1218_v30 }
  0x6c   : > { %797 = vmatpush1.bf16.msra.mxu0 %v1220_v31  ;;  %838 = vmatpush1.bf16.msra.mxu1 %v1221_v32  ;;  %v885_v31 = vrot.slane (!%p1109_p13), %v880_v22, %v884_v24  ;;  %v889_v32 = vrot.slane (!%p1109_p13), %v880_v22, %v888_v25 }
  0x6d   : > { %798 = vmatprep.subr.bf16.mxu0 %v1222_v33  ;;  %839 = vmatprep.subr.bf16.mxu1 %v1224_v34  ;;  %v893_v33 = vrot.slane (!%p1109_p13), %v880_v22, %v892_v26  ;;  %v897_v34 = vrot.slane (!%p1109_p13), %v880_v22, %v896_v27 }
  0x70   : > { %799 = vmatpush1.bf16.msra.mxu0 %v1226_v35  ;;  %840 = vmatpush1.bf16.msra.mxu1 %v1227_v36 }
  0x71   : > { %800 = vmatprep.subr.bf16.mxu0 %v1228_v37  ;;  %841 = vmatprep.subr.bf16.mxu1 %v1230_v38 }
  0x74   : > { %801 = vmatpush1.bf16.msra.mxu0 %v1232_v39  ;;  %842 = vmatpush1.bf16.msra.mxu1 %v1233_v40 }
  0x75   : > { %802 = vmatprep.subr.bf16.mxu0 %v1234_v41  ;;  %843 = vmatprep.subr.bf16.mxu1 %v1236_v42 }
  0x78   : > { %803 = vmatpush1.bf16.msra.mxu0 %v1238_v43  ;;  %844 = vmatpush1.bf16.msra.mxu1 %v1239_v44 }
  0x79   : > { %804 = vmatprep.subr.bf16.mxu0 %v1240_v45  ;;  %845 = vmatprep.subr.bf16.mxu1 %v1242_v46 }
  0x7c   : > { %805 = vmatpush1.bf16.msra.mxu0 %v1244_v49  ;;  %846 = vmatpush1.bf16.msra.mxu1 %v1245_v50 }
  0x7d   : > { %806 = vmatprep.subr.bf16.mxu0 %v1246_v51  ;;  %847 = vmatprep.subr.bf16.mxu1 %v1248_v52 }
  0x80   : > { %807 = vmatpush1.bf16.msra.mxu0 %v1250_v53  ;;  %848 = vmatpush1.bf16.msra.mxu1 %v1251_v54 }
  0x81   : > { %808 = vmatprep.subr.bf16.mxu0 %v1252_v55  ;;  %849 = vmatprep.subr.bf16.mxu1 %v1254_v56 }
  0x84   : > { %809 = vmatpush1.bf16.msra.mxu0 %v1256_v57  ;;  %850 = vmatpush1.bf16.msra.mxu1 %v1257_v58 }
  0x85   : > { %810 = vmatprep.subr.bf16.mxu0 %v1258_v59  ;;  %851 = vmatprep.subr.bf16.mxu1 %v1260_v60 }
  0x88   : > { %811 = vmatpush1.bf16.msra.mxu0 %v1262_v61  ;;  %852 = vmatpush1.bf16.msra.mxu1 %v1263_v62 }
  0x89   : > { %812 = vmatprep.subr.bf16.mxu0 %v1264_v63  ;;  %853 = vmatprep.subr.bf16.mxu1 %v1266_v0 }
  0x8c   : > { %813 = vmatpush1.bf16.msra.mxu0 %v1268_v1  ;;  %854 = vmatpush1.bf16.msra.mxu1 %v1269_v2 }
  0x8f   : > { %815 = vmatmul.mubr.bf16.vlgmr.msra.gmra.mrb[0].mxu0 %v1043_v3  ;;  %856 = vmatmul.mubr.bf16.vlgmr.msra.gmra.mrb[0].mxu1 %v1043_v3 }
 0x160   : > { %875 = sbr.rel (%p1109_p13) target bundleno = 373 (0x175), region = 63 }
 0x162   : > { %v816_v8 = vpop.f32.mrb[0].mxu0  ;;  %v857_v9 = vpop.f32.mrb[0].mxu1 }
 0x163   : > { %v864_v10 = vadd.f32 %v816_v8, %v386_v4  ;;  %v866_v11 = vadd.f32 %v857_v9, %v388_v5  ;;  %v818_v12 = vpop.f32.mrb[1].mxu0  ;;  %v859_v13 = vpop.f32.mrb[1].mxu1 }
 0x164   : > { %v865_v14 = vadd.f32 %v818_v12, %v387_v6  ;;  %v867_v15 = vadd.f32 %v859_v13, %v389_v7  ;;  %v820_v16 = vpop.f32.mrb[2].mxu0  ;;  %v861_v17 = vpop.f32.mrb[2].mxu1 }
 0x165   : > { %868 = vst [vmem:[#allocation2] sm:$0xff] %v864_v10  ;;  %870 = vst [vmem:[#allocation2 + $0x10] sm:$0xff] %v866_v11  ;;  %v821_v18 = vpop.f32.mrb[3].mxu0  ;;  %v862_v19 = vpop.f32.mrb[3].mxu1 }
 0x166   : > { %869 = vst [vmem:[#allocation2 + $0x8] sm:$0xff] %v865_v14  ;;  %871 = vst [vmem:[#allocation2 + $0x18] sm:$0xff] %v867_v15 }
 0x16c   : > { %v876_v23 = vld [vmem:[#allocation2] sm:$0xff]  ;;  %v878_v29 = vld [vmem:[#allocation2 + $0x10] sm:$0xff] }
 0x16d   : > { %v877_v28 = vld [vmem:[#allocation2 + $0x8] sm:$0xff]  ;;  %v879_v30 = vld [vmem:[#allocation2 + $0x18] sm:$0xff]  ;;  %v902_v35 = vadd.f32 %v885_v31, %v876_v23  ;;  %v904_v37 = vadd.f32 %v893_v33, %v878_v29 }
 0x16e   : > { %v903_v36 = vadd.f32 %v889_v32, %v877_v28  ;;  %v905_v38 = vadd.f32 %v897_v34, %v879_v30 }
 0x16f   : > { %v906_v39 = vmax.f32 %v902_v35, 0.0  ;;  %v908_v41 = vmax.f32 %v904_v37, 0.0 }
 0x170   : > { %v907_v40 = vmax.f32 %v903_v36, 0.0  ;;  %v909_v42 = vmax.f32 %v905_v38, 0.0 }
 0x172   : > { %v1115_v43 = vpack.c.bf16 %v907_v40, %v906_v39  ;;  %v1116_v44 = vpack.c.bf16 %v909_v42, %v908_v41 }
 0x174   : > { %926 = vst [vmem:[%s1561_s15] sm:$0xff] %v1115_v43  ;;  %927 = vst [vmem:[%s1561_s15 + $0x8] sm:$0xff] %v1116_v44 }
 0x175 PF: > { %s13_s18 = sadd.s32 1, %s1326_s18   ;;  %s1664_s12 = smov %s1306_s13 }
 0x176   : > { %p10_p0 = scmp.ge.s32.totalorder %s13_s18, 18   ;;  %s1665_s13 = smov %s1400_s25 }
 0x177   : > { %s1666_s14 = smov %s1318_s16  ;;  %s1667_s15 = smov %s1322_s17 }
 0x178   : > { %s1668_s16 = smov %s1671_s19  ;;  %s1669_s17 = smov %s1675_s20 }
 0x179   :  { %12 = sbr.rel (!%p10_p0) target bundleno = 4 (0x4), region = 104 }

// kernel: vgg_forward.17
= control target key start
LH: loop header
LB: loop body
LE: loop exit
PB: predicated region body
PF: predicated region fallthrough
CT: control target
= control target key end

     0   :  { %s658_s12 = smov 0   ;;  %s660_s13 = smov 0   ;;  %s721_s0 = inlined_call_operand.vmem [shape: bf16[8,1024], index: 0, kind: input, shape index: {}]   ;;  %s722_s1 = inlined_call_operand.vmem [shape: bf16[1024,128], index: 1, kind: input, shape index: {}]   ;;  %s723_s2 = inlined_call_operand.vmem [shape: f32[1,128], index: 2, kind: input, shape index: {}]   ;;  %s724_s3 = inlined_call_operand.vmem [shape: f32[8,128], index: 3, kind: output, shape index: {}]  }
   0x1   :  { %s662_s14 = smov 0  }
   0x2 LB: > { %s22_s15 = sadd.s32 1, %s631_s13  ;;  %p519_p0 = scmp.ge.s32.totalorder %s635_s14, 1  ;;  %s635_s14 = sphi %s662_s14, %s13_s14   ;;  %s631_s13 = sphi %s660_s13, %s726_s13   ;;  %s627_s12 = sphi %s658_s12, %s725_s12  }
   0x3   : > { %p23_p1 = scmp.ge.s32.totalorder %s22_s15, 4  ;;  %p174_p2 = scmp.lt.s32.totalorder %s635_s14, 5 }
   0x5   : > { %s728_s15 = smov (%p23_p1, %s22_s15), 0  ;;  %p175_p3 = pnand %p519_p0, %p174_p2 }
   0x6   : > { %s520_s16 = sshll.u32 (!%p175_p3), %s627_s12, 1  ;;  %s522_s17 = sshll.u32 (!%p175_p3), %s627_s12, 5 }
   0x7   : > { %178 = sbr.rel (%p175_p3) target bundleno = 285 (0x11d), region = 32  ;;  %p209_p4 = scmp.lt.s32.totalorder (!%p175_p3), %s520_s16, 7 }
   0x8   : > { %p215_p5 = scmp.lt.s32.totalorder (!%p175_p3), %s522_s17, 127  ;;  %p524_p6 = scmp.ne.s32.totalorder (!%p175_p3), %s627_s12, 0 }
   0xe   : > { %s730_s16 = smov (!%p209_p4, %s520_s16), 7  ;;  %s732_s17 = smov (!%p215_p5, %s522_s17), 127 }
   0xf   : > { %s521_s18 = sshll.u32 %s730_s16, 2  ;;  %s523_s22 = sshll.u32 %s732_s17, 2  ;;  %v637_v0 = vmov (!%p524_p6), 0.0  }
  0x10   : > { %s212_s21 = scalar_lea.vmem %s721_s0, %s521_s18  ;;  %s686_s25 = scalar_lea.vmem %s722_s1, %s523_s22  ;;  %235 = vst [vmem:[#allocation2] sm:$0xff] (!%p524_p6), %v637_v0 }
  0x11   : > { %234 = sbr.rel (%p524_p6) target bundleno = 24 (0x18), region = 36 }
  0x18 PF: > { %v595_v1 = vld [vmem:[%s686_s25 + $0x40] sm:$0xff]   ;;  %v597_v3 = vld [vmem:[%s686_s25 + $0x48] sm:$0xff]   ;;  %v599_v5 = vld [vmem:[%s686_s25 + $0x50] sm:$0xff]   ;;  %p543_p7 = scmp.ne.s32.totalorder %s627_s12, 3 }
  0x19   : > { %v596_v2 = vld [vmem:[%s686_s25] sm:$0xff]   ;;  %548 = vmatprep.subr.bf16.mxu0 %v595_v1  ;;  %v598_v4 = vld [vmem:[%s686_s25 + $0x8] sm:$0xff]   ;;  %v600_v6 = vld [vmem:[%s686_s25 + $0x10] sm:$0xff]  }
  0x1a   : > { %549 = vmatpush3.bf16.msra.mxu0 %v596_v2  ;;  %v601_v7 = vld [vmem:[%s686_s25 + $0x58] sm:$0xff]   ;;  %v603_v9 = vld [vmem:[%s686_s25 + $0x60] sm:$0xff]   ;;  %v605_v11 = vld [vmem:[%s686_s25 + $0x68] sm:$0xff]  }
  0x1b   : > { %550 = vmatprep.subr.bf16.mxu0 %v597_v3  ;;  %v602_v8 = vld [vmem:[%s686_s25 + $0x18] sm:$0xff]   ;;  %v604_v10 = vld [vmem:[%s686_s25 + $0x20] sm:$0xff]   ;;  %v606_v14 = vld [vmem:[%s686_s25 + $0x28] sm:$0xff]  }
  0x1c   : > { %v237_v12 = vld [vmem:[%s212_s21] sm:$0xff]  ;;  %v607_v15 = vld [vmem:[%s686_s25 + $0x70] sm:$0xff]   ;;  %v609_v17 = vld [vmem:[%s686_s25 + $0x78] sm:$0xff]  }
  0x1d   : > { %v526_v13 = vcombine.high %v237_v12, %v237_v12  ;;  %v608_v16 = vld [vmem:[%s686_s25 + $0x30] sm:$0xff]   ;;  %v610_v18 = vld [vmem:[%s686_s25 + $0x38] sm:$0xff]   ;;  %v525_v19 = vcombine.low %v237_v12, %v237_v12  ;;  %v236_v21 = vld [vmem:[#allocation2] sm:$0xff] }
  0x1e   : > { %551 = vmatpush3.bf16.msra.mxu0 %v598_v4  ;;  %v544_v28 = vld [vmem:[%s723_s2] ss:$0 sm:$0xff] (!%p543_p7) }
  0x1f   : > { %552 = vmatprep.subr.bf16.mxu0 %v599_v5  ;;  %405 = vmatprep.mubr.bf16.mxu0 %v526_v13 }
  0x22   : > { %553 = vmatpush3.bf16.msra.mxu0 %v600_v6 }
  0x23   : > { %554 = vmatprep.subr.bf16.mxu0 %v601_v7 }
  0x26   : > { %555 = vmatpush3.bf16.msra.mxu0 %v602_v8 }
  0x27   : > { %556 = vmatprep.subr.bf16.mxu0 %v603_v9 }
  0x2a   : > { %557 = vmatpush3.bf16.msra.mxu0 %v604_v10 }
  0x2b   : > { %558 = vmatprep.subr.bf16.mxu0 %v605_v11 }
  0x2e   : > { %559 = vmatpush3.bf16.msra.mxu0 %v606_v14 }
  0x2f   : > { %560 = vmatprep.subr.bf16.mxu0 %v607_v15 }
  0x32   : > { %561 = vmatpush3.bf16.msra.mxu0 %v608_v16 }
  0x33   : > { %562 = vmatprep.subr.bf16.mxu0 %v609_v17 }
  0x36   : > { %563 = vmatpush3.bf16.msra.mxu0 %v610_v18 }
  0x39   : > { %406 = vmatmul.mubr.bf16.vlgmr.msra.gmra.mrb[0].mxu0 %v525_v19 }
 0x10c   : > { %v564_v20 = vpop.f32.mrb[0].mxu0  ;;  %418 = sbr.rel (%p543_p7) target bundleno = 285 (0x11d), region = 40 }
 0x10d   : > { %v565_v22 = vpop.f32.mrb[1].mxu0 }
 0x10e   : > { %v566_v23 = vadd.f32 %v565_v22, %v564_v20  ;;  %v567_v24 = vpop.f32.mrb[2].mxu0 }
 0x10f   : > { %v568_v25 = vpop.f32.mrb[3].mxu0 }
 0x110   : > { %v413_v26 = vadd.f32 %v566_v23, %v236_v21 }
 0x112   : > { %414 = vst [vmem:[#allocation2] sm:$0xff] %v413_v26 }
 0x119   : > { %v419_v27 = vld [vmem:[#allocation2] sm:$0xff] }
 0x11a   : > { %v427_v29 = vadd.f32 %v544_v28, %v419_v27 }
 0x11c   : > { %428 = vst [vmem:[%s724_s3] sm:$0xff] %v427_v29 }
 0x11d PF: > { %s13_s14 = sadd.s32 1, %s635_s14   ;;  %s725_s12 = smov %s631_s13 }
 0x11e   : > { %p10_p8 = scmp.ge.s32.totalorder %s13_s14, 6   ;;  %s726_s13 = smov %s728_s15 }
 0x120   :  { %12 = sbr.rel (!%p10_p8) target bundleno = 2 (0x2), region = 76 }

</bundles_post_ra>
